<compile_context>
chip_gen: v7x
topology: tpu7x:2x2x1
jax: 0.10.0
libtpu: 0.0.40
codegen_flags: <defaults>
</compile_context>

<pallas_src>
import functools
import numpy as np

import jax
import jax.numpy as jnp
from jax import lax
from jax.experimental import pallas as pl
from jax.experimental.pallas import tpu as pltpu

EPS = 1e-5          # nn.InstanceNorm2d default eps (affine=False, no running stats)
NEG_SLOPE = 0.2     # nn.LeakyReLU(0.2)


def _leaky(y):
    return jnp.where(y > 0, y, NEG_SLOPE * y)


# ------------------------------ fused kernel ---------------------------------

def fused_aging_kernel(x_ref, m_ref, wh_ref, bh_ref, wres_ref, bres_ref,
                       wt_ref, bt_ref, o_ref, *, H, W, B, repeat_num):
    HW = H * W
    M = B * HW
    Cdim = wh_ref.shape[1]

    # Hoisted loop-invariants, computed exactly once (JAX does not CSE
    # broadcast_in_dim inside loops).  pix/col are small int32 slabs that live
    # in VMEM and are re-loaded per tap (vld is cheap) -- no 9-mask hoist.
    mask = jnp.broadcast_to(m_ref[...], (B, HW, Cdim)).reshape(M, Cdim)   # router 0/1, f32
    pix = lax.broadcasted_iota(jnp.int32, (M, Cdim), 0) % HW              # pixel id within sample
    col = pix % W                                                         # column id within row

    def instance_norm(y):
        # One-pass per-sample, per-channel normalization over HW (biased var),
        # matching nn.InstanceNorm2d(affine=False, eps=1e-5).
        y3 = y.reshape(B, HW, Cdim)
        s1 = jnp.sum(y3, axis=1, keepdims=True)
        s2 = jnp.sum(y3 * y3, axis=1, keepdims=True)
        mean = s1 * (1.0 / HW)
        var = jnp.maximum(s2 * (1.0 / HW) - mean * mean, 0.0)
        return ((y3 - mean) * lax.rsqrt(var + EPS)).reshape(M, Cdim)

    def conv3x3(a, w9, b):
        # a: (M, Cdim) f32 ; w9: (9*Cdim, Cdim) bf16 ; b: (1, Cdim) f32.
        # im2col via flat sublane rolls + per-tap in-kernel boundary masks,
        # columns cast to bf16 before the lane concat, then ONE K=9*Cdim MXU
        # matmul with f32 accumulation.  The masks also zero positions where
        # the flat roll wraps across a sample boundary (batch packing safe).
        cols = []
        for tap in range(9):
            dy, dx = tap // 3 - 1, tap % 3 - 1
            if dy == 0 and dx == 0:
                cols.append(a.astype(jnp.bfloat16))           # center tap: no mask
                continue
            shift = dy * W + dx                               # source offset in flat index
            rolled = pltpu.roll(a, shift=(-shift) % M, axis=0)
            cond = None
            if dy == -1:
                cond = pix >= W
            elif dy == 1:
                cond = pix < HW - W
            if dx == -1:
                c_ok = col >= 1
                cond = c_ok if cond is None else (cond & c_ok)
            elif dx == 1:
                c_ok = col < W - 1
                cond = c_ok if cond is None else (cond & c_ok)
            # Mask select in f32 (v5e has no bf16 VPU), cast to bf16 right after.
            cols.append(jnp.where(cond, rolled, 0.0).astype(jnp.bfloat16))
        patch = jnp.concatenate(cols, axis=1)                 # (M, 9*Cdim) bf16
        # TODO(synk): on v7x (MRB) consider 9 accumulating K=Cdim dots instead
        # of the lane concat + single K=9*Cdim dot.
        y = jnp.dot(patch, w9, preferred_element_type=jnp.float32)
        return y + b

    # ---- head: Conv1x1 -> InstanceNorm -> LeakyReLU -> TaskRouter mask
    x = x_ref[...]                                            # (M, Cin) f32
    y = jnp.dot(x.astype(jnp.bfloat16), wh_ref[...],
                preferred_element_type=jnp.float32) + bh_ref[...]
    h = _leaky(instance_norm(y)) * mask                       # (M, Cdim) f32

    # ---- residual blocks: fori_loop bounds live ranges (no full unroll).
    def block(r, h):
        y1 = conv3x3(h, wres_ref[2 * r], bres_ref[2 * r])
        y1 = _leaky(instance_norm(y1) * mask)                 # conv -> IN -> mask -> relu
        y2 = conv3x3(y1, wres_ref[2 * r + 1], bres_ref[2 * r + 1])
        y2 = instance_norm(y2) * mask                         # conv -> IN -> mask
        return _leaky(h + y2)                                 # relu(residual + x)

    h = lax.fori_loop(0, repeat_num, block, h)

    # ---- tail: Conv1x1 (bias only, no norm / activation)
    out = jnp.dot(h.astype(jnp.bfloat16), wt_ref[...],
                  preferred_element_type=jnp.float32) + bt_ref[...]
    o_ref[...] = out


# ------------------------------ pallas_call glue -----------------------------

def _pick_batch_block(N, HW):
    # Aim for ~512 rows (M = B*HW) per grid step to fill the MXU / vregs, but
    # keep >=2 grid steps when possible so v7x megacore can split the batch.
    b = max(1, min(N, max(1, 512 // max(HW, 1))))
    if N >= 2:
        b = max(1, min(b, N // 2))
    while N % b:
        b -= 1
    return b


def _const_spec(shape):
    nd = len(shape)
    return pl.BlockSpec(tuple(shape), lambda n, _nd=nd: (0,) * _nd)


@jax.jit
def aging_module_forward(params, x_id_nchw, condition):
    N, Cin, H, W = x_id_nchw.shape
    HW = H * W
    Cdim = params["b_head"].shape[-1]
    R = params["wres"].shape[0] // 2
    B = _pick_batch_block(N, HW)
    M = B * HW

    # NCHW -> NHWC -> (N*H*W, Cin): channels on the 128-lane axis, samples
    # packed along the row axis so each grid step processes M = B*HW rows.
    x = jnp.transpose(x_id_nchw, (0, 2, 3, 1)).reshape(N * HW, Cin).astype(jnp.float32)

    # TaskRouter: index_select on the unit-mapping buffer (gather stays in XLA).
    mask = jnp.take(params["unit_mapping"], condition, axis=0)[:, None, :]   # (N,1,Cdim)

    kern = functools.partial(fused_aging_kernel, H=H, W=W, B=B, repeat_num=R)
    out = pl.pallas_call(
        kern,
        out_shape=jax.ShapeDtypeStruct((N * HW, Cin), jnp.float32),
        grid=(N // B,),
        in_specs=[
            pl.BlockSpec((M, Cin), lambda n: (n, 0)),          # x rows (batch block)
            pl.BlockSpec((B, 1, Cdim), lambda n: (n, 0, 0)),   # router mask (per block)
            _const_spec(params["w_head"].shape),               # (Cin, Cdim) bf16
            _const_spec(params["b_head"].shape),               # (1, Cdim) f32
            _const_spec(params["wres"].shape),                 # (2R, 9*Cdim, Cdim) bf16
            _const_spec(params["bres"].shape),                 # (2R, 1, Cdim) f32
            _const_spec(params["w_tail"].shape),               # (Cdim, Cin) bf16
            _const_spec(params["b_tail"].shape),               # (1, Cin) f32
        ],
        out_specs=pl.BlockSpec((M, Cin), lambda n: (n, 0)),
        compiler_params=pltpu.CompilerParams(dimension_semantics=("parallel",)),
    )(x, mask, params["w_head"], params["b_head"], params["wres"],
      params["bres"], params["w_tail"], params["b_tail"])

    # (N*H*W, Cin) -> NCHW
    return jnp.transpose(out.reshape(N, H, W, Cin), (0, 3, 1, 2))


# --------------------------- parameters (synthetic) ---------------------------

def make_unit_mapping(unit_count, age_group, sigma):
    conv_dim = int((age_group - (age_group - 1) * sigma) * unit_count)
    m = np.zeros((age_group, conv_dim), np.float32)
    start = 0
    for i in range(age_group):
        m[i, start:start + unit_count] = 1.0
        start = int(start + (1 - sigma) * unit_count)
    return jnp.asarray(m)


def init_params(key, in_channel, age_group, repeat_num):
    sigma = 1.0 / 8
    unit_count = in_channel // 4
    conv_dim = int((age_group - (age_group - 1) * sigma) * unit_count)

    def conv_w(k, cout, cin, kh, kw):
        fan_in = cin * kh * kw
        return jax.random.normal(k, (cout, cin, kh, kw), jnp.float32) / np.sqrt(fan_in)

    def conv_b(k, cout):
        return jax.random.normal(k, (cout,), jnp.float32) * 0.01

    keys = jax.random.split(key, 4 + 4 * repeat_num)
    p = {"unit_mapping": make_unit_mapping(unit_count, age_group, sigma)}

    # head: Conv2d(in_channel, conv_dim, 1) -> matmul weight (Cin, Cout), bf16 for MXU
    w = conv_w(keys[0], conv_dim, in_channel, 1, 1)
    p["w_head"] = jnp.transpose(w.reshape(conv_dim, in_channel), (1, 0)).astype(jnp.bfloat16)
    p["b_head"] = conv_b(keys[1], conv_dim).reshape(1, conv_dim)

    # residual blocks: 2*repeat_num Conv2d(conv_dim, conv_dim, 3, padding=1)
    # layout: (Cout,Cin,3,3) -> (ky,kx,Cin,Cout) -> (9*Cin, Cout); stacked + bf16.
    wres, bres = [], []
    for r in range(repeat_num):
        ka, kb, kc, kd = keys[2 + 4 * r: 6 + 4 * r]
        for k_w, k_b in ((ka, kb), (kc, kd)):
            w3 = conv_w(k_w, conv_dim, conv_dim, 3, 3)
            wres.append(jnp.transpose(w3, (2, 3, 1, 0)).reshape(9 * conv_dim, conv_dim))
            bres.append(conv_b(k_b, conv_dim).reshape(1, conv_dim))
    p["wres"] = jnp.stack(wres).astype(jnp.bfloat16)      # (2R, 9*Cdim, Cdim)
    p["bres"] = jnp.stack(bres)                           # (2R, 1, Cdim) f32

    # tail: Conv2d(conv_dim, in_channel, 1)
    w = conv_w(keys[2 + 4 * repeat_num], in_channel, conv_dim, 1, 1)
    p["w_tail"] = jnp.transpose(w.reshape(in_channel, conv_dim), (1, 0)).astype(jnp.bfloat16)
    p["b_tail"] = conv_b(keys[3 + 4 * repeat_num], in_channel).reshape(1, in_channel)
    return p


# --------------------------- pure-JAX reference -------------------------------
# Same math as the kernel (bf16 MXU operands, f32 accumulate / element-wise),
# built from lax.conv / einsum, used to verify the Pallas kernel end-to-end.

def reference_forward(params, x_id_nchw, condition):
    N, Cin, H, W = x_id_nchw.shape
    R = params["wres"].shape[0] // 2

    x = jnp.transpose(x_id_nchw, (0, 2, 3, 1)).astype(jnp.float32)           # NHWC
    mask = jnp.take(params["unit_mapping"], condition, axis=0)[:, None, None, :]

    def inorm(y):
        mean = jnp.mean(y, axis=(1, 2), keepdims=True)
        var = jnp.mean((y - mean) ** 2, axis=(1, 2), keepdims=True)
        return (y - mean) * jax.lax.rsqrt(var + EPS)

    def conv1x1(a, w, b):
        y = jnp.einsum("nhwc,cd->nhwd", a.astype(jnp.bfloat16), w,
                       preferred_element_type=jnp.float32)
        return y + b.reshape(1, 1, 1, -1)

    def conv3x3(a, w9, b):
        cdim = a.shape[-1]
        w_hwio = w9.reshape(3, 3, cdim, w9.shape[-1])
        y = jax.lax.conv_general_dilated(
            a.astype(jnp.bfloat16), w_hwio, window_strides=(1, 1), padding="SAME",
            dimension_numbers=("NHWC", "HWIO", "NHWC"),
            preferred_element_type=jnp.float32)
        return y + b.reshape(1, 1, 1, -1)

    h = _leaky(inorm(conv1x1(x, params["w_head"], params["b_head"]))) * mask
    for r in range(R):
        y1 = _leaky(inorm(conv3x3(h, params["wres"][2 * r], params["bres"][2 * r])) * mask)
        y2 = inorm(conv3x3(y1, params["wres"][2 * r + 1], params["bres"][2 * r + 1])) * mask
        h = _leaky(h + y2)
    out = conv1x1(h, params["w_tail"], params["b_tail"])
    return jnp.transpose(out, (0, 3, 1, 2))                                  # NCHW


# --------------------------------- main ---------------------------------------

if __name__ == "__main__":
    # Small AgingModule config: in_channel=32, age_group=9 -> unit_count=8,
    # conv_dim = int((9 - 8/8) * 8) = 64; repeat_num=4 (module default).
    # N=8 so the batch packs into 2 grid steps of 4 samples (M=256 rows each).
    IN_CHANNEL, AGE_GROUP, REPEAT_NUM = 32, 9, 4
    N, H, W = 8, 8, 8

    key = jax.random.PRNGKey(0)
    k_par, k_x, k_cond = jax.random.split(key, 3)

    params = init_params(k_par, IN_CHANNEL, AGE_GROUP, REPEAT_NUM)
    x_id = jax.random.normal(k_x, (N, IN_CHANNEL, H, W), jnp.float32)        # NCHW
    condition = jax.random.randint(k_cond, (N,), 0, AGE_GROUP, jnp.int32)

    out = aging_module_forward(params, x_id, condition)
    out = jax.block_until_ready(out)

    assert out.shape == (N, IN_CHANNEL, H, W), out.shape
    assert bool(jnp.all(jnp.isfinite(out)))

    # Correctness vs. the pure-JAX reference (same bf16/f32 convention, so any
    # residual difference is only accumulation / variance-formula rounding).
    ref = reference_forward(params, x_id, condition)
    max_err = float(jnp.max(jnp.abs(out - ref)))
    assert max_err < 5e-2, f"max abs error vs reference: {max_err}"

    print("KERNEL_OK")
</pallas_src>

<mosaic_0001>
module attributes {stable_mosaic.version = 11 : i64} {
  func.func @fused_aging_kernel(%arg0: i32, %arg1: memref<256x32xf32, #tpu.memory_space<vmem>>, %arg2: memref<4x1x64xf32, #tpu.memory_space<vmem>>, %arg3: memref<32x64xbf16, #tpu.memory_space<vmem>>, %arg4: memref<1x64xf32, #tpu.memory_space<vmem>>, %arg5: memref<8x576x64xbf16, #tpu.memory_space<vmem>>, %arg6: memref<8x1x64xf32, #tpu.memory_space<vmem>>, %arg7: memref<64x32xbf16, #tpu.memory_space<vmem>>, %arg8: memref<1x32xf32, #tpu.memory_space<vmem>>, %arg9: memref<256x32xf32, #tpu.memory_space<vmem>>) attributes {dimension_semantics = [#tpu.dimension_semantics<parallel>], iteration_bounds = array<i64: 2>, scalar_prefetch = 0 : i64, scratch_operands = 0 : i64, tpu.core_type = #tpu.core_type<tc>, window_params = [{transform_indices = @transform_0, window_bounds = array<i64: 256, 32>}, {transform_indices = @transform_1, window_bounds = array<i64: 4, 1, 64>}, {pipeline_mode = #tpu.pipeline_mode<synchronous>, transform_indices = @transform_2, window_bounds = array<i64: 32, 64>}, {pipeline_mode = #tpu.pipeline_mode<synchronous>, transform_indices = @transform_3, window_bounds = array<i64: 1, 64>}, {pipeline_mode = #tpu.pipeline_mode<synchronous>, transform_indices = @transform_4, window_bounds = array<i64: 8, 576, 64>}, {pipeline_mode = #tpu.pipeline_mode<synchronous>, transform_indices = @transform_5, window_bounds = array<i64: 8, 1, 64>}, {pipeline_mode = #tpu.pipeline_mode<synchronous>, transform_indices = @transform_6, window_bounds = array<i64: 64, 32>}, {pipeline_mode = #tpu.pipeline_mode<synchronous>, transform_indices = @transform_7, window_bounds = array<i64: 1, 32>}, {transform_indices = @transform_8, window_bounds = array<i64: 256, 32>}]} {
    %c0 = arith.constant 0 : index
    %c0_0 = arith.constant 0 : index
    %c0_1 = arith.constant 0 : index
    %0 = vector.load %arg2[%c0, %c0_0, %c0_1] : memref<4x1x64xf32, #tpu.memory_space<vmem>>, vector<4x1x64xf32>
    %1 = vector.shape_cast %0 : vector<4x1x64xf32> to vector<4x1x64xf32>
    %2 = vector.broadcast %1 : vector<4x1x64xf32> to vector<4x64x64xf32>
    %3 = vector.shape_cast %2 : vector<4x64x64xf32> to vector<256x64xf32>
    %4 = tpu.iota {dimensions = array<i32: 0>} : vector<256x64xi32>
    %c64_i32 = arith.constant 64 : i32
    %c0_i32 = arith.constant 0 : i32
    %5 = arith.cmpi eq, %c64_i32, %c0_i32 : i32
    %c1_i32 = arith.constant 1 : i32
    %6 = arith.select %5, %c1_i32, %c64_i32 : i32
    %7 = vector.broadcast %6 : i32 to vector<256x64xi32>
    %8 = arith.remsi %4, %7 : vector<256x64xi32>
    %c0_i32_2 = arith.constant 0 : i32
    %9 = vector.broadcast %c0_i32_2 : i32 to vector<256x64xi32>
    %10 = arith.cmpi ne, %8, %9 : vector<256x64xi32>
    %c0_i32_3 = arith.constant 0 : i32
    %11 = vector.broadcast %c0_i32_3 : i32 to vector<256x64xi32>
    %12 = arith.cmpi slt, %8, %11 : vector<256x64xi32>
    %c0_i32_4 = arith.constant 0 : i32
    %13 = arith.cmpi slt, %6, %c0_i32_4 : i32
    %14 = vector.broadcast %13 : i1 to vector<256x64xi1>
    %15 = vector.broadcast %14 : vector<256x64xi1> to vector<256x64xi1>
    %16 = arith.xori %12, %15 : vector<256x64xi1>
    %17 = arith.andi %16, %10 : vector<256x64xi1>
    %18 = vector.broadcast %6 : i32 to vector<256x64xi32>
    %19 = arith.addi %8, %18 : vector<256x64xi32>
    %20 = arith.select %17, %19, %8 : vector<256x64xi1>, vector<256x64xi32>
    %c8_i32 = arith.constant 8 : i32
    %c0_i32_5 = arith.constant 0 : i32
    %21 = arith.cmpi eq, %c8_i32, %c0_i32_5 : i32
    %c1_i32_6 = arith.constant 1 : i32
    %22 = arith.select %21, %c1_i32_6, %c8_i32 : i32
    %23 = vector.broadcast %22 : i32 to vector<256x64xi32>
    %24 = arith.remsi %20, %23 : vector<256x64xi32>
    %c0_i32_7 = arith.constant 0 : i32
    %25 = vector.broadcast %c0_i32_7 : i32 to vector<256x64xi32>
    %26 = arith.cmpi ne, %24, %25 : vector<256x64xi32>
    %c0_i32_8 = arith.constant 0 : i32
    %27 = vector.broadcast %c0_i32_8 : i32 to vector<256x64xi32>
    %28 = arith.cmpi slt, %24, %27 : vector<256x64xi32>
    %c0_i32_9 = arith.constant 0 : i32
    %29 = arith.cmpi slt, %22, %c0_i32_9 : i32
    %30 = vector.broadcast %29 : i1 to vector<256x64xi1>
    %31 = vector.broadcast %30 : vector<256x64xi1> to vector<256x64xi1>
    %32 = arith.xori %28, %31 : vector<256x64xi1>
    %33 = arith.andi %32, %26 : vector<256x64xi1>
    %34 = vector.broadcast %22 : i32 to vector<256x64xi32>
    %35 = arith.addi %24, %34 : vector<256x64xi32>
    %36 = arith.select %33, %35, %24 : vector<256x64xi1>, vector<256x64xi32>
    %c0_10 = arith.constant 0 : index
    %c0_11 = arith.constant 0 : index
    %37 = vector.load %arg1[%c0_10, %c0_11] : memref<256x32xf32, #tpu.memory_space<vmem>>, vector<256x32xf32>
    %38 = arith.truncf %37 : vector<256x32xf32> to vector<256x32xbf16>
    %c0_12 = arith.constant 0 : index
    %c0_13 = arith.constant 0 : index
    %39 = vector.load %arg3[%c0_12, %c0_13] : memref<32x64xbf16, #tpu.memory_space<vmem>>, vector<32x64xbf16>
    %cst = arith.constant dense<0.000000e+00> : vector<256x64xf32>
    %40 = tpu.matmul %38, %39, %cst {dimension_numbers = #tpu.dot_dimension_numbers<[1], [0], [0], [1], [0, 0, 1, 1], [], []>} : vector<256x32xbf16>, vector<32x64xbf16>, vector<256x64xf32> -> vector<256x64xf32>
    %c0_14 = arith.constant 0 : index
    %c0_15 = arith.constant 0 : index
    %41 = vector.load %arg4[%c0_14, %c0_15] : memref<1x64xf32, #tpu.memory_space<vmem>>, vector<1x64xf32>
    %42 = vector.broadcast %41 : vector<1x64xf32> to vector<256x64xf32>
    %43 = arith.addf %40, %42 : vector<256x64xf32>
    %44 = vector.shape_cast %43 : vector<256x64xf32> to vector<4x64x64xf32>
    %cst_16 = arith.constant dense<0.000000e+00> : vector<4x64xf32>
    %45 = vector.multi_reduction <add>, %44, %cst_16 [1] : vector<4x64x64xf32> to vector<4x64xf32>
    %46 = vector.shape_cast %45 : vector<4x64xf32> to vector<4x1x64xf32>
    %47 = arith.mulf %44, %44 : vector<4x64x64xf32>
    %cst_17 = arith.constant dense<0.000000e+00> : vector<4x64xf32>
    %48 = vector.multi_reduction <add>, %47, %cst_17 [1] : vector<4x64x64xf32> to vector<4x64xf32>
    %49 = vector.shape_cast %48 : vector<4x64xf32> to vector<4x1x64xf32>
    %cst_18 = arith.constant 1.562500e-02 : f32
    %50 = vector.broadcast %cst_18 : f32 to vector<4x1x64xf32>
    %51 = arith.mulf %46, %50 : vector<4x1x64xf32>
    %cst_19 = arith.constant 1.562500e-02 : f32
    %52 = vector.broadcast %cst_19 : f32 to vector<4x1x64xf32>
    %53 = arith.mulf %49, %52 : vector<4x1x64xf32>
    %54 = arith.mulf %51, %51 : vector<4x1x64xf32>
    %55 = arith.subf %53, %54 : vector<4x1x64xf32>
    %cst_20 = arith.constant 0.000000e+00 : f32
    %56 = vector.broadcast %cst_20 : f32 to vector<4x1x64xf32>
    %57 = arith.maximumf %55, %56 : vector<4x1x64xf32>
    %58 = vector.broadcast %51 : vector<4x1x64xf32> to vector<4x64x64xf32>
    %59 = arith.subf %44, %58 : vector<4x64x64xf32>
    %cst_21 = arith.constant 9.99999974E-6 : f32
    %60 = vector.broadcast %cst_21 : f32 to vector<4x1x64xf32>
    %61 = arith.addf %57, %60 : vector<4x1x64xf32>
    %62 = math.rsqrt %61 : vector<4x1x64xf32>
    %63 = vector.broadcast %62 : vector<4x1x64xf32> to vector<4x64x64xf32>
    %64 = arith.mulf %59, %63 : vector<4x64x64xf32>
    %65 = vector.shape_cast %64 : vector<4x64x64xf32> to vector<256x64xf32>
    %cst_22 = arith.constant 0.000000e+00 : f32
    %66 = vector.broadcast %cst_22 : f32 to vector<256x64xf32>
    %67 = arith.cmpf ogt, %65, %66 : vector<256x64xf32>
    %cst_23 = arith.constant 2.000000e-01 : f32
    %68 = vector.broadcast %cst_23 : f32 to vector<256x64xf32>
    %69 = arith.mulf %68, %65 : vector<256x64xf32>
    %70 = arith.select %67, %65, %69 : vector<256x64xi1>, vector<256x64xf32>
    %71 = arith.mulf %70, %3 : vector<256x64xf32>
    %c0_i32_24 = arith.constant 0 : i32
    %c4_i32 = arith.constant 4 : i32
    %72 = arith.addi %c0_i32_24, %c4_i32 : i32
    %c1_i32_25 = arith.constant 1 : i32
    %73 = scf.for %arg10 = %c0_i32_24 to %72 step %c1_i32_25 iter_args(%arg11 = %71) -> (vector<256x64xf32>)  : i32 {
      %c2_i32 = arith.constant 2 : i32
      %81 = arith.muli %c2_i32, %arg10 : i32
      %82 = arith.index_cast %81 : i32 to index
      %c0_34 = arith.constant 0 : index
      %c0_35 = arith.constant 0 : index
      %83 = vector.load %arg5[%82, %c0_34, %c0_35] : memref<8x576x64xbf16, #tpu.memory_space<vmem>>, vector<1x576x64xbf16>
      %84 = vector.shape_cast %83 : vector<1x576x64xbf16> to vector<576x64xbf16>
      %c2_i32_36 = arith.constant 2 : i32
      %85 = arith.muli %c2_i32_36, %arg10 : i32
      %86 = arith.index_cast %85 : i32 to index
      %c0_37 = arith.constant 0 : index
      %c0_38 = arith.constant 0 : index
      %87 = vector.load %arg6[%86, %c0_37, %c0_38] : memref<8x1x64xf32, #tpu.memory_space<vmem>>, vector<1x1x64xf32>
      %88 = vector.shape_cast %87 : vector<1x1x64xf32> to vector<1x64xf32>
      %c9_i32 = arith.constant 9 : i32
      %89 = tpu.dynamic_rotate %arg11 by %c9_i32 dim 0 : vector<256x64xf32>, i32 -> vector<256x64xf32>
      %c8_i32_39 = arith.constant 8 : i32
      %90 = vector.broadcast %c8_i32_39 : i32 to vector<256x64xi32>
      %91 = arith.cmpi sge, %20, %90 : vector<256x64xi32>
      %c1_i32_40 = arith.constant 1 : i32
      %92 = vector.broadcast %c1_i32_40 : i32 to vector<256x64xi32>
      %93 = arith.cmpi sge, %36, %92 : vector<256x64xi32>
      %94 = arith.andi %91, %93 : vector<256x64xi1>
      %cst_41 = arith.constant 0.000000e+00 : f32
      %95 = vector.broadcast %cst_41 : f32 to vector<256x64xf32>
      %96 = arith.select %94, %89, %95 : vector<256x64xi1>, vector<256x64xf32>
      %97 = arith.truncf %96 : vector<256x64xf32> to vector<256x64xbf16>
      %c8_i32_42 = arith.constant 8 : i32
      %98 = tpu.dynamic_rotate %arg11 by %c8_i32_42 dim 0 : vector<256x64xf32>, i32 -> vector<256x64xf32>
      %c8_i32_43 = arith.constant 8 : i32
      %99 = vector.broadcast %c8_i32_43 : i32 to vector<256x64xi32>
      %100 = arith.cmpi sge, %20, %99 : vector<256x64xi32>
      %cst_44 = arith.constant 0.000000e+00 : f32
      %101 = vector.broadcast %cst_44 : f32 to vector<256x64xf32>
      %102 = arith.select %100, %98, %101 : vector<256x64xi1>, vector<256x64xf32>
      %103 = arith.truncf %102 : vector<256x64xf32> to vector<256x64xbf16>
      %c7_i32 = arith.constant 7 : i32
      %104 = tpu.dynamic_rotate %arg11 by %c7_i32 dim 0 : vector<256x64xf32>, i32 -> vector<256x64xf32>
      %c8_i32_45 = arith.constant 8 : i32
      %105 = vector.broadcast %c8_i32_45 : i32 to vector<256x64xi32>
      %106 = arith.cmpi sge, %20, %105 : vector<256x64xi32>
      %c7_i32_46 = arith.constant 7 : i32
      %107 = vector.broadcast %c7_i32_46 : i32 to vector<256x64xi32>
      %108 = arith.cmpi slt, %36, %107 : vector<256x64xi32>
      %109 = arith.andi %106, %108 : vector<256x64xi1>
      %cst_47 = arith.constant 0.000000e+00 : f32
      %110 = vector.broadcast %cst_47 : f32 to vector<256x64xf32>
      %111 = arith.select %109, %104, %110 : vector<256x64xi1>, vector<256x64xf32>
      %112 = arith.truncf %111 : vector<256x64xf32> to vector<256x64xbf16>
      %c1_i32_48 = arith.constant 1 : i32
      %113 = tpu.dynamic_rotate %arg11 by %c1_i32_48 dim 0 : vector<256x64xf32>, i32 -> vector<256x64xf32>
      %c1_i32_49 = arith.constant 1 : i32
      %114 = vector.broadcast %c1_i32_49 : i32 to vector<256x64xi32>
      %115 = arith.cmpi sge, %36, %114 : vector<256x64xi32>
      %cst_50 = arith.constant 0.000000e+00 : f32
      %116 = vector.broadcast %cst_50 : f32 to vector<256x64xf32>
      %117 = arith.select %115, %113, %116 : vector<256x64xi1>, vector<256x64xf32>
      %118 = arith.truncf %117 : vector<256x64xf32> to vector<256x64xbf16>
      %119 = arith.truncf %arg11 : vector<256x64xf32> to vector<256x64xbf16>
      %c255_i32 = arith.constant 255 : i32
      %120 = tpu.dynamic_rotate %arg11 by %c255_i32 dim 0 : vector<256x64xf32>, i32 -> vector<256x64xf32>
      %c7_i32_51 = arith.constant 7 : i32
      %121 = vector.broadcast %c7_i32_51 : i32 to vector<256x64xi32>
      %122 = arith.cmpi slt, %36, %121 : vector<256x64xi32>
      %cst_52 = arith.constant 0.000000e+00 : f32
      %123 = vector.broadcast %cst_52 : f32 to vector<256x64xf32>
      %124 = arith.select %122, %120, %123 : vector<256x64xi1>, vector<256x64xf32>
      %125 = arith.truncf %124 : vector<256x64xf32> to vector<256x64xbf16>
      %c249_i32 = arith.constant 249 : i32
      %126 = tpu.dynamic_rotate %arg11 by %c249_i32 dim 0 : vector<256x64xf32>, i32 -> vector<256x64xf32>
      %c56_i32 = arith.constant 56 : i32
      %127 = vector.broadcast %c56_i32 : i32 to vector<256x64xi32>
      %128 = arith.cmpi slt, %20, %127 : vector<256x64xi32>
      %c1_i32_53 = arith.constant 1 : i32
      %129 = vector.broadcast %c1_i32_53 : i32 to vector<256x64xi32>
      %130 = arith.cmpi sge, %36, %129 : vector<256x64xi32>
      %131 = arith.andi %128, %130 : vector<256x64xi1>
      %cst_54 = arith.constant 0.000000e+00 : f32
      %132 = vector.broadcast %cst_54 : f32 to vector<256x64xf32>
      %133 = arith.select %131, %126, %132 : vector<256x64xi1>, vector<256x64xf32>
      %134 = arith.truncf %133 : vector<256x64xf32> to vector<256x64xbf16>
      %c248_i32 = arith.constant 248 : i32
      %135 = tpu.dynamic_rotate %arg11 by %c248_i32 dim 0 : vector<256x64xf32>, i32 -> vector<256x64xf32>
      %c56_i32_55 = arith.constant 56 : i32
      %136 = vector.broadcast %c56_i32_55 : i32 to vector<256x64xi32>
      %137 = arith.cmpi slt, %20, %136 : vector<256x64xi32>
      %cst_56 = arith.constant 0.000000e+00 : f32
      %138 = vector.broadcast %cst_56 : f32 to vector<256x64xf32>
      %139 = arith.select %137, %135, %138 : vector<256x64xi1>, vector<256x64xf32>
      %140 = arith.truncf %139 : vector<256x64xf32> to vector<256x64xbf16>
      %c247_i32 = arith.constant 247 : i32
      %141 = tpu.dynamic_rotate %arg11 by %c247_i32 dim 0 : vector<256x64xf32>, i32 -> vector<256x64xf32>
      %c56_i32_57 = arith.constant 56 : i32
      %142 = vector.broadcast %c56_i32_57 : i32 to vector<256x64xi32>
      %143 = arith.cmpi slt, %20, %142 : vector<256x64xi32>
      %c7_i32_58 = arith.constant 7 : i32
      %144 = vector.broadcast %c7_i32_58 : i32 to vector<256x64xi32>
      %145 = arith.cmpi slt, %36, %144 : vector<256x64xi32>
      %146 = arith.andi %143, %145 : vector<256x64xi1>
      %cst_59 = arith.constant 0.000000e+00 : f32
      %147 = vector.broadcast %cst_59 : f32 to vector<256x64xf32>
      %148 = arith.select %146, %141, %147 : vector<256x64xi1>, vector<256x64xf32>
      %149 = arith.truncf %148 : vector<256x64xf32> to vector<256x64xbf16>
      %150 = tpu.concatenate %97, %103, %112, %118, %119, %125, %134, %140, %149 in 1 : vector<256x64xbf16>, vector<256x64xbf16>, vector<256x64xbf16>, vector<256x64xbf16>, vector<256x64xbf16>, vector<256x64xbf16>, vector<256x64xbf16>, vector<256x64xbf16>, vector<256x64xbf16> -> vector<256x576xbf16>
      %cst_60 = arith.constant dense<0.000000e+00> : vector<256x64xf32>
      %151 = tpu.matmul %150, %84, %cst_60 {dimension_numbers = #tpu.dot_dimension_numbers<[1], [0], [0], [1], [0, 0, 1, 1], [], []>} : vector<256x576xbf16>, vector<576x64xbf16>, vector<256x64xf32> -> vector<256x64xf32>
      %152 = vector.broadcast %88 : vector<1x64xf32> to vector<256x64xf32>
      %153 = arith.addf %151, %152 : vector<256x64xf32>
      %154 = vector.shape_cast %153 : vector<256x64xf32> to vector<4x64x64xf32>
      %cst_61 = arith.constant dense<0.000000e+00> : vector<4x64xf32>
      %155 = vector.multi_reduction <add>, %154, %cst_61 [1] : vector<4x64x64xf32> to vector<4x64xf32>
      %156 = vector.shape_cast %155 : vector<4x64xf32> to vector<4x1x64xf32>
      %157 = arith.mulf %154, %154 : vector<4x64x64xf32>
      %cst_62 = arith.constant dense<0.000000e+00> : vector<4x64xf32>
      %158 = vector.multi_reduction <add>, %157, %cst_62 [1] : vector<4x64x64xf32> to vector<4x64xf32>
      %159 = vector.shape_cast %158 : vector<4x64xf32> to vector<4x1x64xf32>
      %cst_63 = arith.constant 1.562500e-02 : f32
      %160 = vector.broadcast %cst_63 : f32 to vector<4x1x64xf32>
      %161 = arith.mulf %156, %160 : vector<4x1x64xf32>
      %cst_64 = arith.constant 1.562500e-02 : f32
      %162 = vector.broadcast %cst_64 : f32 to vector<4x1x64xf32>
      %163 = arith.mulf %159, %162 : vector<4x1x64xf32>
      %164 = arith.mulf %161, %161 : vector<4x1x64xf32>
      %165 = arith.subf %163, %164 : vector<4x1x64xf32>
      %cst_65 = arith.constant 0.000000e+00 : f32
      %166 = vector.broadcast %cst_65 : f32 to vector<4x1x64xf32>
      %167 = arith.maximumf %165, %166 : vector<4x1x64xf32>
      %168 = vector.broadcast %161 : vector<4x1x64xf32> to vector<4x64x64xf32>
      %169 = arith.subf %154, %168 : vector<4x64x64xf32>
      %cst_66 = arith.constant 9.99999974E-6 : f32
      %170 = vector.broadcast %cst_66 : f32 to vector<4x1x64xf32>
      %171 = arith.addf %167, %170 : vector<4x1x64xf32>
      %172 = math.rsqrt %171 : vector<4x1x64xf32>
      %173 = vector.broadcast %172 : vector<4x1x64xf32> to vector<4x64x64xf32>
      %174 = arith.mulf %169, %173 : vector<4x64x64xf32>
      %175 = vector.shape_cast %174 : vector<4x64x64xf32> to vector<256x64xf32>
      %176 = arith.mulf %175, %3 : vector<256x64xf32>
      %cst_67 = arith.constant 0.000000e+00 : f32
      %177 = vector.broadcast %cst_67 : f32 to vector<256x64xf32>
      %178 = arith.cmpf ogt, %176, %177 : vector<256x64xf32>
      %cst_68 = arith.constant 2.000000e-01 : f32
      %179 = vector.broadcast %cst_68 : f32 to vector<256x64xf32>
      %180 = arith.mulf %179, %176 : vector<256x64xf32>
      %181 = arith.select %178, %176, %180 : vector<256x64xi1>, vector<256x64xf32>
      %c2_i32_69 = arith.constant 2 : i32
      %182 = arith.muli %c2_i32_69, %arg10 : i32
      %c1_i32_70 = arith.constant 1 : i32
      %183 = arith.addi %182, %c1_i32_70 : i32
      %184 = arith.index_cast %183 : i32 to index
      %c0_71 = arith.constant 0 : index
      %c0_72 = arith.constant 0 : index
      %185 = vector.load %arg5[%184, %c0_71, %c0_72] : memref<8x576x64xbf16, #tpu.memory_space<vmem>>, vector<1x576x64xbf16>
      %186 = vector.shape_cast %185 : vector<1x576x64xbf16> to vector<576x64xbf16>
      %c2_i32_73 = arith.constant 2 : i32
      %187 = arith.muli %c2_i32_73, %arg10 : i32
      %c1_i32_74 = arith.constant 1 : i32
      %188 = arith.addi %187, %c1_i32_74 : i32
      %189 = arith.index_cast %188 : i32 to index
      %c0_75 = arith.constant 0 : index
      %c0_76 = arith.constant 0 : index
      %190 = vector.load %arg6[%189, %c0_75, %c0_76] : memref<8x1x64xf32, #tpu.memory_space<vmem>>, vector<1x1x64xf32>
      %191 = vector.shape_cast %190 : vector<1x1x64xf32> to vector<1x64xf32>
      %c9_i32_77 = arith.constant 9 : i32
      %192 = tpu.dynamic_rotate %181 by %c9_i32_77 dim 0 : vector<256x64xf32>, i32 -> vector<256x64xf32>
      %c8_i32_78 = arith.constant 8 : i32
      %193 = vector.broadcast %c8_i32_78 : i32 to vector<256x64xi32>
      %194 = arith.cmpi sge, %20, %193 : vector<256x64xi32>
      %c1_i32_79 = arith.constant 1 : i32
      %195 = vector.broadcast %c1_i32_79 : i32 to vector<256x64xi32>
      %196 = arith.cmpi sge, %36, %195 : vector<256x64xi32>
      %197 = arith.andi %194, %196 : vector<256x64xi1>
      %cst_80 = arith.constant 0.000000e+00 : f32
      %198 = vector.broadcast %cst_80 : f32 to vector<256x64xf32>
      %199 = arith.select %197, %192, %198 : vector<256x64xi1>, vector<256x64xf32>
      %200 = arith.truncf %199 : vector<256x64xf32> to vector<256x64xbf16>
      %c8_i32_81 = arith.constant 8 : i32
      %201 = tpu.dynamic_rotate %181 by %c8_i32_81 dim 0 : vector<256x64xf32>, i32 -> vector<256x64xf32>
      %c8_i32_82 = arith.constant 8 : i32
      %202 = vector.broadcast %c8_i32_82 : i32 to vector<256x64xi32>
      %203 = arith.cmpi sge, %20, %202 : vector<256x64xi32>
      %cst_83 = arith.constant 0.000000e+00 : f32
      %204 = vector.broadcast %cst_83 : f32 to vector<256x64xf32>
      %205 = arith.select %203, %201, %204 : vector<256x64xi1>, vector<256x64xf32>
      %206 = arith.truncf %205 : vector<256x64xf32> to vector<256x64xbf16>
      %c7_i32_84 = arith.constant 7 : i32
      %207 = tpu.dynamic_rotate %181 by %c7_i32_84 dim 0 : vector<256x64xf32>, i32 -> vector<256x64xf32>
      %c8_i32_85 = arith.constant 8 : i32
      %208 = vector.broadcast %c8_i32_85 : i32 to vector<256x64xi32>
      %209 = arith.cmpi sge, %20, %208 : vector<256x64xi32>
      %c7_i32_86 = arith.constant 7 : i32
      %210 = vector.broadcast %c7_i32_86 : i32 to vector<256x64xi32>
      %211 = arith.cmpi slt, %36, %210 : vector<256x64xi32>
      %212 = arith.andi %209, %211 : vector<256x64xi1>
      %cst_87 = arith.constant 0.000000e+00 : f32
      %213 = vector.broadcast %cst_87 : f32 to vector<256x64xf32>
      %214 = arith.select %212, %207, %213 : vector<256x64xi1>, vector<256x64xf32>
      %215 = arith.truncf %214 : vector<256x64xf32> to vector<256x64xbf16>
      %c1_i32_88 = arith.constant 1 : i32
      %216 = tpu.dynamic_rotate %181 by %c1_i32_88 dim 0 : vector<256x64xf32>, i32 -> vector<256x64xf32>
      %c1_i32_89 = arith.constant 1 : i32
      %217 = vector.broadcast %c1_i32_89 : i32 to vector<256x64xi32>
      %218 = arith.cmpi sge, %36, %217 : vector<256x64xi32>
      %cst_90 = arith.constant 0.000000e+00 : f32
      %219 = vector.broadcast %cst_90 : f32 to vector<256x64xf32>
      %220 = arith.select %218, %216, %219 : vector<256x64xi1>, vector<256x64xf32>
      %221 = arith.truncf %220 : vector<256x64xf32> to vector<256x64xbf16>
      %222 = arith.truncf %181 : vector<256x64xf32> to vector<256x64xbf16>
      %c255_i32_91 = arith.constant 255 : i32
      %223 = tpu.dynamic_rotate %181 by %c255_i32_91 dim 0 : vector<256x64xf32>, i32 -> vector<256x64xf32>
      %c7_i32_92 = arith.constant 7 : i32
      %224 = vector.broadcast %c7_i32_92 : i32 to vector<256x64xi32>
      %225 = arith.cmpi slt, %36, %224 : vector<256x64xi32>
      %cst_93 = arith.constant 0.000000e+00 : f32
      %226 = vector.broadcast %cst_93 : f32 to vector<256x64xf32>
      %227 = arith.select %225, %223, %226 : vector<256x64xi1>, vector<256x64xf32>
      %228 = arith.truncf %227 : vector<256x64xf32> to vector<256x64xbf16>
      %c249_i32_94 = arith.constant 249 : i32
      %229 = tpu.dynamic_rotate %181 by %c249_i32_94 dim 0 : vector<256x64xf32>, i32 -> vector<256x64xf32>
      %c56_i32_95 = arith.constant 56 : i32
      %230 = vector.broadcast %c56_i32_95 : i32 to vector<256x64xi32>
      %231 = arith.cmpi slt, %20, %230 : vector<256x64xi32>
      %c1_i32_96 = arith.constant 1 : i32
      %232 = vector.broadcast %c1_i32_96 : i32 to vector<256x64xi32>
      %233 = arith.cmpi sge, %36, %232 : vector<256x64xi32>
      %234 = arith.andi %231, %233 : vector<256x64xi1>
      %cst_97 = arith.constant 0.000000e+00 : f32
      %235 = vector.broadcast %cst_97 : f32 to vector<256x64xf32>
      %236 = arith.select %234, %229, %235 : vector<256x64xi1>, vector<256x64xf32>
      %237 = arith.truncf %236 : vector<256x64xf32> to vector<256x64xbf16>
      %c248_i32_98 = arith.constant 248 : i32
      %238 = tpu.dynamic_rotate %181 by %c248_i32_98 dim 0 : vector<256x64xf32>, i32 -> vector<256x64xf32>
      %c56_i32_99 = arith.constant 56 : i32
      %239 = vector.broadcast %c56_i32_99 : i32 to vector<256x64xi32>
      %240 = arith.cmpi slt, %20, %239 : vector<256x64xi32>
      %cst_100 = arith.constant 0.000000e+00 : f32
      %241 = vector.broadcast %cst_100 : f32 to vector<256x64xf32>
      %242 = arith.select %240, %238, %241 : vector<256x64xi1>, vector<256x64xf32>
      %243 = arith.truncf %242 : vector<256x64xf32> to vector<256x64xbf16>
      %c247_i32_101 = arith.constant 247 : i32
      %244 = tpu.dynamic_rotate %181 by %c247_i32_101 dim 0 : vector<256x64xf32>, i32 -> vector<256x64xf32>
      %c56_i32_102 = arith.constant 56 : i32
      %245 = vector.broadcast %c56_i32_102 : i32 to vector<256x64xi32>
      %246 = arith.cmpi slt, %20, %245 : vector<256x64xi32>
      %c7_i32_103 = arith.constant 7 : i32
      %247 = vector.broadcast %c7_i32_103 : i32 to vector<256x64xi32>
      %248 = arith.cmpi slt, %36, %247 : vector<256x64xi32>
      %249 = arith.andi %246, %248 : vector<256x64xi1>
      %cst_104 = arith.constant 0.000000e+00 : f32
      %250 = vector.broadcast %cst_104 : f32 to vector<256x64xf32>
      %251 = arith.select %249, %244, %250 : vector<256x64xi1>, vector<256x64xf32>
      %252 = arith.truncf %251 : vector<256x64xf32> to vector<256x64xbf16>
      %253 = tpu.concatenate %200, %206, %215, %221, %222, %228, %237, %243, %252 in 1 : vector<256x64xbf16>, vector<256x64xbf16>, vector<256x64xbf16>, vector<256x64xbf16>, vector<256x64xbf16>, vector<256x64xbf16>, vector<256x64xbf16>, vector<256x64xbf16>, vector<256x64xbf16> -> vector<256x576xbf16>
      %cst_105 = arith.constant dense<0.000000e+00> : vector<256x64xf32>
      %254 = tpu.matmul %253, %186, %cst_105 {dimension_numbers = #tpu.dot_dimension_numbers<[1], [0], [0], [1], [0, 0, 1, 1], [], []>} : vector<256x576xbf16>, vector<576x64xbf16>, vector<256x64xf32> -> vector<256x64xf32>
      %255 = vector.broadcast %191 : vector<1x64xf32> to vector<256x64xf32>
      %256 = arith.addf %254, %255 : vector<256x64xf32>
      %257 = vector.shape_cast %256 : vector<256x64xf32> to vector<4x64x64xf32>
      %cst_106 = arith.constant dense<0.000000e+00> : vector<4x64xf32>
      %258 = vector.multi_reduction <add>, %257, %cst_106 [1] : vector<4x64x64xf32> to vector<4x64xf32>
      %259 = vector.shape_cast %258 : vector<4x64xf32> to vector<4x1x64xf32>
      %260 = arith.mulf %257, %257 : vector<4x64x64xf32>
      %cst_107 = arith.constant dense<0.000000e+00> : vector<4x64xf32>
      %261 = vector.multi_reduction <add>, %260, %cst_107 [1] : vector<4x64x64xf32> to vector<4x64xf32>
      %262 = vector.shape_cast %261 : vector<4x64xf32> to vector<4x1x64xf32>
      %cst_108 = arith.constant 1.562500e-02 : f32
      %263 = vector.broadcast %cst_108 : f32 to vector<4x1x64xf32>
      %264 = arith.mulf %259, %263 : vector<4x1x64xf32>
      %cst_109 = arith.constant 1.562500e-02 : f32
      %265 = vector.broadcast %cst_109 : f32 to vector<4x1x64xf32>
      %266 = arith.mulf %262, %265 : vector<4x1x64xf32>
      %267 = arith.mulf %264, %264 : vector<4x1x64xf32>
      %268 = arith.subf %266, %267 : vector<4x1x64xf32>
      %cst_110 = arith.constant 0.000000e+00 : f32
      %269 = vector.broadcast %cst_110 : f32 to vector<4x1x64xf32>
      %270 = arith.maximumf %268, %269 : vector<4x1x64xf32>
      %271 = vector.broadcast %264 : vector<4x1x64xf32> to vector<4x64x64xf32>
      %272 = arith.subf %257, %271 : vector<4x64x64xf32>
      %cst_111 = arith.constant 9.99999974E-6 : f32
      %273 = vector.broadcast %cst_111 : f32 to vector<4x1x64xf32>
      %274 = arith.addf %270, %273 : vector<4x1x64xf32>
      %275 = math.rsqrt %274 : vector<4x1x64xf32>
      %276 = vector.broadcast %275 : vector<4x1x64xf32> to vector<4x64x64xf32>
      %277 = arith.mulf %272, %276 : vector<4x64x64xf32>
      %278 = vector.shape_cast %277 : vector<4x64x64xf32> to vector<256x64xf32>
      %279 = arith.mulf %278, %3 : vector<256x64xf32>
      %280 = arith.addf %arg11, %279 : vector<256x64xf32>
      %cst_112 = arith.constant 0.000000e+00 : f32
      %281 = vector.broadcast %cst_112 : f32 to vector<256x64xf32>
      %282 = arith.cmpf ogt, %280, %281 : vector<256x64xf32>
      %cst_113 = arith.constant 2.000000e-01 : f32
      %283 = vector.broadcast %cst_113 : f32 to vector<256x64xf32>
      %284 = arith.mulf %283, %280 : vector<256x64xf32>
      %285 = arith.select %282, %280, %284 : vector<256x64xi1>, vector<256x64xf32>
      scf.yield %285 : vector<256x64xf32>
    }
    %c4_i32_26 = arith.constant 4 : i32
    %74 = arith.truncf %73 : vector<256x64xf32> to vector<256x64xbf16>
    %c0_27 = arith.constant 0 : index
    %c0_28 = arith.constant 0 : index
    %75 = vector.load %arg7[%c0_27, %c0_28] : memref<64x32xbf16, #tpu.memory_space<vmem>>, vector<64x32xbf16>
    %cst_29 = arith.constant dense<0.000000e+00> : vector<256x32xf32>
    %76 = tpu.matmul %74, %75, %cst_29 {dimension_numbers = #tpu.dot_dimension_numbers<[1], [0], [0], [1], [0, 0, 1, 1], [], []>} : vector<256x64xbf16>, vector<64x32xbf16>, vector<256x32xf32> -> vector<256x32xf32>
    %c0_30 = arith.constant 0 : index
    %c0_31 = arith.constant 0 : index
    %77 = vector.load %arg8[%c0_30, %c0_31] : memref<1x32xf32, #tpu.memory_space<vmem>>, vector<1x32xf32>
    %78 = vector.broadcast %77 : vector<1x32xf32> to vector<256x32xf32>
    %79 = arith.addf %76, %78 : vector<256x32xf32>
    %c0_32 = arith.constant 0 : index
    %c0_33 = arith.constant 0 : index
    %80 = vector.load %arg9[%c0_32, %c0_33] : memref<256x32xf32, #tpu.memory_space<vmem>>, vector<256x32xf32>
    tpu.vector_store %arg9[%c0_32, %c0_33], %79 {strides = array<i32>} : memref<256x32xf32, #tpu.memory_space<vmem>>, vector<256x32xf32>,
    return
  }
  func.func @transform_0(%arg0: i32) -> (i32, i32) {
    %c0_i32 = arith.constant 0 : i32
    %c0_i32_0 = arith.constant 0 : i32
    return %arg0, %c0_i32 : i32, i32
  }
  func.func @transform_1(%arg0: i32) -> (i32, i32, i32) {
    %c0_i32 = arith.constant 0 : i32
    %c0_i32_0 = arith.constant 0 : i32
    %c0_i32_1 = arith.constant 0 : i32
    return %arg0, %c0_i32, %c0_i32_0 : i32, i32, i32
  }
  func.func @transform_2(%arg0: i32) -> (i32, i32) {
    %c0_i32 = arith.constant 0 : i32
    %c0_i32_0 = arith.constant 0 : i32
    %c0_i32_1 = arith.constant 0 : i32
    return %c0_i32, %c0_i32_0 : i32, i32
  }
  func.func @transform_3(%arg0: i32) -> (i32, i32) {
    %c0_i32 = arith.constant 0 : i32
    %c0_i32_0 = arith.constant 0 : i32
    %c0_i32_1 = arith.constant 0 : i32
    return %c0_i32, %c0_i32_0 : i32, i32
  }
  func.func @transform_4(%arg0: i32) -> (i32, i32, i32) {
    %c0_i32 = arith.constant 0 : i32
    %c0_i32_0 = arith.constant 0 : i32
    %c0_i32_1 = arith.constant 0 : i32
    %c0_i32_2 = arith.constant 0 : i32
    return %c0_i32, %c0_i32_0, %c0_i32_1 : i32, i32, i32
  }
  func.func @transform_5(%arg0: i32) -> (i32, i32, i32) {
    %c0_i32 = arith.constant 0 : i32
    %c0_i32_0 = arith.constant 0 : i32
    %c0_i32_1 = arith.constant 0 : i32
    %c0_i32_2 = arith.constant 0 : i32
    return %c0_i32, %c0_i32_0, %c0_i32_1 : i32, i32, i32
  }
  func.func @transform_6(%arg0: i32) -> (i32, i32) {
    %c0_i32 = arith.constant 0 : i32
    %c0_i32_0 = arith.constant 0 : i32
    %c0_i32_1 = arith.constant 0 : i32
    return %c0_i32, %c0_i32_0 : i32, i32
  }
  func.func @transform_7(%arg0: i32) -> (i32, i32) {
    %c0_i32 = arith.constant 0 : i32
    %c0_i32_0 = arith.constant 0 : i32
    %c0_i32_1 = arith.constant 0 : i32
    return %c0_i32, %c0_i32_0 : i32, i32
  }
  func.func @transform_8(%arg0: i32) -> (i32, i32) {
    %c0_i32 = arith.constant 0 : i32
    %c0_i32_0 = arith.constant 0 : i32
    return %arg0, %c0_i32 : i32, i32
  }
}

</mosaic_0001>

<bundles_post_ra>
// kernel: aging_module_forward.1
= control target key start
LH: loop header
LB: loop body
LE: loop exit
PB: predicated region body
PF: predicated region fallthrough
CT: control target
= control target key end

     0   :  { %13 = vsyncpa [#allocation3], 0  ;;  %s14310_s0 = inlined_call_operand.vmem [shape: f32[512,32], index: 0, kind: input, shape index: {}]   ;;  %s14311_s1 = inlined_call_operand.vmem [shape: f32[8,1,64], index: 1, kind: input, shape index: {}]   ;;  %s14312_s2 = inlined_call_operand.vmem [shape: bf16[32,64], index: 2, kind: input, shape index: {}]   ;;  %s14313_s3 = inlined_call_operand.vmem [shape: f32[1,64], index: 3, kind: input, shape index: {}]   ;;  %s14314_s4 = inlined_call_operand.vmem [shape: bf16[8,576,64], index: 4, kind: input, shape index: {}]   ;;  %s14315_s5 = inlined_call_operand.vmem [shape: f32[8,1,64], index: 5, kind: input, shape index: {}]   ;;  %s14316_s6 = inlined_call_operand.vmem [shape: bf16[64,32], index: 6, kind: input, shape index: {}]   ;;  %s14317_s7 = inlined_call_operand.vmem [shape: f32[1,32], index: 7, kind: input, shape index: {}]   ;;  %s14318_s8 = inlined_call_operand.hbm [shape: f32[512,32], index: 8, kind: output, shape index: {}]  }
   0x1   :  { %15 = vsyncpa [#allocation3 + $0x1], 0  ;;  %s8858_s27 = smov 0   ;;  %s8860_s28 = smov 0  }
   0x2   :  { %s8862_s29 = smov 0   ;;  %s8864_s30 = smov 0  }
   0x3 LB: > { %s8879_s9 = sadd.s32 4294967295, %s8674_s30   ;;  %s7133_s10 = sadd.s32 4294967294, %s8674_s30   ;;  %s8674_s30 = sphi %s8864_s30, %s16117_s30   ;;  %s8670_s29 = sphi %s8862_s29, %s16116_s29   ;;  %s8666_s28 = sphi %s8860_s28, %s16115_s28   ;;  %s8662_s27 = sphi %s8858_s27, %s16114_s27  }
   0x4   : > { %s8883_s11 = sadd.s32 1, %s8674_s30   ;;  %s206_s12 = sadd.s32 1, %s8670_s29 }
   0x5   : > { %s203_s13 = ssub.s32 %s8674_s30, %s8883_s11  ;;  %p216_p0 = scmp.ne.s32.totalorder %s8670_s29, %s8666_s28 }
   0x6   : > { %p204_p1 = scmp.eq.s32.totalorder %s203_s13, 0  ;;  %p217_p2 = scmp.eq.s32.totalorder %s8879_s9, 1 }
   0x7   : > { %p222_p3 = scmp.ne.s32.totalorder %s8666_s28, %s8662_s27  ;;  %p223_p4 = scmp.eq.s32.totalorder %s7133_s10, 1 }
   0x8   : > { %s8894_s14 = scalar_select %p204_p1, %s8670_s29, %s206_s12  }
   0x9   : > { %p8896_p5 = por %p217_p2, %p216_p0  ;;  %p8900_p6 = por %p223_p4, %p222_p3 }
   0xa   : > { %p7136_p7 = scmp.ge.s32.totalorder %s8674_s30, 1  ;;  %p276_p8 = scmp.lt.s32.totalorder %s8674_s30, 3 }
   0xc   : > { %p277_p9 = pnand %p7136_p7, %p276_p8 }
   0xe   : > { %280 = sbr.rel (%p277_p9) target bundleno = 1892 (0x764), region = 52 }
  0x15   : > { %s311_s17 = sand.u32 1, %s8666_s28   ;;  %v355_v0 = vlaneseq  ;;  %v8378_v1 = vld [vmem:[%s14312_s2] sm:$0xff]   ;;  %v8379_v2 = vld [vmem:[%s14312_s2 + $0x8] sm:$0xff]   ;;  %s7138_s23 = sshll.u32 %s8879_s9, 5  ;;  %vm14385_vm0 = vcmask 261120   ;;  %vm14644_vm1 = vcmask 523264  }
  0x16   : > { %s8912_s20 = sshll.u32 %s311_s17, 8  ;;  %7903 = vmatprep.subr.bf16.mxu0 %v8378_v1  ;;  %8059 = vmatprep.subr.bf16.mxu1 %v8378_v1  ;;  %p8982_p10 = scmp.lt.s32.totalorder %s7138_s23, 63 }
  0x17   : > { %v8917_v3 = vshrl.u32 %v355_v0, 7  ;;  %7904 = vmatpush3.bf16.msra.mxu0 %v8378_v1  ;;  %8061 = vmatpush3.bf16.msra.mxu1 %v8378_v1  ;;  %s7140_s19 = sshll.u32 %s8879_s9, 2 }
  0x18   : > { %7905 = vmatprep.subr.bf16.mxu0 %v8379_v2  ;;  %8060 = vmatprep.subr.bf16.mxu1 %v8379_v2  ;;  %s16119_s23 = smov (!%p8982_p10, %s7138_s23), 63  ;;  %p9466_p11 = scmp.lt.s32.totalorder %s7140_s19, 7 }
  0x19   : > { %14842 = vst [vmem:[#allocation5_spill] sm:$0xff] %v8917_v3  ;;  %v8920_v4 = vadd.s32 8, %v8917_v3  ;;  %v8923_v5 = vadd.s32 16, %v8917_v3  ;;  %v8926_v6 = vadd.s32 24, %v8917_v3  ;;  %v8929_v7 = vadd.s32 32, %v8917_v3  ;;  %s7139_s25 = sshll.u32 %s16119_s23, 3 }
  0x1a   : > { %v8932_v8 = vadd.s32 40, %v8917_v3  ;;  %v8935_v9 = vadd.s32 48, %v8917_v3  ;;  %v8938_v10 = vadd.s32 56, %v8917_v3  ;;  %v8941_v11 = vadd.s32 64, %v8917_v3  ;;  %s9063_s12 = scalar_lea.vmem %s14310_s0, %s7139_s25  ;;  %s16121_s19 = smov (!%p9466_p11, %s7140_s19), 7 }
  0x1b   : > { %v8945_v12 = vadd.s32 72, %v8917_v3  ;;  %v8948_v13 = vadd.s32 80, %v8917_v3  ;;  %v8951_v14 = vadd.s32 88, %v8917_v3  ;;  %v8954_v15 = vadd.s32 96, %v8917_v3  ;;  %7906 = vmatpush3.bf16.msra.mxu0 %v8379_v2  ;;  %8062 = vmatpush3.bf16.msra.mxu1 %v8379_v2  ;;  %s9547_s24 = scalar_lea.vmem %s14311_s1, %s16121_s19  ;;  %s9759_s25 = scalar_lea.vmem [#allocation2], %s8912_s20 }
  0x1c   : > { %v8957_v16 = vadd.s32 104, %v8917_v3  ;;  %v8960_v17 = vadd.s32 112, %v8917_v3  ;;  %v8963_v18 = vadd.s32 120, %v8917_v3  ;;  %v8966_v19 = vadd.s32 128, %v8917_v3  ;;  %s9846_s20 = smov 0  }
  0x1d   : > { %v8969_v20 = vadd.s32 136, %v8917_v3  ;;  %v8972_v21 = vadd.s32 144, %v8917_v3  ;;  %v8975_v22 = vadd.s32 152, %v8917_v3  ;;  %v8978_v23 = vadd.s32 160, %v8917_v3 }
  0x1e   : > { %v8987_v24 = vadd.s32 168, %v8917_v3  ;;  %v8990_v25 = vadd.s32 176, %v8917_v3  ;;  %v8993_v26 = vadd.s32 184, %v8917_v3  ;;  %v8996_v27 = vadd.s32 192, %v8917_v3 }
  0x1f   : > { %v8999_v28 = vadd.s32 200, %v8917_v3  ;;  %v9002_v29 = vadd.s32 208, %v8917_v3  ;;  %v9005_v30 = vadd.s32 216, %v8917_v3  ;;  %v9008_v31 = vadd.s32 224, %v8917_v3 }
  0x20   : > { %v9011_v32 = vadd.s32 232, %v8917_v3  ;;  %v9014_v33 = vadd.s32 240, %v8917_v3  ;;  %v9017_v34 = vadd.s32 248, %v8917_v3  ;;  %v392_v35 = vand.u32 63, %v8917_v3 }
  0x21   : > { %v399_v36 = vand.u32 63, %v8920_v4  ;;  %v406_v37 = vand.u32 63, %v8923_v5  ;;  %v413_v38 = vand.u32 63, %v8926_v6  ;;  %v420_v39 = vand.u32 63, %v8929_v7 }
  0x22   : > { %v427_v40 = vand.u32 63, %v8932_v8  ;;  %v434_v41 = vand.u32 63, %v8935_v9  ;;  %v441_v42 = vand.u32 63, %v8938_v10  ;;  %v448_v43 = vand.u32 63, %v8941_v11 }
  0x23   : > { %v455_v44 = vand.u32 63, %v8945_v12  ;;  %v462_v45 = vand.u32 63, %v8948_v13  ;;  %v469_v46 = vand.u32 63, %v8951_v14  ;;  %v476_v47 = vand.u32 63, %v8954_v15 }
  0x24   : > { %v483_v48 = vand.u32 63, %v8957_v16  ;;  %v490_v49 = vand.u32 63, %v8960_v17  ;;  %v497_v50 = vand.u32 63, %v8963_v18  ;;  %v504_v51 = vand.u32 63, %v8966_v19  ;;  %v1156_v17 = vld [vmem:[%s9063_s12] sm:$0xff]  ;;  %v1157_v18 = vld [vmem:[%s9063_s12 + $0x8] sm:$0xff] }
  0x25   : > { %v511_v52 = vand.u32 63, %v8969_v20  ;;  %v518_v53 = vand.u32 63, %v8972_v21  ;;  %v525_v54 = vand.u32 63, %v8975_v22  ;;  %v532_v55 = vand.u32 63, %v8978_v23  ;;  %v1172_v23 = vld [vmem:[%s9063_s12 + $0x80] sm:$0xff] }
  0x26   : > { %v539_v56 = vand.u32 63, %v8987_v24  ;;  %v546_v57 = vand.u32 63, %v8990_v25  ;;  %v553_v58 = vand.u32 63, %v8993_v26  ;;  %v560_v59 = vand.u32 63, %v8996_v27  ;;  %v1173_v24 = vld [vmem:[%s9063_s12 + $0x88] sm:$0xff]  ;;  %v1158_v25 = vld [vmem:[%s9063_s12 + $0x10] sm:$0xff] }
  0x27   : > { %v567_v60 = vand.u32 63, %v8999_v28  ;;  %v574_v61 = vand.u32 63, %v9002_v29  ;;  %v581_v62 = vand.u32 63, %v9005_v30  ;;  %v588_v63 = vand.u32 63, %v9008_v31  ;;  %v1159_v26 = vld [vmem:[%s9063_s12 + $0x18] sm:$0xff]  ;;  %v1174_v31 = vld [vmem:[%s9063_s12 + $0x90] sm:$0xff] }
  0x28   : > { %v595_v0 = vand.u32 63, %v9011_v32  ;;  %v602_v1 = vand.u32 63, %v9014_v33  ;;  %v609_v2 = vand.u32 63, %v9017_v34  ;;  %v9058_v4 = vand.u32 7, %v392_v35  ;;  %v1175_v32 = vld [vmem:[%s9063_s12 + $0x98] sm:$0xff] }
  0x29   : > { %v9065_v5 = vand.u32 7, %v399_v36  ;;  %v9067_v6 = vand.u32 7, %v406_v37  ;;  %v9069_v7 = vand.u32 7, %v413_v38  ;;  %v9071_v8 = vand.u32 7, %v420_v39  ;;  %v1160_v37 = vld [vmem:[%s9063_s12 + $0x20] sm:$0xff]  ;;  %v1161_v38 = vld [vmem:[%s9063_s12 + $0x28] sm:$0xff] }
  0x2a   : > { %14844 = vst [vmem:[#allocation6_spill] sm:$0xff] %v9058_v4  ;;  %v9073_v9 = vand.u32 7, %v427_v40  ;;  %v9075_v10 = vand.u32 7, %v434_v41  ;;  %v9077_v11 = vand.u32 7, %v441_v42  ;;  %v9079_v12 = vand.u32 7, %v448_v43  ;;  %v1176_v43 = vld [vmem:[%s9063_s12 + $0xa0] sm:$0xff] }
  0x2b   : > { %14845 = vst [vmem:[#allocation7_spill] sm:$0xff] %v9065_v5  ;;  %14846 = vst [vmem:[#allocation8_spill] sm:$0xff] %v9067_v6  ;;  %v9081_v13 = vand.u32 7, %v455_v44  ;;  %v9083_v14 = vand.u32 7, %v462_v45  ;;  %v9085_v15 = vand.u32 7, %v469_v46  ;;  %v9087_v16 = vand.u32 7, %v476_v47 }
  0x2c   : > { %14847 = vst [vmem:[#allocation9_spill] sm:$0xff] %v9069_v7  ;;  %14848 = vst [vmem:[#allocation10_spill] sm:$0xff] %v9071_v8  ;;  %v9091_v19 = vand.u32 7, %v483_v48  ;;  %v9093_v20 = vand.u32 7, %v490_v49  ;;  %v9095_v21 = vand.u32 7, %v497_v50  ;;  %v9097_v22 = vand.u32 7, %v504_v51 }
  0x2d   : > { %14849 = vst [vmem:[#allocation11_spill] sm:$0xff] %v9073_v9  ;;  %14850 = vst [vmem:[#allocation12_spill] sm:$0xff] %v9075_v10  ;;  %v9103_v27 = vand.u32 7, %v511_v52  ;;  %v9105_v28 = vand.u32 7, %v518_v53  ;;  %v9107_v29 = vand.u32 7, %v525_v54  ;;  %v9109_v30 = vand.u32 7, %v532_v55 }
  0x2e   : > { %14851 = vst [vmem:[#allocation13_spill] sm:$0xff] %v9077_v11  ;;  %14852 = vst [vmem:[#allocation14_spill] sm:$0xff] %v9079_v12  ;;  %v9113_v33 = vand.u32 7, %v539_v56  ;;  %v9115_v34 = vand.u32 7, %v546_v57  ;;  %v9117_v35 = vand.u32 7, %v553_v58  ;;  %v9119_v36 = vand.u32 7, %v560_v59 }
  0x2f   : > { %14853 = vst [vmem:[#allocation15_spill] sm:$0xff] %v9081_v13  ;;  %14854 = vst [vmem:[#allocation16_spill] sm:$0xff] %v9083_v14  ;;  %v9123_v39 = vand.u32 7, %v567_v60  ;;  %v9125_v40 = vand.u32 7, %v574_v61  ;;  %v9127_v41 = vand.u32 7, %v581_v62  ;;  %v9129_v42 = vand.u32 7, %v588_v63 }
  0x30   : > { %14855 = vst [vmem:[#allocation17_spill] sm:$0xff] %v9085_v15  ;;  %14856 = vst [vmem:[#allocation18_spill] sm:$0xff] %v9087_v16  ;;  %v1177_v44 = vld [vmem:[%s9063_s12 + $0xa8] sm:$0xff]  ;;  %v9133_v45 = vand.u32 7, %v595_v0  ;;  %v9135_v46 = vand.u32 7, %v602_v1  ;;  %v9137_v47 = vand.u32 7, %v609_v2  ;;  %v1188_v48 = vpack.c.bf16 %v1157_v18, %v1156_v17 }
  0x31   : > { %14857 = vst [vmem:[#allocation19_spill] sm:$0xff] %v9091_v19  ;;  %14858 = vst [vmem:[#allocation20_spill] sm:$0xff] %v9093_v20  ;;  %v1196_v49 = vpack.c.bf16 %v1173_v24, %v1172_v23  ;;  %v1189_v50 = vpack.c.bf16 %v1159_v26, %v1158_v25  ;;  %v1197_v51 = vpack.c.bf16 %v1175_v32, %v1174_v31  ;;  %v1162_v54 = vld [vmem:[%s9063_s12 + $0x30] sm:$0xff]  ;;  %v1163_v55 = vld [vmem:[%s9063_s12 + $0x38] sm:$0xff] }
  0x32   : > { %14859 = vst [vmem:[#allocation21_spill] sm:$0xff] %v9095_v21  ;;  %14860 = vst [vmem:[#allocation22_spill] sm:$0xff] %v9097_v22  ;;  %v1190_v52 = vpack.c.bf16 %v1161_v38, %v1160_v37  ;;  %7907 = vmatprep.mubr.msk.bf16.mxu0 %vm14385_vm0, %v1188_v48  ;;  %v1198_v53 = vpack.c.bf16 %v1177_v44, %v1176_v43  ;;  %v1178_v56 = vld [vmem:[%s9063_s12 + $0xb0] sm:$0xff]  ;;  %v1179_v57 = vld [vmem:[%s9063_s12 + $0xb8] sm:$0xff]  ;;  %v1191_v62 = vpack.c.bf16 %v1163_v55, %v1162_v54 }
  0x33   : > { %14861 = vst [vmem:[#allocation23_spill] sm:$0xff] %v9103_v27  ;;  %14862 = vst [vmem:[#allocation24_spill] sm:$0xff] %v9105_v28  ;;  %7923 = vmatprep.mubr.msk.bf16.mxu1 %vm14385_vm0, %v1196_v49  ;;  %7908 = vmatmul.mubr.msk.bf16.vlgmr.msra.gmra.mrb[0].mxu0 %vm14385_vm0, %v1189_v50  ;;  %v1164_v58 = vld [vmem:[%s9063_s12 + $0x40] sm:$0xff]  ;;  %v1165_v59 = vld [vmem:[%s9063_s12 + $0x48] sm:$0xff]  ;;  %v1199_v63 = vpack.c.bf16 %v1179_v57, %v1178_v56 }
  0x34   : > { %14863 = vst [vmem:[#allocation25_spill] sm:$0xff] %v9107_v29  ;;  %14864 = vst [vmem:[#allocation26_spill] sm:$0xff] %v9109_v30  ;;  %7924 = vmatmul.mubr.msk.bf16.vlgmr.msra.gmra.mrb[0].mxu1 %vm14385_vm0, %v1197_v51  ;;  %7911 = vmatprep.mubr.msk.bf16.mxu0 %vm14385_vm0, %v1190_v52  ;;  %v1180_v60 = vld [vmem:[%s9063_s12 + $0xc0] sm:$0xff]  ;;  %v1181_v61 = vld [vmem:[%s9063_s12 + $0xc8] sm:$0xff]  ;;  %v1192_v0 = vpack.c.bf16 %v1165_v59, %v1164_v58 }
  0x35   : > { %14865 = vst [vmem:[#allocation27_spill] sm:$0xff] %v9113_v33  ;;  %14866 = vst [vmem:[#allocation28_spill] sm:$0xff] %v9115_v34  ;;  %7927 = vmatprep.mubr.msk.bf16.mxu1 %vm14385_vm0, %v1198_v53  ;;  %v1200_v1 = vpack.c.bf16 %v1181_v61, %v1180_v60  ;;  %v1166_v2 = vld [vmem:[%s9063_s12 + $0x50] sm:$0xff]  ;;  %v1167_v17 = vld [vmem:[%s9063_s12 + $0x58] sm:$0xff] }
  0x36   : > { %14867 = vst [vmem:[#allocation29_spill] sm:$0xff] %v9117_v35  ;;  %14868 = vst [vmem:[#allocation30_spill] sm:$0xff] %v9119_v36  ;;  %v1182_v18 = vld [vmem:[%s9063_s12 + $0xd0] sm:$0xff]  ;;  %v1183_v23 = vld [vmem:[%s9063_s12 + $0xd8] sm:$0xff]  ;;  %v1193_v32 = vpack.c.bf16 %v1167_v17, %v1166_v2 }
  0x37   : > { %14869 = vst [vmem:[#allocation31_spill] sm:$0xff] %v9123_v39  ;;  %14870 = vst [vmem:[#allocation32_spill] sm:$0xff] %v9125_v40  ;;  %v1168_v24 = vld [vmem:[%s9063_s12 + $0x60] sm:$0xff]  ;;  %v1169_v25 = vld [vmem:[%s9063_s12 + $0x68] sm:$0xff]  ;;  %v1201_v37 = vpack.c.bf16 %v1183_v23, %v1182_v18 }
  0x38   : > { %14871 = vst [vmem:[#allocation33_spill] sm:$0xff] %v9127_v41  ;;  %14872 = vst [vmem:[#allocation34_spill] sm:$0xff] %v9129_v42  ;;  %v1184_v26 = vld [vmem:[%s9063_s12 + $0xe0] sm:$0xff]  ;;  %v1185_v31 = vld [vmem:[%s9063_s12 + $0xe8] sm:$0xff]  ;;  %v1194_v38 = vpack.c.bf16 %v1169_v25, %v1168_v24 }
  0x39   : > { %14873 = vst [vmem:[#allocation35_spill] sm:$0xff] %v9133_v45  ;;  %14874 = vst [vmem:[#allocation36_spill] sm:$0xff] %v9135_v46  ;;  %v1202_v43 = vpack.c.bf16 %v1185_v31, %v1184_v26  ;;  %v1170_v44 = vld [vmem:[%s9063_s12 + $0x70] sm:$0xff]  ;;  %v1171_v48 = vld [vmem:[%s9063_s12 + $0x78] sm:$0xff] }
  0x3a   : > { %14875 = vst [vmem:[#allocation37_spill] sm:$0xff] %v9137_v47  ;;  %v1186_v49 = vld [vmem:[%s9063_s12 + $0xf0] sm:$0xff]  ;;  %v1187_v50 = vld [vmem:[%s9063_s12 + $0xf8] sm:$0xff]  ;;  %v1195_v51 = vpack.c.bf16 %v1171_v48, %v1170_v44  ;;  %v9178_v53 = vld [vmem:[%s14313_s3] ss:$0 sm:$0xff] }
  0x3b   : > { %7912 = vmatmul.mubr.msk.bf16.gmra.mrb[4].mxu0 %vm14385_vm0, %v1191_v62  ;;  %v1203_v52 = vpack.c.bf16 %v1187_v50, %v1186_v49 }
  0x3c   : > { %7928 = vmatmul.mubr.msk.bf16.gmra.mrb[4].mxu1 %vm14385_vm0, %v1199_v63  ;;  %7915 = vmatprep.mubr.msk.bf16.mxu0 %vm14385_vm0, %v1192_v0 }
  0x3d   : > { %7931 = vmatprep.mubr.msk.bf16.mxu1 %vm14385_vm0, %v1200_v1 }
  0x43   : > { %7916 = vmatmul.mubr.msk.bf16.gmra.mrb[8].mxu0 %vm14385_vm0, %v1193_v32 }
  0x44   : > { %7932 = vmatmul.mubr.msk.bf16.gmra.mrb[8].mxu1 %vm14385_vm0, %v1201_v37  ;;  %7919 = vmatprep.mubr.msk.bf16.mxu0 %vm14385_vm0, %v1194_v38 }
  0x45   : > { %7935 = vmatprep.mubr.msk.bf16.mxu1 %vm14385_vm0, %v1202_v43 }
  0x4b   : > { %7920 = vmatmul.mubr.msk.bf16.gmra.mrb[12].mxu0 %vm14385_vm0, %v1195_v51 }
  0x4c   : > { %7936 = vmatmul.mubr.msk.bf16.gmra.mrb[12].mxu1 %vm14385_vm0, %v1203_v52 }
 0x106   : > { %v7909_v54 = vpop.f32.mrb[0].mxu0 }
 0x107   : > { %v9181_v55 = vadd.f32 %v7909_v54, %v9178_v53  ;;  %v7925_v56 = vpop.f32.mrb[0].mxu1  ;;  %v1310_v57 = vpop.f32.mrb[1].mxu0 }
 0x108   : > { %v9184_v58 = vadd.f32 %v7925_v56, %v9178_v53  ;;  %v9187_v59 = vadd.f32 %v9178_v53, %v1310_v57  ;;  %v1374_v60 = vpop.f32.mrb[1].mxu1  ;;  %v7910_v61 = vpop.f32.mrb[2].mxu0 }
 0x109   : > { %v9190_v62 = vadd.f32 %v9178_v53, %v1374_v60  ;;  %v7926_v63 = vpop.f32.mrb[2].mxu1  ;;  %v1313_v0 = vpop.f32.mrb[3].mxu0  ;;  %v1524_v1 = vmul.f32 %v9181_v55, %v9181_v55  ;;  %v9195_v2 = vadd.f32 %v7910_v61, %v9178_v53  ;;  %v1441_v18 = vsel %vm14644_vm1, %v9181_v55, 0.0 }
 0x10a   : > { %v1377_v17 = vpop.f32.mrb[3].mxu1  ;;  %v1483_v23 = vsel %vm14644_vm1, %v9184_v58, 0.0  ;;  %v1540_v24 = vmul.f32 %v9184_v58, %v9184_v58  ;;  %v1522_v25 = vmul.f32 %v9187_v59, %v9187_v59  ;;  %v1438_v31 = vsel %vm14644_vm1, %v9187_v59, 0.0 }
 0x10b   : > { %v1538_v26 = vmul.f32 %v9190_v62, %v9190_v62  ;;  %v9210_v32 = vadd.f32 %v7926_v63, %v9178_v53  ;;  %v9213_v37 = vadd.f32 %v9178_v53, %v1313_v0  ;;  %v9216_v38 = vadd.f32 %v9178_v53, %v1377_v17 }
 0x10c   : > { %v1557_v43 = vsel %vm14644_vm1, %v1524_v1, 0.0  ;;  %v1480_v44 = vsel %vm14644_vm1, %v9190_v62, 0.0  ;;  %v1443_v48 = vsel %vm14644_vm1, %v9195_v2, 0.0  ;;  %v1525_v49 = vmul.f32 %v9195_v2, %v9195_v2 }
 0x10d   : > { %v1439_v51 = vsel %vm14644_vm1, %v9213_v37, 0.0  ;;  %v1523_v52 = vmul.f32 %v9213_v37, %v9213_v37  ;;  %v1481_v54 = vsel %vm14644_vm1, %v9216_v38, 0.0  ;;  %v1539_v56 = vmul.f32 %v9216_v38, %v9216_v38 }
 0x10e   : > { %v7913_v50 = vpop.f32.mrb[4].mxu0  ;;  %v1554_v61 = vsel %vm14644_vm1, %v1522_v25, 0.0  ;;  %v1596_v63 = vsel %vm14644_vm1, %v1538_v26, 0.0  ;;  %v1440_v0 = vadd.f32 %v1439_v51, %v1438_v31  ;;  %v1482_v1 = vadd.f32 %v1481_v54, %v1480_v44 }
 0x10f   : > { %v7929_v57 = vpop.f32.mrb[4].mxu1  ;;  %v1326_v60 = vpop.f32.mrb[5].mxu0  ;;  %v1541_v46 = vmul.f32 %v9210_v32, %v9210_v32  ;;  %v1555_v45 = vsel %vm14644_vm1, %v1523_v52, 0.0  ;;  %v1597_v42 = vsel %vm14644_vm1, %v1539_v56, 0.0  ;;  %v1599_v44 = vsel %vm14644_vm1, %v1540_v24, 0.0 }
 0x110   : > { %v1390_v17 = vpop.f32.mrb[5].mxu1  ;;  %v7914_v47 = vpop.f32.mrb[6].mxu0  ;;  %v9240_v41 = vadd.f32 %v9178_v53, %v1326_v60  ;;  %v1442_v36 = vadd.f32 %v1441_v18, %v1440_v0  ;;  %v1556_v25 = vadd.f32 %v1555_v45, %v1554_v61  ;;  %v1484_v35 = vadd.f32 %v1483_v23, %v1482_v1 }
 0x111   : > { %v7930_v40 = vpop.f32.mrb[6].mxu1  ;;  %v1329_v39 = vpop.f32.mrb[7].mxu0  ;;  %v1598_v26 = vadd.f32 %v1597_v42, %v1596_v63  ;;  %v1559_v51 = vsel %vm14644_vm1, %v1525_v49, 0.0  ;;  %v1485_v54 = vsel %vm14644_vm1, %v9210_v32, 0.0  ;;  %v9247_v52 = vadd.f32 %v7913_v50, %v9178_v53 }
 0x112   : > { %v1393_v31 = vpop.f32.mrb[7].mxu1  ;;  %v1558_v56 = vadd.f32 %v1557_v43, %v1556_v25  ;;  %v1444_v34 = vadd.f32 %v1443_v48, %v1442_v36  ;;  %v1445_v18 = vsel %vm14644_vm1, %v9240_v41, 0.0  ;;  %v1601_v45 = vsel %vm14644_vm1, %v1541_v46, 0.0 }
 0x113   : > { %v1600_v60 = vadd.f32 %v1599_v44, %v1598_v26  ;;  %v9253_v42 = vadd.f32 %v7929_v57, %v9178_v53  ;;  %v1526_v23 = vmul.f32 %v9240_v41, %v9240_v41  ;;  %v9258_v24 = vadd.f32 %v9178_v53, %v1390_v17 }
 0x114   : > { %v1446_v49 = vadd.f32 %v1445_v18, %v1444_v34  ;;  %v1560_v50 = vadd.f32 %v1559_v51, %v1558_v56  ;;  %v1486_v61 = vadd.f32 %v1485_v54, %v1484_v35  ;;  %v1528_v36 = vmul.f32 %v9247_v52, %v9247_v52 }
 0x115   : > { %v1602_v43 = vadd.f32 %v1601_v45, %v1600_v60  ;;  %v1561_v48 = vsel %vm14644_vm1, %v1526_v23, 0.0  ;;  %v1487_v46 = vsel %vm14644_vm1, %v9258_v24, 0.0  ;;  %v1542_v57 = vmul.f32 %v9258_v24, %v9258_v24 }
 0x116   : > { %v7917_v63 = vpop.f32.mrb[8].mxu0  ;;  %v1562_v17 = vadd.f32 %v1561_v48, %v1560_v50  ;;  %v1488_v25 = vadd.f32 %v1487_v46, %v1486_v61  ;;  %v9268_v34 = vadd.f32 %v7914_v47, %v9178_v53  ;;  %v9271_v35 = vadd.f32 %v9178_v53, %v1329_v39 }
 0x117   : > { %v7933_v0 = vpop.f32.mrb[8].mxu1  ;;  %v1342_v1 = vpop.f32.mrb[9].mxu0  ;;  %v1449_v51 = vsel %vm14644_vm1, %v9247_v52, 0.0  ;;  %v1603_v54 = vsel %vm14644_vm1, %v1542_v57, 0.0  ;;  %v9277_v56 = vadd.f32 %v7930_v40, %v9178_v53  ;;  %v9280_v60 = vadd.f32 %v9178_v53, %v1393_v31 }
 0x118   : > { %v1406_v26 = vpop.f32.mrb[9].mxu1  ;;  %v7918_v44 = vpop.f32.mrb[10].mxu0  ;;  %v1491_v39 = vsel %vm14644_vm1, %v9253_v42, 0.0  ;;  %v1544_v45 = vmul.f32 %v9253_v42, %v9253_v42  ;;  %v1604_v23 = vadd.f32 %v1603_v54, %v1602_v43  ;;  %v1447_v50 = vsel %vm14644_vm1, %v9271_v35, 0.0 }
 0x119   : > { %v9282_v18 = vpop.f32.mrb[10].mxu1  ;;  %v9284_v47 = vpop.f32.mrb[11].mxu0  ;;  %v1565_v40 = vsel %vm14644_vm1, %v1528_v36, 0.0  ;;  %v1448_v31 = vadd.f32 %v1447_v50, %v1446_v49  ;;  %v1527_v48 = vmul.f32 %v9271_v35, %v9271_v35  ;;  %v1489_v46 = vsel %vm14644_vm1, %v9280_v60, 0.0 }
 0x11a   : > { %v9292_v61 = vpop.f32.mrb[11].mxu1  ;;  %v1451_v57 = vsel %vm14644_vm1, %v9268_v34, 0.0  ;;  %v1529_v43 = vmul.f32 %v9268_v34, %v9268_v34  ;;  %v1490_v54 = vadd.f32 %v1489_v46, %v1488_v25  ;;  %v1543_v33 = vmul.f32 %v9280_v60, %v9280_v60 }
 0x11b   : > { %v1545_v36 = vmul.f32 %v9277_v56, %v9277_v56  ;;  %v1450_v49 = vadd.f32 %v1449_v51, %v1448_v31  ;;  %v1563_v50 = vsel %vm14644_vm1, %v1527_v48, 0.0  ;;  %v9309_v30 = vadd.f32 %v7917_v63, %v9178_v53 }
 0x11c   : > { %v1564_v29 = vadd.f32 %v1563_v50, %v1562_v17  ;;  %v1492_v28 = vadd.f32 %v1491_v39, %v1490_v54  ;;  %v1605_v27 = vsel %vm14644_vm1, %v1543_v33, 0.0  ;;  %v9313_v22 = vadd.f32 %v9178_v53, %v1342_v1 }
 0x11d   : > { %v1493_v46 = vsel %vm14644_vm1, %v9277_v56, 0.0  ;;  %v1452_v21 = vadd.f32 %v1451_v57, %v1450_v49  ;;  %v1606_v20 = vadd.f32 %v1605_v27, %v1604_v23  ;;  %v9320_v51 = vadd.f32 %v7933_v0, %v9178_v53 }
 0x11e   : > { %v9315_v25 = vpop.f32.mrb[12].mxu0  ;;  %v1607_v17 = vsel %vm14644_vm1, %v1544_v45, 0.0  ;;  %v1567_v33 = vsel %vm14644_vm1, %v1529_v43, 0.0  ;;  %v1566_v1 = vadd.f32 %v1565_v40, %v1564_v29  ;;  %v1494_v39 = vadd.f32 %v1493_v46, %v1492_v28 }
 0x11f   : > { %14876 = vst [vmem:[#allocation38_spill] sm:$0xff] %v9320_v51  ;;  %v9322_v31 = vpop.f32.mrb[12].mxu1  ;;  %v9324_v63 = vpop.f32.mrb[13].mxu0  ;;  %v1609_v57 = vsel %vm14644_vm1, %v1545_v36, 0.0  ;;  %v1453_v27 = vrot.slane %v1452_v21, 4  ;;  %v1608_v23 = vadd.f32 %v1607_v17, %v1606_v20  ;;  %v1532_v0 = vmul.f32 %v9309_v30, %v9309_v30 }
 0x120   : > { %v9328_v48 = vpop.f32.mrb[13].mxu1  ;;  %v9330_v54 = vpop.f32.mrb[14].mxu0  ;;  %v1568_v45 = vadd.f32 %v1567_v33, %v1566_v1  ;;  %v1495_v19 = vrot.slane %v1494_v39, 4  ;;  %v1530_v28 = vmul.f32 %v9313_v22, %v9313_v22  ;;  %v9342_v29 = vadd.f32 %v9178_v53, %v1406_v26 }
 0x121   : > { %v9335_v49 = vpop.f32.mrb[14].mxu1  ;;  %v9337_v50 = vpop.f32.mrb[15].mxu0  ;;  %v1454_v43 = vadd.f32 %v1453_v27, %v1452_v21  ;;  %v1610_v36 = vadd.f32 %v1609_v57, %v1608_v23  ;;  %v1462_v20 = vsel %vm14644_vm1, %v9309_v30, 0.0  ;;  %v9350_v46 = vsel %vm14644_vm1, %v9320_v51, 0.0 }
 0x122   : > { %v9344_v40 = vpop.f32.mrb[15].mxu1  ;;  %v1569_v17 = vrot.slane %v1568_v45, 4  ;;  %v1496_v33 = vadd.f32 %v1495_v19, %v1494_v39  ;;  %v9354_v1 = vmul.f32 %v9320_v51, %v9320_v51  ;;  %v9357_v26 = vadd.f32 %v7918_v44, %v9178_v53 }
 0x123   : > { %v1455_v16 = vrot.slane %v1454_v43, 2  ;;  %v1611_v15 = vrot.slane %v1610_v36, 4  ;;  %v1578_v21 = vsel %vm14644_vm1, %v1532_v0, 0.0  ;;  %v1459_v57 = vsel %vm14644_vm1, %v9313_v22, 0.0 }
 0x124   : > { %v1570_v27 = vadd.f32 %v1569_v17, %v1568_v45  ;;  %v1497_v23 = vrot.slane %v1496_v33, 2  ;;  %v1575_v14 = vsel %vm14644_vm1, %v1530_v28, 0.0  ;;  %v1501_v19 = vsel %vm14644_vm1, %v9342_v29, 0.0 }
 0x125   : > { %v1456_v39 = vadd.f32 %v1455_v16, %v1454_v43  ;;  %v1612_v13 = vadd.f32 %v1611_v15, %v1610_v36  ;;  %v1546_v44 = vmul.f32 %v9342_v29, %v9342_v29  ;;  %v9369_v12 = vadd.f32 %v9178_v53, %v9284_v47 }
 0x126   : > { %v1571_v0 = vrot.slane %v1570_v27, 2  ;;  %v1498_v11 = vadd.f32 %v1497_v23, %v1496_v33  ;;  %v1464_v45 = vsel %vm14644_vm1, %v9357_v26, 0.0  ;;  %v1533_v28 = vmul.f32 %v9357_v26, %v9357_v26 }
 0x127   : > { %v1457_v17 = vrot.slane %v1456_v39, 1  ;;  %v1613_v10 = vrot.slane %v1612_v13, 2  ;;  %v1460_v15 = vsel %vm14644_vm1, %v9369_v12, 0.0  ;;  %v1531_v16 = vmul.f32 %v9369_v12, %v9369_v12 }
 0x128   : > { %v1572_v43 = vadd.f32 %v1571_v0, %v1570_v27  ;;  %v1499_v36 = vrot.slane %v1498_v11, 1  ;;  %v9381_v47 = vadd.f32 %v9282_v18, %v9178_v53  ;;  %v1461_v33 = vadd.f32 %v1460_v15, %v1459_v57 }
 0x129   : > { %v1458_v23 = vadd.f32 %v1457_v17, %v1456_v39  ;;  %v1614_v9 = vadd.f32 %v1613_v10, %v1612_v13  ;;  %v1576_v8 = vsel %vm14644_vm1, %v1531_v16, 0.0  ;;  %v9386_v5 = vadd.f32 %v9178_v53, %v9292_v61 }
 0x12a   : > { %v1573_v4 = vrot.slane %v1572_v43, 1  ;;  %v1500_v7 = vadd.f32 %v1499_v36, %v1498_v11  ;;  %v1463_v6 = vadd.f32 %v1462_v20, %v1461_v33  ;;  %v1577_v3 = vadd.f32 %v1576_v8, %v1575_v14 }
 0x12b   : > { %v9388_v51 = vmul.f32 0.015625, %v1458_v23  ;;  %v1615_v27 = vrot.slane %v1614_v9, 1  ;;  %v1502_v18 = vsel %vm14644_vm1, %v9386_v5, 0.0  ;;  %v1547_v57 = vmul.f32 %v9386_v5, %v9386_v5 }
 0x12c   : > { %v1574_v10 = vadd.f32 %v1573_v4, %v1572_v43  ;;  %v9394_v13 = vmul.f32 0.015625, %v1500_v7  ;;  %v1579_v39 = vadd.f32 %v1578_v21, %v1577_v3  ;;  %v1503_v0 = vadd.f32 %v1502_v18, %v1501_v19 }
 0x12d   : > { %v1646_v61 = vmul.f32 %v9388_v51, %v9388_v51  ;;  %v1658_v8 = vsub.f32 %v9187_v59, %v9388_v51  ;;  %v1659_v11 = vsub.f32 %v9213_v37, %v9388_v51  ;;  %v1660_v14 = vsub.f32 %v9181_v55, %v9388_v51 }
 0x12e   : > { %v1642_v20 = vmul.f32 0.015625, %v1574_v10  ;;  %v1661_v4 = vsub.f32 %v9195_v2, %v9388_v51  ;;  %v1662_v3 = vsub.f32 %v9240_v41, %v9388_v51  ;;  %v1663_v7 = vsub.f32 %v9271_v35, %v9388_v51  ;;  %v9574_v2 = vld [vmem:[%s9547_s24] ss:$0 sm:$0xff] }
 0x12f   : > { %v1664_v21 = vsub.f32 %v9247_v52, %v9388_v51  ;;  %v1616_v17 = vadd.f32 %v1615_v27, %v1614_v9  ;;  %v1648_v15 = vmul.f32 %v9394_v13, %v9394_v13  ;;  %v1505_v33 = vadd.f32 %v9350_v46, %v1503_v0  ;;  %14879 = vst [vmem:[#allocation39_spill] sm:$0xff] %v9574_v2 }
 0x130   : > { %v1650_v16 = vsub.f32 %v1642_v20, %v1646_v61  ;;  %v1617_v36 = vsel %vm14644_vm1, %v1546_v44, 0.0  ;;  %v1549_v18 = vmul.f32 %v9381_v47, %v9381_v47  ;;  %v1618_v9 = vsel %vm14644_vm1, %v1547_v57, 0.0 }
 0x131   : > { %v1644_v23 = vmul.f32 0.015625, %v1616_v17  ;;  %v1619_v27 = vadd.f32 %v1618_v9, %v1617_v36  ;;  %v1465_v61 = vadd.f32 %v1464_v45, %v1463_v6  ;;  %v1620_v20 = vsel %vm14644_vm1, %v9354_v1, 0.0 }
 0x132   : > { %v1654_v10 = vmax.f32 %v1650_v16, 0.0  ;;  %v9439_v16 = vadd.f32 %v9178_v53, %v9324_v63  ;;  %v1580_v46 = vsel %vm14644_vm1, %v1533_v28, 0.0  ;;  %v1506_v44 = vsel %vm14644_vm1, %v9381_v47, 0.0 }
 0x133   : > { %v1652_v17 = vsub.f32 %v1644_v23, %v1648_v15  ;;  %v1621_v57 = vadd.f32 %v1620_v20, %v1619_v27  ;;  %v9449_v0 = vadd.f32 %v9315_v25, %v9178_v53  ;;  %v1622_v45 = vsel %vm14644_vm1, %v1549_v18, 0.0 }
 0x134   : > { %v1690_v43 = vadd.f32 1e-05, %v1654_v10  ;;  %v1466_v6 = vsel %vm14644_vm1, %v9439_v16, 0.0  ;;  %v1534_v28 = vmul.f32 %v9439_v16, %v9439_v16  ;;  %v9458_v15 = vadd.f32 %v9322_v31, %v9178_v53 }
 0x135   : > { %v1656_v19 = vmax.f32 %v1652_v17, 0.0  ;;  %v1467_v1 = vadd.f32 %v1466_v6, %v1465_v61  ;;  %v9462_v36 = vadd.f32 %v9178_v53, %v9328_v48  ;;  %v1507_v25 = vadd.f32 %v1506_v44, %v1505_v33 }
 0x136   : > { %8380 = vrsqrt.f32 %v1690_v43  ;;  %v1581_v43 = vadd.f32 %v1580_v46, %v1579_v39  ;;  %v1623_v23 = vadd.f32 %v1622_v45, %v1621_v57  ;;  %v9473_v31 = vadd.f32 %v9330_v54, %v9178_v53 }
 0x137   : > { %v1692_v63 = vadd.f32 1e-05, %v1656_v19  ;;  %v1582_v19 = vsel %vm14644_vm1, %v1534_v28, 0.0  ;;  %v1536_v48 = vmul.f32 %v9449_v0, %v9449_v0  ;;  %v1508_v33 = vsel %vm14644_vm1, %v9462_v36, 0.0 }
 0x138   : > { %v1583_v39 = vadd.f32 %v1582_v19, %v1581_v43  ;;  %v1550_v18 = vmul.f32 %v9462_v36, %v9462_v36  ;;  %v1470_v9 = vsel %vm14644_vm1, %v9449_v0, 0.0  ;;  %v1509_v27 = vadd.f32 %v1508_v33, %v1507_v25 }
 0x139   : > { %8382 = vrsqrt.f32 %v1692_v63  ;;  %v9485_v10 = vadd.f32 %v9335_v49, %v9178_v53  ;;  %v9489_v54 = vadd.f32 %v9178_v53, %v9337_v50  ;;  %v9493_v61 = vsel %vm14644_vm1, %v9458_v15, 0.0 }
 0x13a   : > { %v1624_v20 = vsel %vm14644_vm1, %v1550_v18, 0.0  ;;  %v1537_v17 = vmul.f32 %v9473_v31, %v9473_v31  ;;  %v9500_v46 = vadd.f32 %v9178_v53, %v9344_v40  ;;  %v9508_v49 = vmul.f32 %v9458_v15, %v9458_v15 }
 0x13b   : > { %v9510_v50 = vadd.f32 %v1624_v20, %v1623_v23  ;;  %v1468_v44 = vsel %vm14644_vm1, %v9489_v54, 0.0  ;;  %v1535_v57 = vmul.f32 %v9489_v54, %v9489_v54  ;;  %v9517_v6 = vsel %vm14644_vm1, %v1536_v48, 0.0 }
 0x13c   : > { %v1469_v53 = vadd.f32 %v1468_v44, %v1467_v1  ;;  %v1510_v40 = vsel %vm14644_vm1, %v9500_v46, 0.0  ;;  %v1551_v63 = vmul.f32 %v9500_v46, %v9500_v46  ;;  %v9525_v45 = vsel %vm14644_vm1, %v9473_v31, 0.0 }
 0x13d   : > { %v9529_v28 = vmul.f32 %v9485_v10, %v9485_v10  ;;  %v1584_v43 = vsel %vm14644_vm1, %v1535_v57, 0.0  ;;  %v9532_v25 = vadd.f32 %v1510_v40, %v1509_v27  ;;  %v9535_v1 = vsel %vm14644_vm1, %v1537_v17, 0.0 }
 0x13e   : > { %v9537_v23 = vadd.f32 %v1470_v9, %v1469_v53  ;;  %v9539_v48 = vadd.f32 %v1584_v43, %v1583_v39  ;;  %v9542_v33 = vsel %vm14644_vm1, %v1551_v63, 0.0  ;;  %v14878_v55 = vsub.f32 %v9268_v34, %v9388_v51 }
 0x13f   : > { %v14880_v52 = vsub.f32 %v9190_v62, %v9394_v13 }
 0x140   : > { %v8381_v19 = vpop.eup %8380 }
 0x141   : > { %v1698_v18 = vmul.f32 %v8381_v19, %v1658_v8  ;;  %v1699_v9 = vmul.f32 %v8381_v19, %v1659_v11  ;;  %v1700_v39 = vmul.f32 %v8381_v19, %v1660_v14  ;;  %v1701_v27 = vmul.f32 %v8381_v19, %v1661_v4 }
 0x142   : > { %v1702_v20 = vmul.f32 %v8381_v19, %v1662_v3  ;;  %v1703_v59 = vmul.f32 %v8381_v19, %v1663_v7  ;;  %v1704_v37 = vmul.f32 %v8381_v19, %v1664_v21  ;;  %v1705_v8 = vmul.f32 %v8381_v19, %v14878_v55 }
 0x143   : > { %v8383_v11 = vpop.eup %8382  ;;  %vm1730_vm2 = vcmp.gt.f32.partialorder %v1698_v18, 0.0  ;;  %vm1731_vm3 = vcmp.gt.f32.partialorder %v1699_v9, 0.0  ;;  %vm1732_vm4 = vcmp.gt.f32.partialorder %v1700_v39, 0.0  ;;  %vm1733_vm5 = vcmp.gt.f32.partialorder %v1701_v27, 0.0 }
 0x144   : > { %vm1734_vm6 = vcmp.gt.f32.partialorder %v1702_v20, 0.0  ;;  %vm1735_vm7 = vcmp.gt.f32.partialorder %v1703_v59, 0.0  ;;  %vm1736_vm8 = vcmp.gt.f32.partialorder %v1704_v37, 0.0  ;;  %vm1737_vm9 = vcmp.gt.f32.partialorder %v1705_v8, 0.0 }
 0x145   : > { %v1762_v41 = vmul.f32 0.2, %v1698_v18  ;;  %v1763_v35 = vmul.f32 0.2, %v1699_v9  ;;  %v1764_v14 = vmul.f32 0.2, %v1700_v39  ;;  %v1714_v4 = vmul.f32 %v8383_v11, %v14880_v52 }
 0x146   : > { %v1765_v34 = vmul.f32 0.2, %v1701_v27  ;;  %v1766_v51 = vmul.f32 0.2, %v1702_v20  ;;  %v1767_v3 = vmul.f32 0.2, %v1703_v59  ;;  %v14881_v7 = vsub.f32 %v9216_v38, %v9394_v13 }
 0x147   : > { %v1768_v17 = vmul.f32 0.2, %v1704_v37  ;;  %v1769_v44 = vmul.f32 0.2, %v1705_v8  ;;  %v1794_v57 = vsel %vm1730_vm2, %v1698_v18, %v1762_v41  ;;  %v1795_v53 = vsel %vm1731_vm3, %v1699_v9, %v1763_v35 }
 0x148   : > { %v1715_v21 = vmul.f32 %v8383_v11, %v14881_v7  ;;  %v1796_v40 = vsel %vm1732_vm4, %v1700_v39, %v1764_v14  ;;  %v1797_v63 = vsel %vm1733_vm5, %v1701_v27, %v1765_v34  ;;  %v1798_v62 = vsel %vm1734_vm6, %v1702_v20, %v1766_v51 }
 0x149   : > { %v1799_v43 = vsel %vm1735_vm7, %v1703_v59, %v1767_v3  ;;  %v1800_v19 = vsel %vm1736_vm8, %v1704_v37, %v1768_v17  ;;  %v1801_v55 = vsel %vm1737_vm9, %v1705_v8, %v1769_v44  ;;  %v9591_v38 = vmul.f32 %v9574_v2, %v1794_v57  }
 0x14a   : > { %v9594_v52 = vmul.f32 %v9574_v2, %v1795_v53   ;;  %v9597_v18 = vmul.f32 %v9574_v2, %v1796_v40   ;;  %v9600_v9 = vmul.f32 %v9574_v2, %v1797_v63   ;;  %v9603_v39 = vmul.f32 %v9574_v2, %v1798_v62  }
 0x14b   : > { %v9606_v27 = vmul.f32 %v9574_v2, %v1799_v43   ;;  %v9609_v20 = vmul.f32 %v9574_v2, %v1800_v19   ;;  %v9612_v59 = vmul.f32 %v9574_v2, %v1801_v55   ;;  %v14882_v37 = vsub.f32 %v9184_v58, %v9394_v13 }
 0x14c   : > { %v14883_v41 = vsub.f32 %v9210_v32, %v9394_v13  ;;  %v14884_v14 = vsub.f32 %v9258_v24, %v9394_v13  ;;  %v14885_v51 = vsub.f32 %v9280_v60, %v9394_v13  ;;  %v14886_v7 = vsub.f32 %v9253_v42, %v9394_v13  ;;  %v9633_v32 = vld [vmem:[%s9547_s24 + $0x2] ss:$0 sm:$0xff] }
 0x14d   : > { %v1716_v8 = vmul.f32 %v8383_v11, %v14882_v37  ;;  %v14887_v58 = vsub.f32 %v9277_v56, %v9394_v13  ;;  %vm1746_vm10 = vcmp.gt.f32.partialorder %v1714_v4, 0.0  ;;  %vm1747_vm11 = vcmp.gt.f32.partialorder %v1715_v21, 0.0  ;;  %14888 = vst [vmem:[#allocation40_spill] sm:$0xff] %v9633_v32 }
 0x14e   : > { %v1717_v35 = vmul.f32 %v8383_v11, %v14883_v41  ;;  %v1718_v34 = vmul.f32 %v8383_v11, %v14884_v14  ;;  %v1719_v3 = vmul.f32 %v8383_v11, %v14885_v51  ;;  %v1720_v17 = vmul.f32 %v8383_v11, %v14886_v7 }
 0x14f   : > { %v1721_v44 = vmul.f32 %v8383_v11, %v14887_v58  ;;  %vm1748_vm12 = vcmp.gt.f32.partialorder %v1716_v8, 0.0  ;;  %v1778_v24 = vmul.f32 0.2, %v1714_v4  ;;  %v1779_v60 = vmul.f32 0.2, %v1715_v21 }
 0x150   : > { %vm1749_vm13 = vcmp.gt.f32.partialorder %v1717_v35, 0.0  ;;  %vm1750_vm14 = vcmp.gt.f32.partialorder %v1718_v34, 0.0  ;;  %vm1751_vm15 = vcmp.gt.f32.partialorder %v1719_v3, 0.0  ;;  %vm1752_vm2 = vcmp.gt.f32.partialorder %v1720_v17, 0.0 }
 0x151   : > { %vm1753_vm3 = vcmp.gt.f32.partialorder %v1721_v44, 0.0  ;;  %v1780_v57 = vmul.f32 0.2, %v1716_v8  ;;  %v1473_v42 = vadd.f32 %v9525_v45, %v9537_v23  ;;  %v1781_v53 = vmul.f32 0.2, %v1717_v35 }
 0x152   : > { %v1782_v40 = vmul.f32 0.2, %v1718_v34  ;;  %v1783_v56 = vmul.f32 0.2, %v1719_v3  ;;  %v1587_v13 = vadd.f32 %v9517_v6, %v9539_v48  ;;  %v1784_v11 = vmul.f32 0.2, %v1720_v17 }
 0x153   : > { %v1785_v63 = vmul.f32 0.2, %v1721_v44  ;;  %v1810_v62 = vsel %vm1746_vm10, %v1714_v4, %v1778_v24  ;;  %v1811_v43 = vsel %vm1747_vm11, %v1715_v21, %v1779_v60  ;;  %v1812_v19 = vsel %vm1748_vm12, %v1716_v8, %v1780_v57 }
 0x154   : > { %v1813_v55 = vsel %vm1749_vm13, %v1717_v35, %v1781_v53  ;;  %v1814_v37 = vsel %vm1750_vm14, %v1718_v34, %v1782_v40  ;;  %v1815_v45 = vsel %vm1751_vm15, %v1719_v3, %v1783_v56  ;;  %v1816_v23 = vsel %vm1752_vm2, %v1720_v17, %v1784_v11 }
 0x155   : > { %v1817_v41 = vsel %vm1753_vm3, %v1721_v44, %v1785_v63  ;;  %v9648_v6 = vmul.f32 %v9633_v32, %v1810_v62   ;;  %v9651_v48 = vmul.f32 %v9633_v32, %v1811_v43   ;;  %v9654_v4 = vmul.f32 %v9633_v32, %v1812_v19  }
 0x156   : > { %v9657_v21 = vmul.f32 %v9633_v32, %v1813_v55   ;;  %v9660_v8 = vmul.f32 %v9633_v32, %v1814_v37   ;;  %v9663_v35 = vmul.f32 %v9633_v32, %v1815_v45   ;;  %v9666_v14 = vmul.f32 %v9633_v32, %v1816_v23  }
 0x157   : > { %v9669_v34 = vmul.f32 %v9633_v32, %v1817_v41   ;;  %v1474_v51 = vrot.slane %v1473_v42, 4  ;;  %v1589_v3 = vadd.f32 %v9535_v1, %v1587_v13  ;;  %v1513_v7 = vadd.f32 %v9493_v61, %v9532_v25 }
 0x158   : > { %v1627_v17 = vadd.f32 %v9542_v33, %v9510_v50  ;;  %v1628_v58 = vsel %vm14644_vm1, %v9508_v49, 0.0  ;;  %v1514_v44 = vsel %vm14644_vm1, %v9485_v10, 0.0  ;;  %v1630_v40 = vsel %vm14644_vm1, %v9529_v28, 0.0 }
 0x159   : > { %v1475_v24 = vadd.f32 %v1474_v51, %v1473_v42  ;;  %v1590_v60 = vrot.slane %v1589_v3, 4  ;;  %v1515_v57 = vadd.f32 %v1514_v44, %v1513_v7 }
 0x15a   : > { %v1629_v53 = vadd.f32 %v1628_v58, %v1627_v17 }
 0x15b   : > { %v1476_v1 = vrot.slane %v1475_v24, 2  ;;  %v1591_v56 = vadd.f32 %v1590_v60, %v1589_v3  ;;  %v1516_v13 = vrot.slane %v1515_v57, 4 }
 0x15c   : > { %v1631_v61 = vadd.f32 %v1630_v40, %v1629_v53 }
 0x15d   : > { %v1477_v25 = vadd.f32 %v1476_v1, %v1475_v24  ;;  %v1592_v11 = vrot.slane %v1591_v56, 2  ;;  %v1517_v50 = vadd.f32 %v1516_v13, %v1515_v57 }
 0x15e   : > { %v1632_v33 = vrot.slane %v1631_v61, 4 }
 0x15f   : > { %v1478_v63 = vrot.slane %v1477_v25, 1  ;;  %v1593_v49 = vadd.f32 %v1592_v11, %v1591_v56  ;;  %v1518_v62 = vrot.slane %v1517_v50, 2 }
 0x160   : > { %v1633_v43 = vadd.f32 %v1632_v33, %v1631_v61 }
 0x161   : > { %v1479_v19 = vadd.f32 %v1478_v63, %v1477_v25  ;;  %v1594_v42 = vrot.slane %v1593_v49, 1  ;;  %v1519_v55 = vadd.f32 %v1518_v62, %v1517_v50 }
 0x162   : > { %v1634_v37 = vrot.slane %v1633_v43, 2 }
 0x163   : > { %v1595_v45 = vadd.f32 %v1594_v42, %v1593_v49  ;;  %v1639_v23 = vmul.f32 0.015625, %v1479_v19  ;;  %v1520_v41 = vrot.slane %v1519_v55, 1 }
 0x164   : > { %v1635_v28 = vadd.f32 %v1634_v37, %v1633_v43 }
 0x165   : > { %v1643_v51 = vmul.f32 0.015625, %v1595_v45  ;;  %v1647_v3 = vmul.f32 %v1639_v23, %v1639_v23  ;;  %v1666_v7 = vsub.f32 %v9313_v22, %v1639_v23  ;;  %v1667_v17 = vsub.f32 %v9369_v12, %v1639_v23 }
 0x166   : > { %v1668_v58 = vsub.f32 %v9309_v30, %v1639_v23  ;;  %v1669_v44 = vsub.f32 %v9357_v26, %v1639_v23  ;;  %v1670_v24 = vsub.f32 %v9439_v16, %v1639_v23  ;;  %v1671_v60 = vsub.f32 %v9489_v54, %v1639_v23 }
 0x167   : > { %v1651_v57 = vsub.f32 %v1643_v51, %v1647_v3  ;;  %v1672_v53 = vsub.f32 %v9449_v0, %v1639_v23  ;;  %v1673_v40 = vsub.f32 %v9473_v31, %v1639_v23  ;;  %v1521_v1 = vadd.f32 %v1520_v41, %v1519_v55  ;;  %v14889_v0 = vld [vmem:[#allocation38_spill] sm:$0xff] }
 0x168   : > { %v1636_v56 = vrot.slane %v1635_v28, 1 }
 0x169   : > { %v1655_v13 = vmax.f32 %v1651_v57, 0.0  ;;  %v9690_v61 = vmul.f32 0.015625, %v1521_v1 }
 0x16a   : > { %v1637_v22 = vadd.f32 %v1636_v56, %v1635_v28 }
 0x16b   : > { %v1691_v12 = vadd.f32 1e-05, %v1655_v13  ;;  %v1649_v30 = vmul.f32 %v9690_v61, %v9690_v61  ;;  %v1682_v26 = vsub.f32 %v9342_v29, %v9690_v61  ;;  %v1683_v16 = vsub.f32 %v9386_v5, %v9690_v61 }
 0x16c   : > { %v1645_v54 = vmul.f32 0.015625, %v1637_v22  ;;  %v1684_v31 = vsub.f32 %v14889_v0, %v9690_v61  ;;  %v1685_v25 = vsub.f32 %v9381_v47, %v9690_v61  ;;  %v1686_v11 = vsub.f32 %v9462_v36, %v9690_v61 }
 0x16d   : > { %8384 = vrsqrt.f32 %v1691_v12  ;;  %v1687_v50 = vsub.f32 %v9500_v46, %v9690_v61  ;;  %v1688_v29 = vsub.f32 %v9458_v15, %v9690_v61  ;;  %v1689_v5 = vsub.f32 %v9485_v10, %v9690_v61  ;;  %v9711_v15 = vld [vmem:[%s9547_s24 + $0x1] ss:$0 sm:$0xff] }
 0x16e   : > { %v1653_v33 = vsub.f32 %v1645_v54, %v1649_v30  ;;  %14890 = vst [vmem:[#allocation38_spill] sm:$0xff] %v9711_v15 }
 0x170   : > { %v1657_v63 = vmax.f32 %v1653_v33, 0.0 }
 0x172   : > { %v1693_v49 = vadd.f32 1e-05, %v1657_v63 }
 0x174   : > { %8386 = vrsqrt.f32 %v1693_v49 }
 0x177   : > { %v8385_v62 = vpop.eup %8384 }
 0x178   : > { %v1706_v47 = vmul.f32 %v8385_v62, %v1666_v7  ;;  %v1707_v43 = vmul.f32 %v8385_v62, %v1667_v17  ;;  %v1708_v19 = vmul.f32 %v8385_v62, %v1668_v58  ;;  %v1709_v36 = vmul.f32 %v8385_v62, %v1669_v44 }
 0x179   : > { %v1710_v42 = vmul.f32 %v8385_v62, %v1670_v24  ;;  %v1711_v55 = vmul.f32 %v8385_v62, %v1671_v60  ;;  %v1712_v37 = vmul.f32 %v8385_v62, %v1672_v53  ;;  %v1713_v46 = vmul.f32 %v8385_v62, %v1673_v40 }
 0x17a   : > { %vm1738_vm4 = vcmp.gt.f32.partialorder %v1706_v47, 0.0  ;;  %vm1739_vm5 = vcmp.gt.f32.partialorder %v1707_v43, 0.0  ;;  %vm1740_vm6 = vcmp.gt.f32.partialorder %v1708_v19, 0.0  ;;  %vm1741_vm7 = vcmp.gt.f32.partialorder %v1709_v36, 0.0 }
 0x17b   : > { %vm1742_vm8 = vcmp.gt.f32.partialorder %v1710_v42, 0.0  ;;  %vm1743_vm9 = vcmp.gt.f32.partialorder %v1711_v55, 0.0  ;;  %vm1744_vm10 = vcmp.gt.f32.partialorder %v1712_v37, 0.0  ;;  %vm1745_vm11 = vcmp.gt.f32.partialorder %v1713_v46, 0.0 }
 0x17c   : > { %v1770_v10 = vmul.f32 0.2, %v1706_v47  ;;  %v1771_v45 = vmul.f32 0.2, %v1707_v43  ;;  %v1772_v23 = vmul.f32 0.2, %v1708_v19 }
 0x17d   : > { %v1773_v41 = vmul.f32 0.2, %v1709_v36  ;;  %v1774_v28 = vmul.f32 0.2, %v1710_v42  ;;  %v1775_v51 = vmul.f32 0.2, %v1711_v55 }
 0x17e   : > { %v1776_v3 = vmul.f32 0.2, %v1712_v37  ;;  %v1777_v7 = vmul.f32 0.2, %v1713_v46  ;;  %v1802_v17 = vsel %vm1738_vm4, %v1706_v47, %v1770_v10  ;;  %v1803_v58 = vsel %vm1739_vm5, %v1707_v43, %v1771_v45  ;;  %v8387_v44 = vpop.eup %8386 }
 0x17f   : > { %v1804_v24 = vsel %vm1740_vm6, %v1708_v19, %v1772_v23  ;;  %v1805_v60 = vsel %vm1741_vm7, %v1709_v36, %v1773_v41  ;;  %v1806_v57 = vsel %vm1742_vm8, %v1710_v42, %v1774_v28  ;;  %v1807_v53 = vsel %vm1743_vm9, %v1711_v55, %v1775_v51  ;;  %v9740_v42 = vld [vmem:[%s9547_s24 + $0x3] ss:$0 sm:$0xff] }
 0x180   : > { %v1808_v40 = vsel %vm1744_vm10, %v1712_v37, %v1776_v3  ;;  %v1809_v1 = vsel %vm1745_vm11, %v1713_v46, %v1777_v7  ;;  %v9722_v56 = vmul.f32 %v9711_v15, %v1802_v17   ;;  %v9725_v13 = vmul.f32 %v9711_v15, %v1803_v58   ;;  %14891 = vst [vmem:[#allocation41_spill] sm:$0xff] %v9740_v42 }
 0x181   : > { %v9728_v61 = vmul.f32 %v9711_v15, %v1804_v24   ;;  %v9731_v22 = vmul.f32 %v9711_v15, %v1805_v60   ;;  %v9734_v12 = vmul.f32 %v9711_v15, %v1806_v57   ;;  %v1839_v30 = vmul.f32 %v9711_v15, %v1807_v53  }
 0x182   : > { %v1840_v54 = vmul.f32 %v9711_v15, %v1808_v40   ;;  %v1841_v0 = vmul.f32 %v9711_v15, %v1809_v1   ;;  %v1722_v33 = vmul.f32 %v8387_v44, %v1682_v26  ;;  %v1723_v63 = vmul.f32 %v8387_v44, %v1683_v16 }
 0x183   : > { %v1724_v49 = vmul.f32 %v8387_v44, %v1684_v31  ;;  %v1725_v62 = vmul.f32 %v8387_v44, %v1685_v25  ;;  %v1726_v47 = vmul.f32 %v8387_v44, %v1686_v11  ;;  %v1727_v43 = vmul.f32 %v8387_v44, %v1687_v50 }
 0x184   : > { %v1728_v19 = vmul.f32 %v8387_v44, %v1688_v29  ;;  %v1729_v36 = vmul.f32 %v8387_v44, %v1689_v5  ;;  %vm1754_vm12 = vcmp.gt.f32.partialorder %v1722_v33, 0.0  ;;  %vm1755_vm13 = vcmp.gt.f32.partialorder %v1723_v63, 0.0 }
 0x185   : > { %vm1756_vm14 = vcmp.gt.f32.partialorder %v1724_v49, 0.0  ;;  %vm1757_vm15 = vcmp.gt.f32.partialorder %v1725_v62, 0.0  ;;  %vm1758_vm2 = vcmp.gt.f32.partialorder %v1726_v47, 0.0  ;;  %vm1759_vm3 = vcmp.gt.f32.partialorder %v1727_v43, 0.0 }
 0x186   : > { %vm1760_vm4 = vcmp.gt.f32.partialorder %v1728_v19, 0.0  ;;  %vm1761_vm5 = vcmp.gt.f32.partialorder %v1729_v36, 0.0  ;;  %v1786_v55 = vmul.f32 0.2, %v1722_v33  ;;  %v1787_v37 = vmul.f32 0.2, %v1723_v63 }
 0x187   : > { %v1788_v26 = vmul.f32 0.2, %v1724_v49  ;;  %v1789_v16 = vmul.f32 0.2, %v1725_v62  ;;  %v1790_v31 = vmul.f32 0.2, %v1726_v47 }
 0x188   : > { %v1791_v25 = vmul.f32 0.2, %v1727_v43  ;;  %v1792_v11 = vmul.f32 0.2, %v1728_v19  ;;  %v1793_v50 = vmul.f32 0.2, %v1729_v36  ;;  %v1818_v29 = vsel %vm1754_vm12, %v1722_v33, %v1786_v55 }
 0x189   : > { %v1819_v5 = vsel %vm1755_vm13, %v1723_v63, %v1787_v37  ;;  %v1820_v46 = vsel %vm1756_vm14, %v1724_v49, %v1788_v26  ;;  %v1821_v10 = vsel %vm1757_vm15, %v1725_v62, %v1789_v16  ;;  %v1822_v45 = vsel %vm1758_vm2, %v1726_v47, %v1790_v31 }
 0x18a   : > { %v1823_v23 = vsel %vm1759_vm3, %v1727_v43, %v1791_v25  ;;  %v1824_v41 = vsel %vm1760_vm4, %v1728_v19, %v1792_v11  ;;  %v1825_v28 = vsel %vm1761_vm5, %v1729_v36, %v1793_v50  ;;  %v1850_v51 = vmul.f32 %v9740_v42, %v1818_v29  }
 0x18b   : > { %v1851_v3 = vmul.f32 %v9740_v42, %v1819_v5   ;;  %v1852_v7 = vmul.f32 %v9740_v42, %v1820_v46   ;;  %v1853_v17 = vmul.f32 %v9740_v42, %v1821_v10   ;;  %v1854_v58 = vmul.f32 %v9740_v42, %v1822_v45  }
 0x18c   : > { %v1855_v44 = vmul.f32 %v9740_v42, %v1823_v23   ;;  %v1856_v24 = vmul.f32 %v9740_v42, %v1824_v41   ;;  %v1857_v60 = vmul.f32 %v9740_v42, %v1825_v28  }
 0x18d LB: >> { %14892 = vst [vmem:[#allocation42_spill] sm:$0xff] %v8678_v60  ;;  %14893 = vst [vmem:[#allocation43_spill] sm:$0xff] %v8682_v24  ;;  %v14924_v57 = vld [vmem:[#allocation5_spill] sm:$0xff]  ;;  %v14925_v53 = vld [vmem:[#allocation8_spill] sm:$0xff]  ;;  %v1975_v40 = vrot.slane %v8798_v52, 7  ;;  %v1976_v1 = vrot.slane %v8794_v18, 7  ;;  %v9998_v5 = vpack.c.bf16 %v8794_v18, %v8798_v52  ;;  %v10047_v32 = vpack.c.bf16 %v8778_v20, %v8782_v27  ;;  %s8806_s20 = sphi %s9846_s20, %s16060_s20   ;;  %v8802_v38 = vphi %v9591_v38, %v16059_v38   ;;  %v8798_v52 = vphi %v9594_v52, %v16058_v52   ;;  %v8794_v18 = vphi %v9597_v18, %v16057_v18   ;;  %v8790_v9 = vphi %v9600_v9, %v16056_v9   ;;  %v8786_v39 = vphi %v9603_v39, %v16055_v39   ;;  %v8782_v27 = vphi %v9606_v27, %v16054_v27   ;;  %v8778_v20 = vphi %v9609_v20, %v16053_v20   ;;  %v8774_v59 = vphi %v9612_v59, %v16052_v59   ;;  %v8770_v56 = vphi %v9722_v56, %v16051_v56   ;;  %v8766_v13 = vphi %v9725_v13, %v16050_v13   ;;  %v8762_v61 = vphi %v9728_v61, %v16049_v61   ;;  %v8758_v22 = vphi %v9731_v22, %v16048_v22   ;;  %v8754_v12 = vphi %v9734_v12, %v16047_v12   ;;  %v8750_v30 = vphi %v1839_v30, %v16046_v30   ;;  %v8746_v54 = vphi %v1840_v54, %v16045_v54   ;;  %v8742_v0 = vphi %v1841_v0, %v16044_v0   ;;  %v8738_v6 = vphi %v9648_v6, %v16043_v6   ;;  %v8734_v48 = vphi %v9651_v48, %v16042_v48   ;;  %v8730_v4 = vphi %v9654_v4, %v16041_v4   ;;  %v8726_v21 = vphi %v9657_v21, %v16040_v21   ;;  %v8722_v8 = vphi %v9660_v8, %v16039_v8   ;;  %v8718_v35 = vphi %v9663_v35, %v16038_v35   ;;  %v8714_v14 = vphi %v9666_v14, %v16037_v14   ;;  %v8710_v34 = vphi %v9669_v34, %v16036_v34   ;;  %v8706_v51 = vphi %v1850_v51, %v16035_v51   ;;  %v8702_v3 = vphi %v1851_v3, %v16034_v3   ;;  %v8698_v7 = vphi %v1852_v7, %v16033_v7   ;;  %v8694_v17 = vphi %v1853_v17, %v16032_v17   ;;  %v8690_v58 = vphi %v1854_v58, %v16031_v58   ;;  %v8686_v44 = vphi %v1855_v44, %v16030_v44   ;;  %v8682_v24 = vphi %v1856_v24, %v16029_v24   ;;  %v8678_v60 = vphi %v1857_v60, %v16028_v60  }
 0x18e   : >> { %14894 = vst [vmem:[#allocation44_spill] sm:$0xff] %v8686_v44  ;;  %14895 = vst [vmem:[#allocation45_spill] sm:$0xff] %v8690_v58  ;;  %vm14534_vm6 = vcmp.lt.s32.totalorder %v14924_v57, 1  ;;  %vm2073_vm7 = vcmp.ge.s32.totalorder %v14925_v53, 1  ;;  %v1977_v33 = vrot.slane %v8790_v9, 7  ;;  %v14926_v63 = vld [vmem:[#allocation9_spill] sm:$0xff] }
 0x18f   : >> { %14896 = vst [vmem:[#allocation46_spill] sm:$0xff] %v8694_v17  ;;  %14897 = vst [vmem:[#allocation47_spill] sm:$0xff] %v8698_v7  ;;  %vm2074_vm8 = vcmp.ge.s32.totalorder %v14926_v63, 1  ;;  %s7375_s26 = smul.u32 576, %s8806_s20  ;;  %v14927_v49 = vld [vmem:[#allocation6_spill] sm:$0xff]  ;;  %v14928_v62 = vld [vmem:[#allocation7_spill] sm:$0xff]  ;;  %v9962_v43 = vsel %vm14534_vm6, %v1975_v40, %v1976_v1 }
 0x190   : >> { %14898 = vst [vmem:[#allocation48_spill] sm:$0xff] %v8702_v3  ;;  %14899 = vst [vmem:[#allocation49_spill] sm:$0xff] %v8706_v51  ;;  %vm14448_vm9 = vcmp.ge.s32.totalorder %v14927_v49, 1  ;;  %vm2072_vm10 = vcmp.ge.s32.totalorder %v14928_v62, 1  ;;  %v9958_v47 = vsel %vm14534_vm6, %v1976_v1, %v1977_v33  ;;  %v2410_v19 = vsel %vm2073_vm7, %v9962_v43, 0.0  ;;  %s8808_s18 = smov 64  }
 0x191   : >> { %14900 = vst [vmem:[#allocation50_spill] sm:$0xff] %v8710_v34  ;;  %14901 = vst [vmem:[#allocation51_spill] sm:$0xff] %v8714_v14  ;;  %s9967_s13 = scalar_lea.vmem %s14314_s4, %s7375_s26  ;;  %v2411_v36 = vsel %vm2074_vm8, %v9958_v47, 0.0  ;;  %v1974_v55 = vrot.slane %v8802_v38, 7  ;;  %v14354_v37 = vrot.slane %v8678_v60, 7  ;;  %v14355_v46 = vmov 0.0  }
 0x192   : >> { %14902 = vst [vmem:[#allocation52_spill] sm:$0xff] %v8718_v35  ;;  %14903 = vst [vmem:[#allocation53_spill] sm:$0xff] %v8722_v8  ;;  %v2441_v26 = vpack.c.bf16 %v2411_v36, %v2410_v19  ;;  %v8388_v16 = vld [vmem:[%s9967_s13 + $0x40] sm:$0xff]   ;;  %v2215_v10 = vpack.c.bf16 %v8802_v38, %v14355_v46  ;;  %v8390_v45 = vld [vmem:[%s9967_s13 + $0x48] sm:$0xff]   ;;  %v1978_v41 = vrot.slane %v8786_v39, 7  ;;  %v1979_v19 = vrot.slane %v8782_v27, 7 }
 0x193   : >> { %14904 = vst [vmem:[#allocation54_spill] sm:$0xff] %v8726_v21  ;;  %14905 = vst [vmem:[#allocation55_spill] sm:$0xff] %v8730_v4  ;;  %v9980_v31 = vsel %vm14534_vm6, %v1974_v55, %v1975_v40  ;;  %v9986_v25 = vsel %vm14534_vm6, %v14354_v37, %v1974_v55  ;;  %v8389_v11 = vld [vmem:[%s9967_s13] sm:$0xff]   ;;  %7395 = vmatprep.subr.bf16.mxu0 %v8388_v16  ;;  %v14933_v28 = vld [vmem:[#allocation10_spill] sm:$0xff]  ;;  %v10098_v60 = vpack.c.bf16 %v8762_v61, %v8766_v13  ;;  %vm15053_vm1 = vcmask 523264   ;;  %s7164_s19 = sshll.u32 %s8806_s20, 1 }
 0x194   : >> { %14906 = vst [vmem:[#allocation56_spill] sm:$0xff] %v8734_v48  ;;  %14907 = vst [vmem:[#allocation57_spill] sm:$0xff] %v8738_v6  ;;  %2826 = vrot.lane.b32.xlu1 %v2441_v26, %s8808_s18  ;;  %v2408_v50 = vsel %vm14448_vm9, %v9986_v25, 0.0  ;;  %v2409_v29 = vsel %vm2072_vm10, %v9980_v31, 0.0  ;;  %vm2075_vm11 = vcmp.ge.s32.totalorder %v14933_v28, 1  ;;  %7396 = vmatpush3.bf16.msra.mxu0 %v8389_v11  ;;  %v14934_v40 = vld [vmem:[#allocation11_spill] sm:$0xff]  ;;  %v10011_v36 = vsel %vm14534_vm6, %v1977_v33, %v1978_v41  ;;  %s11274_s23 = scalar_lea.vmem %s14315_s5, %s7164_s19 }
 0x195   : >> { %14908 = vst [vmem:[#allocation58_spill] sm:$0xff] %v8742_v0  ;;  %14909 = vst [vmem:[#allocation59_spill] sm:$0xff] %v8746_v54  ;;  %v2440_v23 = vpack.c.bf16 %v2409_v29, %v2408_v50  ;;  %vm14465_vm12 = vcmp.ge.s32.totalorder %v14934_v40, 1  ;;  %7397 = vmatprep.subr.bf16.mxu0 %v8390_v45  ;;  %v8391_v1 = vld [vmem:[%s9967_s13 + $0x8] sm:$0xff]   ;;  %v8392_v55 = vld [vmem:[%s9967_s13 + $0x50] sm:$0xff]   ;;  %v10018_v26 = vpack.c.bf16 %v8786_v39, %v8790_v9  ;;  %v2412_v16 = vsel %vm2075_vm11, %v10011_v36, 0.0 }
 0x196   : >> { %14910 = vst [vmem:[#allocation60_spill] sm:$0xff] %v8750_v30  ;;  %14911 = vst [vmem:[#allocation61_spill] sm:$0xff] %v8754_v12  ;;  %v1980_v11 = vrot.slane %v8778_v20, 7  ;;  %v1981_v50 = vrot.slane %v8774_v59, 7  ;;  %v10027_v33 = vsel %vm14534_vm6, %v1978_v41, %v1979_v19  ;;  %v14937_v29 = vld [vmem:[#allocation12_spill] sm:$0xff]  ;;  %v14938_v45 = vld [vmem:[#allocation13_spill] sm:$0xff] }
 0x197   : >> { %14912 = vst [vmem:[#allocation62_spill] sm:$0xff] %v8758_v22  ;;  %14913 = vst [vmem:[#allocation63_spill] sm:$0xff] %v8762_v61  ;;  %2824 = vrot.lane.b32.xlu0 %v2440_v23, %s8808_s18  ;;  %vm14454_vm13 = vcmp.ge.s32.totalorder %v14937_v29, 1  ;;  %vm14449_vm14 = vcmp.ge.s32.totalorder %v14938_v45, 1  ;;  %v8393_v23 = vld [vmem:[%s9967_s13 + $0x10] sm:$0xff]   ;;  %v2413_v37 = vsel %vm14465_vm12, %v10027_v33, 0.0 }
 0x198   : >> { %14914 = vst [vmem:[#allocation64_spill] sm:$0xff] %v8766_v13  ;;  %14915 = vst [vmem:[#allocation65_spill] sm:$0xff] %v8770_v56  ;;  %2778 = vrot.lane.b32.xlu1 %v9998_v5, %s8808_s18  ;;  %7398 = vmatpush3.bf16.msra.mxu0 %v8391_v1  ;;  %v10037_v46 = vsel %vm14534_vm6, %v1980_v11, %v1981_v50  ;;  %v10041_v42 = vsel %vm14534_vm6, %v1979_v19, %v1980_v11  ;;  %v8394_v41 = vld [vmem:[%s9967_s13 + $0x58] sm:$0xff]   ;;  %v14941_v19 = vmov 0.0   ;;  %v1989_v58 = vrot.slane %v8742_v0, 7  ;;  %s1863_s24 = sadd.s32 1, %s8806_s20  }
 0x199   : >> { %14916 = vst [vmem:[#allocation66_spill] sm:$0xff] %v8774_v59  ;;  %14917 = vst [vmem:[#allocation67_spill] sm:$0xff] %v8778_v20  ;;  %7399 = vmatprep.subr.bf16.mxu0 %v8392_v55  ;;  %v2442_v1 = vpack.c.bf16 %v2413_v37, %v2412_v16  ;;  %v2414_v15 = vsel %vm14454_vm13, %v10041_v42, 0.0  ;;  %v2415_v2 = vsel %vm14449_vm14, %v10037_v46, 0.0  ;;  %v2219_v55 = vpack.c.bf16 %v8770_v56, %v14941_v19  ;;  %v14943_v16 = vld [vmem:[#allocation15_spill] sm:$0xff]  ;;  %v8395_v11 = vld [vmem:[%s9967_s13 + $0x18] sm:$0xff]   ;;  %s16060_s20 = smov %s1863_s24 }
 0x19a   : >> { %14918 = vst [vmem:[#allocation68_spill] sm:$0xff] %v8782_v27  ;;  %14919 = vst [vmem:[#allocation69_spill] sm:$0xff] %v8786_v39  ;;  %v1982_v37 = vrot.slane %v8770_v56, 7  ;;  %vm14432_vm2 = vcmp.ge.s32.totalorder %v14943_v16, 1  ;;  %v8402_v0 = vld [vmem:[%s9967_s13 + $0x78] sm:$0xff]   ;;  %vm14536_vm9 = vcmp.lt.s32.totalorder %v14933_v28, 7 }
 0x19b   : >> { %14920 = vst [vmem:[#allocation70_spill] sm:$0xff] %v8790_v9  ;;  %14921 = vst [vmem:[#allocation71_spill] sm:$0xff] %v8794_v18  ;;  %2776 = vrot.lane.b32.xlu0 %v2215_v10, %s8808_s18  ;;  %v14942_v10 = vld [vmem:[#allocation14_spill] sm:$0xff]  ;;  %vm14535_vm14 = vcmp.lt.s32.totalorder %v14934_v40, 7  ;;  %vm14473_vm12 = vcmp.lt.s32.totalorder %v14938_v45, 7  ;;  %p13991_p12 = scmp.ge.s32.totalorder %s1863_s24, 4  }
 0x19c   : >> { %14922 = vst [vmem:[#allocation72_spill] sm:$0xff] %v8798_v52  ;;  %14923 = vst [vmem:[#allocation73_spill] sm:$0xff] %v8802_v38  ;;  %2780 = vrot.lane.b32.xlu1 %v10018_v26, %s8808_s18  ;;  %vm14393_vm15 = vcmp.ge.s32.totalorder %v14942_v10, 1  ;;  %7400 = vmatpush3.bf16.msra.mxu0 %v8393_v23  ;;  %v1985_v23 = vrot.slane %v8758_v22, 7  ;;  %s7376_s26 = sshll.u32 (%p13991_p12), %s8879_s9, 12  ;;  %s6950_s10 = sshll.u32 (%p13991_p12), %s9759_s25, 4  ;;  %s14251_s10 = int_to_ptr.vmem [resolvable:$true] %s6950_s10 }
 0x19d   : >> { %14929 = vst [vmem:[#allocation74_spill] sm:$0xff] %v9958_v47  ;;  %14930 = vst [vmem:[#allocation75_spill] sm:$0xff] %v9962_v43  ;;  %7401 = vmatprep.subr.bf16.mxu0 %v8394_v41  ;;  %v1984_v43 = vrot.slane %v8762_v61, 7  ;;  %v14946_v41 = vld [vmem:[#allocation16_spill] sm:$0xff]  ;;  %s8480_s20 = scalar_lea.vmem (%p13991_p12), %s14251_s10, 4096  ;;  %s8810_s19 = smov (%p13991_p12), [#allocation2]  }
 0x19e   : >> { %14931 = vst [vmem:[#allocation76_spill] sm:$0xff] %v9980_v31  ;;  %14932 = vst [vmem:[#allocation77_spill] sm:$0xff] %v9986_v25  ;;  %vm14416_vm3 = vcmp.ge.s32.totalorder %v14946_v41, 1  ;;  %v14947_v31 = vld [vmem:[#allocation17_spill] sm:$0xff]  ;;  %v8407_v41 = vld [vmem:[%s9967_s13 + $0xc8] sm:$0xff]   ;;  %p8481_p13 = scmp.ne.s32.totalorder (%p13991_p12), %s14251_s10, %s8480_s20  ;;  %s8484_s21 = sshll.u32 (%p13991_p12), %s8810_s19, 4  ;;  %s8485_s21 = int_to_ptr.vmem [resolvable:$false] %s8484_s21 }
 0x19f   : >> { %14935 = vst [vmem:[#allocation78_spill] sm:$0xff] %v10011_v36  ;;  %14936 = vst [vmem:[#allocation79_spill] sm:$0xff] %v10027_v33  ;;  %v8396_v33 = vld [vmem:[%s9967_s13 + $0x60] sm:$0xff]   ;;  %2828 = vrot.lane.b32.xlu0 %v2442_v1, %s8808_s18  ;;  %v2443_v36 = vpack.c.bf16 %v2415_v2, %v2414_v15  ;;  %vm14394_vm4 = vcmp.ge.s32.totalorder %v14947_v31, 1  ;;  %v10089_v1 = vsel %vm14534_vm6, %v1984_v43, %v1985_v23  ;;  %s8486_s22 = scalar_lea.vmem (%p13991_p12), %s8485_s21, 8192  ;;  %p8487_p2 = scmp.lt.s32.totalorder (%p13991_p12), %s14251_s10, %s8485_s21 }
 0x1a0   : >> { %14939 = vst [vmem:[#allocation80_spill] sm:$0xff] %v10037_v46  ;;  %14940 = vst [vmem:[#allocation81_spill] sm:$0xff] %v10041_v42  ;;  %v1983_v42 = vrot.slane %v8766_v13, 7  ;;  %v10066_v46 = vsel %vm14534_vm6, %v1981_v50, %v1982_v37  ;;  %2782 = vrot.lane.b32.xlu1 %v10047_v32, %s8808_s18  ;;  %v8397_v2 = vld [vmem:[%s9967_s13 + $0x20] sm:$0xff]   ;;  %7402 = vmatpush3.bf16.msra.mxu0 %v8395_v11  ;;  %v2419_v24 = vsel %vm14394_vm4, %v10089_v1, 0.0  ;;  %v14951_v11 = vld [vmem:[#allocation19_spill] sm:$0xff]  ;;  %p8482_p0 = pnand (%p13991_p12), %p8481_p13, %p8896_p5  ;;  %p8488_p3 = scmp.lt.s32.totalorder (%p13991_p12), %s8486_s22, %s8480_s20 }
 0x1a1   : >> { %14944 = vst [vmem:[#allocation82_spill] sm:$0xff] %v10066_v46  ;;  %v2416_v47 = vsel %vm14393_vm15, %v10066_v46, 0.0  ;;  %14948 = vst [vmem:[#allocation84_spill] sm:$0xff] %v10089_v1  ;;  %7403 = vmatprep.subr.bf16.mxu0 %v8396_v33  ;;  %vm14406_vm0 = vcmp.ge.s32.totalorder %v14951_v11, 1  ;;  %v1987_v33 = vrot.slane %v8750_v30, 7  ;;  %v8400_v1 = vld [vmem:[%s9967_s13 + $0x70] sm:$0xff]  }
 0x1a2   : >> { %v10079_v50 = vsel %vm14534_vm6, %v1982_v37, %v1983_v42  ;;  %v10093_v46 = vsel %vm14534_vm6, %v1983_v42, %v1984_v43  ;;  %v8398_v37 = vld [vmem:[%s9967_s13 + $0x68] sm:$0xff]   ;;  %v10109_v42 = vpack.c.bf16 %v8754_v12, %v8758_v22  ;;  %v8405_v31 = vld [vmem:[%s9967_s13 + $0xc0] sm:$0xff]   ;;  %p8483_p1 = pneg (%p13991_p12), %p8482_p0  ;;  %p8489_p4 = por (%p13991_p12), %p8488_p3, %p8487_p2 }
 0x1a3   : >> { %14945 = vst [vmem:[#allocation83_spill] sm:$0xff] %v10079_v50  ;;  %v2417_v15 = vsel %vm14432_vm2, %v10079_v50, 0.0  ;;  %14949 = vst [vmem:[#allocation85_spill] sm:$0xff] %v10093_v46  ;;  %v2418_v50 = vsel %vm14416_vm3, %v10093_v46, 0.0  ;;  %2830 = vrot.lane.b32.xlu0 %v2443_v36, %s8808_s18  ;;  %v14950_v43 = vld [vmem:[#allocation18_spill] sm:$0xff]  ;;  %7507 = vmatprep.subr.bf16.mxu1 %v8405_v31  ;;  %v1990_v31 = vrot.slane %v8738_v6, 7 }
 0x1a4   : >> { %v2444_v25 = vpack.c.bf16 %v2417_v15, %v2416_v47  ;;  %v1986_v47 = vrot.slane %v8754_v12, 7  ;;  %vm14415_vm5 = vcmp.ge.s32.totalorder %v14950_v43, 1  ;;  %2784 = vrot.lane.b32.xlu1 %v2219_v55, %s8808_s18  ;;  %v8399_v15 = vld [vmem:[%s9967_s13 + $0x28] sm:$0xff]   ;;  %7404 = vmatpush3.bf16.msra.mxu0 %v8397_v2  ;;  %v2445_v46 = vpack.c.bf16 %v2419_v24, %v2418_v50  ;;  %v14954_v2 = vld [vmem:[#allocation20_spill] sm:$0xff]  ;;  %v14955_v24 = vld [vmem:[#allocation21_spill] sm:$0xff]  ;;  %p8490_p7 = pnand (%p13991_p12), %p8489_p4, %p8483_p1 }
 0x1a5   : >> { %v1988_v55 = vrot.slane %v8746_v54, 7  ;;  %7405 = vmatprep.subr.bf16.mxu0 %v8398_v37  ;;  %vm14411_vm15 = vcmp.ge.s32.totalorder %v14954_v2, 1  ;;  %v14956_v50 = vmov %v14955_v24  ;;  %vm14414_vm4 = vcmp.ge.s32.totalorder %v14955_v24, 1  ;;  %v8401_v43 = vld [vmem:[%s9967_s13 + $0x30] sm:$0xff]   ;;  %v8408_v24 = vld [vmem:[%s9967_s13 + $0x88] sm:$0xff]  }
 0x1a6   : >> { %v10119_v36 = vsel %vm14534_vm6, %v1985_v23, %v1986_v47  ;;  %v10131_v23 = vsel %vm14534_vm6, %v1986_v47, %v1987_v33  ;;  %v10155_v12 = vpack.c.bf16 %v8746_v54, %v8750_v30  ;;  %v1991_v2 = vrot.slane %v8734_v48, 7  ;;  %v14960_v54 = vld [vmem:[#allocation23_spill] sm:$0xff] }
 0x1a7   : >> { %14952 = vst [vmem:[#allocation86_spill] sm:$0xff] %v10119_v36  ;;  %v2420_v44 = vsel %vm14415_vm5, %v10119_v36, 0.0  ;;  %2832 = vrot.lane.b32.xlu0 %v2444_v25, %s8808_s18  ;;  %14953 = vst [vmem:[#allocation87_spill] sm:$0xff] %v10131_v23  ;;  %v8406_v36 = vld [vmem:[%s9967_s13 + $0x80] sm:$0xff]   ;;  %v2421_v37 = vsel %vm14406_vm0, %v10131_v23, 0.0  ;;  %v10145_v25 = vsel %vm14534_vm6, %v1988_v55, %v1989_v58  ;;  %v10149_v47 = vsel %vm14534_vm6, %v1987_v33, %v1988_v55  ;;  %v14959_v55 = vld [vmem:[#allocation22_spill] sm:$0xff] }
 0x1a8   : >> { %2786 = vrot.lane.b32.xlu1 %v10098_v60, %s8808_s18  ;;  %14957 = vst [vmem:[#allocation88_spill] sm:$0xff] %v10145_v25  ;;  %14958 = vst [vmem:[#allocation89_spill] sm:$0xff] %v10149_v47  ;;  %v2422_v23 = vsel %vm14411_vm15, %v10149_v47, 0.0  ;;  %v2423_v11 = vsel %vm14414_vm4, %v10145_v25, 0.0  ;;  %7406 = vmatpush3.bf16.msra.mxu0 %v8399_v15  ;;  %v2446_v33 = vpack.c.bf16 %v2421_v37, %v2420_v44  ;;  %vm14422_vm0 = vcmp.ge.s32.totalorder %v14959_v55, 1  ;;  %v8409_v44 = vld [vmem:[%s9967_s13 + $0xd0] sm:$0xff]  }
 0x1a9   : >> { %7508 = vmatpush3.bf16.msra.mxu1 %v8406_v36  ;;  %7407 = vmatprep.subr.bf16.mxu0 %v8400_v1  ;;  %v14961_v16 = vmov %v14960_v54  ;;  %vm14428_vm15 = vcmp.ge.s32.totalorder %v14960_v54, 1  ;;  %v14423_v47 = vrot.slane %v8802_v38, 1  ;;  %v2232_v15 = vrot.slane %v8798_v52, 1  ;;  %v8403_v36 = vld [vmem:[%s9967_s13 + $0x38] sm:$0xff]   ;;  %v10182_v54 = vld [vmem:[%s9967_s13 + $0x100] sm:$0xff]  }
 0x1aa   : >> { %7509 = vmatprep.subr.bf16.mxu1 %v8407_v41  ;;  %v10176_v1 = vsel %vm14534_vm6, %v1989_v58, %v1990_v31  ;;  %vm14582_vm4 = vcmp.lt.s32.totalorder %v14924_v57, 7  ;;  %vm14426_vm5 = vcmp.lt.s32.totalorder %v14927_v49, 7  ;;  %14963 = vst [vmem:[#allocation91_spill] sm:$0xff] %v10182_v54  ;;  %v10186_v41 = vsel %vm14534_vm6, %v1990_v31, %v1991_v2  ;;  %v8410_v58 = vld [vmem:[%s9967_s13 + $0x90] sm:$0xff]   ;;  %v8411_v52 = vld [vmem:[%s9967_s13 + $0xd8] sm:$0xff]   ;;  %v8413_v49 = vld [vmem:[%s9967_s13 + $0xe0] sm:$0xff]  }
 0x1ab   : >> { %2834 = vrot.lane.b32.xlu0 %v2445_v46, %s8808_s18  ;;  %14962 = vst [vmem:[#allocation90_spill] sm:$0xff] %v10176_v1  ;;  %v2233_v46 = vrot.slane %v8794_v18, 1  ;;  %14964 = vst [vmem:[#allocation92_spill] sm:$0xff] %v10186_v41  ;;  %v10192_v37 = vsel %vm14582_vm4, %v14423_v47, %v2232_v15  ;;  %vm14576_vm3 = vcmp.lt.s32.totalorder %v14928_v62, 7  ;;  %v2447_v25 = vpack.c.bf16 %v2423_v11, %v2422_v23  ;;  %v8412_v23 = vld [vmem:[%s9967_s13 + $0x98] sm:$0xff]  }
 0x1ac   : >> { %2788 = vrot.lane.b32.xlu1 %v10109_v42, %s8808_s18  ;;  %7408 = vmatpush3.bf16.msra.mxu0 %v8401_v43  ;;  %v2424_v18 = vsel %vm14422_vm0, %v10176_v1, 0.0  ;;  %v2425_v43 = vsel %vm14428_vm15, %v10186_v41, 0.0  ;;  %v2472_v11 = vsel %vm14426_vm5, %v10192_v37, 0.0  ;;  %v14967_v41 = vld [vmem:[#allocation25_spill] sm:$0xff]  ;;  %v2235_v1 = vrot.slane %v8786_v39, 1 }
 0x1ad   : >> { %7510 = vmatpush3.bf16.msra.mxu1 %v8408_v24  ;;  %v10201_v31 = vsel %vm14582_vm4, %v2232_v15, %v2233_v46  ;;  %7409 = vmatprep.subr.bf16.mxu0 %v8402_v0  ;;  %v1992_v24 = vrot.slane %v8730_v4, 7  ;;  %v14966_v15 = vld [vmem:[#allocation24_spill] sm:$0xff]  ;;  %v2448_v47 = vpack.c.bf16 %v2425_v43, %v2424_v18  ;;  %vm14435_vm5 = vcmp.ge.s32.totalorder %v14967_v41, 1  ;;  %v8415_v43 = vld [vmem:[%s9967_s13 + $0xe8] sm:$0xff]  }
 0x1ae   : >> { %14965 = vst [vmem:[#allocation93_spill] sm:$0xff] %v10201_v31  ;;  %7511 = vmatprep.subr.bf16.mxu1 %v8409_v44  ;;  %v2473_v0 = vsel %vm14576_vm3, %v10201_v31, 0.0  ;;  %vm14440_vm0 = vcmp.ge.s32.totalorder %v14966_v15, 1  ;;  %v2234_v44 = vrot.slane %v8790_v9, 1  ;;  %vm14577_vm15 = vcmp.lt.s32.totalorder %v14925_v53, 7 }
 0x1af   : >> { %2836 = vrot.lane.b32.xlu0 %v2446_v33, %s8808_s18  ;;  %v1993_v33 = vrot.slane %v8726_v21, 7  ;;  %v10233_v18 = vsel %vm14534_vm6, %v1991_v2, %v1992_v24  ;;  %vm14580_vm2 = vcmp.lt.s32.totalorder %v14926_v63, 7  ;;  %v2223_v2 = vpack.c.bf16 %v8738_v6, %v14941_v19 }
 0x1b0   : >> { %2790 = vrot.lane.b32.xlu1 %v10155_v12, %s8808_s18  ;;  %7410 = vmatpush3.bf16.msra.mxu0 %v8403_v36  ;;  %14969 = vst [vmem:[#allocation95_spill] sm:$0xff] %v10233_v18  ;;  %v10237_v36 = vsel %vm14582_vm4, %v2233_v46, %v2234_v44  ;;  %v2426_v46 = vsel %vm14440_vm0, %v10233_v18, 0.0  ;;  %v8416_v18 = vld [vmem:[%s9967_s13 + $0xa8] sm:$0xff]   ;;  %v2237_v39 = vrot.slane %v8778_v20, 1  ;;  %v2249_v63 = vrot.slane %v8730_v4, 1 }
 0x1b1   : >> { %7512 = vmatpush3.bf16.msra.mxu1 %v8410_v58  ;;  %7939 = vmatprep.subr.bf16.mxu0 %v10182_v54  ;;  %v10229_v9 = vsel %vm14534_vm6, %v1992_v24, %v1993_v33  ;;  %14970 = vst [vmem:[#allocation96_spill] sm:$0xff] %v10237_v36  ;;  %v2504_v58 = vpack.c.bf16 %v2473_v0, %v2472_v11  ;;  %v2474_v11 = vsel %vm14577_vm15, %v10237_v36, 0.0  ;;  %v1994_v24 = vrot.slane %v8722_v8, 7 }
 0x1b2   : >> { %7513 = vmatprep.subr.bf16.mxu1 %v8411_v52  ;;  %14968 = vst [vmem:[#allocation94_spill] sm:$0xff] %v10229_v9  ;;  %v10243_v52 = vsel %vm14582_vm4, %v2234_v44, %v2235_v1  ;;  %v2236_v44 = vrot.slane %v8782_v27, 1 }
 0x1b3   : >> { %2838 = vrot.lane.b32.xlu0 %v2447_v25, %s8808_s18  ;;  %v8414_v25 = vld [vmem:[%s9967_s13 + $0xa0] sm:$0xff]   ;;  %v2475_v0 = vsel %vm14580_vm2, %v10243_v52, 0.0  ;;  %v10278_v38 = vsel %vm14534_vm6, %v1993_v33, %v1994_v24 }
 0x1b4   : >> { %2920 = vrot.lane.b32.xlu1 %v9998_v5, %s8808_s18  ;;  %v2427_v5 = vsel %vm14435_vm5, %v10229_v9, 0.0  ;;  %v14973_v9 = vld [vmem:[#allocation27_spill] sm:$0xff]  ;;  %14975 = vst [vmem:[#allocation98_spill] sm:$0xff] %v10278_v38  ;;  %v10286_v27 = vsel %vm14582_vm4, %v2235_v1, %v2236_v44 }
 0x1b5   : >> { %7514 = vmatpush3.bf16.msra.mxu1 %v8412_v23  ;;  %v1995_v23 = vrot.slane %v8718_v35, 7  ;;  %v14974_v36 = vmov %v14973_v9  ;;  %vm14464_vm0 = vcmp.ge.s32.totalorder %v14973_v9, 1  ;;  %v2449_v54 = vpack.c.bf16 %v2427_v5, %v2426_v46  ;;  %v8417_v9 = vld [vmem:[%s9967_s13 + $0xf0] sm:$0xff]  }
 0x1b6   : >> { %7515 = vmatprep.subr.bf16.mxu1 %v8413_v49  ;;  %v10271_v49 = vsel %vm14577_vm15, %v10243_v52, 0.0  ;;  %v10302_v1 = vsel %vm14580_vm2, %v10286_v27, 0.0  ;;  %v8418_v46 = vld [vmem:[%s9967_s13 + $0xb0] sm:$0xff]  }
 0x1b7   : >> { %2840 = vrot.lane.b32.xlu0 %v2448_v47, %s8808_s18  ;;  %14971 = vst [vmem:[#allocation97_spill] sm:$0xff] %v10271_v49  ;;  %v14972_v47 = vld [vmem:[#allocation26_spill] sm:$0xff]  ;;  %14978 = vst [vmem:[#allocation101_spill] sm:$0xff] %v10302_v1  ;;  %v14981_v49 = vld [vmem:[#allocation29_spill] sm:$0xff]  ;;  %v10326_v1 = vpack.c.bf16 %v8730_v4, %v8734_v48 }
 0x1b8   : >> { %2872 = vrot.lane.b32.xlu1 %v2504_v58, %s8808_s18  ;;  %vm14452_vm5 = vcmp.ge.s32.totalorder %v14972_v47, 1  ;;  %v10282_v58 = vsel %vm14534_vm6, %v1994_v24, %v1995_v23  ;;  %v2476_v24 = vsel %vm14536_vm9, %v10286_v27, 0.0  ;;  %vm14467_vm13 = vcmp.ge.s32.totalorder %v14981_v49, 1 }
 0x1b9   : >> { %7516 = vmatpush3.bf16.msra.mxu1 %v8414_v25  ;;  %14976 = vst [vmem:[#allocation99_spill] sm:$0xff] %v10282_v58  ;;  %v2428_v33 = vsel %vm14452_vm5, %v10278_v38, 0.0  ;;  %v10297_v25 = vsel %vm14582_vm4, %v2236_v44, %v2237_v39  ;;  %v2429_v5 = vsel %vm14464_vm0, %v10282_v58, 0.0  ;;  %v1997_v44 = vrot.slane %v8710_v34, 7  ;;  %v8419_v38 = vld [vmem:[%s9967_s13 + $0xf8] sm:$0xff]  }
 0x1ba   : >> { %7517 = vmatprep.subr.bf16.mxu1 %v8415_v43  ;;  %14977 = vst [vmem:[#allocation100_spill] sm:$0xff] %v10297_v25  ;;  %v2505_v43 = vpack.c.bf16 %v2475_v0, %v2474_v11  ;;  %v1996_v11 = vrot.slane %v8714_v14, 7  ;;  %v14979_v0 = vld [vmem:[#allocation28_spill] sm:$0xff]  ;;  %v2239_v58 = vrot.slane %v8770_v56, 1  ;;  %vm14477_vm0 = vcmp.lt.s32.totalorder %v14937_v29, 7 }
 0x1bb   : >> { %2792 = vrot.lane.b32.xlu0 %v2223_v2, %s8808_s18  ;;  %v14980_v2 = vmov %v14979_v0  ;;  %vm14471_vm5 = vcmp.ge.s32.totalorder %v14979_v0, 1 }
 0x1bc   : >> { %2922 = vrot.lane.b32.xlu1 %v10018_v26, %s8808_s18  ;;  %v2477_v26 = vsel %vm14535_vm14, %v10297_v25, 0.0  ;;  %v10333_v20 = vsel %vm14534_vm6, %v1996_v11, %v1997_v44  ;;  %v10337_v0 = vsel %vm14534_vm6, %v1995_v23, %v1996_v11  ;;  %v2241_v11 = vrot.slane %v8762_v61, 1 }
 0x1bd   : >> { %7518 = vmatpush3.bf16.msra.mxu1 %v8416_v18  ;;  %v2238_v18 = vrot.slane %v8774_v59, 1  ;;  %14982 = vst [vmem:[#allocation102_spill] sm:$0xff] %v10333_v20  ;;  %14983 = vst [vmem:[#allocation103_spill] sm:$0xff] %v10337_v0  ;;  %v2506_v25 = vpack.c.bf16 %v2477_v26, %v2476_v24  ;;  %v2431_v23 = vsel %vm14467_vm13, %v10333_v20, 0.0  ;;  %v2667_v24 = vpack.c.bf16 %v14941_v19, %v8774_v59  ;;  %v15012_v59 = vld [vmem:[#allocation34_spill] sm:$0xff] }
 0x1be   : >> { %7519 = vmatprep.subr.bf16.mxu1 %v8417_v9  ;;  %v2450_v9 = vpack.c.bf16 %v2429_v5, %v2428_v33  ;;  %v1999_v5 = vrot.slane %v8702_v3, 7  ;;  %v2240_v26 = vrot.slane %v8766_v13, 1  ;;  %v14999_v13 = vld [vmem:[#allocation32_spill] sm:$0xff]  ;;  %v15013_v53 = vmov %v15012_v59 }
 0x1bf   : >> { %2842 = vrot.lane.b32.xlu0 %v2449_v54, %s8808_s18  ;;  %v8420_v54 = vld [vmem:[%s9967_s13 + $0xb8] sm:$0xff]   ;;  %v10344_v56 = vsel %vm14582_vm4, %v2238_v18, %v2239_v58 }
 0x1c0   : >> { %2874 = vrot.lane.b32.xlu1 %v2505_v43, %s8808_s18  ;;  %14984 = vst [vmem:[#allocation104_spill] sm:$0xff] %v10344_v56  ;;  %v10348_v43 = vsel %vm14582_vm4, %v2237_v39, %v2238_v18  ;;  %v2479_v33 = vsel %vm14473_vm12, %v10344_v56, 0.0  ;;  %v14988_v56 = vld [vmem:[#allocation31_spill] sm:$0xff]  ;;  %vm14486_vm12 = vcmp.lt.s32.totalorder %v14942_v10, 7  ;;  %v15000_v10 = vmov %v14999_v13 }
 0x1c1   : >> { %7520 = vmatpush3.bf16.msra.mxu1 %v8418_v46  ;;  %14985 = vst [vmem:[#allocation105_spill] sm:$0xff] %v10348_v43  ;;  %v2478_v39 = vsel %vm14477_vm0, %v10348_v43, 0.0  ;;  %v1998_v46 = vrot.slane %v8706_v51, 7  ;;  %v14989_v43 = vmov %v14988_v56 }
 0x1c2   : >> { %7521 = vmatprep.subr.bf16.mxu1 %v8419_v38  ;;  %v2430_v38 = vsel %vm14471_vm5, %v10337_v0, 0.0  ;;  %vm14489_vm5 = vcmp.ge.s32.totalorder %v14988_v56, 1  ;;  %v14992_v0 = vld [vmem:[#allocation15_spill] sm:$0xff]  ;;  %v10395_v56 = vsel %vm14582_vm4, %v2240_v26, %v2241_v11 }
 0x1c3   : >> { %2794 = vrot.lane.b32.xlu0 %v10326_v1, %s8808_s18  ;;  %v2451_v18 = vpack.c.bf16 %v2431_v23, %v2430_v38  ;;  %v10384_v20 = vsel %vm14534_vm6, %v1998_v46, %v1999_v5  ;;  %vm14491_vm0 = vcmp.lt.s32.totalorder %v14992_v0, 7  ;;  %14994 = vst [vmem:[#allocation108_spill] sm:$0xff] %v10395_v56  ;;  %v10399_v38 = vsel %vm14582_vm4, %v2239_v58, %v2240_v26  ;;  %v14996_v26 = vld [vmem:[#allocation61_spill] sm:$0xff] }
 0x1c4   : >> { %2924 = vrot.lane.b32.xlu1 %v10047_v32, %s8808_s18  ;;  %v10369_v32 = vpack.c.bf16 %v8722_v8, %v8726_v21  ;;  %14990 = vst [vmem:[#allocation106_spill] sm:$0xff] %v10384_v20  ;;  %14995 = vst [vmem:[#allocation109_spill] sm:$0xff] %v10399_v38  ;;  %v10403_v23 = vpack.c.bf16 %v8714_v14, %v8718_v35  ;;  %v2433_v0 = vsel %vm14489_vm5, %v10384_v20, 0.0  ;;  %v2481_v58 = vsel %vm14491_vm0, %v10395_v56, 0.0  ;;  %v15018_v56 = vld [vmem:[#allocation19_spill] sm:$0xff] }
 0x1c5   : >> { %7522 = vmatpush3.bf16.msra.mxu1 %v8420_v54  ;;  %v2507_v54 = vpack.c.bf16 %v2479_v33, %v2478_v39  ;;  %v2480_v39 = vsel %vm14486_vm12, %v10399_v38, 0.0  ;;  %v2000_v33 = vrot.slane %v8698_v7, 7  ;;  %vm14505_vm12 = vcmp.ge.s32.totalorder %v14999_v13, 1  ;;  %v15033_v38 = vld [vmem:[#allocation42_spill] sm:$0xff] }
 0x1c7   : >> { %2844 = vrot.lane.b32.xlu0 %v2450_v9, %s8808_s18  ;;  %v14986_v9 = vld [vmem:[#allocation30_spill] sm:$0xff]  ;;  %v10431_v61 = vsel %vm14534_vm6, %v1999_v5, %v2000_v33  ;;  %v2227_v5 = vpack.c.bf16 %v8706_v51, %v14941_v19 }
 0x1c8   : >> { %2876 = vrot.lane.b32.xlu1 %v2506_v25, %s8808_s18  ;;  %v14987_v45 = vmov %v14986_v9  ;;  %vm14488_vm13 = vcmp.ge.s32.totalorder %v14986_v9, 1  ;;  %v10388_v25 = vsel %vm14534_vm6, %v1997_v44, %v1998_v46  ;;  %v2001_v46 = vrot.slane %v8694_v17, 7  ;;  %14998 = vst [vmem:[#allocation111_spill] sm:$0xff] %v10431_v61 }
 0x1c9   : >> { %14991 = vst [vmem:[#allocation107_spill] sm:$0xff] %v10388_v25  ;;  %v2432_v44 = vsel %vm14488_vm13, %v10388_v25, 0.0  ;;  %v2243_v9 = vrot.slane %v14996_v26, 1  ;;  %v2434_v13 = vsel %vm14505_vm12, %v10431_v61, 0.0 }
 0x1ca   : >> { %v2452_v20 = vpack.c.bf16 %v2433_v0, %v2432_v44  ;;  %v10427_v25 = vsel %vm14534_vm6, %v2000_v33, %v2001_v46 }
 0x1cb   : >> { %2796 = vrot.lane.b32.xlu0 %v10369_v32, %s8808_s18  ;;  %14997 = vst [vmem:[#allocation110_spill] sm:$0xff] %v10427_v25 }
 0x1cc   : >> { %2926 = vrot.lane.b32.xlu1 %v2667_v24, %s8808_s18  ;;  %v2242_v24 = vrot.slane %v8758_v22, 1 }
 0x1ce   : >> { %v10439_v44 = vsel %vm14582_vm4, %v2242_v24, %v2243_v9  ;;  %v10443_v0 = vsel %vm14582_vm4, %v2241_v11, %v2242_v24  ;;  %v15009_v24 = vld [vmem:[#allocation45_spill] sm:$0xff] }
 0x1cf   : >> { %2846 = vrot.lane.b32.xlu0 %v2451_v18, %s8808_s18  ;;  %v2508_v18 = vpack.c.bf16 %v2481_v58, %v2480_v39  ;;  %15003 = vst [vmem:[#allocation112_spill] sm:$0xff] %v10439_v44  ;;  %15004 = vst [vmem:[#allocation113_spill] sm:$0xff] %v10443_v0  ;;  %v15005_v39 = vld [vmem:[#allocation16_spill] sm:$0xff]  ;;  %v15007_v58 = vld [vmem:[#allocation17_spill] sm:$0xff] }
 0x1d0   : >> { %2878 = vrot.lane.b32.xlu1 %v2507_v54, %s8808_s18  ;;  %v15001_v54 = vld [vmem:[#allocation33_spill] sm:$0xff]  ;;  %vm14514_vm5 = vcmp.lt.s32.totalorder %v15005_v39, 7  ;;  %vm14509_vm0 = vcmp.lt.s32.totalorder %v15007_v58, 7  ;;  %v15010_v39 = vld [vmem:[#allocation44_spill] sm:$0xff] }
 0x1d1   : >> { %v15002_v29 = vmov %v15001_v54  ;;  %vm14501_vm13 = vcmp.ge.s32.totalorder %v15001_v54, 1  ;;  %v2482_v11 = vsel %vm14514_vm5, %v10443_v0, 0.0  ;;  %v2483_v33 = vsel %vm14509_vm0, %v10439_v44, 0.0  ;;  %v15014_v0 = vld [vmem:[#allocation35_spill] sm:$0xff] }
 0x1d2   : >> { %v2002_v54 = vrot.slane %v15009_v24, 7  ;;  %v2003_v58 = vrot.slane %v15010_v39, 7  ;;  %v15015_v26 = vmov %v15014_v0  ;;  %vm14519_vm12 = vcmp.ge.s32.totalorder %v15014_v0, 1 }
 0x1d3   : >> { %2798 = vrot.lane.b32.xlu0 %v10403_v23, %s8808_s18  ;;  %v2509_v44 = vpack.c.bf16 %v2483_v33, %v2482_v11  ;;  %vm14526_vm5 = vcmp.lt.s32.totalorder %v15018_v56, 7  ;;  %v10493_v56 = vpack.c.bf16 %v8698_v7, %v8702_v3  ;;  %v2247_v11 = vrot.slane %v8738_v6, 1 }
 0x1d4   : >> { %2928 = vrot.lane.b32.xlu1 %v10098_v60, %s8808_s18  ;;  %v2435_v60 = vsel %vm14501_vm13, %v10427_v25, 0.0  ;;  %v2244_v25 = vrot.slane %v8750_v30, 1  ;;  %vm14524_vm13 = vcmp.ge.s32.totalorder %v15012_v59, 1  ;;  %v10476_v30 = vsel %vm14534_vm6, %v2002_v54, %v2003_v58 }
 0x1d5   : >> { %v2453_v22 = vpack.c.bf16 %v2435_v60, %v2434_v13  ;;  %15020 = vst [vmem:[#allocation114_spill] sm:$0xff] %v10476_v30  ;;  %15024 = vst [vmem:[#allocation118_spill] sm:$0xff] %v10493_v56  ;;  %v2437_v0 = vsel %vm14519_vm12, %v10476_v30, 0.0  ;;  %v15026_v60 = vld [vmem:[#allocation58_spill] sm:$0xff]  ;;  %v15029_v30 = vld [vmem:[#allocation37_spill] sm:$0xff]  ;;  %v15034_v6 = vrot.slane %v15033_v38, 7 }
 0x1d7   : >> { %2848 = vrot.lane.b32.xlu0 %v2452_v20, %s8808_s18  ;;  %v15011_v20 = vld [vmem:[#allocation59_spill] sm:$0xff] }
 0x1d8   : >> { %2880 = vrot.lane.b32.xlu1 %v2508_v18, %s8808_s18  ;;  %v2245_v61 = vrot.slane %v15011_v20, 1  ;;  %v15016_v18 = vld [vmem:[#allocation18_spill] sm:$0xff]  ;;  %v15031_v20 = vld [vmem:[#allocation20_spill] sm:$0xff] }
 0x1d9   : >> { %vm2308_vm0 = vcmp.lt.s32.totalorder %v15016_v18, 7  ;;  %v15027_v18 = vld [vmem:[#allocation36_spill] sm:$0xff]  ;;  %v15032_v31 = vmov %v15031_v20 }
 0x1da   : >> { %v10484_v59 = vsel %vm14582_vm4, %v2244_v25, %v2245_v61  ;;  %vm14540_vm12 = vcmp.ge.s32.totalorder %v15027_v18, 1 }
 0x1db   : >> { %2800 = vrot.lane.b32.xlu0 %v2227_v5, %s8808_s18  ;;  %v10480_v5 = vsel %vm14534_vm6, %v2001_v46, %v2002_v54  ;;  %15022 = vst [vmem:[#allocation116_spill] sm:$0xff] %v10484_v59 }
 0x1dc   : >> { %2930 = vrot.lane.b32.xlu1 %v10109_v42, %s8808_s18  ;;  %15021 = vst [vmem:[#allocation115_spill] sm:$0xff] %v10480_v5  ;;  %v10488_v42 = vsel %vm14582_vm4, %v2243_v9, %v2244_v25  ;;  %v2436_v46 = vsel %vm14524_vm13, %v10480_v5, 0.0  ;;  %v15025_v9 = vld [vmem:[#allocation43_spill] sm:$0xff]  ;;  %v15028_v5 = vmov %v15027_v18  ;;  %vm14537_vm13 = vcmp.ge.s32.totalorder %v15029_v30, 1 }
 0x1dd   : >> { %15023 = vst [vmem:[#allocation117_spill] sm:$0xff] %v10488_v42  ;;  %v2484_v25 = vsel %vm2308_vm0, %v10488_v42, 0.0  ;;  %v2004_v13 = vrot.slane %v15025_v9, 7  ;;  %v2454_v33 = vpack.c.bf16 %v2437_v0, %v2436_v46  ;;  %v15030_v42 = vmov %v15029_v30 }
 0x1de   : >> { %v10538_v30 = vsel %vm14535_vm14, %v10286_v27, 0.0  ;;  %v2671_v27 = vpack.c.bf16 %v14941_v19, %v15026_v60  ;;  %vm14541_vm14 = vcmp.lt.s32.totalorder %v14959_v55, 7 }
 0x1df   : >> { %2850 = vrot.lane.b32.xlu0 %v2453_v22, %s8808_s18  ;;  %v2485_v22 = vsel %vm14526_vm5, %v10484_v59, 0.0  ;;  %vm2310_vm5 = vcmp.lt.s32.totalorder %v15031_v20, 7  ;;  %v2248_v59 = vrot.slane %v8734_v48, 1  ;;  %v10528_v46 = vsel %vm14534_vm6, %v2003_v58, %v2004_v13 }
 0x1e0   : >> { %2882 = vrot.lane.b32.xlu1 %v2509_v44, %s8808_s18  ;;  %v2246_v44 = vrot.slane %v15026_v60, 1  ;;  %v2510_v54 = vpack.c.bf16 %v2485_v22, %v2484_v25  ;;  %15036 = vst [vmem:[#allocation120_spill] sm:$0xff] %v10528_v46 }
 0x1e2   : >> { %v10542_v20 = vsel %vm14582_vm4, %v2246_v44, %v2247_v11 }
 0x1e3   : >> { %2802 = vrot.lane.b32.xlu0 %v10493_v56, %s8808_s18  ;;  %v10524_v56 = vsel %vm14534_vm6, %v2004_v13, %v15034_v6  ;;  %15037 = vst [vmem:[#allocation121_spill] sm:$0xff] %v10542_v20  ;;  %v10546_v6 = vsel %vm14582_vm4, %v2245_v61, %v2246_v44  ;;  %vm2311_vm6 = vcmp.lt.s32.totalorder %v14956_v50, 7  ;;  %v2438_v61 = vsel %vm14540_vm12, %v10528_v46, 0.0 }
 0x1e4   : >> { %2932 = vrot.lane.b32.xlu1 %v10155_v12, %s8808_s18  ;;  %15035 = vst [vmem:[#allocation119_spill] sm:$0xff] %v10524_v56  ;;  %v10533_v12 = vsel %vm14536_vm9, %v10243_v52, 0.0  ;;  %v10554_v52 = vpack.c.bf16 %v15009_v24, %v8694_v17  ;;  %v2439_v0 = vsel %vm14537_vm13, %v10524_v56, 0.0  ;;  %v2486_v25 = vsel %vm2310_vm5, %v10546_v6, 0.0 }
 0x1e5   : >> { %v2487_v22 = vsel %vm2311_vm6, %v10542_v20, 0.0  ;;  %v10573_v13 = vsel %vm14582_vm4, %v2248_v59, %v2249_v63  ;;  %v10577_v44 = vsel %vm14582_vm4, %v2247_v11, %v2248_v59  ;;  %vm14542_vm9 = vcmp.lt.s32.totalorder %v14961_v16, 7 }
 0x1e6   : >> { %v2455_v18 = vpack.c.bf16 %v2439_v0, %v2438_v61  ;;  %v2511_v58 = vpack.c.bf16 %v2487_v22, %v2486_v25  ;;  %v2488_v59 = vsel %vm14541_vm14, %v10577_v44, 0.0  ;;  %v2489_v11 = vsel %vm14542_vm9, %v10573_v13, 0.0 }
 0x1e7   : >> { %2852 = vrot.lane.b32.xlu0 %v2454_v33, %s8808_s18  ;;  %v2250_v33 = vrot.slane %v8726_v21, 1  ;;  %vm14544_vm13 = vcmp.lt.s32.totalorder %v14966_v15, 7  ;;  %v2252_v20 = vrot.slane %v8718_v35, 1  ;;  %vm14543_vm12 = vcmp.lt.s32.totalorder %v14967_v41, 7 }
 0x1e8   : >> { %2884 = vrot.lane.b32.xlu1 %v2510_v54, %s8808_s18  ;;  %v2251_v54 = vrot.slane %v8722_v8, 1  ;;  %v2253_v61 = vrot.slane %v8714_v14, 1  ;;  %v10607_v0 = vpack.c.bf16 %v15025_v9, %v15010_v39  ;;  %v2512_v25 = vpack.c.bf16 %v2489_v11, %v2488_v59  ;;  %v15050_v8 = vld [vmem:[#allocation73_spill] sm:$0xff] }
 0x1e9   : >> { %vm14554_vm14 = vcmp.lt.s32.totalorder %v14972_v47, 7  ;;  %vm14553_vm9 = vcmp.lt.s32.totalorder %v14974_v36, 7  ;;  %v2255_v59 = vrot.slane %v8706_v51, 1 }
 0x1ea   : >> { %v10596_v56 = vsel %vm14582_vm4, %v2250_v33, %v2251_v54 }
 0x1eb   : >> { %2804 = vrot.lane.b32.xlu0 %v10554_v52, %s8808_s18 }
 0x1ec   : >> { %2934 = vrot.lane.b32.xlu1 %v2671_v27, %s8808_s18  ;;  %v10600_v27 = vsel %vm14582_vm4, %v2249_v63, %v2250_v33  ;;  %v2491_v63 = vsel %vm14543_vm12, %v10596_v56, 0.0  ;;  %v10618_v33 = vsel %vm14582_vm4, %v2251_v54, %v2252_v20  ;;  %vm14557_vm12 = vcmp.lt.s32.totalorder %v14980_v2, 7 }
 0x1ed   : >> { %v2490_v22 = vsel %vm14544_vm13, %v10600_v27, 0.0  ;;  %v2492_v54 = vsel %vm14554_vm14, %v10618_v33, 0.0  ;;  %vm14556_vm13 = vcmp.lt.s32.totalorder %v14981_v49, 7  ;;  %vm14560_vm14 = vcmp.lt.s32.totalorder %v14989_v43, 7 }
 0x1ee   : >> { %v2513_v11 = vpack.c.bf16 %v2491_v63, %v2490_v22  ;;  %v2256_v22 = vrot.slane %v8702_v3, 1  ;;  %v2257_v63 = vrot.slane %v8698_v7, 1 }
 0x1ef   : >> { %2854 = vrot.lane.b32.xlu0 %v2455_v18, %s8808_s18  ;;  %v10623_v18 = vsel %vm14582_vm4, %v2252_v20, %v2253_v61 }
 0x1f0   : >> { %2886 = vrot.lane.b32.xlu1 %v2511_v58, %s8808_s18  ;;  %v2254_v58 = vrot.slane %v8710_v34, 1  ;;  %v2493_v20 = vsel %vm14553_vm9, %v10623_v18, 0.0  ;;  %vm14559_vm9 = vcmp.lt.s32.totalorder %v14987_v45, 7 }
 0x1f1   : >> { %v2514_v14 = vpack.c.bf16 %v2493_v20, %v2492_v54 }
 0x1f2   : >> { %v10641_v51 = vsel %vm14582_vm4, %v2254_v58, %v2255_v59 }
 0x1f3   : >> { %2806 = vrot.lane.b32.xlu0 %v10607_v0, %s8808_s18  ;;  %15038 = vst [vmem:[#allocation122_spill] sm:$0xff] %v10641_v51  ;;  %v2495_v35 = vsel %vm14556_vm13, %v10641_v51, 0.0  ;;  %vm2322_vm13 = vcmp.lt.s32.totalorder %v15000_v10, 7 }
 0x1f4   : >> { %2888 = vrot.lane.b32.xlu1 %v2512_v25, %s8808_s18  ;;  %v10645_v25 = vsel %vm14582_vm4, %v2253_v61, %v2254_v58  ;;  %v10662_v61 = vsel %vm14582_vm4, %v2256_v22, %v2257_v63  ;;  %v2258_v58 = vrot.slane %v8694_v17, 1  ;;  %v15043_v17 = vld [vmem:[#allocation93_spill] sm:$0xff] }
 0x1f5   : >> { %v2494_v46 = vsel %vm14557_vm12, %v10645_v25, 0.0  ;;  %v2497_v51 = vsel %vm14560_vm14, %v10662_v61, 0.0  ;;  %vm2323_vm12 = vcmp.lt.s32.totalorder %v15002_v29, 7  ;;  %vm14646_vm14 = vcmp.lt.s32.totalorder %v15015_v26, 7  ;;  %v15084_v29 = vld [vmem:[#allocation113_spill] sm:$0xff] }
 0x1f6   : >> { %v2515_v54 = vpack.c.bf16 %v2495_v35, %v2494_v46  ;;  %v2260_v35 = vrot.slane %v15010_v39, 1  ;;  %v2675_v46 = vpack.c.bf16 %v14941_v19, %v8710_v34  ;;  %v15048_v34 = vld [vmem:[#allocation118_spill] sm:$0xff] }
 0x1f7   : >> { %2936 = vrot.lane.b32.xlu0 %v10326_v1, %s8808_s18  ;;  %v10666_v1 = vsel %vm14582_vm4, %v2255_v59, %v2256_v22 }
 0x1f8   : >> { %2890 = vrot.lane.b32.xlu1 %v2513_v11, %s8808_s18  ;;  %v2259_v11 = vrot.slane %v15009_v24, 1  ;;  %v2496_v20 = vsel %vm14559_vm9, %v10666_v1, 0.0  ;;  %vm14647_vm9 = vcmp.lt.s32.totalorder %v15013_v53, 7 }
 0x1f9   : >> { %v2516_v22 = vpack.c.bf16 %v2497_v51, %v2496_v20  ;;  %v2361_v51 = vsel %vm14576_vm3, %v10192_v37, 0.0  ;;  %vm14595_vm3 = vcmp.lt.s32.totalorder %v15028_v5, 7 }
 0x1fa   : >> { %v10683_v59 = vsel %vm14582_vm4, %v2258_v58, %v2259_v11 }
 0x1fb   : >> { %2938 = vrot.lane.b32.xlu0 %v10369_v32, %s8808_s18  ;;  %15039 = vst [vmem:[#allocation123_spill] sm:$0xff] %v10683_v59  ;;  %v2261_v32 = vrot.slane %v15025_v9, 1  ;;  %v15042_v9 = vld [vmem:[#allocation77_spill] sm:$0xff] }
 0x1fc   : >> { %2892 = vrot.lane.b32.xlu1 %v2514_v14, %s8808_s18  ;;  %v10687_v14 = vsel %vm14582_vm4, %v2257_v63, %v2258_v58  ;;  %v2499_v63 = vsel %vm2323_vm12, %v10683_v59, 0.0  ;;  %v2136_v39 = vsel %vm2072_vm10, %v15042_v9, 0.0  ;;  %v15051_v9 = vrot.slane %v15050_v8, 1  ;;  %v15068_v59 = vld [vmem:[#allocation79_spill] sm:$0xff] }
 0x1fd   : >> { %v2498_v24 = vsel %vm2322_vm13, %v10687_v14, 0.0  ;;  %v10704_v58 = vsel %vm14582_vm4, %v2260_v35, %v2261_v32  ;;  %v2167_v26 = vpack.c.bf16 %v2136_v39, %v14941_v19 }
 0x1fe   : >> { %15040 = vst [vmem:[#allocation124_spill] sm:$0xff] %v10704_v58  ;;  %v2517_v20 = vpack.c.bf16 %v2499_v63, %v2498_v24  ;;  %v15046_v24 = vld [vmem:[#allocation96_spill] sm:$0xff] }
 0x1ff   : >> { %2940 = vrot.lane.b32.xlu0 %v10403_v23, %s8808_s18  ;;  %v10708_v23 = vsel %vm14582_vm4, %v2259_v11, %v2260_v35  ;;  %v2501_v35 = vsel %vm14646_vm14, %v10704_v58, 0.0  ;;  %v2363_v3 = vsel %vm14580_vm2, %v15046_v24, 0.0  ;;  %vm15060_vm2 = vcmp.ge.s32.totalorder %v14934_v40, 1 }
 0x200   : >> { %2894 = vrot.lane.b32.xlu1 %v2515_v54, %s8808_s18  ;;  %15041 = vst [vmem:[#allocation125_spill] sm:$0xff] %v10708_v23  ;;  %v2262_v54 = vrot.slane %v15033_v38, 1  ;;  %v2500_v11 = vsel %vm14647_vm9, %v10708_v23, 0.0 }
 0x201   : >> { %v2518_v7 = vpack.c.bf16 %v2501_v35, %v2500_v11  ;;  %v15054_v11 = vld [vmem:[#allocation76_spill] sm:$0xff]  ;;  %v15055_v35 = vld [vmem:[#allocation75_spill] sm:$0xff] }
 0x202   : >> { %v10738_v58 = vsel %vm14582_vm4, %v2261_v32, %v2262_v54  ;;  %v2137_v39 = vsel %vm2073_vm7, %v15054_v11, 0.0 }
 0x203   : >> { %2942 = vrot.lane.b32.xlu0 %v2675_v46, %s8808_s18  ;;  %v2392_v46 = vpack.c.bf16 %v2361_v51, %v14941_v19  ;;  %15049 = vst [vmem:[#allocation77_spill] sm:$0xff] %v10738_v58  ;;  %v10744_v51 = vsel %vm14582_vm4, %v2262_v54, %v15051_v9  ;;  %v2502_v54 = vsel %vm14595_vm3, %v10738_v58, 0.0 }
 0x204   : >> { %2896 = vrot.lane.b32.xlu1 %v2516_v22, %s8808_s18  ;;  %v2362_v22 = vsel %vm14577_vm15, %v15043_v17, 0.0  ;;  %15052 = vst [vmem:[#allocation118_spill] sm:$0xff] %v10744_v51  ;;  %vm14585_vm15 = vcmp.lt.s32.totalorder %v15030_v42, 7 }
 0x205   : >> { %v2503_v9 = vsel %vm14585_vm15, %v10744_v51, 0.0  ;;  %v15061_v51 = vld [vmem:[#allocation100_spill] sm:$0xff] }
 0x206   : >> { %v2827_v37 = vpop.permute.xlu1 %2826 }
 0x207   : >> { %2944 = vrot.lane.b32.xlu0 %v15048_v34, %s8808_s18  ;;  %v2393_v34 = vpack.c.bf16 %v2363_v3, %v2362_v22  ;;  %v8421_v22 = vld [vmem:[%s9967_s13 + $0x108] sm:$0xff]  }
 0x208   : >> { %2898 = vrot.lane.b32.xlu1 %v2517_v20, %s8808_s18 }
 0x209   : >> { %v2825_v24 = vpop.permute.xlu0 %2824  ;;  %v3022_v20 = vsel %vm15053_vm1, %v2393_v34, %v2827_v37  ;;  %v15056_v37 = vld [vmem:[#allocation91_spill] sm:$0xff] }
 0x20a   : >> { %v3018_v17 = vsel %vm15053_vm1, %v2392_v46, %v2825_v24  ;;  %v2779_v32 = vpop.permute.xlu1 %2778  ;;  %v2138_v46 = vsel %vm2074_vm8, %v15055_v35, 0.0  ;;  %v2519_v24 = vpack.c.bf16 %v2503_v9, %v2502_v54  ;;  %v8422_v54 = vld [vmem:[%s9967_s13 + $0x110] sm:$0xff]  }
 0x20b   : >> { %3510 = vmatprep.mubr.bf16.mxu0 %v3018_v17  ;;  %2946 = vrot.lane.b32.xlu0 %v10554_v52, %s8808_s18  ;;  %v2679_v52 = vpack.c.bf16 %v14941_v19, %v15033_v38  ;;  %v15065_v38 = vld [vmem:[#allocation13_spill] sm:$0xff] }
 0x20c   : >> { %2900 = vrot.lane.b32.xlu1 %v2518_v7, %s8808_s18  ;;  %v2168_v7 = vpack.c.bf16 %v2138_v46, %v2137_v39  ;;  %v15059_v39 = vld [vmem:[#allocation78_spill] sm:$0xff]  ;;  %v15066_v42 = vmov %v15065_v38  ;;  %vm15067_vm15 = vcmp.lt.s32.totalorder %v15065_v38, 7  ;;  %v15070_v38 = vld [vmem:[#allocation81_spill] sm:$0xff] }
 0x20d   : >> { %v2777_v3 = vpop.permute.xlu0 %2776  ;;  %v2140_v46 = vsel %vm15060_vm2, %v15059_v39, 0.0 }
 0x20e   : >> { %v2954_v17 = vsel %vm15053_vm1, %v2167_v26, %v2777_v3  ;;  %v2781_v57 = vpop.permute.xlu1 %2780  ;;  %v2958_v26 = vsel %vm15053_vm1, %v2168_v7, %v2779_v32  ;;  %v15057_v3 = vpack.c.bf16 %v10538_v30, %v10533_v12  ;;  %v15062_v32 = vld [vmem:[#allocation12_spill] sm:$0xff]  ;;  %v15064_v7 = vld [vmem:[#allocation105_spill] sm:$0xff] }
 0x20f   : >> { %3511 = vmatmul.mubr.bf16.vlgmr.msra.gmra.mrb[0].mxu0 %v2954_v17  ;;  %2948 = vrot.lane.b32.xlu0 %v10607_v0, %s8808_s18  ;;  %vm15063_vm4 = vcmp.lt.s32.totalorder %v15062_v32, 7  ;;  %v2367_v12 = vsel %vm15067_vm15, %v15064_v7, 0.0  ;;  %vm15069_vm2 = vcmp.ge.s32.totalorder %v15062_v32, 1  ;;  %vm15071_vm15 = vcmp.ge.s32.totalorder %v15066_v42, 1 }
 0x210   : >> { %7940 = vmatpush3.bf16.msra.mxu0 %v15056_v37  ;;  %3518 = vmatprep.mubr.bf16.mxu0 %v3022_v20  ;;  %v15058_v37 = vld [vmem:[#allocation74_spill] sm:$0xff] }
 0x211   : >> { %v2829_v34 = vpop.permute.xlu0 %2828  ;;  %7941 = vmatprep.subr.bf16.mxu0 %v8421_v22  ;;  %2902 = vrot.lane.b32.xlu1 %v2519_v24, %s8808_s18  ;;  %v2139_v20 = vsel %vm2075_vm11, %v15058_v37, 0.0  ;;  %v8423_v24 = vld [vmem:[%s9967_s13 + $0x118] sm:$0xff]  }
 0x212   : >> { %v2783_v9 = vpop.permute.xlu1 %2782  ;;  %v3026_v17 = vsel %vm15053_vm1, %v15057_v3, %v2829_v34  ;;  %v2169_v30 = vpack.c.bf16 %v2140_v46, %v2139_v20  ;;  %v15073_v20 = vld [vmem:[#allocation15_spill] sm:$0xff] }
 0x213   : >> { %2950 = vrot.lane.b32.xlu0 %v2679_v52, %s8808_s18  ;;  %v15074_v46 = vmov %v15073_v20 }
 0x214   : >> { %7942 = vmatpush3.bf16.msra.mxu0 %v8421_v22  ;;  %v2366_v22 = vsel %vm15063_vm4, %v15061_v51, 0.0  ;;  %v2962_v5 = vsel %vm15053_vm1, %v2169_v30, %v2781_v57  ;;  %v2141_v51 = vsel %vm15069_vm2, %v15068_v59, 0.0  ;;  %vm15075_vm4 = vcmp.lt.s32.totalorder %v15073_v20, 7 }
 0x215   : >> { %v2831_v0 = vpop.permute.xlu0 %2830  ;;  %7943 = vmatprep.subr.bf16.mxu0 %v8422_v54  ;;  %v2395_v3 = vpack.c.bf16 %v2367_v12, %v2366_v22  ;;  %v2585_v12 = vsel %vm2072_vm10, %v15055_v35, 0.0  ;;  %vm15079_vm2 = vcmp.ge.s32.totalorder %v15074_v46, 1 }
 0x216   : >> { %v2785_v52 = vpop.permute.xlu1 %2784 }
 0x217   : >> { %3519 = vmatmul.mubr.bf16.gmra.mrb[4].mxu0 %v2958_v26  ;;  %v3030_v53 = vsel %vm15053_vm1, %v2395_v3, %v2831_v0  ;;  %v2142_v26 = vsel %vm15071_vm15, %v15070_v38, 0.0 }
 0x218   : >> { %3526 = vmatprep.mubr.bf16.mxu0 %v3026_v17  ;;  %7944 = vmatpush3.bf16.msra.mxu0 %v8422_v54  ;;  %v15072_v54 = vld [vmem:[#allocation109_spill] sm:$0xff]  ;;  %v2170_v57 = vpack.c.bf16 %v2142_v26, %v2141_v51  ;;  %v15080_v26 = vld [vmem:[#allocation108_spill] sm:$0xff] }
 0x219   : >> { %v2833_v34 = vpop.permute.xlu0 %2832  ;;  %7945 = vmatprep.subr.bf16.mxu0 %v8423_v24  ;;  %v2369_v22 = vsel %vm15075_vm4, %v15072_v54, 0.0 }
 0x21a   : >> { %v2787_v58 = vpop.permute.xlu1 %2786  ;;  %v2396_v3 = vpack.c.bf16 %v2369_v22, %v14941_v19  ;;  %v2966_v20 = vsel %vm15053_vm1, %v2170_v57, %v2783_v9  ;;  %v15085_v22 = vld [vmem:[#allocation17_spill] sm:$0xff]  ;;  %v15088_v57 = vld [vmem:[#allocation72_spill] sm:$0xff] }
 0x21b   : >> { %v15086_v10 = vmov %v15085_v22  ;;  %vm15087_vm15 = vcmp.lt.s32.totalorder %v15085_v22, 7 }
 0x21c   : >> { %7946 = vmatpush3.bf16.msra.mxu0 %v8423_v24  ;;  %v15076_v24 = vld [vmem:[#allocation6_spill] sm:$0xff]  ;;  %v2371_v21 = vsel %vm15087_vm15, %v15084_v29, 0.0  ;;  %v2588_v29 = vsel %vm2075_vm11, %v15068_v59, 0.0  ;;  %vm15102_vm15 = vcmp.ge.s32.totalorder %v14934_v40, 1 }
 0x21d   : >> { %v2835_v23 = vpop.permute.xlu0 %2834  ;;  %vm15077_vm3 = vcmp.ge.s32.totalorder %v15076_v24, 1  ;;  %v15081_v24 = vld [vmem:[#allocation16_spill] sm:$0xff] }
 0x21e   : >> { %v10803_v17 = vpop.permute.xlu1 %2788  ;;  %v2584_v0 = vsel %vm15077_vm3, %v15054_v11, 0.0  ;;  %v15082_v62 = vmov %v15081_v24  ;;  %vm15083_vm3 = vcmp.lt.s32.totalorder %v15081_v24, 7 }
 0x21f   : >> { %3527 = vmatmul.mubr.bf16.gmra.mrb[8].mxu0 %v2962_v5  ;;  %v2616_v7 = vpack.c.bf16 %v2585_v12, %v2584_v0  ;;  %v15078_v5 = vld [vmem:[#allocation82_spill] sm:$0xff]  ;;  %v2370_v35 = vsel %vm15083_vm3, %v15080_v26, 0.0  ;;  %v2456_v0 = vpack.c.bf16 %v15088_v57, %v15050_v8  ;;  %v2586_v12 = vsel %vm2073_vm7, %v15058_v37, 0.0  ;;  %v15091_v57 = vld [vmem:[#allocation85_spill] sm:$0xff]  ;;  %v15094_v8 = vld [vmem:[#allocation18_spill] sm:$0xff] }
 0x220   : >> { %3534 = vmatprep.mubr.bf16.mxu0 %v3030_v53  ;;  %v3034_v53 = vsel %vm15053_vm1, %v2396_v3, %v2833_v34  ;;  %v2144_v51 = vsel %vm15079_vm2, %v15078_v5, 0.0  ;;  %v2587_v3 = vsel %vm2074_vm8, %v15059_v39, 0.0  ;;  %vm15090_vm4 = vcmp.ge.s32.totalorder %v15082_v62, 1 }
 0x221   : >> { %v2837_v30 = vpop.permute.xlu0 %2836  ;;  %v2171_v34 = vpack.c.bf16 %v2144_v51, %v14941_v19  ;;  %vm15092_vm2 = vcmp.ge.s32.totalorder %v15086_v10, 1  ;;  %v15095_v63 = vmov %v15094_v8  ;;  %v2589_v8 = vsel %vm15102_vm15, %v15070_v38, 0.0 }
 0x222   : >> { %v10815_v42 = vpop.permute.xlu1 %2790  ;;  %v2146_v39 = vsel %vm15092_vm2, %v15091_v57, 0.0  ;;  %vm15113_vm15 = vcmp.ge.s32.totalorder %v15032_v31, 1 }
 0x225   : >> { %v10818_v54 = vpop.permute.xlu0 %2838 }
 0x226   : >> { %v2921_v11 = vpop.permute.xlu1 %2920 }
 0x227   : >> { %3535 = vmatmul.mubr.bf16.gmra.mrb[12].mxu0 %v2966_v20  ;;  %v3146_v9 = vsel %vm15053_vm1, %v2616_v7, %v2921_v11  ;;  %v2397_v20 = vpack.c.bf16 %v2371_v21, %v2370_v35  ;;  %v2617_v11 = vpack.c.bf16 %v2587_v3, %v2586_v12  ;;  %v15093_v35 = vld [vmem:[#allocation112_spill] sm:$0xff]  ;;  %v15096_v12 = vld [vmem:[#allocation117_spill] sm:$0xff]  ;;  %v15100_v3 = vld [vmem:[#allocation71_spill] sm:$0xff] }
 0x228   : >> { %3542 = vmatprep.mubr.bf16.mxu0 %v3034_v53  ;;  %3671 = vmatprep.mubr.bf16.mxu1 %v3146_v9  ;;  %v2970_v53 = vsel %vm15053_vm1, %v2171_v34, %v2785_v52  ;;  %v15089_v9 = vld [vmem:[#allocation83_spill] sm:$0xff]  ;;  %v15097_v52 = vld [vmem:[#allocation19_spill] sm:$0xff] }
 0x229   : >> { %v10840_v5 = vpop.permute.xlu0 %2840  ;;  %v3038_v51 = vsel %vm15053_vm1, %v2397_v20, %v2835_v23  ;;  %v2145_v37 = vsel %vm15090_vm4, %v15089_v9, 0.0  ;;  %v15098_v45 = vmov %v15097_v52  ;;  %vm15099_vm3 = vcmp.lt.s32.totalorder %v15097_v52, 7  ;;  %v15101_v20 = vld [vmem:[#allocation70_spill] sm:$0xff] }
 0x22a   : >> { %v2873_v24 = vpop.permute.xlu1 %2872  ;;  %v2373_v34 = vsel %vm15099_vm3, %v15096_v12, 0.0  ;;  %vm15104_vm4 = vcmp.ge.s32.totalorder %v15095_v63, 1  ;;  %vm15106_vm2 = vcmp.ge.s32.totalorder %v15098_v45, 1  ;;  %vm15111_vm3 = vcmp.ge.s32.totalorder %v15062_v32, 1 }
 0x22b   : >> { %v3082_v7 = vsel %vm15053_vm1, %v2456_v0, %v2873_v24  ;;  %v2372_v0 = vsel %vm2308_vm0, %v15093_v35, 0.0  ;;  %v2457_v24 = vpack.c.bf16 %v15101_v20, %v15100_v3 }
 0x22c   : >> { %3672 = vmatmul.mubr.bf16.vlgmr.msra.gmra.mrb[0].mxu1 %v3082_v7  ;;  %v2172_v7 = vpack.c.bf16 %v2146_v39, %v2145_v37  ;;  %v2398_v52 = vpack.c.bf16 %v2373_v34, %v2372_v0  ;;  %v15103_v39 = vld [vmem:[#allocation84_spill] sm:$0xff] }
 0x22d   : >> { %v10844_v22 = vpop.permute.xlu0 %2792  ;;  %v2147_v59 = vsel %vm15104_vm4, %v15103_v39, 0.0  ;;  %v15107_v34 = vld [vmem:[#allocation116_spill] sm:$0xff]  ;;  %vm15115_vm4 = vcmp.ge.s32.totalorder %v14956_v50, 1 }
 0x22e   : >> { %v2923_v21 = vpop.permute.xlu1 %2922  ;;  %v2974_v20 = vsel %vm15053_vm1, %v2172_v7, %v2787_v58  ;;  %v3042_v37 = vsel %vm15053_vm1, %v2398_v52, %v2837_v30  ;;  %v2375_v58 = vsel %vm2311_vm6, %v10546_v6, 0.0  ;;  %v15109_v7 = vld [vmem:[#allocation68_spill] sm:$0xff] }
 0x22f   : >> { %3543 = vmatmul.mubr.bf16.gmra.mrb[16].mxu0 %v2970_v53  ;;  %v3150_v23 = vsel %vm15053_vm1, %v2617_v11, %v2923_v21  ;;  %v2618_v21 = vpack.c.bf16 %v2589_v8, %v2588_v29  ;;  %v2374_v29 = vsel %vm2310_vm5, %v15107_v34, 0.0 }
 0x230   : >> { %3550 = vmatprep.mubr.bf16.mxu0 %v3038_v51  ;;  %3679 = vmatprep.mubr.bf16.mxu1 %v3150_v23  ;;  %v15105_v23 = vld [vmem:[#allocation86_spill] sm:$0xff]  ;;  %v2399_v34 = vpack.c.bf16 %v2375_v58, %v2374_v29 }
 0x231   : >> { %v10868_v35 = vpop.permute.xlu0 %2842  ;;  %v2148_v38 = vsel %vm15106_vm2, %v15105_v23, 0.0  ;;  %vm15116_vm2 = vcmp.lt.s32.totalorder %v14961_v16, 7 }
 0x232   : >> { %v2875_v53 = vpop.permute.xlu1 %2874  ;;  %v2173_v52 = vpack.c.bf16 %v2148_v38, %v2147_v59  ;;  %v15112_v59 = vld [vmem:[#allocation87_spill] sm:$0xff]  ;;  %v2377_v58 = vsel %vm15116_vm2, %v10577_v44, 0.0  ;;  %vm15125_vm2 = vcmp.lt.s32.totalorder %v14966_v15, 7 }
 0x233   : >> { %v3086_v11 = vsel %vm15053_vm1, %v2457_v24, %v2875_v53  ;;  %v15108_v24 = vld [vmem:[#allocation69_spill] sm:$0xff]  ;;  %v15110_v53 = vld [vmem:[#allocation80_spill] sm:$0xff]  ;;  %v2149_v38 = vsel %vm15113_vm15, %v15112_v59, 0.0  ;;  %vm15122_vm15 = vcmp.ge.s32.totalorder %v15074_v46, 1  ;;  %v2400_v44 = vpack.c.bf16 %v2377_v58, %v14941_v19 }
 0x234   : >> { %3680 = vmatmul.mubr.bf16.gmra.mrb[4].mxu1 %v3086_v11  ;;  %v2458_v8 = vpack.c.bf16 %v15109_v7, %v15108_v24  ;;  %v2590_v11 = vsel %vm15111_vm3, %v15110_v53, 0.0  ;;  %v2593_v7 = vsel %vm15122_vm15, %v15091_v57, 0.0  ;;  %v15127_v58 = vld [vmem:[#allocation65_spill] sm:$0xff]  ;;  %vm15129_vm15 = vcmp.ge.s32.totalorder %v15082_v62, 1 }
 0x235   : >> { %v10872_v51 = vpop.permute.xlu0 %2794 }
 0x236   : >> { %v2925_v0 = vpop.permute.xlu1 %2924 }
 0x237   : >> { %3551 = vmatmul.mubr.bf16.gmra.mrb[20].mxu0 %v2974_v20  ;;  %v3154_v30 = vsel %vm15053_vm1, %v2618_v21, %v2925_v0  ;;  %v2619_v20 = vpack.c.bf16 %v14941_v19, %v2590_v11  ;;  %v2978_v21 = vsel %vm15053_vm1, %v2173_v52, %v10803_v17  ;;  %v15117_v17 = vld [vmem:[#allocation67_spill] sm:$0xff] }
 0x238   : >> { %3558 = vmatprep.mubr.bf16.mxu0 %v3042_v37  ;;  %3687 = vmatprep.mubr.bf16.mxu1 %v3154_v30  ;;  %v3046_v37 = vsel %vm15053_vm1, %v2399_v34, %v10818_v54  ;;  %v15114_v30 = vld [vmem:[#allocation89_spill] sm:$0xff]  ;;  %v15119_v34 = vld [vmem:[#allocation14_spill] sm:$0xff] }
 0x239   : >> { %v10893_v3 = vpop.permute.xlu0 %2844  ;;  %v2150_v29 = vsel %vm15115_vm4, %v15114_v30, 0.0  ;;  %v15120_v53 = vmov %v15119_v34  ;;  %vm15121_vm3 = vcmp.ge.s32.totalorder %v15119_v34, 1  ;;  %vm15124_vm4 = vcmp.ge.s32.totalorder %v14961_v16, 1 }
 0x23a   : >> { %v2877_v12 = vpop.permute.xlu1 %2876  ;;  %v2174_v54 = vpack.c.bf16 %v2150_v29, %v2149_v38  ;;  %v2592_v11 = vsel %vm15121_vm3, %v15089_v9, 0.0  ;;  %v3050_v9 = vsel %vm15053_vm1, %v2400_v44, %v10840_v5  ;;  %v15123_v38 = vld [vmem:[#allocation90_spill] sm:$0xff]  ;;  %vm15126_vm3 = vcmp.lt.s32.totalorder %v14967_v41, 7 }
 0x23b   : >> { %v3090_v26 = vsel %vm15053_vm1, %v2458_v8, %v2877_v12  ;;  %v2152_v57 = vsel %vm15124_vm4, %v15123_v38, 0.0  ;;  %vm15130_vm4 = vcmp.ge.s32.totalorder %v15086_v10, 1  ;;  %v15131_v38 = vld [vmem:[#allocation92_spill] sm:$0xff] }
 0x23c   : >> { %3688 = vmatmul.mubr.bf16.gmra.mrb[8].mxu1 %v3090_v26  ;;  %v15118_v26 = vld [vmem:[#allocation66_spill] sm:$0xff]  ;;  %v2175_v5 = vpack.c.bf16 %v2152_v57, %v14941_v19  ;;  %v15133_v57 = vld [vmem:[#allocation95_spill] sm:$0xff] }
 0x23d   : >> { %v10899_v0 = vpop.permute.xlu0 %2796  ;;  %v2459_v8 = vpack.c.bf16 %v15118_v26, %v15117_v17  ;;  %v2620_v17 = vpack.c.bf16 %v2593_v7, %v2592_v11  ;;  %v2379_v7 = vsel %vm15126_vm3, %v10600_v27, 0.0  ;;  %vm15134_vm3 = vcmp.ge.s32.totalorder %v14967_v41, 1 }
 0x23e   : >> { %v2927_v12 = vpop.permute.xlu1 %2926 }
 0x23f   : >> { %3559 = vmatmul.mubr.bf16.gmra.mrb[24].mxu0 %v2978_v21  ;;  %v3158_v52 = vsel %vm15053_vm1, %v2619_v20, %v2927_v12  ;;  %v2982_v20 = vsel %vm15053_vm1, %v2174_v54, %v10815_v42  ;;  %v2378_v12 = vsel %vm15125_vm2, %v10573_v13, 0.0  ;;  %v2595_v54 = vsel %vm15130_vm4, %v15105_v23, 0.0 }
 0x240   : >> { %3566 = vmatprep.mubr.bf16.mxu0 %v3046_v37  ;;  %3695 = vmatprep.mubr.bf16.mxu1 %v3158_v52  ;;  %v2594_v52 = vsel %vm15129_vm15, %v15103_v39, 0.0  ;;  %v2401_v11 = vpack.c.bf16 %v2379_v7, %v2378_v12  ;;  %vm15132_vm2 = vcmp.ge.s32.totalorder %v14966_v15, 1  ;;  %vm15135_vm15 = vcmp.lt.s32.totalorder %v14972_v47, 7 }
 0x241   : >> { %v10921_v24 = vpop.permute.xlu0 %2846  ;;  %v2153_v23 = vsel %vm15132_vm2, %v15131_v38, 0.0  ;;  %v2380_v7 = vsel %vm15135_vm15, %v10596_v56, 0.0  ;;  %vm15136_vm4 = vcmp.lt.s32.totalorder %v14974_v36, 7  ;;  %vm15139_vm2 = vcmp.ge.s32.totalorder %v15095_v63, 1 }
 0x242   : >> { %v2879_v21 = vpop.permute.xlu1 %2878  ;;  %v3054_v39 = vsel %vm15053_vm1, %v2401_v11, %v10868_v35  ;;  %vm15142_vm15 = vcmp.ge.s32.totalorder %v14972_v47, 1 }
 0x243   : >> { %v3094_v26 = vsel %vm15053_vm1, %v2459_v8, %v2879_v21  ;;  %v2621_v21 = vpack.c.bf16 %v2595_v54, %v2594_v52  ;;  %v2596_v54 = vsel %vm15139_vm2, %v15112_v59, 0.0  ;;  %vm15145_vm2 = vcmp.lt.s32.totalorder %v14980_v2, 7 }
 0x244   : >> { %3696 = vmatmul.mubr.bf16.gmra.mrb[12].mxu1 %v3094_v26  ;;  %v15128_v26 = vld [vmem:[#allocation64_spill] sm:$0xff] }
 0x245   : >> { %v10927_v37 = vpop.permute.xlu0 %2798  ;;  %v2460_v8 = vpack.c.bf16 %v15128_v26, %v15127_v58 }
 0x246   : >> { %v2929_v29 = vpop.permute.xlu1 %2928 }
 0x247   : >> { %3567 = vmatmul.mubr.bf16.gmra.mrb[28].mxu0 %v2982_v20  ;;  %v3162_v42 = vsel %vm15053_vm1, %v2620_v17, %v2929_v29  ;;  %v2986_v20 = vsel %vm15053_vm1, %v2175_v5, %v10844_v22  ;;  %v2154_v29 = vsel %vm15134_vm3, %v15133_v57, 0.0  ;;  %v2381_v22 = vsel %vm15136_vm4, %v10618_v33, 0.0 }
 0x248   : >> { %3574 = vmatprep.mubr.bf16.mxu0 %v3050_v9  ;;  %3703 = vmatprep.mubr.bf16.mxu1 %v3162_v42  ;;  %v15137_v42 = vld [vmem:[#allocation63_spill] sm:$0xff]  ;;  %v2176_v52 = vpack.c.bf16 %v2154_v29, %v2153_v23  ;;  %vm15140_vm3 = vcmp.ge.s32.totalorder %v15098_v45, 1  ;;  %v15141_v29 = vld [vmem:[#allocation94_spill] sm:$0xff]  ;;  %vm15144_vm4 = vcmp.ge.s32.totalorder %v14974_v36, 1 }
 0x249   : >> { %v10950_v34 = vpop.permute.xlu0 %2848  ;;  %v2597_v11 = vsel %vm15140_vm3, %v15114_v30, 0.0  ;;  %v2155_v30 = vsel %vm15142_vm15, %v15141_v29, 0.0  ;;  %vm15146_vm3 = vcmp.lt.s32.totalorder %v14981_v49, 7  ;;  %vm15150_vm15 = vcmp.ge.s32.totalorder %v15032_v31, 1 }
 0x24a   : >> { %v2881_v44 = vpop.permute.xlu1 %2880 }
 0x24b   : >> { %v3098_v17 = vsel %vm15053_vm1, %v2460_v8, %v2881_v44  ;;  %v15138_v8 = vld [vmem:[#allocation62_spill] sm:$0xff] }
 0x24c   : >> { %3704 = vmatmul.mubr.bf16.gmra.mrb[16].mxu1 %v3098_v17  ;;  %v2461_v5 = vpack.c.bf16 %v15138_v8, %v15137_v42  ;;  %v2402_v17 = vpack.c.bf16 %v2381_v22, %v2380_v7 }
 0x24d   : >> { %v10955_v9 = vpop.permute.xlu0 %2800 }
 0x24e   : >> { %v2931_v12 = vpop.permute.xlu1 %2930  ;;  %v3058_v59 = vsel %vm15053_vm1, %v2402_v17, %v10893_v3 }
 0x24f   : >> { %3575 = vmatmul.mubr.bf16.gmra.mrb[32].mxu0 %v2986_v20  ;;  %v3166_v35 = vsel %vm15053_vm1, %v2621_v21, %v2931_v12  ;;  %v2622_v12 = vpack.c.bf16 %v2597_v11, %v2596_v54  ;;  %v15148_v54 = vld [vmem:[#allocation60_spill] sm:$0xff] }
 0x250   : >> { %3582 = vmatprep.mubr.bf16.mxu0 %v3054_v39  ;;  %3711 = vmatprep.mubr.bf16.mxu1 %v3166_v35  ;;  %v2990_v39 = vsel %vm15053_vm1, %v2176_v52, %v10872_v51  ;;  %v15143_v35 = vld [vmem:[#allocation98_spill] sm:$0xff]  ;;  %v2383_v51 = vsel %vm15146_vm3, %v10645_v25, 0.0  ;;  %v15147_v52 = vld [vmem:[#allocation61_spill] sm:$0xff]  ;;  %vm15155_vm3 = vcmp.lt.s32.totalorder %v14989_v43, 7 }
 0x251   : >> { %v10980_v44 = vpop.permute.xlu0 %2850  ;;  %v2156_v7 = vsel %vm15144_vm4, %v15143_v35, 0.0  ;;  %v2462_v11 = vpack.c.bf16 %v15148_v54, %v15147_v52  ;;  %vm15152_vm4 = vcmp.ge.s32.totalorder %v14980_v2, 1 }
 0x252   : >> { %v2883_v20 = vpop.permute.xlu1 %2882  ;;  %v2177_v17 = vpack.c.bf16 %v2156_v7, %v2155_v30  ;;  %v15153_v30 = vld [vmem:[#allocation103_spill] sm:$0xff] }
 0x253   : >> { %v3102_v21 = vsel %vm15053_vm1, %v2461_v5, %v2883_v20  ;;  %v2382_v5 = vsel %vm15145_vm2, %v10623_v18, 0.0  ;;  %v15149_v20 = vld [vmem:[#allocation88_spill] sm:$0xff]  ;;  %vm15154_vm2 = vcmp.ge.s32.totalorder %v14981_v49, 1 }
 0x254   : >> { %3712 = vmatmul.mubr.bf16.gmra.mrb[20].mxu1 %v3102_v21  ;;  %v2598_v21 = vsel %vm15150_vm15, %v15149_v20, 0.0  ;;  %v2403_v42 = vpack.c.bf16 %v2383_v51, %v2382_v5  ;;  %v2158_v7 = vsel %vm15154_vm2, %v15153_v30, 0.0  ;;  %vm15157_vm15 = vcmp.ge.s32.totalorder %v14959_v55, 1 }
 0x255   : >> { %v10985_v23 = vpop.permute.xlu0 %2802  ;;  %vm15160_vm2 = vcmp.ge.s32.totalorder %v14989_v43, 1 }
 0x256   : >> { %v2933_v22 = vpop.permute.xlu1 %2932  ;;  %v3062_v5 = vsel %vm15053_vm1, %v2403_v42, %v10921_v24 }
 0x257   : >> { %3583 = vmatmul.mubr.bf16.gmra.mrb[36].mxu0 %v2990_v39  ;;  %v3170_v3 = vsel %vm15053_vm1, %v2622_v12, %v2933_v22  ;;  %v2623_v39 = vpack.c.bf16 %v14941_v19, %v2598_v21  ;;  %v2994_v12 = vsel %vm15053_vm1, %v2177_v17, %v10899_v0  ;;  %v15151_v22 = vld [vmem:[#allocation99_spill] sm:$0xff] }
 0x258   : >> { %3590 = vmatprep.mubr.bf16.mxu0 %v3058_v59  ;;  %3719 = vmatprep.mubr.bf16.mxu1 %v3170_v3  ;;  %v2157_v59 = vsel %vm15152_vm4, %v15151_v22, 0.0  ;;  %vm15158_vm4 = vcmp.ge.s32.totalorder %v14961_v16, 1 }
 0x259   : >> { %v11007_v8 = vpop.permute.xlu0 %2852  ;;  %v2178_v17 = vpack.c.bf16 %v2158_v7, %v2157_v59  ;;  %v2601_v42 = vsel %vm15158_vm4, %v15133_v57, 0.0  ;;  %v15159_v59 = vld [vmem:[#allocation107_spill] sm:$0xff]  ;;  %v2386_v57 = vsel %vm2322_vm13, %v10662_v61, 0.0  ;;  %vm15167_vm4 = vcmp.ge.s32.totalorder %v14972_v47, 1 }
 0x25a   : >> { %v2885_v26 = vpop.permute.xlu1 %2884  ;;  %v2160_v7 = vsel %vm15160_vm2, %v15159_v59, 0.0  ;;  %vm15168_vm2 = vcmp.ge.s32.totalorder %v14974_v36, 1 }
 0x25b   : >> { %v3106_v58 = vsel %vm15053_vm1, %v2462_v11, %v2885_v26  ;;  %v2385_v26 = vsel %vm15155_vm3, %v10666_v1, 0.0  ;;  %v2600_v1 = vsel %vm15157_vm15, %v15131_v38, 0.0  ;;  %vm15165_vm3 = vcmp.ge.s32.totalorder %v14966_v15, 1 }
 0x25c   : >> { %3720 = vmatmul.mubr.bf16.gmra.mrb[24].mxu1 %v3106_v58  ;;  %v15156_v58 = vld [vmem:[#allocation59_spill] sm:$0xff]  ;;  %v2404_v20 = vpack.c.bf16 %v2385_v26, %v14941_v19  ;;  %v15162_v26 = vld [vmem:[#allocation32_spill] sm:$0xff]  ;;  %vm15166_vm15 = vcmp.ge.s32.totalorder %v14967_v41, 1 }
 0x25d   : >> { %v11019_v3 = vpop.permute.xlu0 %2804  ;;  %v2463_v11 = vpack.c.bf16 %v15026_v60, %v15156_v58 }
 0x25e   : >> { %v2935_v51 = vpop.permute.xlu1 %2934 }
 0x25f   : >> { %3591 = vmatmul.mubr.bf16.gmra.mrb[40].mxu0 %v2994_v12  ;;  %v3174_v0 = vsel %vm15053_vm1, %v2623_v39, %v2935_v51  ;;  %v2998_v39 = vsel %vm15053_vm1, %v2178_v17, %v10927_v37  ;;  %v3066_v12 = vsel %vm15053_vm1, %v2404_v20, %v10950_v34  ;;  %v15163_v51 = vld [vmem:[#allocation33_spill] sm:$0xff]  ;;  %v2387_v37 = vsel %vm2323_vm12, %v10687_v14, 0.0 }
 0x260   : >> { %3598 = vmatprep.mubr.bf16.mxu0 %v3062_v5  ;;  %3727 = vmatprep.mubr.bf16.mxu1 %v3174_v0  ;;  %v15161_v5 = vld [vmem:[#allocation57_spill] sm:$0xff]  ;;  %v2624_v0 = vpack.c.bf16 %v2601_v42, %v2600_v1  ;;  %v2602_v34 = vsel %vm15165_vm3, %v15141_v29, 0.0  ;;  %v2603_v20 = vsel %vm15166_vm15, %v15143_v35, 0.0  ;;  %v2405_v59 = vpack.c.bf16 %v2387_v37, %v2386_v57  ;;  %v15173_v57 = vld [vmem:[#allocation54_spill] sm:$0xff] }
 0x261   : >> { %v11030_v21 = vpop.permute.xlu0 %2854  ;;  %v2464_v38 = vpack.c.bf16 %v8734_v48, %v15161_v5  ;;  %v2625_v1 = vpack.c.bf16 %v2603_v20, %v2602_v34  ;;  %v2604_v42 = vsel %vm15167_vm4, %v15151_v22, 0.0  ;;  %v2605_v29 = vsel %vm15168_vm2, %v15153_v30, 0.0  ;;  %v15174_v30 = vld [vmem:[#allocation123_spill] sm:$0xff] }
 0x262   : >> { %v2887_v54 = vpop.permute.xlu1 %2886  ;;  %vm15170_vm3 = vcmp.ge.s32.totalorder %v15162_v26, 1  ;;  %v2465_v37 = vpack.c.bf16 %v15173_v57, %v8730_v4  ;;  %vm15181_vm4 = vcmp.ge.s32.totalorder %v14980_v2, 1 }
 0x263   : >> { %v3110_v24 = vsel %vm15053_vm1, %v2463_v11, %v2887_v54  ;;  %v15164_v11 = vmov %v15163_v51 }
 0x264   : >> { %3728 = vmatmul.mubr.bf16.gmra.mrb[28].mxu1 %v3110_v24  ;;  %v2179_v24 = vpack.c.bf16 %v2160_v7, %v14941_v19  ;;  %v15171_v7 = vld [vmem:[#allocation111_spill] sm:$0xff]  ;;  %vm15172_vm15 = vcmp.ge.s32.totalorder %v15164_v11, 1 }
 0x265   : >> { %v11046_v54 = vpop.permute.xlu0 %2806 }
 0x266   : >> { %v2889_v17 = vpop.permute.xlu1 %2888  ;;  %v3002_v35 = vsel %vm15053_vm1, %v2179_v24, %v10955_v9  ;;  %v2388_v9 = vsel %vm14647_vm9, %v15174_v30, 0.0  ;;  %v2626_v24 = vpack.c.bf16 %v2605_v29, %v2604_v42  ;;  %v15182_v42 = vld [vmem:[#allocation110_spill] sm:$0xff] }
 0x267   : >> { %3599 = vmatmul.mubr.bf16.gmra.mrb[44].mxu0 %v2998_v39  ;;  %v3114_v5 = vsel %vm15053_vm1, %v2464_v38, %v2889_v17  ;;  %v3070_v39 = vsel %vm15053_vm1, %v2405_v59, %v10980_v44  ;;  %v2162_v38 = vsel %vm15172_vm15, %v15171_v7, 0.0  ;;  %v15178_v17 = vld [vmem:[#allocation35_spill] sm:$0xff] }
 0x268   : >> { %3606 = vmatprep.mubr.bf16.mxu0 %v3066_v12  ;;  %v15169_v12 = vld [vmem:[#allocation106_spill] sm:$0xff]  ;;  %v15179_v50 = vmov %v15178_v17 }
 0x269   : >> { %v2937_v48 = vpop.permute.xlu0 %2936 }
 0x26a   : >> { %v3178_v51 = vsel %vm15053_vm1, %v2624_v0, %v2937_v48  ;;  %v2161_v48 = vsel %vm15170_vm3, %v15169_v12, 0.0  ;;  %v15175_v0 = vld [vmem:[#allocation34_spill] sm:$0xff]  ;;  %v2891_v20 = vpop.permute.xlu1 %2890  ;;  %vm15185_vm3 = vcmp.ge.s32.totalorder %v15179_v50, 1 }
 0x26b   : >> { %3735 = vmatprep.mubr.bf16.mxu1 %v3178_v51  ;;  %v15176_v49 = vmov %v15175_v0  ;;  %v2180_v59 = vpack.c.bf16 %v2162_v38, %v2161_v48  ;;  %v3118_v60 = vsel %vm15053_vm1, %v2465_v37, %v2891_v20  ;;  %v15180_v0 = vld [vmem:[#allocation102_spill] sm:$0xff]  ;;  %v15186_v48 = vld [vmem:[#allocation53_spill] sm:$0xff]  ;;  %v15187_v38 = vld [vmem:[#allocation52_spill] sm:$0xff] }
 0x26c   : >> { %3736 = vmatmul.mubr.bf16.gmra.mrb[32].mxu1 %v3114_v5  ;;  %v15177_v5 = vld [vmem:[#allocation125_spill] sm:$0xff]  ;;  %v2606_v58 = vsel %vm15181_vm4, %v15180_v0, 0.0  ;;  %vm15183_vm2 = vcmp.ge.s32.totalorder %v15176_v49, 1  ;;  %v15189_v37 = vld [vmem:[#allocation36_spill] sm:$0xff]  ;;  %v15195_v0 = vld [vmem:[#allocation30_spill] sm:$0xff] }
 0x26d   : >> { %v2939_v22 = vpop.permute.xlu0 %2938  ;;  %v2389_v44 = vsel %vm14646_vm14, %v15177_v5, 0.0  ;;  %v3006_v17 = vsel %vm15053_vm1, %v2180_v59, %v10985_v23  ;;  %v2163_v29 = vsel %vm15183_vm2, %v15182_v42, 0.0  ;;  %vm15190_vm15 = vcmp.lt.s32.totalorder %v15189_v37, 7 }
 0x26e   : >> { %v3182_v34 = vsel %vm15053_vm1, %v2625_v1, %v2939_v22  ;;  %v2406_v51 = vpack.c.bf16 %v2389_v44, %v2388_v9  ;;  %v2466_v22 = vpack.c.bf16 %v15187_v38, %v15186_v48  ;;  %v15192_v9 = vld [vmem:[#allocation37_spill] sm:$0xff]  ;;  %v2893_v44 = vpop.permute.xlu1 %2892  ;;  %v15196_v2 = vmov %v15195_v0 }
 0x26f   : >> { %3607 = vmatmul.mubr.bf16.gmra.mrb[48].mxu0 %v3002_v35  ;;  %3743 = vmatprep.mubr.bf16.mxu1 %v3182_v34  ;;  %v15184_v35 = vld [vmem:[#allocation115_spill] sm:$0xff]  ;;  %v15193_v5 = vmov %v15192_v9  ;;  %vm15194_vm4 = vcmp.lt.s32.totalorder %v15192_v9, 7  ;;  %v2627_v34 = vpack.c.bf16 %v14941_v19, %v2606_v58  ;;  %vm15197_vm2 = vcmp.ge.s32.totalorder %v15195_v0, 1  ;;  %v15210_v0 = vld [vmem:[#allocation7_spill] sm:$0xff] }
 0x270   : >> { %3614 = vmatprep.mubr.bf16.mxu0 %v3070_v39  ;;  %v3074_v1 = vsel %vm15053_vm1, %v2406_v51, %v11007_v8  ;;  %v2164_v39 = vsel %vm15185_vm3, %v15184_v35, 0.0  ;;  %v3122_v51 = vsel %vm15053_vm1, %v2466_v22, %v2893_v44  ;;  %v2608_v38 = vsel %vm15197_vm2, %v15169_v12, 0.0  ;;  %v15203_v12 = vld [vmem:[#allocation51_spill] sm:$0xff] }
 0x271   : >> { %v2941_v57 = vpop.permute.xlu0 %2940  ;;  %vm15198_vm3 = vcmp.ge.s32.totalorder %v14989_v43, 1  ;;  %v15211_v43 = vmov %v15210_v0 }
 0x272   : >> { %v3186_v4 = vsel %vm15053_vm1, %v2626_v24, %v2941_v57  ;;  %v15188_v57 = vld [vmem:[#allocation124_spill] sm:$0xff]  ;;  %v2181_v24 = vpack.c.bf16 %v2164_v39, %v2163_v29  ;;  %v2609_v9 = vsel %vm15198_vm3, %v15171_v7, 0.0  ;;  %v2895_v7 = vpop.permute.xlu1 %2894  ;;  %vm15212_vm3 = vcmp.lt.s32.totalorder %v15210_v0, 7 }
 0x273   : >> { %v2390_v23 = vsel %vm15190_vm15, %v15188_v57, 0.0  ;;  %vm15200_vm15 = vcmp.ge.s32.totalorder %v15189_v37, 1  ;;  %v15201_v39 = vld [vmem:[#allocation120_spill] sm:$0xff]  ;;  %v2628_v44 = vpack.c.bf16 %v2609_v9, %v2608_v38 }
 0x274   : >> { %3744 = vmatmul.mubr.bf16.gmra.mrb[36].mxu1 %v3118_v60  ;;  %v15191_v60 = vld [vmem:[#allocation77_spill] sm:$0xff]  ;;  %v3010_v58 = vsel %vm15053_vm1, %v2181_v24, %v11019_v3  ;;  %v15206_v24 = vld [vmem:[#allocation6_spill] sm:$0xff] }
 0x275   : >> { %3751 = vmatprep.mubr.bf16.mxu1 %v3186_v4  ;;  %v2391_v8 = vsel %vm15194_vm4, %v15191_v60, 0.0  ;;  %v2943_v20 = vpop.permute.xlu0 %2942  ;;  %vm15202_vm4 = vcmp.ge.s32.totalorder %v15193_v5, 1  ;;  %v15207_v57 = vmov %v15206_v24  ;;  %vm15208_vm2 = vcmp.lt.s32.totalorder %v15206_v24, 7  ;;  %v15223_v24 = vld [vmem:[#allocation47_spill] sm:$0xff] }
 0x276   : >> { %v2407_v59 = vpack.c.bf16 %v2391_v8, %v2390_v23  ;;  %v3190_v4 = vsel %vm15053_vm1, %v2627_v34, %v2943_v20  ;;  %v2166_v22 = vsel %vm15202_vm4, %v15201_v39, 0.0  ;;  %v15204_v23 = vld [vmem:[#allocation50_spill] sm:$0xff]  ;;  %v15205_v20 = vld [vmem:[#allocation93_spill] sm:$0xff]  ;;  %vm15214_vm4 = vcmp.ge.s32.totalorder %v15164_v11, 1 }
 0x277   : >> { %3615 = vmatmul.mubr.bf16.gmra.mrb[52].mxu0 %v3006_v17  ;;  %v2467_v8 = vpack.c.bf16 %v15204_v23, %v15203_v12 }
 0x278   : >> { %3622 = vmatprep.mubr.bf16.mxu0 %v3074_v1  ;;  %v3078_v17 = vsel %vm15053_vm1, %v2407_v59, %v11030_v21  ;;  %v15199_v1 = vld [vmem:[#allocation114_spill] sm:$0xff]  ;;  %v2712_v59 = vsel %vm15208_vm2, %v15205_v20, 0.0  ;;  %vm15218_vm2 = vcmp.lt.s32.totalorder %v14933_v28, 7  ;;  %v15219_v20 = vld [vmem:[#allocation105_spill] sm:$0xff] }
 0x279   : >> { %v2165_v29 = vsel %vm15200_vm15, %v15199_v1, 0.0  ;;  %v2945_v3 = vpop.permute.xlu0 %2944  ;;  %v3126_v21 = vsel %vm15053_vm1, %v2467_v8, %v2895_v7  ;;  %vm15213_vm15 = vcmp.ge.s32.totalorder %v15162_v26, 1  ;;  %v2897_v8 = vpop.permute.xlu1 %2896 }
 0x27a   : >> { %v2182_v34 = vpack.c.bf16 %v2166_v22, %v2165_v29  ;;  %v3194_v52 = vsel %vm15053_vm1, %v2628_v44, %v2945_v3  ;;  %v2610_v38 = vsel %vm15213_vm15, %v15182_v42, 0.0  ;;  %v15216_v29 = vld [vmem:[#allocation48_spill] sm:$0xff]  ;;  %vm15221_vm15 = vcmp.ge.s32.totalorder %v15176_v49, 1 }
 0x27b   : >> { %v15217_v3 = vld [vmem:[#allocation100_spill] sm:$0xff] }
 0x27c   : >> { %3752 = vmatmul.mubr.bf16.gmra.mrb[40].mxu1 %v3122_v51  ;;  %v15209_v51 = vld [vmem:[#allocation96_spill] sm:$0xff]  ;;  %v3014_v9 = vsel %vm15053_vm1, %v2182_v34, %v11046_v54 }
 0x27d   : >> { %3759 = vmatprep.mubr.bf16.mxu1 %v3190_v4  ;;  %v2713_v48 = vsel %vm15212_vm3, %v15209_v51, 0.0  ;;  %v2611_v4 = vsel %vm15214_vm4, %v15184_v35, 0.0  ;;  %v2947_v44 = vpop.permute.xlu0 %2946  ;;  %v2716_v35 = vsel %vm15218_vm2, %v15217_v3, 0.0  ;;  %vm15220_vm3 = vcmp.lt.s32.totalorder %v14934_v40, 7  ;;  %v2899_v0 = vpop.permute.xlu1 %2898 }
 0x27e   : >> { %v2629_v7 = vpack.c.bf16 %v2611_v4, %v2610_v38  ;;  %v2717_v54 = vsel %vm15220_vm3, %v15219_v20, 0.0  ;;  %vm15222_vm4 = vcmp.ge.s32.totalorder %v15179_v50, 1  ;;  %v15225_v4 = vld [vmem:[#allocation101_spill] sm:$0xff]  ;;  %vm15229_vm2 = vcmp.lt.s32.totalorder %v15062_v32, 7 }
 0x27f   : >> { %3623 = vmatmul.mubr.bf16.gmra.mrb[56].mxu0 %v3010_v58  ;;  %v2744_v58 = vpack.c.bf16 %v2713_v48, %v2712_v59  ;;  %v2613_v34 = vsel %vm15222_vm4, %v15201_v39, 0.0  ;;  %v15224_v59 = vld [vmem:[#allocation46_spill] sm:$0xff]  ;;  %vm15231_vm3 = vcmp.lt.s32.totalorder %v15120_v53, 7  ;;  %vm15235_vm4 = vcmp.ge.s32.totalorder %v15189_v37, 1 }
 0x280   : >> { %3630 = vmatprep.mubr.bf16.mxu0 %v3078_v17  ;;  %v15215_v17 = vld [vmem:[#allocation49_spill] sm:$0xff]  ;;  %v3198_v48 = vsel %vm15053_vm1, %v2629_v7, %v2947_v44  ;;  %v2469_v51 = vpack.c.bf16 %v15224_v59, %v15223_v24  ;;  %v15230_v7 = vld [vmem:[#allocation108_spill] sm:$0xff] }
 0x281   : >> { %v2468_v22 = vpack.c.bf16 %v15216_v29, %v15215_v17  ;;  %v2720_v44 = vsel %vm15231_vm3, %v15230_v7, 0.0  ;;  %vm15241_vm3 = vcmp.lt.s32.totalorder %v15086_v10, 7 }
 0x283   : >> { %v3130_v42 = vsel %vm15053_vm1, %v2468_v22, %v2897_v8  ;;  %v2949_v22 = vpop.permute.xlu0 %2948  ;;  %v3134_v8 = vsel %vm15053_vm1, %v2469_v51, %v2899_v0  ;;  %v2901_v0 = vpop.permute.xlu1 %2900 }
 0x284   : >> { %3760 = vmatmul.mubr.bf16.gmra.mrb[44].mxu1 %v3126_v21  ;;  %v2746_v21 = vpack.c.bf16 %v2717_v54, %v2716_v35  ;;  %v15234_v54 = vld [vmem:[#allocation119_spill] sm:$0xff] }
 0x285   : >> { %3767 = vmatprep.mubr.bf16.mxu1 %v3194_v52  ;;  %v2612_v52 = vsel %vm15221_vm15, %v15199_v1, 0.0  ;;  %v15228_v1 = vld [vmem:[#allocation104_spill] sm:$0xff]  ;;  %vm15233_vm15 = vcmp.lt.s32.totalorder %v15074_v46, 7 }
 0x286   : >> { %v2630_v38 = vpack.c.bf16 %v2613_v34, %v2612_v52  ;;  %v2718_v39 = vsel %vm15229_vm2, %v15228_v1, 0.0  ;;  %v15236_v34 = vld [vmem:[#allocation45_spill] sm:$0xff]  ;;  %vm15239_vm2 = vcmp.lt.s32.totalorder %v15082_v62, 7 }
 0x287   : >> { %3631 = vmatmul.mubr.bf16.gmra.mrb[60].mxu0 %v3014_v9  ;;  %v15226_v9 = vld [vmem:[#allocation97_spill] sm:$0xff]  ;;  %v2747_v20 = vpack.c.bf16 %v14941_v19, %v2718_v39 }
 0x288   : >> { %7947 = vmatprep.mubr.msk.bf16.mxu0 %vm15053_vm1, %v2744_v58  ;;  %v15227_v58 = vpack.c.bf16 %v15225_v4, %v15226_v9  ;;  %v3202_v35 = vsel %vm15053_vm1, %v2630_v38, %v2949_v22  ;;  %v2951_v9 = vpop.permute.xlu0 %2950  ;;  %v15238_v38 = vld [vmem:[#allocation112_spill] sm:$0xff]  ;;  %v15240_v22 = vld [vmem:[#allocation117_spill] sm:$0xff] }
 0x289   : >> { %v2723_v1 = vsel %vm15241_vm3, %v15240_v22, 0.0  ;;  %vm15249_vm3 = vcmp.lt.s32.totalorder %v14966_v15, 7 }
 0x28a   : >> { %v2730_v22 = vsel %vm15249_vm3, %v10596_v56, 0.0  ;;  %v15254_v56 = vld [vmem:[#allocation28_spill] sm:$0xff] }
 0x28b   : >> { %vm15255_vm3 = vcmp.lt.s32.totalorder %v15254_v56, 7 }
 0x28c   : >> { %3768 = vmatmul.mubr.bf16.gmra.mrb[48].mxu1 %v3130_v42  ;;  %v15232_v42 = vld [vmem:[#allocation113_spill] sm:$0xff] }
 0x28d   : >> { %3775 = vmatprep.mubr.bf16.mxu1 %v3198_v48  ;;  %v2721_v3 = vsel %vm15233_vm15, %v15232_v42, 0.0  ;;  %v2614_v48 = vsel %vm15235_vm4, %v15234_v54, 0.0  ;;  %vm15243_vm15 = vcmp.lt.s32.totalorder %v15098_v45, 7  ;;  %v15245_v54 = vld [vmem:[#allocation42_spill] sm:$0xff]  ;;  %vm15247_vm4 = vcmp.lt.s32.totalorder %v14959_v55, 7 }
 0x28e   : >> { %v2748_v52 = vpack.c.bf16 %v2721_v3, %v2720_v44  ;;  %v2631_v4 = vpack.c.bf16 %v14941_v19, %v2614_v48  ;;  %v2725_v44 = vsel %vm15243_vm15, %v10546_v6, 0.0  ;;  %vm15250_vm15 = vcmp.lt.s32.totalorder %v14967_v41, 7  ;;  %v8425_v41 = vld [vmem:[%s9967_s13 + $0x120] sm:$0xff]  }
 0x28f   : >> { %7948 = vmatmul.mubr.msk.bf16.vlgmr.msra.gmra.mrb[64].mxu0 %vm15053_vm1, %v15227_v58  ;;  %v2722_v58 = vsel %vm15239_vm2, %v15238_v38, 0.0  ;;  %vm15248_vm2 = vcmp.lt.s32.totalorder %v14961_v16, 7 }
 0x290   : >> { %7951 = vmatprep.mubr.msk.bf16.mxu0 %vm15053_vm1, %v2746_v21  ;;  %v15237_v21 = vld [vmem:[#allocation44_spill] sm:$0xff]  ;;  %v3206_v42 = vsel %vm15053_vm1, %v2631_v4, %v2951_v9  ;;  %v2749_v3 = vpack.c.bf16 %v2723_v1, %v2722_v58  ;;  %v2728_v4 = vsel %vm15247_vm4, %v10573_v13, 0.0  ;;  %v2729_v9 = vsel %vm15248_vm2, %v10600_v27, 0.0 }
 0x291   : >> { %v2470_v51 = vpack.c.bf16 %v15237_v21, %v15236_v34  ;;  %v2752_v58 = vpack.c.bf16 %v2729_v9, %v2728_v4  ;;  %v2731_v13 = vsel %vm15250_vm15, %v10618_v33, 0.0  ;;  %vm15251_vm4 = vcmp.lt.s32.totalorder %v14972_v47, 7  ;;  %v15261_v9 = vld [vmem:[#allocation118_spill] sm:$0xff] }
 0x292   : >> { %v2732_v27 = vsel %vm15251_vm4, %v10623_v18, 0.0  ;;  %vm15252_vm2 = vcmp.lt.s32.totalorder %v14974_v36, 7  ;;  %vm15256_vm15 = vcmp.lt.s32.totalorder %v15196_v2, 7  ;;  %v15257_v18 = vld [vmem:[#allocation31_spill] sm:$0xff] }
 0x293   : >> { %v3138_v39 = vsel %vm15053_vm1, %v2470_v51, %v2901_v0  ;;  %v15246_v51 = vld [vmem:[#allocation121_spill] sm:$0xff]  ;;  %v2733_v1 = vsel %vm15252_vm2, %v10645_v25, 0.0  ;;  %v2736_v33 = vsel %vm15256_vm15, %v10662_v61, 0.0  ;;  %vm15258_vm4 = vcmp.lt.s32.totalorder %v15257_v18, 7  ;;  %v15260_v61 = vld [vmem:[#allocation124_spill] sm:$0xff] }
 0x294   : >> { %3776 = vmatmul.mubr.bf16.gmra.mrb[52].mxu1 %v3134_v8  ;;  %v15242_v8 = vld [vmem:[#allocation116_spill] sm:$0xff]  ;;  %v2726_v0 = vsel %vm2310_vm5, %v15246_v51, 0.0  ;;  %vm15262_vm2 = vcmp.lt.s32.totalorder %v15189_v37, 7 }
 0x295   : >> { %3783 = vmatprep.mubr.bf16.mxu1 %v3202_v35  ;;  %v2724_v7 = vsel %vm2308_vm0, %v15242_v8, 0.0  ;;  %v2751_v38 = vpack.c.bf16 %v14941_v19, %v2726_v0  ;;  %v2754_v8 = vpack.c.bf16 %v2733_v1, %v2732_v27  ;;  %v2740_v0 = vsel %vm14647_vm9, %v15260_v61, 0.0 }
 0x296   : >> { %v2750_v35 = vpack.c.bf16 %v2725_v44, %v2724_v7  ;;  %v15253_v7 = vld [vmem:[#allocation122_spill] sm:$0xff] }
 0x297   : >> { %7952 = vmatmul.mubr.msk.bf16.gmra.mrb[68].mxu0 %vm15053_vm1, %v2747_v20  ;;  %v15244_v20 = vld [vmem:[#allocation43_spill] sm:$0xff]  ;;  %v2734_v44 = vsel %vm15255_vm3, %v15253_v7, 0.0 }
 0x298   : >> { %7955 = vmatprep.mubr.msk.bf16.mxu0 %vm15053_vm1, %v2748_v52  ;;  %v2471_v48 = vpack.c.bf16 %v15245_v54, %v15244_v20  ;;  %v2903_v52 = vpop.permute.xlu1 %2902  ;;  %v2755_v25 = vpack.c.bf16 %v14941_v19, %v2734_v44 }
 0x29a   : >> { %v3142_v6 = vsel %vm15053_vm1, %v2471_v48, %v2903_v52  ;;  %v2738_v48 = vsel %vm2322_vm13, %v15174_v30, 0.0  ;;  %v15259_v52 = vld [vmem:[#allocation125_spill] sm:$0xff]  ;;  %v2742_v30 = vsel %vm15262_vm2, %v15261_v9, 0.0 }
 0x29b   : >> { %v2739_v51 = vsel %vm2323_vm12, %v15259_v52, 0.0 }
 0x29c   : >> { %3784 = vmatmul.mubr.bf16.gmra.mrb[56].mxu1 %v3138_v39  ;;  %v2753_v39 = vpack.c.bf16 %v2731_v13, %v2730_v22 }
 0x29d   : >> { %3791 = vmatprep.mubr.bf16.mxu1 %v3206_v42 }
 0x29f   : >> { %7956 = vmatmul.mubr.msk.bf16.gmra.mrb[72].mxu0 %vm15053_vm1, %v2749_v3  ;;  %v2737_v3 = vsel %vm15258_vm4, %v10687_v14, 0.0  ;;  %v2741_v14 = vsel %vm14646_vm14, %v15191_v60, 0.0 }
 0x2a0   : >> { %7959 = vmatprep.mubr.msk.bf16.mxu0 %vm15053_vm1, %v2750_v35  ;;  %v2756_v35 = vpack.c.bf16 %v2737_v3, %v2736_v33  ;;  %v2758_v4 = vpack.c.bf16 %v2741_v14, %v2740_v0 }
 0x2a4   : >> { %3792 = vmatmul.mubr.bf16.gmra.mrb[60].mxu1 %v3142_v6  ;;  %v2757_v6 = vpack.c.bf16 %v2739_v51, %v2738_v48 }
 0x2a7   : >> { %7960 = vmatmul.mubr.msk.bf16.gmra.mrb[76].mxu0 %vm15053_vm1, %v2751_v38  ;;  %v2759_v38 = vpack.c.bf16 %v14941_v19, %v2742_v30 }
 0x2a8   : >> { %7963 = vmatprep.mubr.msk.bf16.mxu0 %vm15053_vm1, %v2752_v58 }
 0x2af   : >> { %7964 = vmatmul.mubr.msk.bf16.gmra.mrb[80].mxu0 %vm15053_vm1, %v2753_v39 }
 0x2b0   : >> { %7967 = vmatprep.mubr.msk.bf16.mxu0 %vm15053_vm1, %v2754_v8 }
 0x2b7   : >> { %7968 = vmatmul.mubr.msk.bf16.gmra.mrb[84].mxu0 %vm15053_vm1, %v2755_v25 }
 0x2b8   : >> { %7971 = vmatprep.mubr.msk.bf16.mxu0 %vm15053_vm1, %v2756_v35 }
 0x2bf   : >> { %7972 = vmatmul.mubr.msk.bf16.gmra.mrb[88].mxu0 %vm15053_vm1, %v2757_v6 }
 0x2c0   : >> { %7975 = vmatprep.mubr.msk.bf16.mxu0 %vm15053_vm1, %v2758_v4  ;;  %v11277_v4 = vld [vmem:[%s11274_s23] ss:$0 sm:$0xff] }
 0x2c7   : >> { %7976 = vmatmul.mubr.msk.bf16.gmra.mrb[92].mxu0 %vm15053_vm1, %v2759_v38 }
 0x2e2   : >> { %v7411_v58 = vpop.f32.mrb[0].mxu0 }
 0x2e3   : >> { %v7412_v22 = vpop.f32.mrb[1].mxu0 }
 0x2e4   : >> { %v7413_v13 = vadd.f32 %v7412_v22, %v7411_v58  ;;  %v7414_v27 = vpop.f32.mrb[2].mxu0 }
 0x2e5   : >> { %v7415_v60 = vpop.f32.mrb[3].mxu0 }
 0x2e6   : >> { %v7416_v1 = vadd.f32 %v7415_v60, %v7414_v27  ;;  %v3513_v58 = vadd.f32 %v7413_v13, %v11277_v4 }
 0x2ea   : >> { %v7417_v39 = vpop.f32.mrb[4].mxu0 }
 0x2eb   : >> { %v7418_v8 = vpop.f32.mrb[5].mxu0 }
 0x2ec   : >> { %v7419_v7 = vadd.f32 %v7418_v8, %v7417_v39  ;;  %v7420_v56 = vpop.f32.mrb[6].mxu0  ;;  %v3516_v8 = vadd.f32 %v7416_v1, %v11277_v4 }
 0x2ed   : >> { %v7421_v44 = vpop.f32.mrb[7].mxu0 }
 0x2ee   : >> { %v7422_v33 = vadd.f32 %v7421_v44, %v7420_v56  ;;  %v3521_v13 = vadd.f32 %v7419_v7, %v11277_v4 }
 0x2f0   : >> { %v3524_v1 = vadd.f32 %v7422_v33, %v11277_v4 }
 0x2f2   : >> { %v7423_v18 = vpop.f32.mrb[8].mxu0 }
 0x2f3   : >> { %v7424_v3 = vpop.f32.mrb[9].mxu0 }
 0x2f4   : >> { %v7425_v25 = vadd.f32 %v7424_v3, %v7423_v18  ;;  %v7426_v35 = vpop.f32.mrb[10].mxu0 }
 0x2f5   : >> { %v7427_v48 = vpop.f32.mrb[11].mxu0 }
 0x2f6   : >> { %v7428_v52 = vadd.f32 %v7427_v48, %v7426_v35  ;;  %v3529_v7 = vadd.f32 %v7425_v25, %v11277_v4 }
 0x2f8   : >> { %v3532_v33 = vadd.f32 %v7428_v52, %v11277_v4 }
 0x2fa   : >> { %v7429_v51 = vpop.f32.mrb[12].mxu0 }
 0x2fb   : >> { %v7430_v61 = vpop.f32.mrb[13].mxu0 }
 0x2fc   : >> { %v7431_v0 = vadd.f32 %v7430_v61, %v7429_v51  ;;  %v7432_v14 = vpop.f32.mrb[14].mxu0 }
 0x2fd   : >> { %v7433_v6 = vpop.f32.mrb[15].mxu0 }
 0x2fe   : >> { %v7434_v9 = vadd.f32 %v7433_v6, %v7432_v14  ;;  %v3537_v25 = vadd.f32 %v7431_v0, %v11277_v4 }
 0x2ff   : >> { %v7523_v30 = vpop.f32.mrb[0].mxu1 }
 0x300   : >> { %v7524_v38 = vpop.f32.mrb[1].mxu1  ;;  %v3540_v52 = vadd.f32 %v7434_v9, %v11277_v4 }
 0x301   : >> { %v7525_v22 = vadd.f32 %v7524_v38, %v7523_v30  ;;  %v7526_v27 = vpop.f32.mrb[2].mxu1 }
 0x302   : >> { %v7435_v60 = vpop.f32.mrb[16].mxu0  ;;  %v7527_v39 = vpop.f32.mrb[3].mxu1 }
 0x303   : >> { %v7436_v56 = vpop.f32.mrb[17].mxu0  ;;  %v7528_v44 = vadd.f32 %v7527_v39, %v7526_v27  ;;  %v11281_v18 = vadd.f32 %v7525_v22, %v3513_v58 }
 0x304   : >> { %v7437_v3 = vadd.f32 %v7436_v56, %v7435_v60  ;;  %v7438_v35 = vpop.f32.mrb[18].mxu0 }
 0x305   : >> { %v7439_v48 = vpop.f32.mrb[19].mxu0  ;;  %v11283_v51 = vadd.f32 %v7528_v44, %v3516_v8 }
 0x306   : >> { %v7440_v61 = vadd.f32 %v7439_v48, %v7438_v35  ;;  %v3545_v0 = vadd.f32 %v7437_v3, %v11277_v4 }
 0x307   : >> { %v7529_v14 = vpop.f32.mrb[4].mxu1 }
 0x308   : >> { %v7530_v6 = vpop.f32.mrb[5].mxu1  ;;  %v3548_v9 = vadd.f32 %v7440_v61, %v11277_v4 }
 0x309   : >> { %v7531_v30 = vadd.f32 %v7530_v6, %v7529_v14  ;;  %v7532_v38 = vpop.f32.mrb[6].mxu1 }
 0x30a   : >> { %v7441_v54 = vpop.f32.mrb[20].mxu0  ;;  %v7533_v20 = vpop.f32.mrb[7].mxu1 }
 0x30b   : >> { %v7442_v21 = vpop.f32.mrb[21].mxu0  ;;  %v7534_v27 = vadd.f32 %v7533_v20, %v7532_v38  ;;  %v11287_v58 = vadd.f32 %v7531_v30, %v3521_v13 }
 0x30c   : >> { %v7443_v22 = vadd.f32 %v7442_v21, %v7441_v54  ;;  %v7444_v60 = vpop.f32.mrb[22].mxu0 }
 0x30d   : >> { %v7445_v39 = vpop.f32.mrb[23].mxu0  ;;  %v11289_v8 = vadd.f32 %v7534_v27, %v3524_v1 }
 0x30e   : >> { %v7446_v56 = vadd.f32 %v7445_v39, %v7444_v60  ;;  %v3553_v3 = vadd.f32 %v7443_v22, %v11277_v4 }
 0x30f   : >> { %v7535_v44 = vpop.f32.mrb[8].mxu1 }
 0x310   : >> { %v7536_v35 = vpop.f32.mrb[9].mxu1  ;;  %v3556_v61 = vadd.f32 %v7446_v56, %v11277_v4 }
 0x311   : >> { %v7537_v48 = vadd.f32 %v7536_v35, %v7535_v44  ;;  %v7538_v14 = vpop.f32.mrb[10].mxu1 }
 0x312   : >> { %v7447_v6 = vpop.f32.mrb[24].mxu0  ;;  %v7539_v34 = vpop.f32.mrb[11].mxu1 }
 0x313   : >> { %v7448_v59 = vpop.f32.mrb[25].mxu0  ;;  %v7540_v20 = vadd.f32 %v7539_v34, %v7538_v14  ;;  %v11293_v13 = vadd.f32 %v7537_v48, %v3529_v7 }
 0x314   : >> { %v7449_v21 = vadd.f32 %v7448_v59, %v7447_v6  ;;  %v7450_v54 = vpop.f32.mrb[26].mxu0 }
 0x315   : >> { %v7451_v30 = vpop.f32.mrb[27].mxu0  ;;  %v11295_v38 = vadd.f32 %v7540_v20, %v3532_v33 }
 0x316   : >> { %v7452_v1 = vadd.f32 %v7451_v30, %v7450_v54  ;;  %v3561_v22 = vadd.f32 %v7449_v21, %v11277_v4 }
 0x317   : >> { %v7541_v27 = vpop.f32.mrb[12].mxu1 }
 0x318   : >> { %v7542_v60 = vpop.f32.mrb[13].mxu1  ;;  %v3564_v56 = vadd.f32 %v7452_v1, %v11277_v4 }
 0x319   : >> { %v7543_v39 = vadd.f32 %v7542_v60, %v7541_v27  ;;  %v7544_v44 = vpop.f32.mrb[14].mxu1 }
 0x31a   : >> { %v7453_v35 = vpop.f32.mrb[28].mxu0  ;;  %v7545_v24 = vpop.f32.mrb[15].mxu1 }
 0x31b   : >> { %v7454_v17 = vpop.f32.mrb[29].mxu0  ;;  %v7546_v34 = vadd.f32 %v7545_v24, %v7544_v44  ;;  %v11299_v7 = vadd.f32 %v7543_v39, %v3537_v25 }
 0x31c   : >> { %v7455_v59 = vadd.f32 %v7454_v17, %v7453_v35  ;;  %v7456_v48 = vpop.f32.mrb[30].mxu0 }
 0x31d   : >> { %v7457_v14 = vpop.f32.mrb[31].mxu0  ;;  %v11301_v6 = vadd.f32 %v7546_v34, %v3540_v52 }
 0x31e   : >> { %v7458_v33 = vadd.f32 %v7457_v14, %v7456_v48  ;;  %v3569_v21 = vadd.f32 %v7455_v59, %v11277_v4 }
 0x31f   : >> { %v7547_v20 = vpop.f32.mrb[16].mxu1 }
 0x320   : >> { %v7548_v54 = vpop.f32.mrb[17].mxu1  ;;  %v3572_v1 = vadd.f32 %v7458_v33, %v11277_v4 }
 0x321   : >> { %v7549_v30 = vadd.f32 %v7548_v54, %v7547_v20  ;;  %v7550_v27 = vpop.f32.mrb[18].mxu1 }
 0x322   : >> { %v7459_v60 = vpop.f32.mrb[32].mxu0  ;;  %v7551_v23 = vpop.f32.mrb[19].mxu1 }
 0x323   : >> { %v7460_v12 = vpop.f32.mrb[33].mxu0  ;;  %v7552_v24 = vadd.f32 %v7551_v23, %v7550_v27  ;;  %v11305_v25 = vadd.f32 %v7549_v30, %v3545_v0 }
 0x324   : >> { %v7461_v17 = vadd.f32 %v7460_v12, %v7459_v60  ;;  %v7462_v39 = vpop.f32.mrb[34].mxu0 }
 0x325   : >> { %v7463_v44 = vpop.f32.mrb[35].mxu0  ;;  %v11307_v35 = vadd.f32 %v7552_v24, %v3548_v9 }
 0x326   : >> { %v7464_v52 = vadd.f32 %v7463_v44, %v7462_v39  ;;  %v3577_v59 = vadd.f32 %v7461_v17, %v11277_v4 }
 0x327   : >> { %v7553_v34 = vpop.f32.mrb[20].mxu1 }
 0x328   : >> { %v7554_v48 = vpop.f32.mrb[21].mxu1  ;;  %v3580_v33 = vadd.f32 %v7464_v52, %v11277_v4 }
 0x329   : >> { %v7555_v14 = vadd.f32 %v7554_v48, %v7553_v34  ;;  %v7556_v20 = vpop.f32.mrb[22].mxu1 }
 0x32a   : >> { %v7465_v54 = vpop.f32.mrb[36].mxu0  ;;  %v7557_v5 = vpop.f32.mrb[23].mxu1 }
 0x32b   : >> { %v7466_v37 = vpop.f32.mrb[37].mxu0  ;;  %v7558_v23 = vadd.f32 %v7557_v5, %v7556_v20  ;;  %v11311_v0 = vadd.f32 %v7555_v14, %v3553_v3 }
 0x32c   : >> { %v7467_v12 = vadd.f32 %v7466_v37, %v7465_v54  ;;  %v7468_v30 = vpop.f32.mrb[38].mxu0 }
 0x32d   : >> { %v7469_v27 = vpop.f32.mrb[39].mxu0  ;;  %v11313_v60 = vadd.f32 %v7558_v23, %v3556_v61 }
 0x32e   : >> { %v7470_v9 = vadd.f32 %v7469_v27, %v7468_v30  ;;  %v3585_v17 = vadd.f32 %v7467_v12, %v11277_v4 }
 0x32f   : >> { %v7559_v24 = vpop.f32.mrb[24].mxu1 }
 0x330   : >> { %v7560_v39 = vpop.f32.mrb[25].mxu1  ;;  %v3588_v52 = vadd.f32 %v7470_v9, %v11277_v4 }
 0x331   : >> { %v7561_v44 = vadd.f32 %v7560_v39, %v7559_v24  ;;  %v7562_v34 = vpop.f32.mrb[26].mxu1 }
 0x332   : >> { %v7471_v48 = vpop.f32.mrb[40].mxu0  ;;  %v7563_v50 = vpop.f32.mrb[27].mxu1 }
 0x333   : >> { %v7472_v49 = vpop.f32.mrb[41].mxu0  ;;  %v7564_v5 = vadd.f32 %v7563_v50, %v7562_v34  ;;  %v11317_v3 = vadd.f32 %v7561_v44, %v3561_v22 }
 0x334   : >> { %v7473_v37 = vadd.f32 %v7472_v49, %v7471_v48  ;;  %v7474_v14 = vpop.f32.mrb[42].mxu0 }
 0x335   : >> { %v7475_v20 = vpop.f32.mrb[43].mxu0  ;;  %v11319_v54 = vadd.f32 %v7564_v5, %v3564_v56 }
 0x336   : >> { %v7476_v61 = vadd.f32 %v7475_v20, %v7474_v14 }
 0x337   : >> { %v7565_v23 = vpop.f32.mrb[28].mxu1 }
 0x338   : >> { %v7566_v30 = vpop.f32.mrb[29].mxu1 }
 0x339   : >> { %v7567_v27 = vadd.f32 %v7566_v30, %v7565_v23  ;;  %v7568_v24 = vpop.f32.mrb[30].mxu1 }
 0x33a   : >> { %v7477_v39 = vpop.f32.mrb[44].mxu0  ;;  %v7569_v11 = vpop.f32.mrb[31].mxu1 }
 0x33b   : >> { %v7478_v26 = vpop.f32.mrb[45].mxu0  ;;  %v7570_v50 = vadd.f32 %v7569_v11, %v7568_v24  ;;  %v11323_v22 = vadd.f32 %v7567_v27, %v3569_v21 }
 0x33c   : >> { %v7479_v49 = vadd.f32 %v7478_v26, %v7477_v39  ;;  %v7480_v44 = vpop.f32.mrb[46].mxu0 }
 0x33d   : >> { %v7481_v34 = vpop.f32.mrb[47].mxu0  ;;  %v11325_v48 = vadd.f32 %v7570_v50, %v3572_v1 }
 0x33e   : >> { %v7482_v56 = vadd.f32 %v7481_v34, %v7480_v44 }
 0x33f   : >> { %v7571_v5 = vpop.f32.mrb[32].mxu1 }
 0x340   : >> { %v7572_v14 = vpop.f32.mrb[33].mxu1 }
 0x341   : >> { %v7573_v20 = vadd.f32 %v7572_v14, %v7571_v5  ;;  %v7574_v23 = vpop.f32.mrb[34].mxu1 }
 0x342   : >> { %v7483_v30 = vpop.f32.mrb[48].mxu0  ;;  %v7575_v29 = vpop.f32.mrb[35].mxu1 }
 0x343   : >> { %v7484_v2 = vpop.f32.mrb[49].mxu0  ;;  %v7576_v11 = vadd.f32 %v7575_v29, %v7574_v23  ;;  %v11329_v21 = vadd.f32 %v7573_v20, %v3577_v59 }
 0x344   : >> { %v7485_v26 = vadd.f32 %v7484_v2, %v7483_v30  ;;  %v7486_v27 = vpop.f32.mrb[50].mxu0 }
 0x345   : >> { %v7487_v24 = vpop.f32.mrb[51].mxu0  ;;  %v11331_v39 = vadd.f32 %v7576_v11, %v3580_v33 }
 0x346   : >> { %v7488_v1 = vadd.f32 %v7487_v24, %v7486_v27  ;;  %v3593_v27 = vadd.f32 %v7473_v37, %v11277_v4 }
 0x347   : >> { %v7577_v50 = vpop.f32.mrb[36].mxu1 }
 0x348   : >> { %v7578_v44 = vpop.f32.mrb[37].mxu1 }
 0x349   : >> { %v7579_v34 = vadd.f32 %v7578_v44, %v7577_v50  ;;  %v7580_v5 = vpop.f32.mrb[38].mxu1 }
 0x34a   : >> { %v7489_v14 = vpop.f32.mrb[52].mxu0  ;;  %v7581_v42 = vpop.f32.mrb[39].mxu1 }
 0x34b   : >> { %v7490_v36 = vpop.f32.mrb[53].mxu0  ;;  %v7582_v29 = vadd.f32 %v7581_v42, %v7580_v5  ;;  %v11335_v59 = vadd.f32 %v7579_v34, %v3585_v17  ;;  %v3596_v42 = vadd.f32 %v7476_v61, %v11277_v4 }
 0x34c   : >> { %v11337_v2 = vadd.f32 %v7490_v36, %v7489_v14  ;;  %v7492_v20 = vpop.f32.mrb[54].mxu0 }
 0x34d   : >> { %v7493_v23 = vpop.f32.mrb[55].mxu0  ;;  %v11339_v30 = vadd.f32 %v7582_v29, %v3588_v52 }
 0x34e   : >> { %v11341_v33 = vadd.f32 %v7493_v23, %v7492_v20  ;;  %v8424_v20 = vld [vmem:[%s9967_s13 + $0x160] sm:$0xff]  }
 0x34f   : >> { %v7583_v12 = vpop.f32.mrb[40].mxu1  ;;  %7639 = vmatprep.subr.bf16.mxu1 %v8424_v20 }
 0x350   : >> { %v7584_v11 = vpop.f32.mrb[41].mxu1  ;;  %7640 = vmatpush3.bf16.msra.mxu1 %v8425_v41 }
 0x351   : >> { %v7585_v24 = vadd.f32 %v7584_v11, %v7583_v12  ;;  %v7586_v50 = vpop.f32.mrb[42].mxu1  ;;  %v3601_v11 = vadd.f32 %v7479_v49, %v11277_v4 }
 0x352   : >> { %v7495_v9 = vpop.f32.mrb[56].mxu0  ;;  %v7587_v44 = vpop.f32.mrb[43].mxu1 }
 0x353   : >> { %v7496_v36 = vpop.f32.mrb[57].mxu0  ;;  %v7588_v17 = vadd.f32 %v7587_v44, %v7586_v50  ;;  %v11345_v34 = vadd.f32 %v7585_v24, %v3593_v27  ;;  %v3604_v24 = vadd.f32 %v7482_v56, %v11277_v4 }
 0x354   : >> { %v11347_v5 = vadd.f32 %v7496_v36, %v7495_v9  ;;  %v7498_v14 = vpop.f32.mrb[58].mxu0 }
 0x355   : >> { %v7499_v52 = vpop.f32.mrb[59].mxu0  ;;  %v11349_v29 = vadd.f32 %v7588_v17, %v3596_v42 }
 0x356   : >> { %v11352_v23 = vadd.f32 %v7499_v52, %v7498_v14 }
 0x357   : >> { %v7589_v37 = vpop.f32.mrb[44].mxu1 }
 0x358   : >> { %v7590_v12 = vpop.f32.mrb[45].mxu1 }
 0x359   : >> { %v7591_v61 = vadd.f32 %v7590_v12, %v7589_v37  ;;  %v7592_v47 = vpop.f32.mrb[46].mxu1  ;;  %v3609_v12 = vadd.f32 %v7485_v26, %v11277_v4 }
 0x35a   : >> { %v7501_v50 = vpop.f32.mrb[60].mxu0  ;;  %v7593_v27 = vpop.f32.mrb[47].mxu1 }
 0x35b   : >> { %v7502_v9 = vpop.f32.mrb[61].mxu0  ;;  %v7594_v44 = vadd.f32 %v7593_v27, %v7592_v47  ;;  %v11357_v36 = vadd.f32 %v7591_v61, %v3601_v11  ;;  %v3612_v11 = vadd.f32 %v7488_v1, %v11277_v4 }
 0x35c   : >> { %v11359_v42 = vadd.f32 %v7502_v9, %v7501_v50  ;;  %v7504_v17 = vpop.f32.mrb[62].mxu0 }
 0x35d   : >> { %v7505_v14 = vpop.f32.mrb[63].mxu0  ;;  %v11361_v52 = vadd.f32 %v7594_v44, %v3604_v24 }
 0x35e   : >> { %v11363_v20 = vadd.f32 %v7505_v14, %v7504_v17  ;;  %v8426_v14 = vld [vmem:[%s9967_s13 + $0x168] sm:$0xff]  }
 0x35f   : >> { %v7595_v49 = vpop.f32.mrb[48].mxu1  ;;  %7641 = vmatprep.subr.bf16.mxu1 %v8426_v14 }
 0x360   : >> { %v7596_v37 = vpop.f32.mrb[49].mxu1 }
 0x361   : >> { %v7597_v15 = vadd.f32 %v7596_v37, %v7595_v49  ;;  %v7598_v56 = vpop.f32.mrb[50].mxu1 }
 0x362   : >> { %v7949_v16 = vpop.f32.mrb[64].mxu0  ;;  %v7599_v47 = vpop.f32.mrb[51].mxu1 }
 0x363   : >> { %v11368_v41 = vadd.f32 %v7949_v16, %v11287_v58  ;;  %v3834_v61 = vpop.f32.mrb[65].mxu0  ;;  %v7600_v50 = vadd.f32 %v7599_v47, %v7598_v56  ;;  %v11370_v27 = vadd.f32 %v7597_v15, %v3609_v12 }
 0x364   : >> { %v11373_v24 = vadd.f32 %v3834_v61, %v11281_v18  ;;  %v7950_v9 = vpop.f32.mrb[66].mxu0  ;;  %v3617_v61 = vadd.f32 %v11337_v2, %v11277_v4 }
 0x365   : >> { %v11376_v44 = vadd.f32 %v7950_v9, %v11289_v8  ;;  %v3837_v26 = vpop.f32.mrb[67].mxu0  ;;  %v11378_v17 = vadd.f32 %v7600_v50, %v3612_v11  ;;  %v4047_v18 = vmul.f32 %v11368_v41, %v11368_v41  ;;  %v8427_v11 = vld [vmem:[%s9967_s13 + $0x128] sm:$0xff]   ;;  %v3964_v50 = vsel %vm15053_vm1, %v11368_v41, 0.0 }
 0x366   : >> { %v4045_v16 = vmul.f32 %v11373_v24, %v11373_v24  ;;  %v11384_v58 = vadd.f32 %v3837_v26, %v11283_v51  ;;  %v3961_v8 = vsel %vm15053_vm1, %v11373_v24, 0.0  ;;  %7642 = vmatpush3.bf16.msra.mxu1 %v8427_v11 }
 0x367   : >> { %v7601_v15 = vpop.f32.mrb[52].mxu1  ;;  %v4048_v12 = vmul.f32 %v11376_v44, %v11376_v44  ;;  %v3966_v2 = vsel %vm15053_vm1, %v11376_v44, 0.0 }
 0x368   : >> { %v3962_v1 = vsel %vm15053_vm1, %v11384_v58, 0.0  ;;  %v4046_v49 = vmul.f32 %v11384_v58, %v11384_v58  ;;  %v7602_v37 = vpop.f32.mrb[53].mxu1  ;;  %v4077_v9 = vsel %vm15053_vm1, %v4045_v16, 0.0 }
 0x369   : >> { %v3963_v51 = vadd.f32 %v3962_v1, %v3961_v8  ;;  %v7603_v56 = vadd.f32 %v7602_v37, %v7601_v15  ;;  %v7604_v47 = vpop.f32.mrb[54].mxu1  ;;  %v4080_v1 = vsel %vm15053_vm1, %v4047_v18, 0.0 }
 0x36a   : >> { %v4078_v26 = vsel %vm15053_vm1, %v4046_v49, 0.0  ;;  %v7953_v14 = vpop.f32.mrb[68].mxu0  ;;  %v7605_v55 = vpop.f32.mrb[55].mxu1 }
 0x36b   : >> { %v3965_v31 = vadd.f32 %v3964_v50, %v3963_v51  ;;  %v4079_v45 = vadd.f32 %v4078_v26, %v4077_v9  ;;  %v11404_v63 = vadd.f32 %v7953_v14, %v11299_v7  ;;  %v3850_v15 = vpop.f32.mrb[69].mxu0  ;;  %v7606_v8 = vadd.f32 %v7605_v55, %v7604_v47 }
 0x36c   : >> { %v11410_v37 = vadd.f32 %v3850_v15, %v11293_v13  ;;  %v7954_v16 = vpop.f32.mrb[70].mxu0  ;;  %v11412_v49 = vadd.f32 %v7603_v56, %v3617_v61  ;;  %v3620_v51 = vadd.f32 %v11341_v33, %v11277_v4  ;;  %v4082_v7 = vsel %vm15053_vm1, %v4048_v12, 0.0 }
 0x36d   : >> { %v4081_v50 = vadd.f32 %v4080_v1, %v4079_v45  ;;  %v3967_v9 = vadd.f32 %v3966_v2, %v3965_v31  ;;  %v3853_v55 = vpop.f32.mrb[71].mxu0  ;;  %v11422_v13 = vadd.f32 %v7954_v16, %v11301_v6  ;;  %v3625_v45 = vadd.f32 %v11347_v5, %v11277_v4 }
 0x36e   : >> { %v3968_v18 = vsel %vm15053_vm1, %v11410_v37, 0.0  ;;  %v4049_v47 = vmul.f32 %v11410_v37, %v11410_v37  ;;  %v11425_v56 = vadd.f32 %v3853_v55, %v11295_v38  ;;  %v11427_v26 = vadd.f32 %v7606_v8, %v3620_v51 }
 0x36f   : >> { %v3969_v11 = vadd.f32 %v3968_v18, %v3967_v9  ;;  %v4083_v61 = vadd.f32 %v4082_v7, %v4081_v50  ;;  %v7607_v33 = vpop.f32.mrb[56].mxu1  ;;  %v4051_v31 = vmul.f32 %v11404_v63, %v11404_v63  ;;  %v3628_v16 = vadd.f32 %v11352_v23, %v11277_v4 }
 0x370   : >> { %v4084_v12 = vsel %vm15053_vm1, %v4049_v47, 0.0  ;;  %v3970_v6 = vsel %vm15053_vm1, %v11425_v56, 0.0  ;;  %v7608_v14 = vpop.f32.mrb[57].mxu1  ;;  %v4050_v1 = vmul.f32 %v11425_v56, %v11425_v56  ;;  %v3633_v5 = vadd.f32 %v11359_v42, %v11277_v4 }
 0x371   : >> { %v4085_v15 = vadd.f32 %v4084_v12, %v4083_v61  ;;  %v3971_v38 = vadd.f32 %v3970_v6, %v3969_v11  ;;  %v7609_v2 = vadd.f32 %v7608_v14, %v7607_v33  ;;  %v7610_v8 = vpop.f32.mrb[58].mxu1  ;;  %v3972_v51 = vsel %vm15053_vm1, %v11404_v63, 0.0 }
 0x372   : >> { %v4052_v7 = vmul.f32 %v11422_v13, %v11422_v13  ;;  %v7957_v50 = vpop.f32.mrb[72].mxu0  ;;  %v7611_v9 = vpop.f32.mrb[59].mxu1  ;;  %v4086_v18 = vsel %vm15053_vm1, %v4050_v1, 0.0  ;;  %v3974_v42 = vsel %vm15053_vm1, %v11422_v13, 0.0  ;;  %v4088_v14 = vsel %vm15053_vm1, %v4051_v31, 0.0 }
 0x373   : >> { %v3973_v55 = vadd.f32 %v3972_v51, %v3971_v38  ;;  %v11448_v47 = vadd.f32 %v7957_v50, %v11311_v0  ;;  %v3866_v11 = vpop.f32.mrb[73].mxu0  ;;  %v7612_v23 = vadd.f32 %v7611_v9, %v7610_v8  ;;  %v4087_v61 = vadd.f32 %v4086_v18, %v4085_v15  ;;  %v8428_v51 = vld [vmem:[%s9967_s13 + $0x170] sm:$0xff]  }
 0x374   : >> { %v11453_v33 = vadd.f32 %v3866_v11, %v11305_v25  ;;  %v7958_v12 = vpop.f32.mrb[74].mxu0  ;;  %v11455_v6 = vadd.f32 %v7609_v2, %v3625_v45  ;;  %v3636_v15 = vadd.f32 %v11363_v20, %v11277_v4  ;;  %v4090_v31 = vsel %vm15053_vm1, %v4052_v7, 0.0  ;;  %7643 = vmatprep.subr.bf16.mxu1 %v8428_v51 }
 0x375   : >> { %v3975_v38 = vadd.f32 %v3974_v42, %v3973_v55  ;;  %v4055_v1 = vmul.f32 %v11448_v47, %v11448_v47  ;;  %v11461_v0 = vadd.f32 %v7958_v12, %v11313_v60  ;;  %v3869_v8 = vpop.f32.mrb[75].mxu0  ;;  %v4089_v50 = vadd.f32 %v4088_v14, %v4087_v61 }
 0x376   : >> { %v4053_v25 = vmul.f32 %v11453_v33, %v11453_v33  ;;  %v11469_v45 = vadd.f32 %v3869_v8, %v11307_v35  ;;  %v3985_v60 = vsel %vm15053_vm1, %v11448_v47, 0.0  ;;  %v3982_v9 = vsel %vm15053_vm1, %v11453_v33, 0.0  ;;  %v8429_v8 = vld [vmem:[%s9967_s13 + $0x130] sm:$0xff]  }
 0x377   : >> { %v3976_v2 = vrot.slane %v3975_v38, 4  ;;  %v7613_v55 = vpop.f32.mrb[60].mxu1  ;;  %v4091_v4 = vadd.f32 %v4090_v31, %v4089_v50  ;;  %v4101_v20 = vsel %vm15053_vm1, %v4055_v1, 0.0  ;;  %v4056_v42 = vmul.f32 %v11461_v0, %v11461_v0  ;;  %7644 = vmatpush3.bf16.msra.mxu1 %v8429_v8 }
 0x378   : >> { %v3983_v18 = vsel %vm15053_vm1, %v11469_v45, 0.0  ;;  %v4054_v35 = vmul.f32 %v11469_v45, %v11469_v45  ;;  %v7614_v7 = vpop.f32.mrb[61].mxu1  ;;  %v4098_v51 = vsel %vm15053_vm1, %v4053_v25, 0.0  ;;  %v11486_v62 = vadd.f32 %v7612_v23, %v3628_v16 }
 0x379   : >> { %v3977_v11 = vadd.f32 %v3976_v2, %v3975_v38  ;;  %v3984_v61 = vadd.f32 %v3983_v18, %v3982_v9  ;;  %v7615_v12 = vadd.f32 %v7614_v7, %v7613_v55  ;;  %v7616_v14 = vpop.f32.mrb[62].mxu1  ;;  %v4092_v10 = vrot.slane %v4091_v4, 4 }
 0x37a   : >> { %v4099_v1 = vsel %vm15053_vm1, %v4054_v35, 0.0  ;;  %v7961_v50 = vpop.f32.mrb[76].mxu0  ;;  %v7617_v31 = vpop.f32.mrb[63].mxu1  ;;  %v3987_v16 = vsel %vm15053_vm1, %v11461_v0, 0.0  ;;  %v4103_v23 = vsel %vm15053_vm1, %v4056_v42, 0.0 }
 0x37b   : >> { %v3978_v46 = vrot.slane %v3977_v11, 2  ;;  %v3986_v53 = vadd.f32 %v3985_v60, %v3984_v61  ;;  %v4100_v32 = vadd.f32 %v4099_v1, %v4098_v51  ;;  %v11489_v38 = vadd.f32 %v7961_v50, %v11323_v22  ;;  %v3882_v2 = vpop.f32.mrb[77].mxu0 }
 0x37c   : >> { %v4093_v9 = vadd.f32 %v4092_v10, %v4091_v4  ;;  %v11492_v55 = vadd.f32 %v3882_v2, %v11317_v3  ;;  %v7962_v18 = vpop.f32.mrb[78].mxu0  ;;  %v7618_v25 = vadd.f32 %v7617_v31, %v7616_v14  ;;  %v11494_v7 = vadd.f32 %v7615_v12, %v3633_v5 }
 0x37d   : >> { %v3979_v35 = vadd.f32 %v3978_v46, %v3977_v11  ;;  %v4102_v60 = vadd.f32 %v4101_v20, %v4100_v32  ;;  %v3885_v61 = vpop.f32.mrb[79].mxu0  ;;  %v3988_v51 = vadd.f32 %v3987_v16, %v3986_v53  ;;  %v4059_v5 = vmul.f32 %v11489_v38, %v11489_v38 }
 0x37e   : >> { %v4094_v22 = vrot.slane %v4093_v9, 2  ;;  %v3989_v10 = vsel %vm15053_vm1, %v11492_v55, 0.0  ;;  %v4057_v3 = vmul.f32 %v11492_v55, %v11492_v55  ;;  %v11506_v11 = vadd.f32 %v7962_v18, %v11325_v48 }
 0x37f   : >> { %v3980_v4 = vrot.slane %v3979_v35, 1  ;;  %v4104_v46 = vadd.f32 %v4103_v23, %v4102_v60  ;;  %v3990_v42 = vadd.f32 %v3989_v10, %v3988_v51  ;;  %v11510_v53 = vadd.f32 %v3885_v61, %v11319_v54 }
 0x380   : >> { %v4095_v12 = vadd.f32 %v4094_v22, %v4093_v9  ;;  %v4105_v32 = vsel %vm15053_vm1, %v4057_v3, 0.0  ;;  %v4060_v8 = vmul.f32 %v11506_v11, %v11506_v11  ;;  %v11518_v2 = vadd.f32 %v7618_v25, %v3636_v15 }
 0x381   : >> { %v3981_v20 = vadd.f32 %v3980_v4, %v3979_v35  ;;  %v4106_v14 = vadd.f32 %v4105_v32, %v4104_v46  ;;  %v3991_v50 = vsel %vm15053_vm1, %v11510_v53, 0.0  ;;  %v4058_v48 = vmul.f32 %v11510_v53, %v11510_v53  ;;  %v8430_v4 = vld [vmem:[%s9967_s13 + $0x178] sm:$0xff]  }
 0x382   : >> { %v4096_v1 = vrot.slane %v4095_v12, 1  ;;  %v7965_v31 = vpop.f32.mrb[80].mxu0  ;;  %v3993_v54 = vsel %vm15053_vm1, %v11489_v38, 0.0  ;;  %v3992_v18 = vadd.f32 %v3991_v50, %v3990_v42  ;;  %v4109_v60 = vsel %vm15053_vm1, %v4059_v5, 0.0  ;;  %7645 = vmatprep.subr.bf16.mxu1 %v8430_v4 }
 0x383   : >> { %v11520_v9 = vmul.f32 0.015625, %v3981_v20  ;;  %v11525_v35 = vadd.f32 %v7965_v31, %v11335_v59  ;;  %v3898_v16 = vpop.f32.mrb[81].mxu0  ;;  %v4107_v61 = vsel %vm15053_vm1, %v4058_v48, 0.0  ;;  %v3995_v51 = vsel %vm15053_vm1, %v11506_v11, 0.0 }
 0x384   : >> { %v4097_v23 = vadd.f32 %v4096_v1, %v4095_v12  ;;  %v11530_v22 = vadd.f32 %v3898_v16, %v11329_v21  ;;  %v7966_v15 = vpop.f32.mrb[82].mxu0  ;;  %v3994_v10 = vadd.f32 %v3993_v54, %v3992_v18  ;;  %v4108_v3 = vadd.f32 %v4107_v61, %v4106_v14 }
 0x385   : >> { %v4169_v25 = vmul.f32 %v11520_v9, %v11520_v9  ;;  %v3901_v59 = vpop.f32.mrb[83].mxu0  ;;  %v4111_v12 = vsel %vm15053_vm1, %v4060_v8, 0.0  ;;  %v4063_v21 = vmul.f32 %v11525_v35, %v11525_v35  ;;  %v4006_v20 = vsel %vm15053_vm1, %v11525_v35, 0.0 }
 0x386   : >> { %v4165_v46 = vmul.f32 0.015625, %v4097_v23  ;;  %v3996_v42 = vadd.f32 %v3995_v51, %v3994_v10  ;;  %v4110_v32 = vadd.f32 %v4109_v60, %v4108_v3  ;;  %v11545_v1 = vadd.f32 %v7966_v15, %v11339_v30  ;;  %v8431_v30 = vld [vmem:[%s9967_s13 + $0x138] sm:$0xff]  }
 0x387   : >> { %v4003_v50 = vsel %vm15053_vm1, %v11530_v22, 0.0  ;;  %v4061_v48 = vmul.f32 %v11530_v22, %v11530_v22  ;;  %v11552_v8 = vadd.f32 %v3901_v59, %v11331_v39  ;;  %v4122_v18 = vsel %vm15053_vm1, %v4063_v21, 0.0  ;;  %7646 = vmatpush3.bf16.msra.mxu1 %v8431_v30 }
 0x388   : >> { %v4173_v14 = vsub.f32 %v4165_v46, %v4169_v25  ;;  %v3997_v31 = vrot.slane %v3996_v42, 4  ;;  %v4112_v54 = vadd.f32 %v4111_v12, %v4110_v32  ;;  %v4064_v60 = vmul.f32 %v11545_v1, %v11545_v1 }
 0x389   : >> { %v4004_v61 = vsel %vm15053_vm1, %v11552_v8, 0.0  ;;  %v4062_v15 = vmul.f32 %v11552_v8, %v11552_v8  ;;  %v4119_v46 = vsel %vm15053_vm1, %v4061_v48, 0.0 }
 0x38a   : >> { %v4177_v23 = vmax.f32 %v4173_v14, 0.0  ;;  %v7969_v39 = vpop.f32.mrb[84].mxu0  ;;  %v3998_v25 = vadd.f32 %v3997_v31, %v3996_v42  ;;  %v4113_v51 = vrot.slane %v4112_v54, 4  ;;  %v4005_v10 = vadd.f32 %v4004_v61, %v4003_v50 }
 0x38b   : >> { %v11565_v3 = vadd.f32 %v7969_v39, %v11357_v36  ;;  %v3914_v59 = vpop.f32.mrb[85].mxu0  ;;  %v4120_v12 = vsel %vm15053_vm1, %v4062_v15, 0.0  ;;  %v4008_v36 = vsel %vm15053_vm1, %v11545_v1, 0.0  ;;  %v4124_v50 = vsel %vm15053_vm1, %v4064_v60, 0.0 }
 0x38c   : >> { %v4213_v4 = vadd.f32 1e-05, %v4177_v23  ;;  %v11570_v21 = vadd.f32 %v3914_v59, %v11345_v34  ;;  %v7970_v32 = vpop.f32.mrb[86].mxu0  ;;  %v3999_v14 = vrot.slane %v3998_v25, 2  ;;  %v4114_v16 = vadd.f32 %v4113_v51, %v4112_v54 }
 0x38d   : >> { %v4007_v5 = vadd.f32 %v4006_v20, %v4005_v10  ;;  %v4121_v42 = vadd.f32 %v4120_v12, %v4119_v46  ;;  %v3917_v31 = vpop.f32.mrb[87].mxu0  ;;  %v4067_v15 = vmul.f32 %v11565_v3, %v11565_v3  ;;  %v11582_v54 = vadd.f32 %v7970_v32, %v11361_v52 }
 0x38e   : >> { %8460 = vrsqrt.f32 %v4213_v4  ;;  %v4010_v48 = vsel %vm15053_vm1, %v11570_v21, 0.0  ;;  %v4000_v30 = vadd.f32 %v3999_v14, %v3998_v25  ;;  %v4115_v23 = vrot.slane %v4114_v16, 2 }
 0x38f   : >> { %v4123_v61 = vadd.f32 %v4122_v18, %v4121_v42  ;;  %v4009_v34 = vadd.f32 %v4008_v36, %v4007_v5  ;;  %v4065_v20 = vmul.f32 %v11570_v21, %v11570_v21  ;;  %v11585_v39 = vadd.f32 %v3917_v31, %v11349_v29 }
 0x390   : >> { %v4001_v60 = vrot.slane %v4000_v30, 1  ;;  %v4116_v51 = vadd.f32 %v4115_v23, %v4114_v16  ;;  %v4014_v18 = vsel %vm15053_vm1, %v11565_v3, 0.0  ;;  %v4068_v25 = vmul.f32 %v11582_v54, %v11582_v54 }
 0x391   : >> { %v4011_v10 = vadd.f32 %v4010_v48, %v4009_v34  ;;  %v4125_v59 = vadd.f32 %v4124_v50, %v4123_v61  ;;  %v4126_v5 = vsel %vm15053_vm1, %v4065_v20, 0.0  ;;  %v4012_v4 = vsel %vm15053_vm1, %v11585_v39, 0.0  ;;  %v8432_v20 = vld [vmem:[%s9967_s13 + $0x180] sm:$0xff]  }
 0x392   : >> { %v7973_v52 = vpop.f32.mrb[88].mxu0  ;;  %v4002_v46 = vadd.f32 %v4001_v60, %v4000_v30  ;;  %v4117_v29 = vrot.slane %v4116_v51, 1  ;;  %v4130_v14 = vsel %vm15053_vm1, %v4067_v15, 0.0  ;;  %v4066_v42 = vmul.f32 %v11585_v39, %v11585_v39  ;;  %7647 = vmatprep.subr.bf16.mxu1 %v8432_v20 }
 0x393   : >> { %v4127_v12 = vadd.f32 %v4126_v5, %v4125_v59  ;;  %v4013_v32 = vadd.f32 %v4012_v4, %v4011_v10  ;;  %v3930_v16 = vpop.f32.mrb[89].mxu0  ;;  %v11598_v31 = vadd.f32 %v7973_v52, %v11412_v49  ;;  %v4016_v15 = vsel %vm15053_vm1, %v11582_v54, 0.0 }
 0x394   : >> { %v11601_v36 = vadd.f32 %v3930_v16, %v11370_v27  ;;  %v7974_v50 = vpop.f32.mrb[90].mxu0  ;;  %v4118_v48 = vadd.f32 %v4117_v29, %v4116_v51  ;;  %v11603_v23 = vmul.f32 0.015625, %v4002_v46  ;;  %v4132_v60 = vsel %vm15053_vm1, %v4068_v25, 0.0 }
 0x395   : >> { %15263 = vst [vmem:[#allocation76_spill] sm:$0xff] %v11598_v31  ;;  %v4015_v30 = vadd.f32 %v4014_v18, %v4013_v32  ;;  %v11606_v61 = vadd.f32 %v7974_v50, %v11427_v26  ;;  %v3933_v34 = vpop.f32.mrb[91].mxu0  ;;  %v4128_v49 = vsel %vm15053_vm1, %v4066_v42, 0.0  ;;  %v4071_v27 = vmul.f32 %v11598_v31, %v11598_v31  ;;  %v8433_v50 = vld [vmem:[%s9967_s13 + $0x140] sm:$0xff]  }
 0x396   : >> { %15264 = vst [vmem:[#allocation75_spill] sm:$0xff] %v11601_v36  ;;  %v4166_v51 = vmul.f32 0.015625, %v4118_v48  ;;  %v4170_v10 = vmul.f32 %v11603_v23, %v11603_v23  ;;  %v4027_v26 = vsel %vm15053_vm1, %v11598_v31, 0.0  ;;  %v4129_v25 = vadd.f32 %v4128_v49, %v4127_v12  ;;  %7648 = vmatpush3.bf16.msra.mxu1 %v8433_v50 }
 0x397   : >> { %15265 = vst [vmem:[#allocation91_spill] sm:$0xff] %v11606_v61  ;;  %v4017_v59 = vadd.f32 %v4016_v15, %v4015_v30  ;;  %v4024_v4 = vsel %vm15053_vm1, %v11601_v36, 0.0  ;;  %v4069_v52 = vmul.f32 %v11601_v36, %v11601_v36  ;;  %v15266_v46 = vsub.f32 %v11425_v56, %v11520_v9 }
 0x398   : >> { %v11619_v18 = vpop.eup %8460  ;;  %v4174_v32 = vsub.f32 %v4166_v51, %v4170_v10  ;;  %v4143_v42 = vsel %vm15053_vm1, %v4071_v27, 0.0  ;;  %v4131_v48 = vadd.f32 %v4130_v14, %v4129_v25  ;;  %v4072_v12 = vmul.f32 %v11606_v61, %v11606_v61 }
 0x399   : >> { %v4226_v29 = vmul.f32 %v11619_v18, %v15266_v46  ;;  %v4018_v16 = vrot.slane %v4017_v59, 4  ;;  %v11636_v30 = vadd.f32 %v3933_v34, %v11378_v17  ;;  %v15268_v15 = vsub.f32 %v11373_v24, %v11520_v9 }
 0x39a   : >> { %v7977_v20 = vpop.f32.mrb[92].mxu0  ;;  %v4178_v49 = vmax.f32 %v4174_v32, 0.0  ;;  %v4140_v51 = vsel %vm15053_vm1, %v4069_v52, 0.0  ;;  %v4029_v27 = vsel %vm15053_vm1, %v11606_v61, 0.0  ;;  %v4133_v10 = vadd.f32 %v4132_v60, %v4131_v48  ;;  %v15270_v32 = vld [vmem:[#allocation39_spill] sm:$0xff] }
 0x39b   : >> { %15267 = vst [vmem:[#allocation74_spill] sm:$0xff] %v11636_v30  ;;  %v4221_v56 = vmul.f32 %v11619_v18, %v15268_v15  ;;  %v4019_v46 = vadd.f32 %v4018_v16, %v4017_v59  ;;  %v3946_v14 = vpop.f32.mrb[93].mxu0  ;;  %v4025_v17 = vsel %vm15053_vm1, %v11636_v30, 0.0  ;;  %v4070_v34 = vmul.f32 %v11636_v30, %v11636_v30 }
 0x39c   : >> { %v11650_v24 = vadd.f32 %v7977_v20, %v11494_v7  ;;  %v7978_v25 = vpop.f32.mrb[94].mxu0  ;;  %v11653_v59 = vmul.f32 %v15270_v32, %v4226_v29  ;;  %v4214_v52 = vadd.f32 1e-05, %v4178_v49  ;;  %v4026_v15 = vadd.f32 %v4025_v17, %v4024_v4 }
 0x39d   : >> { %v4020_v16 = vrot.slane %v4019_v46, 2  ;;  %v3949_v5 = vpop.f32.mrb[95].mxu0  ;;  %v4134_v61 = vrot.slane %v4133_v10, 4  ;;  %v4145_v60 = vsel %vm15053_vm1, %v4072_v12, 0.0  ;;  %v4141_v50 = vsel %vm15053_vm1, %v4070_v34, 0.0 }
 0x39e   : >> { %15269 = vst [vmem:[#allocation78_spill] sm:$0xff] %v11650_v24  ;;  %v4075_v48 = vmul.f32 %v11650_v24, %v11650_v24  ;;  %8462 = vrsqrt.f32 %v4214_v52  ;;  %v4028_v7 = vadd.f32 %v4027_v26, %v4026_v15  ;;  %v4142_v20 = vadd.f32 %v4141_v50, %v4140_v51 }
 0x39f   : >> { %v4021_v31 = vadd.f32 %v4020_v16, %v4019_v46  ;;  %v4135_v30 = vadd.f32 %v4134_v61, %v4133_v10  ;;  %v4035_v29 = vsel %vm15053_vm1, %v11650_v24, 0.0  ;;  %v11662_v49 = vadd.f32 %v3946_v14, %v11455_v6 }
 0x3a0   : >> { %v11665_v4 = vadd.f32 %v7978_v25, %v11518_v2  ;;  %v4144_v17 = vadd.f32 %v4143_v42, %v4142_v20  ;;  %v4030_v34 = vadd.f32 %v4029_v27, %v4028_v7  ;;  %v11668_v36 = vadd.f32 %v3949_v5, %v11486_v62  ;;  %v8435_v7 = vld [vmem:[%s9967_s13 + $0x1e0] sm:$0xff]  }
 0x3a1   : >> { %15271 = vst [vmem:[#allocation79_spill] sm:$0xff] %v11662_v49  ;;  %v4022_v12 = vrot.slane %v4021_v31, 1  ;;  %v4136_v52 = vrot.slane %v4135_v30, 2  ;;  %v4151_v26 = vsel %vm15053_vm1, %v4075_v48, 0.0  ;;  %v4031_v61 = vsel %vm15053_vm1, %v11662_v49, 0.0  ;;  %v8434_v48 = vld [vmem:[%s9967_s13 + $0x188] sm:$0xff]   ;;  %7751 = vmatprep.subr.bf16.mxu0 %v8435_v7 }
 0x3a2   : >> { %v4073_v46 = vmul.f32 %v11662_v49, %v11662_v49  ;;  %v4032_v51 = vadd.f32 %v4031_v61, %v4030_v34  ;;  %v4146_v2 = vadd.f32 %v4145_v60, %v4144_v17  ;;  %v4037_v42 = vsel %vm15053_vm1, %v11665_v4, 0.0  ;;  %7649 = vmatprep.subr.bf16.mxu1 %v8434_v48 }
 0x3a3   : >> { %v4023_v6 = vadd.f32 %v4022_v12, %v4021_v31  ;;  %v4137_v27 = vadd.f32 %v4136_v52, %v4135_v30  ;;  %v4033_v5 = vsel %vm15053_vm1, %v11668_v36, 0.0  ;;  %v4074_v14 = vmul.f32 %v11668_v36, %v11668_v36 }
 0x3a4   : >> { %v4147_v62 = vsel %vm15053_vm1, %v4073_v46, 0.0  ;;  %v4076_v31 = vmul.f32 %v11665_v4, %v11665_v4  ;;  %v4034_v16 = vadd.f32 %v4033_v5, %v4032_v51  ;;  %v4253_v30 = vmul.f32 %v15270_v32, %v4221_v56 }
 0x3a5   : >> { %v11682_v10 = vmul.f32 0.015625, %v4023_v6  ;;  %v4148_v25 = vadd.f32 %v4147_v62, %v4146_v2  ;;  %v4138_v15 = vrot.slane %v4137_v27, 1  ;;  %v4149_v60 = vsel %vm15053_vm1, %v4074_v14, 0.0  ;;  %v8436_v62 = vld [vmem:[%s9967_s13 + $0x148] sm:$0xff]  }
 0x3a6   : >> { %v4182_v50 = vsub.f32 %v11384_v58, %v11520_v9  ;;  %v4036_v17 = vadd.f32 %v4035_v29, %v4034_v16  ;;  %vm4285_vm3 = vcmp.gt.f32.partialorder %v4253_v30, 0.0  ;;  %v4317_v61 = vmul.f32 0.2, %v4253_v30  ;;  %v8437_v29 = vld [vmem:[%s9967_s13 + $0x1a0] sm:$0xff]   ;;  %7650 = vmatpush3.bf16.msra.mxu1 %v8436_v62 }
 0x3a7   : >> { %v4171_v20 = vmul.f32 %v11682_v10, %v11682_v10  ;;  %v4202_v12 = vsub.f32 %v11585_v39, %v11682_v10  ;;  %v4150_v34 = vadd.f32 %v4149_v60, %v4148_v25  ;;  %v4139_v52 = vadd.f32 %v4138_v15, %v4137_v27  ;;  %7752 = vmatpush3.bf16.msra.mxu0 %v8437_v29 }
 0x3a8   : >> { %v4183_v56 = vsub.f32 %v11368_v41, %v11520_v9  ;;  %v11698_v58 = vpop.eup %8462  ;;  %v4153_v46 = vsel %vm15053_vm1, %v4076_v31, 0.0  ;;  %v4038_v6 = vadd.f32 %v4037_v42, %v4036_v17  ;;  %v4222_v2 = vmul.f32 %v11619_v18, %v4182_v50  ;;  %v8438_v50 = vld [vmem:[%s9967_s13 + $0x1e8] sm:$0xff]  }
 0x3a9   : >> { %v4152_v51 = vadd.f32 %v4151_v26, %v4150_v34  ;;  %v15272_v27 = vsub.f32 %v11510_v53, %v11603_v23  ;;  %v4167_v41 = vmul.f32 0.015625, %v4139_v52  ;;  %v11710_v14 = vsel %vm4285_vm3, %v4253_v30, %v4317_v61  ;;  %v8439_v34 = vld [vmem:[%s9967_s13 + $0x1a8] sm:$0xff]   ;;  %7753 = vmatprep.subr.bf16.mxu0 %v8438_v50 }
 0x3aa   : >> { %15273 = vst [vmem:[#allocation81_spill] sm:$0xff] %v11710_v14  ;;  %v4223_v25 = vmul.f32 %v11619_v18, %v4183_v56  ;;  %v4039_v16 = vrot.slane %v4038_v6, 4  ;;  %v4603_v26 = vpack.c.bf16 %v11710_v14, %v14941_v19  ;;  %v4254_v31 = vmul.f32 %v15270_v32, %v4222_v2 }
 0x3ab   : >> { %v11708_v5 = vmul.f32 %v11698_v58, %v15272_v27  ;;  %v4154_v42 = vadd.f32 %v4153_v46, %v4152_v51  ;;  %v4322_v53 = vmul.f32 0.2, %v11653_v59  ;;  %v4175_v15 = vsub.f32 %v4167_v41, %v4171_v20  ;;  %7754 = vmatpush3.bf16.msra.mxu0 %v8439_v34  ;;  %v8440_v27 = vld [vmem:[%s9967_s13 + $0x1f0] sm:$0xff]  }
 0x3ac   : >> { %v4255_v60 = vmul.f32 %v15270_v32, %v4223_v25  ;;  %v4184_v30 = vsub.f32 %v11376_v44, %v11520_v9  ;;  %v4040_v48 = vadd.f32 %v4039_v16, %v4038_v6  ;;  %5003 = vrot.lane.b32.xlu1 %v4603_v26, %s8808_s18  ;;  %vm4286_vm15 = vcmp.gt.f32.partialorder %v4254_v31, 0.0  ;;  %v8441_v41 = vld [vmem:[%s9967_s13 + $0x1b0] sm:$0xff]   ;;  %7755 = vmatprep.subr.bf16.mxu0 %v8440_v27 }
 0x3ad   : >> { %v4155_v7 = vrot.slane %v4154_v42, 4  ;;  %v4318_v17 = vmul.f32 0.2, %v4254_v31  ;;  %v4179_v52 = vmax.f32 %v4175_v15, 0.0  ;;  %v4185_v20 = vsub.f32 %v11410_v37, %v11520_v9 }
 0x3ae   : >> { %vm4287_vm4 = vcmp.gt.f32.partialorder %v4255_v60, 0.0  ;;  %v4319_v61 = vmul.f32 0.2, %v4255_v60  ;;  %v4041_v56 = vrot.slane %v4040_v48, 2  ;;  %v4224_v6 = vmul.f32 %v11619_v18, %v4184_v30 }
 0x3af   : >> { %v4156_v46 = vadd.f32 %v4155_v7, %v4154_v42  ;;  %v11725_v44 = vsel %vm4286_vm15, %v4254_v31, %v4318_v17  ;;  %v4215_v51 = vadd.f32 1e-05, %v4179_v52  ;;  %v4225_v62 = vmul.f32 %v11619_v18, %v4185_v20  ;;  %7756 = vmatpush3.bf16.msra.mxu0 %v8441_v41  ;;  %v8442_v7 = vld [vmem:[%s9967_s13 + $0x1f8] sm:$0xff]   ;;  %v8445_v41 = vld [vmem:[%s9967_s13 + $0x200] sm:$0xff]  }
 0x3b0   : >> { %15274 = vst [vmem:[#allocation109_spill] sm:$0xff] %v11725_v44  ;;  %v11728_v2 = vsel %vm4287_vm4, %v4255_v60, %v4319_v61  ;;  %v4187_v29 = vsub.f32 %v11404_v63, %v11520_v9  ;;  %v4042_v25 = vadd.f32 %v4041_v56, %v4040_v48  ;;  %v4256_v42 = vmul.f32 %v15270_v32, %v4224_v6  ;;  %v8443_v17 = vld [vmem:[%s9967_s13 + $0x1b8] sm:$0xff]  }
 0x3b1   : >> { %15275 = vst [vmem:[#allocation82_spill] sm:$0xff] %v11728_v2  ;;  %v4157_v37 = vrot.slane %v4156_v46, 2  ;;  %v11737_v16 = vpack.c.bf16 %v11728_v2, %v11725_v44  ;;  %8464 = vrsqrt.f32 %v4215_v51  ;;  %v4257_v26 = vmul.f32 %v15270_v32, %v4225_v62  ;;  %7757 = vmatprep.subr.bf16.mxu0 %v8442_v7 }
 0x3b2   : >> { %v4227_v31 = vmul.f32 %v11619_v18, %v4187_v29  ;;  %vm4290_vm2 = vcmp.gt.f32.partialorder %v11653_v59, 0.0  ;;  %v4043_v63 = vrot.slane %v4042_v25, 1  ;;  %vm4288_vm3 = vcmp.gt.f32.partialorder %v4256_v42, 0.0 }
 0x3b3   : >> { %v4158_v15 = vadd.f32 %v4157_v37, %v4156_v46  ;;  %5005 = vrot.lane.b32.xlu1 %v11737_v16, %s8808_s18  ;;  %v4320_v60 = vmul.f32 0.2, %v4256_v42  ;;  %vm4289_vm15 = vcmp.gt.f32.partialorder %v4257_v26, 0.0  ;;  %v4321_v30 = vmul.f32 0.2, %v4257_v26  ;;  %7758 = vmatpush3.bf16.msra.mxu0 %v8443_v17 }
 0x3b4   : >> { %v4259_v50 = vmul.f32 %v15270_v32, %v4227_v31  ;;  %v11747_v48 = vsel %vm4290_vm2, %v11653_v59, %v4322_v53  ;;  %v4044_v34 = vadd.f32 %v4043_v63, %v4042_v25  ;;  %v4189_v20 = vsub.f32 %v11453_v33, %v11603_v23  ;;  %v8446_v25 = vld [vmem:[%s9967_s13 + $0x150] sm:$0xff]   ;;  %v8447_v31 = vld [vmem:[%s9967_s13 + $0x1c0] sm:$0xff]   ;;  %7759 = vmatprep.subr.bf16.mxu0 %v8445_v41 }
 0x3b5   : >> { %15276 = vst [vmem:[#allocation83_spill] sm:$0xff] %v11747_v48  ;;  %v4159_v52 = vrot.slane %v4158_v15, 1  ;;  %v11751_v61 = vsel %vm4288_vm3, %v4256_v42, %v4320_v60  ;;  %v11755_v56 = vsel %vm4289_vm15, %v4257_v26, %v4321_v30  ;;  %v4190_v59 = vsub.f32 %v11469_v45, %v11603_v23  ;;  %v8444_v45 = vld [vmem:[%s9967_s13 + $0x190] sm:$0xff]  }
 0x3b6   : >> { %15277 = vst [vmem:[#allocation85_spill] sm:$0xff] %v11751_v61  ;;  %15278 = vst [vmem:[#allocation84_spill] sm:$0xff] %v11755_v56  ;;  %vm4291_vm4 = vcmp.gt.f32.partialorder %v4259_v50, 0.0  ;;  %v4323_v46 = vmul.f32 0.2, %v4259_v50  ;;  %v11759_v6 = vmul.f32 0.015625, %v4044_v34  ;;  %v11763_v51 = vpack.c.bf16 %v11755_v56, %v11751_v61  ;;  %7651 = vmatprep.subr.bf16.mxu1 %v8444_v45 }
 0x3b7   : >> { %v4160_v53 = vadd.f32 %v4159_v52, %v4158_v15  ;;  %v4229_v62 = vmul.f32 %v11698_v58, %v4189_v20  ;;  %v4191_v29 = vsub.f32 %v11448_v47, %v11603_v23  ;;  %v4230_v27 = vmul.f32 %v11698_v58, %v4190_v59  ;;  %v15280_v47 = vld [vmem:[#allocation38_spill] sm:$0xff]  ;;  %7652 = vmatpush3.bf16.msra.mxu1 %v8446_v25 }
 0x3b8   : >> { %v11766_v33 = vsel %vm4291_vm4, %v4259_v50, %v4323_v46  ;;  %v4172_v42 = vmul.f32 %v11759_v6, %v11759_v6  ;;  %5007 = vrot.lane.b32.xlu1 %v11763_v51, %s8808_s18  ;;  %v4192_v26 = vsub.f32 %v11461_v0, %v11603_v23  ;;  %v4193_v7 = vsub.f32 %v11492_v55, %v11603_v23  ;;  %v8448_v20 = vld [vmem:[%s9967_s13 + $0x208] sm:$0xff]  }
 0x3b9   : >> { %15279 = vst [vmem:[#allocation86_spill] sm:$0xff] %v11766_v33  ;;  %v4168_v37 = vmul.f32 0.015625, %v4160_v53  ;;  %v11783_v63 = vpack.c.bf16 %v11766_v33, %v11747_v48  ;;  %v4261_v15 = vmul.f32 %v15280_v47, %v4229_v62  ;;  %v4231_v60 = vmul.f32 %v11698_v58, %v4191_v29  ;;  %7760 = vmatpush3.bf16.msra.mxu0 %v8447_v31  ;;  %v8449_v46 = vld [vmem:[%s9967_s13 + $0x1c8] sm:$0xff]   ;;  %v8451_v31 = vld [vmem:[%s9967_s13 + $0x1d0] sm:$0xff]  }
 0x3ba   : >> { %v4262_v30 = vmul.f32 %v15280_v47, %v4230_v27  ;;  %v4232_v0 = vmul.f32 %v11698_v58, %v4192_v26  ;;  %v4233_v62 = vmul.f32 %v11698_v58, %v4193_v7  ;;  %7761 = vmatprep.subr.bf16.mxu0 %v8448_v20  ;;  %v8450_v26 = vld [vmem:[%s9967_s13 + $0x210] sm:$0xff]   ;;  %v8453_v20 = vld [vmem:[%s9967_s13 + $0x1d8] sm:$0xff]  }
 0x3bb   : >> { %v4176_v50 = vsub.f32 %v4168_v37, %v4172_v42  ;;  %v11791_v17 = vpop.eup %8464  ;;  %vm4293_vm2 = vcmp.gt.f32.partialorder %v4261_v15, 0.0  ;;  %v4325_v34 = vmul.f32 0.2, %v4261_v15  ;;  %v4263_v52 = vmul.f32 %v15280_v47, %v4231_v60 }
 0x3bc   : >> { %vm4294_vm3 = vcmp.gt.f32.partialorder %v4262_v30, 0.0  ;;  %v4242_v59 = vmul.f32 %v11791_v17, %v4202_v12  ;;  %5009 = vrot.lane.b32.xlu1 %v11783_v63, %s8808_s18  ;;  %v4326_v53 = vmul.f32 0.2, %v4262_v30  ;;  %v4264_v45 = vmul.f32 %v15280_v47, %v4232_v0 }
 0x3bd   : >> { %v4180_v55 = vmax.f32 %v4176_v50, 0.0  ;;  %v11803_v29 = vsel %vm4293_vm2, %v4261_v15, %v4325_v34  ;;  %vm4295_vm15 = vcmp.gt.f32.partialorder %v4263_v52, 0.0  ;;  %v4327_v27 = vmul.f32 0.2, %v4263_v52  ;;  %7762 = vmatpush3.bf16.msra.mxu0 %v8449_v46 }
 0x3be   : >> { %15281 = vst [vmem:[#allocation80_spill] sm:$0xff] %v11803_v29  ;;  %v4607_v39 = vpack.c.bf16 %v11803_v29, %v14941_v19  ;;  %v4266_v12 = vmul.f32 %v15280_v47, %v11708_v5  ;;  %v11811_v25 = vsel %vm4294_vm3, %v4262_v30, %v4326_v53  ;;  %v4265_v42 = vmul.f32 %v15280_v47, %v4233_v62 }
 0x3bf   : >> { %v4216_v41 = vadd.f32 1e-05, %v4180_v55  ;;  %15282 = vst [vmem:[#allocation87_spill] sm:$0xff] %v11811_v25  ;;  %v11813_v37 = vsel %vm4295_vm15, %v4263_v52, %v4327_v27  ;;  %vm4296_vm4 = vcmp.gt.f32.partialorder %v4264_v45, 0.0  ;;  %v4195_v15 = vsub.f32 %v11489_v38, %v11603_v23  ;;  %7763 = vmatprep.subr.bf16.mxu0 %v8450_v26  ;;  %v8452_v52 = vld [vmem:[%s9967_s13 + $0x218] sm:$0xff]  }
 0x3c0   : >> { %15283 = vst [vmem:[#allocation89_spill] sm:$0xff] %v11813_v37  ;;  %5011 = vrot.lane.b32.xlu1 %v4607_v39, %s8808_s18  ;;  %vm4297_vm2 = vcmp.gt.f32.partialorder %v4265_v42, 0.0  ;;  %v4328_v5 = vmul.f32 0.2, %v4264_v45  ;;  %v4329_v60 = vmul.f32 0.2, %v4265_v42  ;;  %v11823_v30 = vpack.c.bf16 %v11813_v37, %v11811_v25 }
 0x3c1   : >> { %8466 = vrsqrt.f32 %v4216_v41  ;;  %v4235_v50 = vmul.f32 %v11698_v58, %v4195_v15  ;;  %v4330_v7 = vmul.f32 0.2, %v4266_v12  ;;  %7764 = vmatpush3.bf16.msra.mxu0 %v8451_v31  ;;  %vm4298_vm3 = vcmp.gt.f32.partialorder %v4266_v12, 0.0  ;;  %v15288_v15 = vld [vmem:[#allocation5_spill] sm:$0xff] }
 0x3c2   : >> { %v11826_v0 = vsel %vm4296_vm4, %v4264_v45, %v4328_v5  ;;  %v11828_v34 = vsel %vm4297_vm2, %v4265_v42, %v4329_v60  ;;  %7765 = vmatprep.subr.bf16.mxu0 %v8452_v52  ;;  %v14636_v62 = vrot.slane %v11710_v14, 1  ;;  %v4620_v27 = vrot.slane %v11725_v44, 1  ;;  %v8454_v45 = vld [vmem:[%s9967_s13 + $0x198] sm:$0xff]  }
 0x3c3   : >> { %15284 = vst [vmem:[#allocation90_spill] sm:$0xff] %v11826_v0  ;;  %15285 = vst [vmem:[#allocation92_spill] sm:$0xff] %v11828_v34  ;;  %v4267_v38 = vmul.f32 %v15280_v47, %v4235_v50  ;;  %v11837_v46 = vpack.c.bf16 %v11828_v34, %v11826_v0  ;;  %v11839_v53 = vsel %vm4298_vm3, %v4266_v12, %v4330_v7  ;;  %v4621_v39 = vrot.slane %v11728_v2, 1  ;;  %v8455_v42 = vld [vmem:[%s9967_s13 + $0x158] sm:$0xff]  }
 0x3c4   : >> { %5013 = vrot.lane.b32.xlu1 %v11823_v30, %s8808_s18  ;;  %15286 = vst [vmem:[#allocation95_spill] sm:$0xff] %v11839_v53  ;;  %7653 = vmatprep.subr.bf16.mxu1 %v8454_v45  ;;  %v4212_v31 = vsub.f32 %v11665_v4, %v11759_v6  ;;  %vm15289_vm4 = vcmp.lt.s32.totalorder %v15288_v15, 7  ;;  %v15293_v7 = vld [vmem:[#allocation40_spill] sm:$0xff]  ;;  %vm15295_vm3 = vcmp.lt.s32.totalorder %v15207_v57, 7  ;;  %v4622_v45 = vrot.slane %v11751_v61, 1 }
 0x3c5   : >> { %vm4299_vm15 = vcmp.gt.f32.partialorder %v4267_v38, 0.0  ;;  %v4331_v55 = vmul.f32 0.2, %v4267_v38  ;;  %7766 = vmatpush3.bf16.msra.mxu0 %v8453_v20  ;;  %7654 = vmatpush3.bf16.msra.mxu1 %v8455_v42  ;;  %v11862_v5 = vsel %vm15289_vm4, %v14636_v62, %v4620_v27  ;;  %vm15291_vm2 = vmmov %vm15289_vm4  ;;  %v4274_v52 = vmul.f32 %v15293_v7, %v4242_v59  ;;  %v15296_v62 = vld [vmem:[#allocation41_spill] sm:$0xff] }
 0x3c6   : >> { %15290 = vst [vmem:[#allocation98_spill] sm:$0xff] %v11862_v5  ;;  %v11868_v60 = vsel %vm15291_vm2, %v4620_v27, %v4621_v39  ;;  %v4795_v20 = vsel %vm15295_vm3, %v11862_v5, 0.0  ;;  %v4623_v42 = vrot.slane %v11755_v56, 1  ;;  %v4459_v59 = vrot.slane %v11710_v14, 7 }
 0x3c7   : >> { %v11846_v41 = vsel %vm4299_vm15, %v4267_v38, %v4331_v55  ;;  %15292 = vst [vmem:[#allocation88_spill] sm:$0xff] %v11868_v60  ;;  %v15294_v55 = vmov %v15293_v7  ;;  %v4188_v38 = vsub.f32 %v11422_v13, %v11520_v9  ;;  %vm15297_vm15 = vcmp.lt.s32.totalorder %v15211_v43, 7 }
 0x3c8   : >> { %5015 = vrot.lane.b32.xlu1 %v11837_v46, %s8808_s18  ;;  %15287 = vst [vmem:[#allocation94_spill] sm:$0xff] %v11846_v41  ;;  %v11854_v12 = vpack.c.bf16 %v11846_v41, %v11839_v53  ;;  %v4460_v7 = vrot.slane %v11725_v44, 7  ;;  %v4461_v4 = vrot.slane %v11728_v2, 7  ;;  %v4462_v5 = vrot.slane %v11751_v61, 7 }
 0x3c9   : >> { %v4228_v13 = vmul.f32 %v11619_v18, %v4188_v38  ;;  %vm4306_vm2 = vcmp.gt.f32.partialorder %v4274_v52, 0.0  ;;  %vm15298_vm3 = vcmp.lt.s32.totalorder %v15288_v15, 7  ;;  %vm15303_vm1 = vcmp.lt.s32.totalorder %v15288_v15, 1 }
 0x3ca   : >> { %v11895_v44 = vsel %vm15298_vm3, %v4622_v45, %v4623_v42  ;;  %v11906_v61 = vsel %vm15303_vm1, %v4459_v59, %v4460_v7  ;;  %vm15304_vm9 = vmmov %vm15303_vm1 }
 0x3cb   : >> { %v11850_v26 = vpop.eup %8466  ;;  %15299 = vst [vmem:[#allocation99_spill] sm:$0xff] %v11895_v44 }
 0x3cc   : >> { %5017 = vrot.lane.b32.xlu1 %v11854_v12, %s8808_s18  ;;  %v4252_v50 = vmul.f32 %v11850_v26, %v4212_v31  ;;  %v4796_v31 = vsel %vm15297_vm15, %v11868_v60, 0.0  ;;  %v4260_v60 = vmul.f32 %v15270_v32, %v4228_v13  ;;  %vm15300_vm15 = vmmov %vm15298_vm3  ;;  %v4625_v13 = vrot.slane %v11766_v33, 1 }
 0x3cd   : >> { %v4827_v14 = vpack.c.bf16 %v4796_v31, %v4795_v20  ;;  %v11899_v18 = vsel %vm15300_vm15, %v4621_v39, %v4622_v45  ;;  %v11911_v20 = vsel %vm15304_vm9, %v4461_v4, %v4462_v5  ;;  %vm15305_vm3 = vmmov %vm15303_vm1  ;;  %v4463_v45 = vrot.slane %v11755_v56, 7  ;;  %v15311_v56 = vld [vmem:[#allocation9_spill] sm:$0xff] }
 0x3ce   : >> { %v4284_v27 = vmul.f32 %v15296_v62, %v4252_v50  ;;  %v4338_v50 = vmul.f32 0.2, %v4274_v52  ;;  %15301 = vst [vmem:[#allocation103_spill] sm:$0xff] %v11899_v18  ;;  %vm4292_vm14 = vcmp.gt.f32.partialorder %v4260_v60, 0.0  ;;  %v4324_v24 = vmul.f32 0.2, %v4260_v60 }
 0x3cf   : >> { %v11915_v39 = vsel %vm15305_vm3, %v4460_v7, %v4461_v4  ;;  %v4624_v31 = vrot.slane %v11747_v48, 1  ;;  %v15308_v4 = vld [vmem:[#allocation8_spill] sm:$0xff]  ;;  %vm15314_vm15 = vcmp.ge.s32.totalorder %v15207_v57, 1  ;;  %vm15318_vm3 = vmmov %vm15303_vm1 }
 0x3d0   : >> { %5147 = vrot.lane.b32.xlu1 %v11737_v16, %s8808_s18  ;;  %vm4316_vm4 = vcmp.gt.f32.partialorder %v4284_v27, 0.0  ;;  %v4348_v9 = vmul.f32 0.2, %v4284_v27  ;;  %vm15310_vm9 = vcmp.lt.s32.totalorder %v15308_v4, 7  ;;  %v11949_v4 = vsel %vm4306_vm2, %v4274_v52, %v4338_v50 }
 0x3d1   : >> { %v4797_v7 = vsel %vm15310_vm9, %v11899_v18, 0.0  ;;  %15315 = vst [vmem:[#allocation123_spill] sm:$0xff] %v11949_v4  ;;  %vm15325_vm9 = vcmp.ge.s32.totalorder %v14934_v40, 1  ;;  %v4470_v50 = vrot.slane %v11826_v0, 7 }
 0x3d2   : >> { %v11901_v16 = vsel %vm4316_vm4, %v4284_v27, %v4348_v9  ;;  %v4464_v27 = vrot.slane %v11747_v48, 7  ;;  %v11927_v9 = vsel %vm4292_vm14, %v4260_v60, %v4324_v24  ;;  %vm15313_vm4 = vcmp.lt.s32.totalorder %v15311_v56, 7  ;;  %vm15316_vm14 = vmmov %vm15303_vm1 }
 0x3d3   : >> { %15302 = vst [vmem:[#allocation107_spill] sm:$0xff] %v11901_v16  ;;  %v14655_v38 = vrot.slane %v11901_v16, 7  ;;  %15307 = vst [vmem:[#allocation111_spill] sm:$0xff] %v11927_v9  ;;  %v4798_v49 = vsel %vm15313_vm4, %v11895_v44, 0.0  ;;  %v4732_v16 = vsel %vm2072_vm10, %v11906_v61, 0.0  ;;  %v4733_v24 = vsel %vm2073_vm7, %v11915_v39, 0.0 }
 0x3d4   : >> { %5099 = vrot.lane.b32.xlu1 %v4827_v14, %s8808_s18  ;;  %v4734_v60 = vsel %vm2074_vm8, %v11911_v20, 0.0  ;;  %v4465_v56 = vrot.slane %v11766_v33, 7  ;;  %v11963_v44 = vld [vmem:[%s9967_s13 + $0x220] sm:$0xff]   ;;  %v4828_v18 = vpack.c.bf16 %v4798_v49, %v4797_v7  ;;  %vm15326_vm4 = vmmov %vm15318_vm3  ;;  %v4469_v7 = vrot.slane %v11813_v37, 7 }
 0x3d5   : >> { %v11925_v14 = vsel %vm15303_vm1, %v14655_v38, %v4459_v59  ;;  %v11955_v38 = vsel %vm15316_vm14, %v4463_v45, %v4464_v27  ;;  %15320 = vst [vmem:[#allocation115_spill] sm:$0xff] %v11963_v44  ;;  %vm15321_vm1 = vcmp.lt.s32.totalorder %v15288_v15, 7  ;;  %v4764_v33 = vpack.c.bf16 %v4734_v60, %v4733_v24  ;;  %7979 = vmatprep.subr.bf16.mxu1 %v11963_v44  ;;  %vm15330_vm14 = vmmov %vm15318_vm3 }
 0x3d6   : >> { %15306 = vst [vmem:[#allocation106_spill] sm:$0xff] %v11925_v14  ;;  %v4731_v48 = vsel %vm15314_vm15, %v11925_v14, 0.0  ;;  %15317 = vst [vmem:[#allocation102_spill] sm:$0xff] %v11955_v38  ;;  %v11967_v52 = vsel %vm15321_vm1, %v4624_v31, %v4625_v13  ;;  %v4468_v14 = vrot.slane %v11811_v25, 7 }
 0x3d7   : >> { %v4763_v59 = vpack.c.bf16 %v4732_v16, %v4731_v48  ;;  %v11959_v48 = vsel %vm15318_vm3, %v4462_v5, %v4463_v45  ;;  %v4466_v16 = vrot.slane %v11927_v9, 7  ;;  %15322 = vst [vmem:[#allocation77_spill] sm:$0xff] %v11967_v52  ;;  %vm15323_vm2 = vmmov %vm15321_vm1  ;;  %v4626_v5 = vrot.slane %v11927_v9, 1 }
 0x3d8   : >> { %5149 = vrot.lane.b32.xlu1 %v11763_v51, %s8808_s18  ;;  %15319 = vst [vmem:[#allocation110_spill] sm:$0xff] %v11959_v48  ;;  %v11971_v51 = vsel %vm15323_vm2, %v4623_v42, %v4624_v31  ;;  %v4467_v45 = vrot.slane %v11803_v29, 7  ;;  %v4735_v49 = vsel %vm2075_vm11, %v11959_v48, 0.0  ;;  %v4736_v42 = vsel %vm15325_vm9, %v11955_v38, 0.0  ;;  %vm15328_vm15 = vmmov %vm15318_vm3 }
 0x3d9   : >> { %15324 = vst [vmem:[#allocation114_spill] sm:$0xff] %v11971_v51  ;;  %5051 = vrot.lane.b32.xlu0 %v4763_v59, %s8808_s18  ;;  %v11987_v31 = vsel %vm15326_vm4, %v4464_v27, %v4465_v56  ;;  %v11993_v59 = vsel %vm15328_vm15, %v4465_v56, %v4466_v16  ;;  %vm15333_vm1 = vcmp.lt.s32.totalorder %v14933_v28, 7  ;;  %vm15334_vm2 = vcmp.lt.s32.totalorder %v14934_v40, 7  ;;  %v15340_v27 = vld [vmem:[#allocation12_spill] sm:$0xff]  ;;  %v15343_v40 = vld [vmem:[#allocation13_spill] sm:$0xff] }
 0x3da   : >> { %15327 = vst [vmem:[#allocation120_spill] sm:$0xff] %v11987_v31  ;;  %15329 = vst [vmem:[#allocation93_spill] sm:$0xff] %v11993_v59  ;;  %v11997_v24 = vsel %vm15330_vm14, %v4467_v45, %v4468_v14  ;;  %v12001_v60 = vsel %vm15318_vm3, %v4466_v16, %v4467_v45  ;;  %v4800_v56 = vsel %vm15334_vm2, %v11967_v52, 0.0  ;;  %v15335_v38 = vrot.slane %v11803_v29, 1 }
 0x3db   : >> { %15331 = vst [vmem:[#allocation96_spill] sm:$0xff] %v11997_v24  ;;  %15332 = vst [vmem:[#allocation100_spill] sm:$0xff] %v12001_v60  ;;  %vm15336_vm9 = vcmp.lt.s32.totalorder %v15288_v15, 7  ;;  %v4765_v44 = vpack.c.bf16 %v4736_v42, %v4735_v49  ;;  %v15341_v28 = vmov %v15340_v27  ;;  %vm15342_vm15 = vcmp.ge.s32.totalorder %v15340_v27, 1 }
 0x3dc   : >> { %5101 = vrot.lane.b32.xlu1 %v4828_v18, %s8808_s18  ;;  %v4799_v18 = vsel %vm15333_vm1, %v11971_v51, 0.0  ;;  %v12017_v16 = vsel %vm15336_vm9, %v4626_v5, %v15335_v38  ;;  %vm15338_vm4 = vmmov %vm15336_vm9  ;;  %v4737_v51 = vsel %vm15342_vm15, %v11987_v31, 0.0  ;;  %vm15344_vm14 = vcmp.ge.s32.totalorder %v15343_v40, 1  ;;  %v15347_v38 = vld [vmem:[#allocation15_spill] sm:$0xff] }
 0x3dd   : >> { %5053 = vrot.lane.b32.xlu0 %v4764_v33, %s8808_s18  ;;  %15337 = vst [vmem:[#allocation105_spill] sm:$0xff] %v12017_v16  ;;  %v12021_v45 = vsel %vm15338_vm4, %v4625_v13, %v4626_v5  ;;  %v4738_v52 = vsel %vm15344_vm14, %v11993_v59, 0.0  ;;  %v15345_v33 = vld [vmem:[#allocation14_spill] sm:$0xff]  ;;  %v15348_v32 = vmov %v15347_v38  ;;  %vm15349_vm1 = vcmp.ge.s32.totalorder %v15347_v38, 1 }
 0x3de   : >> { %15339 = vst [vmem:[#allocation101_spill] sm:$0xff] %v12021_v45  ;;  %vm15346_vm3 = vcmp.ge.s32.totalorder %v15345_v33, 1  ;;  %v4740_v48 = vsel %vm15349_vm1, %v11997_v24, 0.0  ;;  %vm15350_vm2 = vcmp.lt.s32.totalorder %v15288_v15, 1  ;;  %v4829_v49 = vpack.c.bf16 %v4800_v56, %v4799_v18  ;;  %v15360_v56 = vld [vmem:[#allocation16_spill] sm:$0xff] }
 0x3df   : >> { %v4739_v2 = vsel %vm15346_vm3, %v12001_v60, 0.0  ;;  %v12037_v13 = vsel %vm15350_vm2, %v4468_v14, %v4469_v7  ;;  %vm15352_vm9 = vmmov %vm15350_vm2  ;;  %v4196_v27 = vsub.f32 %v11506_v11, %v11603_v23  ;;  %v4926_v38 = vpack.c.bf16 %v14941_v19, %v11927_v9 }
 0x3e0   : >> { %15351 = vst [vmem:[#allocation97_spill] sm:$0xff] %v12037_v13  ;;  %5151 = vrot.lane.b32.xlu1 %v11783_v63, %s8808_s18  ;;  %v12044_v42 = vsel %vm15352_vm9, %v4469_v7, %v4470_v50  ;;  %vm15354_vm4 = vcmp.lt.s32.totalorder %v15341_v28, 7  ;;  %vm15355_vm15 = vcmp.lt.s32.totalorder %v15343_v40, 7  ;;  %v15356_v63 = vrot.slane %v11813_v37, 1 }
 0x3e1   : >> { %15353 = vst [vmem:[#allocation104_spill] sm:$0xff] %v12044_v42  ;;  %v4801_v14 = vsel %vm15354_vm4, %v12021_v45, 0.0  ;;  %v4802_v5 = vsel %vm15355_vm15, %v12017_v16, 0.0  ;;  %5055 = vrot.lane.b32.xlu0 %v4765_v44, %s8808_s18  ;;  %v15357_v7 = vrot.slane %v11811_v25, 1  ;;  %vm15358_vm14 = vcmp.lt.s32.totalorder %v15288_v15, 7  ;;  %v15363_v16 = vld [vmem:[#allocation17_spill] sm:$0xff]  ;;  %vm15367_vm4 = vmmov %vm15352_vm9 }
 0x3e2   : >> { %v4766_v23 = vpack.c.bf16 %v4738_v52, %v4737_v51  ;;  %v4767_v18 = vpack.c.bf16 %v4740_v48, %v4739_v2  ;;  %v15361_v31 = vmov %v15360_v56  ;;  %vm15362_vm3 = vcmp.ge.s32.totalorder %v15360_v56, 1 }
 0x3e3   : >> { %v12063_v11 = vsel %vm15358_vm14, %v15357_v7, %v15356_v63  ;;  %v4741_v60 = vsel %vm15362_vm3, %v12037_v13, 0.0  ;;  %v4236_v24 = vmul.f32 %v11698_v58, %v4196_v27  ;;  %vm15364_vm1 = vcmp.ge.s32.totalorder %v15363_v16, 1  ;;  %v15528_v13 = vld [vmem:[#allocation36_spill] sm:$0xff] }
 0x3e4   : >> { %15359 = vst [vmem:[#allocation108_spill] sm:$0xff] %v12063_v11  ;;  %v4742_v44 = vsel %vm15364_vm1, %v12044_v42, 0.0  ;;  %v4471_v9 = vrot.slane %v11828_v34, 7  ;;  %v4472_v40 = vrot.slane %v11839_v53, 7  ;;  %v4197_v63 = vsub.f32 %v11530_v22, %v11682_v10  ;;  %5103 = vrot.lane.b32.xlu1 %v4829_v49, %s8808_s18 }
 0x3e5   : >> { %v4268_v2 = vmul.f32 %v15280_v47, %v4236_v24  ;;  %v4198_v48 = vsub.f32 %v11552_v8, %v11682_v10  ;;  %v4199_v58 = vsub.f32 %v11525_v35, %v11682_v10  ;;  %v4200_v52 = vsub.f32 %v11545_v1, %v11682_v10  ;;  %5057 = vrot.lane.b32.xlu0 %v4766_v23, %s8808_s18 }
 0x3e6   : >> { %v4473_v51 = vrot.slane %v11846_v41, 7  ;;  %v4237_v27 = vmul.f32 %v11791_v17, %v4197_v63  ;;  %v4201_v22 = vsub.f32 %v11570_v21, %v11682_v10  ;;  %v4203_v24 = vsub.f32 %v11565_v3, %v11682_v10 }
 0x3e7   : >> { %vm4300_vm2 = vcmp.gt.f32.partialorder %v4268_v2, 0.0  ;;  %v4332_v8 = vmul.f32 0.2, %v4268_v2  ;;  %v4238_v49 = vmul.f32 %v11791_v17, %v4198_v48  ;;  %v4239_v35 = vmul.f32 %v11791_v17, %v4199_v58 }
 0x3e8   : >> { %v4269_v1 = vmul.f32 %v15294_v55, %v4237_v27  ;;  %v4240_v7 = vmul.f32 %v11791_v17, %v4200_v52  ;;  %v4241_v23 = vmul.f32 %v11791_v17, %v4201_v22  ;;  %v12097_v56 = vmul.f32 %v11791_v17, %v4203_v24  ;;  %5153 = vrot.lane.b32.xlu1 %v4926_v38, %s8808_s18 }
 0x3e9   : >> { %v12102_v3 = vsel %vm15352_vm9, %v4471_v9, %v4472_v40  ;;  %v12104_v21 = vsel %vm4300_vm2, %v4268_v2, %v4332_v8  ;;  %v4270_v63 = vmul.f32 %v15294_v55, %v4238_v49  ;;  %v4271_v48 = vmul.f32 %v15294_v55, %v4239_v35  ;;  %5059 = vrot.lane.b32.xlu0 %v4767_v18, %s8808_s18  ;;  %v15376_v35 = vld [vmem:[#allocation19_spill] sm:$0xff] }
 0x3ea   : >> { %15365 = vst [vmem:[#allocation113_spill] sm:$0xff] %v12102_v3  ;;  %15366 = vst [vmem:[#allocation119_spill] sm:$0xff] %v12104_v21  ;;  %v12111_v58 = vsel %vm15367_vm4, %v4470_v50, %v4471_v9  ;;  %v4474_v52 = vrot.slane %v12104_v21, 7  ;;  %vm4301_vm15 = vcmp.gt.f32.partialorder %v4269_v1, 0.0  ;;  %v4333_v38 = vmul.f32 0.2, %v4269_v1 }
 0x3eb   : >> { %15368 = vst [vmem:[#allocation112_spill] sm:$0xff] %v12111_v58  ;;  %v4830_v27 = vpack.c.bf16 %v4802_v5, %v4801_v14  ;;  %vm4302_vm14 = vcmp.gt.f32.partialorder %v4270_v63, 0.0  ;;  %v4334_v22 = vmul.f32 0.2, %v4270_v63  ;;  %v4272_v2 = vmul.f32 %v15294_v55, %v4240_v7  ;;  %v15374_v5 = vld [vmem:[#allocation18_spill] sm:$0xff] }
 0x3ec   : >> { %v15369_v24 = vrot.slane %v11811_v25, 1  ;;  %v15370_v8 = vrot.slane %v11803_v29, 1  ;;  %vm15371_vm3 = vcmp.lt.s32.totalorder %v15288_v15, 7  ;;  %v4768_v49 = vpack.c.bf16 %v4742_v44, %v4741_v60 }
 0x3ed   : >> { %v12123_v9 = vsel %vm4301_vm15, %v4269_v1, %v4333_v38  ;;  %v4335_v50 = vmul.f32 0.2, %v4271_v48  ;;  %5105 = vrot.lane.b32.xlu1 %v4830_v27, %s8808_s18  ;;  %vm15375_vm1 = vcmp.ge.s32.totalorder %v15374_v5, 1  ;;  %v15377_v47 = vmov %v15376_v35  ;;  %vm15381_vm15 = vmmov %vm15367_vm4 }
 0x3ee   : >> { %v12121_v18 = vsel %vm15371_vm3, %v15370_v8, %v15369_v24  ;;  %15373 = vst [vmem:[#allocation116_spill] sm:$0xff] %v12123_v9  ;;  %v4743_v14 = vsel %vm15375_vm1, %v12111_v58, 0.0  ;;  %vm15378_vm2 = vcmp.ge.s32.totalorder %v15376_v35, 1  ;;  %v12132_v42 = vsel %vm4302_vm14, %v4270_v63, %v4334_v22  ;;  %5061 = vrot.lane.b32.xlu0 %v4768_v49, %s8808_s18  ;;  %v15393_v58 = vld [vmem:[#allocation20_spill] sm:$0xff] }
 0x3ef   : >> { %15372 = vst [vmem:[#allocation117_spill] sm:$0xff] %v12121_v18  ;;  %v4744_v7 = vsel %vm15378_vm2, %v12102_v3, 0.0  ;;  %15379 = vst [vmem:[#allocation121_spill] sm:$0xff] %v12132_v42  ;;  %vm4303_vm9 = vcmp.gt.f32.partialorder %v4271_v48, 0.0  ;;  %v12137_v60 = vsel %vm15367_vm4, %v4473_v51, %v4474_v52  ;;  %v12141_v44 = vsel %vm15381_vm15, %v4472_v40, %v4473_v51 }
 0x3f0   : >> { %15380 = vst [vmem:[#allocation122_spill] sm:$0xff] %v12137_v60  ;;  %15382 = vst [vmem:[#allocation125_spill] sm:$0xff] %v12141_v44  ;;  %v4475_v1 = vrot.slane %v12123_v9, 7  ;;  %v4476_v38 = vrot.slane %v12132_v42, 7  ;;  %vm15383_vm3 = vcmp.lt.s32.totalorder %v15345_v33, 7  ;;  %vm15384_vm14 = vcmp.lt.s32.totalorder %v15348_v32, 7 }
 0x3f1   : >> { %v4803_v63 = vsel %vm15383_vm3, %v12121_v18, 0.0  ;;  %v4804_v27 = vsel %vm15384_vm14, %v12063_v11, 0.0  ;;  %vm4304_vm1 = vcmp.gt.f32.partialorder %v4272_v2, 0.0  ;;  %v4336_v22 = vmul.f32 0.2, %v4272_v2  ;;  %5155 = vrot.lane.b32.xlu1 %v11823_v30, %s8808_s18 }
 0x3f2   : >> { %v15385_v24 = vrot.slane %v11828_v34, 1  ;;  %v15386_v8 = vrot.slane %v11826_v0, 1  ;;  %vm15387_vm2 = vcmp.lt.s32.totalorder %v15288_v15, 7  ;;  %v15390_v49 = vrot.slane %v11813_v37, 1 }
 0x3f3   : >> { %vm15391_vm4 = vmmov %vm15387_vm2  ;;  %v4769_v3 = vpack.c.bf16 %v4744_v7, %v4743_v14  ;;  %v12167_v11 = vsel %vm4303_vm9, %v4271_v48, %v4335_v50  ;;  %vm15395_vm15 = vcmp.ge.s32.totalorder %v15393_v58, 1  ;;  %v12177_v0 = vsel %vm4304_vm1, %v4272_v2, %v4336_v22 }
 0x3f4   : >> { %v12157_v40 = vsel %vm15387_vm2, %v15386_v8, %v15385_v24  ;;  %v15389_v51 = vmov %v15386_v8  ;;  %v4745_v29 = vsel %vm15395_vm15, %v12141_v44, 0.0  ;;  %v15396_v24 = vld [vmem:[#allocation21_spill] sm:$0xff]  ;;  %v4477_v37 = vrot.slane %v12167_v11, 7 }
 0x3f5   : >> { %15388 = vst [vmem:[#allocation124_spill] sm:$0xff] %v12157_v40  ;;  %v12165_v35 = vsel %vm15391_vm4, %v15390_v49, %v15389_v51  ;;  %vm15398_vm3 = vcmp.ge.s32.totalorder %v15396_v24, 1  ;;  %5063 = vrot.lane.b32.xlu0 %v4769_v3, %s8808_s18  ;;  %vm15399_vm9 = vcmp.lt.s32.totalorder %v15288_v15, 1  ;;  %v4478_v58 = vrot.slane %v12177_v0, 7  ;;  %v15409_v49 = vld [vmem:[#allocation23_spill] sm:$0xff] }
 0x3f6   : >> { %15392 = vst [vmem:[#allocation118_spill] sm:$0xff] %v12165_v35  ;;  %v4746_v8 = vsel %vm15398_vm3, %v12137_v60, 0.0  ;;  %v12184_v48 = vsel %vm15399_vm9, %v4475_v1, %v4476_v38  ;;  %vm15401_vm14 = vmmov %vm15399_vm9  ;;  %v4831_v50 = vpack.c.bf16 %v4804_v27, %v4803_v63  ;;  %vm15403_vm1 = vcmp.lt.s32.totalorder %v15363_v16, 7  ;;  %v15407_v63 = vld [vmem:[#allocation22_spill] sm:$0xff] }
 0x3f7   : >> { %15400 = vst [vmem:[#allocation126_spill] sm:$0xff] %v12184_v48  ;;  %v12188_v30 = vsel %vm15401_vm14, %v4474_v52, %v4475_v1  ;;  %v4806_v2 = vsel %vm15403_vm1, %v12157_v40, 0.0  ;;  %v14703_v14 = vrot.slane %v12167_v11, 1  ;;  %v4273_v7 = vmul.f32 %v15294_v55, %v4241_v23  ;;  %vm15405_vm4 = vmmov %vm15399_vm9 }
 0x3f8   : >> { %15402 = vst [vmem:[#allocation127_spill] sm:$0xff] %v12188_v30  ;;  %vm15404_vm2 = vcmp.lt.s32.totalorder %v15361_v31, 7  ;;  %v4770_v22 = vpack.c.bf16 %v4746_v8, %v4745_v29  ;;  %v12201_v52 = vsel %vm15405_vm4, %v4477_v37, %v4478_v58  ;;  %v4638_v1 = vrot.slane %v12177_v0, 1  ;;  %5107 = vrot.lane.b32.xlu1 %v4831_v50, %s8808_s18 }
 0x3f9   : >> { %v4805_v3 = vsel %vm15404_vm2, %v12165_v35, 0.0  ;;  %15406 = vst [vmem:[#allocation128_spill] sm:$0xff] %v12201_v52  ;;  %vm15408_vm15 = vcmp.ge.s32.totalorder %v15407_v63, 1  ;;  %vm15410_vm3 = vcmp.ge.s32.totalorder %v15409_v49, 1  ;;  %vm4305_vm9 = vcmp.gt.f32.partialorder %v4273_v7, 0.0  ;;  %vm15417_vm2 = vmmov %vm15405_vm4 }
 0x3fa   : >> { %v4747_v27 = vsel %vm15408_vm15, %v12188_v30, 0.0  ;;  %v4748_v23 = vsel %vm15410_vm3, %v12184_v48, 0.0  ;;  %5065 = vrot.lane.b32.xlu0 %v4770_v22, %s8808_s18  ;;  %v4337_v29 = vmul.f32 0.2, %v4273_v7  ;;  %vm15411_vm14 = vcmp.lt.s32.totalorder %v15288_v15, 7 }
 0x3fb   : >> { %v12216_v24 = vsel %vm15411_vm14, %v14703_v14, %v4638_v1  ;;  %v4832_v8 = vpack.c.bf16 %v4806_v2, %v4805_v3  ;;  %v4480_v50 = vrot.slane %v11949_v4, 7  ;;  %v4275_v51 = vmul.f32 %v15294_v55, %v12097_v56  ;;  %vm15415_vm1 = vmmov %vm15411_vm14 }
 0x3fc   : >> { %15412 = vst [vmem:[#allocation129_spill] sm:$0xff] %v12216_v24  ;;  %v4204_v30 = vsub.f32 %v11582_v54, %v11682_v10  ;;  %v15413_v48 = vrot.slane %v11846_v41, 1  ;;  %v15414_v22 = vrot.slane %v11839_v53, 1  ;;  %v4771_v40 = vpack.c.bf16 %v4748_v23, %v4747_v27  ;;  %5157 = vrot.lane.b32.xlu1 %v11837_v46, %s8808_s18  ;;  %vm15422_vm15 = vmmov %vm15415_vm1 }
 0x3fd   : >> { %v12233_v2 = vsel %vm15417_vm2, %v4476_v38, %v4477_v37  ;;  %v12235_v3 = vsel %vm4305_vm9, %v4273_v7, %v4337_v29  ;;  %vm4307_vm4 = vcmp.gt.f32.partialorder %v4275_v51, 0.0  ;;  %v4339_v56 = vmul.f32 0.2, %v4275_v51  ;;  %vm15424_vm3 = vmmov %vm15415_vm1  ;;  %v15430_v29 = vld [vmem:[#allocation24_spill] sm:$0xff] }
 0x3fe   : >> { %v12229_v60 = vsel %vm15415_vm1, %v15414_v22, %v15413_v48  ;;  %15418 = vst [vmem:[#allocation131_spill] sm:$0xff] %v12233_v2  ;;  %15419 = vst [vmem:[#allocation132_spill] sm:$0xff] %v12235_v3  ;;  %v14705_v54 = vrot.slane %v12235_v3, 1  ;;  %v4479_v10 = vrot.slane %v12235_v3, 7  ;;  %v15420_v14 = vmov %v15414_v22  ;;  %5067 = vrot.lane.b32.xlu0 %v4771_v40, %s8808_s18 }
 0x3ff   : >> { %15416 = vst [vmem:[#allocation130_spill] sm:$0xff] %v12229_v60  ;;  %v15421_v48 = vrot.slane %v11828_v34, 1  ;;  %v4611_v37 = vpack.c.bf16 %v12123_v9, %v14941_v19  ;;  %v12254_v46 = vpack.c.bf16 %v12235_v3, %v12177_v0  ;;  %v4244_v38 = vmul.f32 %v11791_v17, %v4204_v30  ;;  %vm15426_vm9 = vmmov %vm15417_vm2  ;;  %v15432_v30 = vld [vmem:[#allocation25_spill] sm:$0xff] }
 0x400   : >> { %v12261_v7 = vsel %vm15424_vm3, %v4638_v1, %v14705_v54  ;;  %vm15427_vm14 = vmmov %vm15417_vm2  ;;  %v12271_v23 = vsel %vm4307_vm4, %v4275_v51, %v4339_v56  ;;  %vm15431_vm1 = vcmp.ge.s32.totalorder %v15430_v29, 1  ;;  %v15433_v53 = vmov %v15432_v30  ;;  %v15435_v1 = vld [vmem:[#allocation26_spill] sm:$0xff]  ;;  %v15437_v54 = vld [vmem:[#allocation27_spill] sm:$0xff]  ;;  %5109 = vrot.lane.b32.xlu1 %v4832_v8, %s8808_s18 }
 0x401   : >> { %v12247_v27 = vsel %vm15422_vm15, %v15421_v48, %v15420_v14  ;;  %15425 = vst [vmem:[#allocation134_spill] sm:$0xff] %v12261_v7  ;;  %v12265_v14 = vsel %vm15426_vm9, %v4479_v10, %v4480_v50  ;;  %v12269_v40 = vsel %vm15427_vm14, %v4478_v58, %v4479_v10  ;;  %15429 = vst [vmem:[#allocation136_spill] sm:$0xff] %v12271_v23  ;;  %v4749_v17 = vsel %vm15431_vm1, %v12233_v2, 0.0  ;;  %v15440_v10 = vld [vmem:[#allocation75_spill] sm:$0xff]  ;;  %v15441_v2 = vld [vmem:[#allocation74_spill] sm:$0xff] }
 0x402   : >> { %15423 = vst [vmem:[#allocation133_spill] sm:$0xff] %v12247_v27  ;;  %15428 = vst [vmem:[#allocation135_spill] sm:$0xff] %v12269_v40  ;;  %vm15434_vm2 = vcmp.ge.s32.totalorder %v15432_v30, 1  ;;  %vm15436_vm15 = vcmp.ge.s32.totalorder %v15435_v1, 1  ;;  %v15438_v16 = vmov %v15437_v54  ;;  %vm15439_vm3 = vcmp.ge.s32.totalorder %v15437_v54, 1  ;;  %5019 = vrot.lane.b32.xlu0 %v4611_v37, %s8808_s18 }
 0x403   : >> { %v4750_v22 = vsel %vm15434_vm2, %v12201_v52, 0.0  ;;  %v4751_v48 = vsel %vm15436_vm15, %v12269_v40, 0.0  ;;  %v4752_v34 = vsel %vm15439_vm3, %v12265_v14, 0.0  ;;  %v4276_v58 = vmul.f32 %v15294_v55, %v4244_v38  ;;  %vm15448_vm15 = vmmov %vm15427_vm14 }
 0x404   : >> { %v4773_v51 = vpack.c.bf16 %v4752_v34, %v4751_v48  ;;  %v4205_v56 = vsub.f32 %v15440_v10, %v11759_v6  ;;  %v4206_v30 = vsub.f32 %v15441_v2, %v11759_v6  ;;  %v4807_v52 = vsel %vm2308_vm0, %v12247_v27, 0.0  ;;  %5159 = vrot.lane.b32.xlu1 %v11854_v12, %s8808_s18 }
 0x405   : >> { %vm15442_vm4 = vcmp.lt.s32.totalorder %v15377_v47, 7  ;;  %v4481_v34 = vrot.slane %v12271_v23, 7  ;;  %vm4308_vm9 = vcmp.gt.f32.partialorder %v4276_v58, 0.0  ;;  %v4340_v8 = vmul.f32 0.2, %v4276_v58 }
 0x406   : >> { %v4808_v54 = vsel %vm15442_vm4, %v12229_v60, 0.0  ;;  %v4245_v38 = vmul.f32 %v11850_v26, %v4205_v56  ;;  %v4246_v48 = vmul.f32 %v11850_v26, %v4206_v30  ;;  %v4635_v2 = vrot.slane %v12123_v9, 1  ;;  %v15445_v9 = vld [vmem:[#allocation76_spill] sm:$0xff] }
 0x407   : >> { %v4772_v10 = vpack.c.bf16 %v4750_v22, %v4749_v17  ;;  %v12305_v40 = vsel %vm15427_vm14, %v4480_v50, %v4481_v34  ;;  %v4210_v37 = vsub.f32 %v11668_v36, %v11759_v6  ;;  %v12311_v60 = vsel %vm4308_vm9, %v4276_v58, %v4340_v8  ;;  %v15443_v50 = vld [vmem:[#allocation28_spill] sm:$0xff] }
 0x408   : >> { %v4833_v56 = vpack.c.bf16 %v4808_v54, %v4807_v52  ;;  %v4634_v30 = vrot.slane %v12104_v21, 1  ;;  %v14721_v17 = vrot.slane %v12311_v60, 7  ;;  %v14725_v22 = vrot.slane %v12311_v60, 1 }
 0x409   : >> { %5069 = vrot.lane.b32.xlu0 %v4772_v10, %s8808_s18  ;;  %vm15444_vm1 = vcmp.ge.s32.totalorder %v15443_v50, 1  ;;  %v4277_v36 = vmul.f32 %v15296_v62, %v4245_v38  ;;  %v4207_v12 = vsub.f32 %v15445_v9, %v11759_v6  ;;  %v4278_v58 = vmul.f32 %v15296_v62, %v4246_v48  ;;  %v15453_v10 = vld [vmem:[#allocation29_spill] sm:$0xff] }
 0x40a   : >> { %v4753_v55 = vsel %vm15444_vm1, %v12305_v40, 0.0  ;;  %vm15446_vm2 = vcmp.lt.s32.totalorder %v15288_v15, 7  ;;  %v12330_v54 = vpack.c.bf16 %v12167_v11, %v12132_v42  ;;  %v12336_v8 = vsel %vm15448_vm15, %v4481_v34, %v14721_v17  ;;  %5111 = vrot.lane.b32.xlu1 %v4833_v56, %s8808_s18  ;;  %v15455_v34 = vld [vmem:[#allocation91_spill] sm:$0xff] }
 0x40b   : >> { %v12326_v52 = vsel %vm15446_vm2, %v4634_v30, %v4635_v2  ;;  %15449 = vst [vmem:[#allocation74_spill] sm:$0xff] %v12336_v8  ;;  %v15450_v9 = vrot.slane %v12271_v23, 1  ;;  %vm15451_vm3 = vmmov %vm15446_vm2  ;;  %v4636_v48 = vrot.slane %v12132_v42, 1  ;;  %vm15454_vm4 = vcmp.ge.s32.totalorder %v15453_v10, 1 }
 0x40c   : >> { %15447 = vst [vmem:[#allocation75_spill] sm:$0xff] %v12326_v52  ;;  %v4754_v27 = vsel %vm15454_vm4, %v12336_v8, 0.0  ;;  %v4247_v47 = vmul.f32 %v11850_v26, %v4207_v12  ;;  %v4208_v17 = vsub.f32 %v15455_v34, %v11759_v6  ;;  %v4250_v44 = vmul.f32 %v11850_v26, %v4210_v37  ;;  %vm15457_vm9 = vmmov %vm15446_vm2  ;;  %v15459_v34 = vld [vmem:[#allocation79_spill] sm:$0xff] }
 0x40d   : >> { %v12344_v38 = vsel %vm15451_vm3, %v15450_v9, %v14725_v22  ;;  %v4930_v5 = vpack.c.bf16 %v14941_v19, %v12104_v21  ;;  %5021 = vrot.lane.b32.xlu0 %v12330_v54, %s8808_s18  ;;  %v4774_v56 = vpack.c.bf16 %v4754_v27, %v4753_v55  ;;  %v15456_v9 = vrot.slane %v11846_v41, 1  ;;  %vm15462_vm15 = vmmov %vm15446_vm2 }
 0x40e   : >> { %15452 = vst [vmem:[#allocation76_spill] sm:$0xff] %v12344_v38  ;;  %v4341_v8 = vmul.f32 0.2, %v4277_v36  ;;  %v4342_v12 = vmul.f32 0.2, %v4278_v58  ;;  %v4248_v42 = vmul.f32 %v11850_v26, %v4208_v17  ;;  %v4810_v37 = vsel %vm2311_vm6, %v12326_v52, 0.0 }
 0x40f   : >> { %v12363_v22 = vsel %vm15457_vm9, %v15456_v9, %v4634_v30  ;;  %vm4309_vm14 = vcmp.gt.f32.partialorder %v4277_v36, 0.0  ;;  %vm4310_vm1 = vcmp.gt.f32.partialorder %v4278_v58, 0.0  ;;  %v4209_v21 = vsub.f32 %v15459_v34, %v11759_v6  ;;  %5161 = vrot.lane.b32.xlu1 %v4930_v5, %s8808_s18 }
 0x410   : >> { %15458 = vst [vmem:[#allocation91_spill] sm:$0xff] %v12363_v22  ;;  %v15460_v55 = vrot.slane %v12167_v11, 1  ;;  %v12380_v30 = vsel %vm15462_vm15, %v4635_v2, %v4636_v48  ;;  %v4279_v17 = vmul.f32 %v15296_v62, %v4247_v47  ;;  %v4282_v9 = vmul.f32 %v15296_v62, %v4250_v44 }
 0x411   : >> { %15463 = vst [vmem:[#allocation137_spill] sm:$0xff] %v12380_v30  ;;  %v4809_v34 = vsel %vm2310_vm5, %v12363_v22, 0.0  ;;  %5071 = vrot.lane.b32.xlu0 %v4773_v51, %s8808_s18  ;;  %v4249_v5 = vmul.f32 %v11850_v26, %v4209_v21  ;;  %v12389_v41 = vsel %vm4309_vm14, %v4277_v36, %v4341_v8  ;;  %v4280_v2 = vmul.f32 %v15296_v62, %v4248_v42  ;;  %v15468_v8 = vld [vmem:[#allocation78_spill] sm:$0xff] }
 0x412   : >> { %v12376_v27 = vsel %vm15446_vm2, %v4636_v48, %v15460_v55  ;;  %v4834_v52 = vpack.c.bf16 %v4810_v37, %v4809_v34  ;;  %15464 = vst [vmem:[#allocation138_spill] sm:$0xff] %v12389_v41  ;;  %v12391_v55 = vsel %vm4310_vm1, %v4278_v58, %v4342_v12  ;;  %vm15466_vm3 = vcmp.lt.s32.totalorder %v15407_v63, 7 }
 0x413   : >> { %15461 = vst [vmem:[#allocation79_spill] sm:$0xff] %v12376_v27  ;;  %15465 = vst [vmem:[#allocation139_spill] sm:$0xff] %v12391_v55  ;;  %v4811_v47 = vsel %vm15466_vm3, %v12380_v30, 0.0  ;;  %vm15467_vm4 = vcmp.lt.s32.totalorder %v15409_v49, 7  ;;  %v4640_v51 = vrot.slane %v11949_v4, 1  ;;  %vm4311_vm9 = vcmp.gt.f32.partialorder %v4279_v17, 0.0 }
 0x414   : >> { %v4812_v44 = vsel %vm15467_vm4, %v12376_v27, 0.0  ;;  %5113 = vrot.lane.b32.xlu1 %v4834_v52, %s8808_s18  ;;  %v4343_v21 = vmul.f32 0.2, %v4279_v17  ;;  %v4281_v36 = vmul.f32 %v15296_v62, %v4249_v5  ;;  %v4483_v42 = vrot.slane %v12389_v41, 7 }
 0x415   : >> { %5023 = vrot.lane.b32.xlu0 %v12254_v46, %s8808_s18  ;;  %v4484_v58 = vrot.slane %v12391_v55, 7  ;;  %v4211_v48 = vsub.f32 %v15468_v8, %v11759_v6  ;;  %vm4314_vm14 = vcmp.gt.f32.partialorder %v4282_v9, 0.0  ;;  %v4835_v12 = vpack.c.bf16 %v4812_v44, %v4811_v47 }
 0x416   : >> { %v4344_v37 = vmul.f32 0.2, %v4280_v2  ;;  %vm15469_vm1 = vcmp.lt.s32.totalorder %v15430_v29, 7  ;;  %vm15470_vm2 = vcmp.lt.s32.totalorder %v15433_v53, 7  ;;  %vm4312_vm15 = vcmp.gt.f32.partialorder %v4280_v2, 0.0 }
 0x417   : >> { %v4813_v52 = vsel %vm15469_vm1, %v12216_v24, 0.0  ;;  %v4814_v34 = vsel %vm15470_vm2, %v12261_v7, 0.0  ;;  %v4251_v5 = vmul.f32 %v11850_v26, %v4211_v48  ;;  %v15471_v63 = vrot.slane %v12271_v23, 1 }
 0x418   : >> { %5115 = vrot.lane.b32.xlu1 %v4835_v12, %s8808_s18  ;;  %vm15472_vm3 = vcmp.lt.s32.totalorder %v15288_v15, 7  ;;  %v15474_v47 = vrot.slane %v12235_v3, 1  ;;  %v4643_v8 = vrot.slane %v12389_v41, 1  ;;  %v12431_v7 = vsel %vm4311_vm9, %v4279_v17, %v4343_v21 }
 0x419   : >> { %v12421_v6 = vsel %vm15472_vm3, %v4640_v51, %v15471_v63  ;;  %vm15475_vm4 = vmmov %vm15472_vm3  ;;  %15477 = vst [vmem:[#allocation141_spill] sm:$0xff] %v12431_v7  ;;  %5073 = vrot.lane.b32.xlu0 %v4774_v56, %s8808_s18  ;;  %v4345_v26 = vmul.f32 0.2, %v4281_v36  ;;  %vm15478_vm1 = vcmp.lt.s32.totalorder %v15288_v15, 1  ;;  %v15479_v63 = vrot.slane %v12311_v60, 7 }
 0x41a   : >> { %15473 = vst [vmem:[#allocation78_spill] sm:$0xff] %v12421_v6  ;;  %v12427_v44 = vsel %vm15475_vm4, %v15474_v47, %v4640_v51  ;;  %v12436_v48 = vsel %vm15478_vm1, %v4483_v42, %v4484_v58  ;;  %vm15480_vm2 = vmmov %vm15478_vm1  ;;  %v4283_v51 = vmul.f32 %v15296_v62, %v4251_v5  ;;  %v4346_v47 = vmul.f32 0.2, %v4282_v9  ;;  %v15491_v62 = vld [vmem:[#allocation31_spill] sm:$0xff] }
 0x41b   : >> { %15476 = vst [vmem:[#allocation140_spill] sm:$0xff] %v12427_v44  ;;  %v12442_v12 = vsel %vm15480_vm2, %v15479_v63, %v4483_v42  ;;  %v4836_v3 = vpack.c.bf16 %v4814_v34, %v4813_v52  ;;  %vm4313_vm3 = vcmp.gt.f32.partialorder %v4281_v36, 0.0  ;;  %v12445_v17 = vsel %vm4312_vm15, %v4280_v2, %v4344_v37  ;;  %v15488_v34 = vld [vmem:[#allocation30_spill] sm:$0xff] }
 0x41c   : >> { %15481 = vst [vmem:[#allocation142_spill] sm:$0xff] %v12442_v12  ;;  %15482 = vst [vmem:[#allocation143_spill] sm:$0xff] %v12445_v17  ;;  %vm15483_vm9 = vcmp.lt.s32.totalorder %v15435_v1, 7  ;;  %vm15484_vm4 = vcmp.lt.s32.totalorder %v15438_v16, 7  ;;  %v12455_v53 = vpack.c.bf16 %v12271_v23, %v11949_v4  ;;  %v4644_v42 = vrot.slane %v12391_v55, 1 }
 0x41d   : >> { %v4815_v56 = vsel %vm15483_vm9, %v12427_v44, 0.0  ;;  %v4816_v21 = vsel %vm15484_vm4, %v12421_v6, 0.0  ;;  %5117 = vrot.lane.b32.xlu1 %v4836_v3, %s8808_s18  ;;  %v15485_v52 = vrot.slane %v12311_v60, 1  ;;  %vm15486_vm15 = vcmp.lt.s32.totalorder %v15288_v15, 7 }
 0x41e   : >> { %v4645_v37 = vrot.slane %v12431_v7, 1  ;;  %v15489_v5 = vmov %v15488_v34  ;;  %vm15490_vm1 = vcmp.ge.s32.totalorder %v15488_v34, 1  ;;  %vm15492_vm2 = vcmp.ge.s32.totalorder %v15491_v62, 1  ;;  %5025 = vrot.lane.b32.xlu0 %v12455_v53, %s8808_s18 }
 0x41f   : >> { %v12463_v2 = vsel %vm15486_vm15, %v15485_v52, %v4643_v8  ;;  %v4755_v63 = vsel %vm15490_vm1, %v12442_v12, 0.0  ;;  %v4756_v4 = vsel %vm15492_vm2, %v12436_v48, 0.0  ;;  %v12474_v3 = vsel %vm4313_vm3, %v4281_v36, %v4345_v26  ;;  %vm15497_vm3 = vmmov %vm15486_vm15 }
 0x420   : >> { %15487 = vst [vmem:[#allocation144_spill] sm:$0xff] %v12463_v2  ;;  %15493 = vst [vmem:[#allocation145_spill] sm:$0xff] %v12474_v3  ;;  %v4347_v6 = vmul.f32 0.2, %v4283_v51  ;;  %v4485_v44 = vrot.slane %v12431_v7, 7  ;;  %v4486_v52 = vrot.slane %v12445_v17, 7  ;;  %v4837_v24 = vpack.c.bf16 %v4816_v21, %v4815_v56 }
 0x421   : >> { %vm4315_vm9 = vcmp.gt.f32.partialorder %v4283_v51, 0.0  ;;  %vm15494_vm4 = vcmp.lt.s32.totalorder %v15453_v10, 7  ;;  %v12483_v12 = vsel %vm15486_vm15, %v4643_v8, %v4644_v42  ;;  %v4646_v29 = vrot.slane %v12445_v17, 1 }
 0x422   : >> { %v4818_v34 = vsel %vm15494_vm4, %v12463_v2, 0.0  ;;  %15495 = vst [vmem:[#allocation146_spill] sm:$0xff] %v12483_v12  ;;  %v4775_v27 = vpack.c.bf16 %v4756_v4, %v4755_v63  ;;  %v12487_v36 = vsel %vm4314_vm14, %v4282_v9, %v4346_v47  ;;  %5119 = vrot.lane.b32.xlu1 %v4837_v24, %s8808_s18  ;;  %v12492_v26 = vsel %vm15497_vm3, %v4644_v42, %v4645_v37  ;;  %v15505_v63 = vld [vmem:[#allocation32_spill] sm:$0xff] }
 0x423   : >> { %15496 = vst [vmem:[#allocation147_spill] sm:$0xff] %v12487_v36  ;;  %v4647_v56 = vrot.slane %v12474_v3, 1  ;;  %vm15498_vm1 = vcmp.lt.s32.totalorder %v15443_v50, 7  ;;  %v12499_v8 = vsel %vm4315_vm9, %v4283_v51, %v4347_v6  ;;  %vm15500_vm2 = vcmp.lt.s32.totalorder %v15288_v15, 1  ;;  %vm15504_vm9 = vmmov %vm15497_vm3 }
 0x424   : >> { %v4817_v21 = vsel %vm15498_vm1, %v12344_v38, 0.0  ;;  %5075 = vrot.lane.b32.xlu0 %v4775_v27, %s8808_s18  ;;  %15499 = vst [vmem:[#allocation148_spill] sm:$0xff] %v12499_v8  ;;  %v12503_v4 = vsel %vm15500_vm2, %v4485_v44, %v4486_v52  ;;  %vm15501_vm14 = vmmov %vm15500_vm2  ;;  %vm15502_vm4 = vcmp.lt.s32.totalorder %v15489_v5, 7  ;;  %vm15503_vm15 = vcmp.lt.s32.totalorder %v15491_v62, 7  ;;  %v12537_v38 = vpop.permute.xlu1 %5003 }
 0x425   : >> { %v12507_v24 = vsel %vm15501_vm14, %v4484_v58, %v4485_v44  ;;  %v4838_v9 = vpack.c.bf16 %v4818_v34, %v4817_v21  ;;  %v4819_v47 = vsel %vm15502_vm4, %v12483_v12, 0.0  ;;  %v4820_v42 = vsel %vm15503_vm15, %v12492_v26, 0.0  ;;  %vm15509_vm14 = vmmov %vm15497_vm3 }
 0x426   : >> { %v12517_v27 = vsel %vm15504_vm9, %v4645_v37, %v4646_v29  ;;  %v4648_v6 = vrot.slane %v12487_v36, 1  ;;  %v4615_v51 = vpack.c.bf16 %v12389_v41, %v14941_v19  ;;  %v12525_v58 = vsel %vm15497_vm3, %v4646_v29, %v4647_v56  ;;  %v15507_v37 = vld [vmem:[#allocation33_spill] sm:$0xff]  ;;  %vm15510_vm4 = vmmov %vm15497_vm3 }
 0x427   : >> { %5121 = vrot.lane.b32.xlu1 %v4838_v9, %s8808_s18  ;;  %v4649_v44 = vrot.slane %v12499_v8, 1  ;;  %vm15506_vm1 = vcmp.ge.s32.totalorder %v15505_v63, 1  ;;  %vm15508_vm2 = vcmp.ge.s32.totalorder %v15507_v37, 1  ;;  %v4487_v2 = vrot.slane %v12474_v3, 7 }
 0x428   : >> { %v4757_v34 = vsel %vm15506_vm1, %v12507_v24, 0.0  ;;  %v4758_v21 = vsel %vm15508_vm2, %v12503_v4, 0.0  ;;  %5027 = vrot.lane.b32.xlu0 %v4615_v51, %s8808_s18  ;;  %v4488_v9 = vrot.slane %v12487_v36, 7  ;;  %v4839_v12 = vpack.c.bf16 %v4820_v42, %v4819_v47  ;;  %v15511_v42 = vld [vmem:[#allocation107_spill] sm:$0xff]  ;;  %v12575_v18 = vpop.permute.xlu1 %5005  ;;  %vm15521_vm2 = vmmov %vm15510_vm4 }
 0x429   : >> { %v4821_v29 = vsel %vm2322_vm13, %v12517_v27, 0.0  ;;  %v4822_v49 = vsel %vm2323_vm12, %v12525_v58, 0.0  ;;  %v4776_v30 = vpack.c.bf16 %v4758_v21, %v4757_v34  ;;  %v12548_v51 = vsel %vm15509_vm14, %v4648_v6, %v4649_v44  ;;  %v15514_v21 = vld [vmem:[#allocation34_spill] sm:$0xff]  ;;  %15520 = vst [vmem:[#allocation149_spill] sm:$0xff] %v12575_v18  ;;  %vm15524_vm14 = vmmov %vm15521_vm2 }
 0x42a   : >> { %v12552_v47 = vsel %vm15510_vm4, %v4647_v56, %v4648_v6  ;;  %v4650_v32 = vrot.slane %v15511_v42, 1  ;;  %vm15512_vm15 = vcmp.lt.s32.totalorder %v15288_v15, 1  ;;  %v15515_v25 = vmov %v15514_v21  ;;  %v15517_v56 = vld [vmem:[#allocation35_spill] sm:$0xff] }
 0x42b   : >> { %5123 = vrot.lane.b32.xlu1 %v4839_v12, %s8808_s18  ;;  %v12558_v22 = vsel %vm15512_vm15, %v4487_v2, %v4488_v9  ;;  %vm15513_vm9 = vmmov %vm15512_vm15  ;;  %v4840_v12 = vpack.c.bf16 %v4822_v49, %v4821_v29  ;;  %vm15516_vm3 = vcmp.lt.s32.totalorder %v15514_v21, 7  ;;  %v15518_v31 = vmov %v15517_v56  ;;  %v15522_v49 = vld [vmem:[#allocation81_spill] sm:$0xff] }
 0x42c   : >> { %5077 = vrot.lane.b32.xlu0 %v4776_v30, %s8808_s18  ;;  %v12562_v34 = vsel %vm15513_vm9, %v4486_v52, %v4487_v2  ;;  %v4823_v35 = vsel %vm15516_vm3, %v12552_v47, 0.0  ;;  %vm15519_vm1 = vcmp.lt.s32.totalorder %v15517_v56, 7  ;;  %v12572_v30 = vpack.c.bf16 %v12431_v7, %v12391_v55 }
 0x42d   : >> { %v4824_v6 = vsel %vm15519_vm1, %v12548_v51, 0.0  ;;  %v12579_v2 = vsel %vm15521_vm2, %v4649_v44, %v4650_v32  ;;  %v15523_v52 = vrot.slane %v15522_v49, 1  ;;  %vm15526_vm4 = vcmp.ge.s32.totalorder %v15515_v25, 1 }
 0x42e   : >> { %v4759_v21 = vsel %vm15526_vm4, %v12562_v34, 0.0  ;;  %vm15527_vm15 = vcmp.ge.s32.totalorder %v15518_v31, 1  ;;  %v4489_v44 = vrot.slane %v12499_v8, 7  ;;  %v4841_v56 = vpack.c.bf16 %v4824_v6, %v4823_v35 }
 0x42f   : >> { %5125 = vrot.lane.b32.xlu1 %v4840_v12, %s8808_s18  ;;  %v12585_v29 = vsel %vm15524_vm14, %v4650_v32, %v15523_v52  ;;  %v4760_v12 = vsel %vm15527_vm15, %v12558_v22, 0.0  ;;  %v15529_v33 = vmov %v15528_v13  ;;  %vm15530_vm9 = vcmp.lt.s32.totalorder %v15528_v13, 7  ;;  %v15531_v32 = vld [vmem:[#allocation37_spill] sm:$0xff]  ;;  %v12612_v13 = vpop.permute.xlu1 %5007 }
 0x430   : >> { %15525 = vst [vmem:[#allocation81_spill] sm:$0xff] %v12585_v29  ;;  %5029 = vrot.lane.b32.xlu0 %v12572_v30, %s8808_s18  ;;  %v4825_v45 = vsel %vm15530_vm9, %v12579_v2, 0.0  ;;  %vm15532_vm3 = vcmp.lt.s32.totalorder %v15531_v32, 7  ;;  %v4777_v28 = vpack.c.bf16 %v4760_v12, %v4759_v21  ;;  %v15533_v59 = vrot.slane %v15511_v42, 7 }
 0x431   : >> { %v4826_v52 = vsel %vm15532_vm3, %v12585_v29, 0.0  ;;  %vm15534_vm1 = vcmp.lt.s32.totalorder %v15288_v15, 1  ;;  %v12616_v29 = vpack.c.bf16 %v12474_v3, %v12445_v17  ;;  %vm15537_vm14 = vcmp.ge.s32.totalorder %v15529_v33, 1 }
 0x432   : >> { %v12608_v18 = vsel %vm15534_vm1, %v4489_v44, %v15533_v59  ;;  %vm15536_vm2 = vmmov %vm15534_vm1  ;;  %v4842_v6 = vpack.c.bf16 %v4826_v52, %v4825_v45  ;;  %vm15538_vm4 = vcmp.ge.s32.totalorder %v15531_v32, 1  ;;  %vm15539_vm15 = vcmp.ge.s32.totalorder %v15443_v50, 1 }
 0x433   : >> { %5127 = vrot.lane.b32.xlu1 %v4841_v56, %s8808_s18  ;;  %15535 = vst [vmem:[#allocation150_spill] sm:$0xff] %v12608_v18  ;;  %v4492_v35 = vsel %vm15536_vm2, %v4488_v9, %v4489_v44  ;;  %v4762_v59 = vsel %vm15538_vm4, %v12608_v18, 0.0  ;;  %v12626_v9 = vpop.permute.xlu1 %5009  ;;  %v12638_v56 = vsel %vm15539_vm15, %v12265_v14, 0.0  ;;  %vm15540_vm9 = vcmp.ge.s32.totalorder %v15453_v10, 1 }
 0x434   : >> { %5079 = vrot.lane.b32.xlu0 %v4777_v28, %s8808_s18  ;;  %v4761_v28 = vsel %vm15537_vm14, %v4492_v35, 0.0  ;;  %v12643_v52 = vsel %vm15540_vm9, %v12305_v40, 0.0  ;;  %v12662_v45 = vsel %vm2322_vm13, %v12492_v26, 0.0  ;;  %vm15541_vm3 = vcmp.ge.s32.totalorder %v15507_v37, 1 }
 0x435   : >> { %v4778_v21 = vpack.c.bf16 %v4762_v59, %v4761_v28  ;;  %v12667_v28 = vsel %vm2323_vm12, %v12517_v27, 0.0  ;;  %v12676_v44 = vsel %vm15541_vm3, %v12507_v24, 0.0  ;;  %vm15542_vm1 = vcmp.ge.s32.totalorder %v15505_v63, 1 }
 0x436   : >> { %v12681_v15 = vsel %vm15542_vm1, %v12436_v48, 0.0  ;;  %vm15543_vm2 = vcmp.lt.s32.totalorder %v15515_v25, 7  ;;  %vm15545_vm14 = vcmp.lt.s32.totalorder %v15518_v31, 7  ;;  %vm15546_vm4 = vcmp.ge.s32.totalorder %v15515_v25, 1 }
 0x437   : >> { %5129 = vrot.lane.b32.xlu1 %v4842_v6, %s8808_s18  ;;  %v12631_v12 = vpop.permute.xlu1 %5011  ;;  %v12647_v6 = vpack.c.bf16 %v12499_v8, %v12487_v36  ;;  %v12686_v8 = vsel %vm15543_vm2, %v12525_v58, 0.0  ;;  %v12698_v36 = vsel %vm15546_vm4, %v12503_v4, 0.0  ;;  %vm15548_vm15 = vcmp.ge.s32.totalorder %v15518_v31, 1 }
 0x438   : >> { %5031 = vrot.lane.b32.xlu0 %v12616_v29, %s8808_s18  ;;  %15544 = vst [vmem:[#allocation151_spill] sm:$0xff] %v12686_v8  ;;  %15547 = vst [vmem:[#allocation152_spill] sm:$0xff] %v12698_v36  ;;  %v12705_v7 = vsel %vm15548_vm15, %v12562_v34, 0.0  ;;  %vm15549_vm9 = vcmp.lt.s32.totalorder %v15529_v33, 7  ;;  %vm15551_vm3 = vcmp.lt.s32.totalorder %v15531_v32, 7  ;;  %vm15552_vm1 = vcmp.ge.s32.totalorder %v15529_v33, 1 }
 0x439   : >> { %v12710_v3 = vsel %vm15549_vm9, %v12548_v51, 0.0  ;;  %v12715_v17 = vsel %vm15551_vm3, %v12579_v2, 0.0  ;;  %v12726_v55 = vsel %vm15552_vm1, %v12558_v22, 0.0  ;;  %vm15554_vm2 = vcmp.ge.s32.totalorder %v15531_v32, 1 }
 0x43a   : >> { %15550 = vst [vmem:[#allocation153_spill] sm:$0xff] %v12710_v3  ;;  %15553 = vst [vmem:[#allocation154_spill] sm:$0xff] %v12726_v55  ;;  %v12730_v23 = vsel %vm15554_vm2, %v4492_v35, 0.0  ;;  %v4844_v41 = vsel %vm2072_vm10, %v11915_v39, 0.0  ;;  %vm15557_vm4 = vcmp.ge.s32.totalorder %v15438_v16, 1  ;;  %vm15558_vm15 = vcmp.ge.s32.totalorder %v15489_v5, 1 }
 0x43b   : >> { %v12669_v59 = vpop.permute.xlu1 %5013  ;;  %15555 = vst [vmem:[#allocation155_spill] sm:$0xff] %v12730_v23  ;;  %v12747_v32 = vsel %vm15557_vm4, %v12305_v40, 0.0  ;;  %v12752_v33 = vsel %vm15558_vm15, %v12436_v48, 0.0  ;;  %vm15560_vm9 = vcmp.ge.s32.totalorder %v15207_v57, 1  ;;  %vm15561_vm3 = vcmp.ge.s32.totalorder %v15491_v62, 1  ;;  %v15573_v3 = vld [vmem:[#allocation8_spill] sm:$0xff] }
 0x43c   : >> { %5081 = vrot.lane.b32.xlu0 %v4778_v21, %s8808_s18  ;;  %v12693_v21 = vsel %vm15545_vm14, %v12552_v47, 0.0  ;;  %vm15556_vm14 = vcmp.ge.s32.totalorder %v15435_v1, 1  ;;  %15559 = vst [vmem:[#allocation156_spill] sm:$0xff] %v12752_v33  ;;  %v12764_v40 = vsel %vm15561_vm3, %v12507_v24, 0.0  ;;  %vm15563_vm1 = vcmp.ge.s32.totalorder %v15505_v63, 1  ;;  %v15576_v23 = vld [vmem:[#allocation9_spill] sm:$0xff] }
 0x43d   : >> { %v12739_v18 = vsel %vm15556_vm14, %v12265_v14, 0.0  ;;  %15562 = vst [vmem:[#allocation157_spill] sm:$0xff] %v12764_v40  ;;  %v12769_v48 = vsel %vm15563_vm1, %v12503_v4, 0.0  ;;  %vm15565_vm2 = vcmp.ge.s32.totalorder %v15507_v37, 1  ;;  %vm15567_vm14 = vcmp.ge.s32.totalorder %v15515_v25, 1  ;;  %v15600_v37 = vld [vmem:[#allocation10_spill] sm:$0xff] }
 0x43e   : >> { %15564 = vst [vmem:[#allocation158_spill] sm:$0xff] %v12769_v48  ;;  %v12783_v24 = vsel %vm15567_vm14, %v12558_v22, 0.0  ;;  %vm15569_vm4 = vcmp.ge.s32.totalorder %v15518_v31, 1  ;;  %vm15571_vm15 = vcmask 523264   ;;  %v4934_v22 = vpack.c.bf16 %v14941_v19, %v12311_v60  ;;  %v15575_v48 = vld [vmem:[#allocation110_spill] sm:$0xff] }
 0x43f   : >> { %v12732_v8 = vpop.permute.xlu1 %5015  ;;  %15568 = vst [vmem:[#allocation160_spill] sm:$0xff] %v12783_v24  ;;  %v12787_v14 = vsel %vm15569_vm4, %v4492_v35, 0.0  ;;  %v15572_v35 = vld [vmem:[#allocation109_spill] sm:$0xff]  ;;  %v15574_v36 = vmov %v15573_v3  ;;  %v4845_v4 = vsel %vm2073_vm7, %v11911_v20, 0.0  ;;  %vm15580_vm3 = vcmp.lt.s32.totalorder %v15211_v43, 7 }
 0x440   : >> { %5033 = vrot.lane.b32.xlu0 %v12647_v6, %s8808_s18  ;;  %15570 = vst [vmem:[#allocation161_spill] sm:$0xff] %v12787_v14  ;;  %v4779_v57 = vpack.c.bf16 %v15572_v35, %v15522_v49  ;;  %vm15581_vm1 = vcmp.lt.s32.totalorder %v15489_v5, 7  ;;  %vm15593_vm14 = vcmp.lt.s32.totalorder %v15574_v36, 7  ;;  %vm15595_vm4 = vcmp.lt.s32.totalorder %v15576_v23, 7  ;;  %v15634_v14 = vld [vmem:[#allocation97_spill] sm:$0xff] }
 0x441   : >> { %v12817_v35 = vsel %vm15581_vm1, %v12492_v26, 0.0  ;;  %v12836_v26 = vsel %vm2323_vm12, %v12552_v47, 0.0 }
 0x442   : >> { %15582 = vst [vmem:[#allocation109_spill] sm:$0xff] %v12817_v35 }
 0x443   : >> { %v12771_v55 = vpop.permute.xlu1 %5017 }
 0x444   : >> { %5163 = vrot.lane.b32.xlu0 %v12330_v54, %s8808_s18  ;;  %v4843_v54 = vsel %vm15560_vm9, %v11906_v61, 0.0  ;;  %vm15578_vm9 = vmmov %vm15571_vm15 }
 0x445   : >> { %v4875_v33 = vpack.c.bf16 %v4844_v41, %v4843_v54  ;;  %v4846_v41 = vsel %vm2074_vm8, %v15575_v48, 0.0  ;;  %v15577_v54 = vld [vmem:[#allocation106_spill] sm:$0xff]  ;;  %vm15591_vm12 = vmmov %vm15578_vm9 }
 0x446   : >> { %v4876_v3 = vpack.c.bf16 %v4846_v41, %v4845_v4  ;;  %vm15605_vm1 = vmmov %vm15578_vm9 }
 0x448   : >> { %5165 = vrot.lane.b32.xlu0 %v12254_v46, %s8808_s18  ;;  %v12778_v46 = vsel %vm15565_vm2, %v12562_v34, 0.0  ;;  %v5148_v34 = vpop.permute.xlu1 %5147  ;;  %vm15583_vm2 = vcmp.lt.s32.totalorder %v15491_v62, 7 }
 0x449   : >> { %15566 = vst [vmem:[#allocation159_spill] sm:$0xff] %v12778_v46  ;;  %v5373_v40 = vsel %vm15571_vm15, %v4875_v33, %v5148_v34  ;;  %v4524_v33 = vsel %vm2072_vm10, %v15577_v54, 0.0  ;;  %v15579_v34 = vld [vmem:[#allocation98_spill] sm:$0xff]  ;;  %vm15587_vm10 = vcmp.lt.s32.totalorder %v15515_v25, 7  ;;  %vm15596_vm15 = vmmov %vm15578_vm9  ;;  %v15635_v46 = vld [vmem:[#allocation15_spill] sm:$0xff] }
 0x44a   : >> { %5898 = vmatprep.mubr.bf16.mxu0 %v5373_v40  ;;  %v4684_v49 = vsel %vm15580_vm3, %v15579_v34, 0.0  ;;  %15586 = vst [vmem:[#allocation98_spill] sm:$0xff] %v12836_v26  ;;  %v4555_v54 = vpack.c.bf16 %v4524_v33, %v14941_v19  ;;  %v15592_v34 = vld [vmem:[#allocation88_spill] sm:$0xff]  ;;  %v15597_v25 = vld [vmem:[#allocation82_spill] sm:$0xff]  ;;  %v15598_v33 = vld [vmem:[#allocation85_spill] sm:$0xff] }
 0x44b   : >> { %v4715_v41 = vpack.c.bf16 %v4684_v49, %v14941_v19  ;;  %v4685_v4 = vsel %vm15593_vm14, %v15592_v34, 0.0  ;;  %vm15620_vm14 = vmmov %vm15605_vm1 }
 0x44c   : >> { %5167 = vrot.lane.b32.xlu0 %v12455_v53, %s8808_s18  ;;  %v5100_v53 = vpop.permute.xlu1 %5099  ;;  %v5181_v47 = vsel %vm15578_vm9, %v4555_v54, %v12537_v38  ;;  %v15606_v54 = vld [vmem:[#allocation115_spill] sm:$0xff] }
 0x44d   : >> { %v5309_v40 = vsel %vm15578_vm9, %v4779_v57, %v5100_v53  ;;  %v12827_v57 = vsel %vm2322_vm13, %v12525_v58, 0.0  ;;  %vm15589_vm13 = vcmp.lt.s32.totalorder %v15518_v31, 7  ;;  %v8457_v53 = vld [vmem:[%s9967_s13 + $0x228] sm:$0xff]   ;;  %v4780_v31 = vpack.c.bf16 %v15598_v33, %v15597_v25 }
 0x44e   : >> { %5899 = vmatmul.mubr.bf16.vlgmr.msra.gmra.mrb[96].mxu0 %v5309_v40  ;;  %15585 = vst [vmem:[#allocation106_spill] sm:$0xff] %v12827_v57  ;;  %v12846_v58 = vsel %vm15589_vm13, %v12579_v2, 0.0  ;;  %v15594_v2 = vld [vmem:[#allocation103_spill] sm:$0xff]  ;;  %vm15614_vm13 = vmmov %vm15605_vm1 }
 0x44f   : >> { %15590 = vst [vmem:[#allocation163_spill] sm:$0xff] %v12846_v58  ;;  %v4686_v5 = vsel %vm15595_vm4, %v15594_v2, 0.0  ;;  %v15616_v58 = vld [vmem:[#allocation83_spill] sm:$0xff]  ;;  %vm15621_vm4 = vmmov %vm15605_vm1 }
 0x450   : >> { %5169 = vrot.lane.b32.xlu0 %v4934_v22, %s8808_s18  ;;  %v12822_v22 = vsel %vm15583_vm2, %v12517_v27, 0.0  ;;  %v12841_v27 = vsel %vm15587_vm10, %v12548_v51, 0.0  ;;  %v5052_v51 = vpop.permute.xlu0 %5051  ;;  %vm15607_vm2 = vmmov %vm15605_vm1  ;;  %vm15609_vm10 = vcmp.lt.s32.totalorder %v15600_v37, 7 }
 0x451   : >> { %15584 = vst [vmem:[#allocation110_spill] sm:$0xff] %v12822_v22  ;;  %15588 = vst [vmem:[#allocation162_spill] sm:$0xff] %v12841_v27  ;;  %v5245_v49 = vsel %vm15596_vm15, %v4715_v41, %v5052_v51  ;;  %v15602_v27 = vld [vmem:[#allocation11_spill] sm:$0xff]  ;;  %v4716_v51 = vpack.c.bf16 %v4686_v5, %v4685_v4  ;;  %v15632_v22 = vld [vmem:[#allocation14_spill] sm:$0xff] }
 0x452   : >> { %5737 = vmatprep.mubr.bf16.mxu1 %v5245_v49  ;;  %v15603_v57 = vmov %v15602_v27  ;;  %vm15604_vm3 = vcmp.ge.s32.totalorder %v15602_v27, 1  ;;  %v4525_v49 = vsel %vm2073_vm7, %v11906_v61, 0.0  ;;  %v8458_v27 = vld [vmem:[%s9967_s13 + $0x230] sm:$0xff]   ;;  %vm15612_vm7 = vmmov %vm15605_vm1 }
 0x453   : >> { %5738 = vmatmul.mubr.bf16.vlgmr.msra.gmra.mrb[64].mxu1 %v5181_v47  ;;  %vm15622_vm15 = vmmov %vm15604_vm3 }
 0x454   : >> { %5171 = vrot.lane.b32.xlu0 %v12572_v30, %s8808_s18  ;;  %v5150_v30 = vpop.permute.xlu1 %5149  ;;  %7980 = vmatpush3.bf16.msra.mxu1 %v15606_v54  ;;  %v5054_v25 = vpop.permute.xlu0 %5053  ;;  %v15613_v54 = vld [vmem:[#allocation149_spill] sm:$0xff] }
 0x455   : >> { %v5377_v40 = vsel %vm15591_vm12, %v4876_v3, %v5150_v30  ;;  %v15599_v30 = vld [vmem:[#allocation102_spill] sm:$0xff]  ;;  %v5249_v33 = vsel %vm15607_vm2, %v4716_v51, %v5054_v25  ;;  %7981 = vmatprep.subr.bf16.mxu1 %v8457_v53  ;;  %vm15633_vm2 = vcmp.ge.s32.totalorder %v15632_v22, 1 }
 0x456   : >> { %5906 = vmatprep.mubr.bf16.mxu0 %v5377_v40  ;;  %v4847_v63 = vsel %vm2075_vm11, %v15599_v30, 0.0  ;;  %v15601_v40 = vld [vmem:[#allocation120_spill] sm:$0xff]  ;;  %5745 = vmatprep.mubr.bf16.mxu1 %v5249_v33 }
 0x457   : >> { %v4848_v41 = vsel %vm15604_vm3, %v15601_v40, 0.0  ;;  %v15615_v33 = vld [vmem:[#allocation84_spill] sm:$0xff] }
 0x458   : >> { %5173 = vrot.lane.b32.xlu0 %v12616_v29, %s8808_s18  ;;  %v5102_v3 = vpop.permute.xlu1 %5101  ;;  %v4526_v29 = vsel %vm2074_vm8, %v11915_v39, 0.0  ;;  %v4877_v5 = vpack.c.bf16 %v4848_v41, %v4847_v63  ;;  %v15610_v39 = vld [vmem:[#allocation114_spill] sm:$0xff]  ;;  %vm15611_vm8 = vcmp.lt.s32.totalorder %v15603_v57, 7  ;;  %v4938_v63 = vpack.c.bf16 %v14941_v19, %v15511_v42  ;;  %7982 = vmatpush3.bf16.msra.mxu1 %v8457_v53 }
 0x459   : >> { %v5313_v38 = vsel %vm15605_vm1, %v4780_v31, %v5102_v3  ;;  %v15608_v31 = vld [vmem:[#allocation99_spill] sm:$0xff]  ;;  %v4688_v47 = vsel %vm15611_vm8, %v15610_v39, 0.0  ;;  %v4556_v3 = vpack.c.bf16 %v4526_v29, %v4525_v49  ;;  %7983 = vmatprep.subr.bf16.mxu1 %v8458_v27  ;;  %v4781_v26 = vpack.c.bf16 %v15616_v58, %v15615_v33  ;;  %v15617_v49 = vld [vmem:[#allocation93_spill] sm:$0xff]  ;;  %v15629_v33 = vld [vmem:[#allocation86_spill] sm:$0xff] }
 0x45a   : >> { %5907 = vmatmul.mubr.bf16.gmra.mrb[100].mxu0 %v5313_v38  ;;  %v4687_v4 = vsel %vm15609_vm10, %v15608_v31, 0.0  ;;  %v5056_v38 = vpop.permute.xlu0 %5055  ;;  %v4528_v58 = vsel %vm15622_vm15, %v15575_v48, 0.0  ;;  %vm15636_vm10 = vcmp.ge.s32.totalorder %v15635_v46, 1  ;;  %vm15637_vm8 = vmmov %vm15605_vm1  ;;  %v15686_v57 = vld [vmem:[#allocation20_spill] sm:$0xff] }
 0x45b   : >> { %v4717_v41 = vpack.c.bf16 %v4688_v47, %v4687_v4  ;;  %v5185_v25 = vsel %vm15614_vm13, %v4556_v3, %v15613_v54  ;;  %v4527_v47 = vsel %vm2075_vm11, %v11911_v20, 0.0  ;;  %vm15628_vm11 = vmmov %vm15605_vm1 }
 0x45c   : >> { %5175 = vrot.lane.b32.xlu0 %v12647_v6, %s8808_s18  ;;  %v5152_v61 = vpop.permute.xlu1 %5151  ;;  %v8459_v6 = vld [vmem:[%s9967_s13 + $0x238] sm:$0xff]   ;;  %5746 = vmatmul.mubr.bf16.gmra.mrb[68].mxu1 %v5185_v25  ;;  %vm15644_vm15 = vmmov %vm15605_vm1  ;;  %s14249_s13 = scalar_lea.hbm (%p13991_p12), %s14318_s8, %s7376_s26 }
 0x45d   : >> { %v5381_v51 = vsel %vm15612_vm7, %v4877_v5, %v5152_v61  ;;  %v15618_v5 = vld [vmem:[#allocation12_spill] sm:$0xff]  ;;  %v5253_v35 = vsel %vm15620_vm14, %v4717_v41, %v5056_v38  ;;  %7984 = vmatpush3.bf16.msra.mxu1 %v8458_v27  ;;  %v4557_v41 = vpack.c.bf16 %v4528_v58, %v4527_v47  ;;  %v4852_v47 = vsel %vm15636_vm10, %v15634_v14, 0.0  ;;  %vm15638_vm7 = vmmov %vm15605_vm1 }
 0x45e   : >> { %5914 = vmatprep.mubr.bf16.mxu0 %v5381_v51  ;;  %vm15619_vm12 = vcmp.ge.s32.totalorder %v15618_v5, 1  ;;  %v5058_v4 = vpop.permute.xlu0 %5057  ;;  %5753 = vmatprep.mubr.bf16.mxu1 %v5253_v35  ;;  %v15623_v51 = vld [vmem:[#allocation77_spill] sm:$0xff]  ;;  %vm15624_vm9 = vcmp.lt.s32.totalorder %v15618_v5, 7  ;;  %vm15642_vm14 = vcmp.lt.s32.totalorder %v15635_v46, 7 }
 0x45f   : >> { %v4849_v61 = vsel %vm15619_vm12, %v15617_v49, 0.0  ;;  %7985 = vmatprep.subr.bf16.mxu1 %v8459_v6  ;;  %v4689_v38 = vsel %vm15624_vm9, %v15623_v51, 0.0  ;;  %v5189_v25 = vsel %vm15628_vm11, %v4557_v41, %v12612_v13  ;;  %vm15639_vm13 = vmmov %vm15619_vm12  ;;  %v15667_v46 = vld [vmem:[#allocation113_spill] sm:$0xff] }
 0x460   : >> { %5177 = vrot.lane.b32.xlu0 %v4938_v63, %s8808_s18  ;;  %v5104_v29 = vpop.permute.xlu1 %5103  ;;  %v4878_v3 = vpack.c.bf16 %v14941_v19, %v4849_v61  ;;  %v15626_v63 = vld [vmem:[#allocation13_spill] sm:$0xff]  ;;  %v4529_v13 = vsel %vm15639_vm13, %v15599_v30, 0.0  ;;  %vm15647_vm9 = vmmov %vm15605_vm1  ;;  %v15672_v5 = vld [vmem:[#allocation19_spill] sm:$0xff]  ;;  %s14269_s18 = scalar_lea.sflag (%p13991_p12), [#allocation3], %s311_s17 }
 0x461   : >> { %v5317_v53 = vsel %vm15621_vm4, %v4781_v26, %v5104_v29  ;;  %v15625_v26 = vld [vmem:[#allocation101_spill] sm:$0xff]  ;;  %vm15627_vm3 = vcmp.lt.s32.totalorder %v15626_v63, 7  ;;  %7986 = vmatpush3.bf16.msra.mxu1 %v8459_v6  ;;  %v15630_v29 = vld [vmem:[#allocation111_spill] sm:$0xff]  ;;  %vm15640_vm12 = vcmp.ge.s32.totalorder %v15626_v63, 1  ;;  %vm15643_vm4 = vmmov %vm15605_vm1 }
 0x462   : >> { %5915 = vmatmul.mubr.bf16.gmra.mrb[104].mxu0 %v5317_v53  ;;  %v4690_v35 = vsel %vm15627_vm3, %v15625_v26, 0.0  ;;  %v5060_v54 = vpop.permute.xlu0 %5059  ;;  %v4782_v49 = vpack.c.bf16 %v15630_v29, %v15629_v33  ;;  %v15631_v53 = vld [vmem:[#allocation96_spill] sm:$0xff]  ;;  %v4530_v22 = vsel %vm15640_vm12, %v15601_v40, 0.0  ;;  %v15646_v29 = vld [vmem:[#allocation87_spill] sm:$0xff]  ;;  %vm15655_vm11 = vmmov %vm15643_vm4 }
 0x463   : >> { %v4718_v48 = vpack.c.bf16 %v4690_v35, %v4689_v38  ;;  %v4851_v24 = vsel %vm15633_vm2, %v15631_v53, 0.0  ;;  %v15641_v35 = vld [vmem:[#allocation117_spill] sm:$0xff]  ;;  %v4558_v41 = vpack.c.bf16 %v4530_v22, %v4529_v13  ;;  %v15645_v33 = vld [vmem:[#allocation80_spill] sm:$0xff]  ;;  %v15652_v13 = vld [vmem:[#allocation17_spill] sm:$0xff] }
 0x464   : >> { %v5154_v27 = vpop.permute.xlu1 %5153  ;;  %5754 = vmatmul.mubr.bf16.gmra.mrb[72].mxu1 %v5189_v25  ;;  %v4879_v38 = vpack.c.bf16 %v4852_v47, %v4851_v24  ;;  %v4783_v40 = vpack.c.bf16 %v15646_v29, %v15645_v33  ;;  %v15649_v47 = vld [vmem:[#allocation16_spill] sm:$0xff]  ;;  %v15653_v63 = vmov %v15652_v13  ;;  %vm15657_vm2 = vmmov %vm15636_vm10 }
 0x465   : >> { %v5385_v20 = vsel %vm15605_vm1, %v4878_v3, %v5154_v27  ;;  %v5257_v58 = vsel %vm15637_vm8, %v4718_v48, %v5058_v4  ;;  %v4692_v27 = vsel %vm15642_vm14, %v15641_v35, 0.0  ;;  %v5193_v30 = vsel %vm15644_vm15, %v4558_v41, %v12626_v9  ;;  %v15656_v9 = vld [vmem:[#allocation100_spill] sm:$0xff]  ;;  %vm15663_vm13 = vmmov %vm15643_vm4 }
 0x466   : >> { %5922 = vmatprep.mubr.bf16.mxu0 %v5385_v20  ;;  %v5062_v3 = vpop.permute.xlu0 %5061  ;;  %5761 = vmatprep.mubr.bf16.mxu1 %v5257_v58  ;;  %v4719_v25 = vpack.c.bf16 %v4692_v27, %v14941_v19  ;;  %vm15650_vm3 = vcmp.ge.s32.totalorder %v15649_v47, 1  ;;  %vm15654_vm1 = vcmp.ge.s32.totalorder %v15652_v13, 1  ;;  %v4532_v27 = vsel %vm15657_vm2, %v15656_v9, 0.0  ;;  %v15665_v13 = vld [vmem:[#allocation90_spill] sm:$0xff]  ;;  %vm15666_vm12 = vmmov %vm15643_vm4 }
 0x467   : >> { %vm15659_vm10 = vcmp.lt.s32.totalorder %v15649_v47, 7  ;;  %vm15661_vm8 = vcmp.lt.s32.totalorder %v15653_v63, 7 }
 0x468   : >> { %v5106_v61 = vpop.permute.xlu1 %5105  ;;  %v5261_v24 = vsel %vm15647_vm9, %v4719_v25, %v5060_v54  ;;  %v15658_v54 = vld [vmem:[#allocation108_spill] sm:$0xff]  ;;  %vm15675_vm9 = vmmov %vm15650_vm3 }
 0x469   : >> { %v5321_v6 = vsel %vm15638_vm7, %v4782_v49, %v5106_v61  ;;  %v15648_v61 = vld [vmem:[#allocation104_spill] sm:$0xff]  ;;  %v4693_v41 = vsel %vm15659_vm10, %v15658_v54, 0.0  ;;  %vm15662_vm7 = vmmov %vm15643_vm4 }
 0x46a   : >> { %5923 = vmatmul.mubr.bf16.gmra.mrb[108].mxu0 %v5321_v6  ;;  %v5064_v48 = vpop.permute.xlu0 %5063  ;;  %v4853_v58 = vsel %vm15650_vm3, %v15648_v61, 0.0  ;;  %v15651_v6 = vld [vmem:[#allocation112_spill] sm:$0xff]  ;;  %vm15674_vm15 = vmmov %vm15662_vm7 }
 0x46b   : >> { %v4854_v22 = vsel %vm15654_vm1, %v15651_v6, 0.0  ;;  %vm15676_vm3 = vmmov %vm15654_vm1  ;;  %vm15679_vm1 = vcmp.lt.s32.totalorder %v15672_v5, 7 }
 0x46c   : >> { %v5156_v4 = vpop.permute.xlu1 %5155  ;;  %5762 = vmatmul.mubr.bf16.gmra.mrb[76].mxu1 %v5193_v30  ;;  %v4559_v30 = vpack.c.bf16 %v4532_v27, %v14941_v19  ;;  %v15671_v27 = vld [vmem:[#allocation125_spill] sm:$0xff]  ;;  %vm15681_vm2 = vmmov %vm15662_vm7 }
 0x46d   : >> { %v5389_v20 = vsel %vm15643_vm4, %v4879_v38, %v5156_v4  ;;  %5769 = vmatprep.mubr.bf16.mxu1 %v5261_v24  ;;  %v4880_v4 = vpack.c.bf16 %v4854_v22, %v4853_v58  ;;  %v15664_v58 = vld [vmem:[#allocation89_spill] sm:$0xff]  ;;  %vm15673_vm4 = vcmp.ge.s32.totalorder %v15672_v5, 1  ;;  %vm15684_vm10 = vmmov %vm15681_vm2 }
 0x46e   : >> { %5930 = vmatprep.mubr.bf16.mxu0 %v5389_v20  ;;  %v5066_v35 = vpop.permute.xlu0 %5065  ;;  %v15660_v20 = vld [vmem:[#allocation118_spill] sm:$0xff]  ;;  %v5197_v24 = vsel %vm15663_vm13, %v4559_v30, %v12631_v12  ;;  %v4784_v22 = vpack.c.bf16 %v15665_v13, %v15664_v58  ;;  %v4533_v12 = vsel %vm15675_vm9, %v15631_v53, 0.0  ;;  %v15678_v30 = vld [vmem:[#allocation133_spill] sm:$0xff] }
 0x46f   : >> { %v4694_v25 = vsel %vm15661_vm8, %v15660_v20, 0.0  ;;  %v15668_v20 = vld [vmem:[#allocation18_spill] sm:$0xff]  ;;  %vm15687_vm8 = vcmp.ge.s32.totalorder %v15686_v57, 1  ;;  %v15943_v57 = vld [vmem:[#allocation66_spill] sm:$0xff] }
 0x470   : >> { %v5108_v49 = vpop.permute.xlu1 %5107  ;;  %vm15670_vm14 = vcmp.ge.s32.totalorder %v15668_v20, 1  ;;  %v15677_v20 = vld [vmem:[#allocation124_spill] sm:$0xff]  ;;  %vm15701_vm9 = vmmov %vm15687_vm8 }
 0x471   : >> { %v5325_v38 = vsel %vm15655_vm11, %v4783_v40, %v5108_v49  ;;  %v4720_v49 = vpack.c.bf16 %v4694_v25, %v4693_v41  ;;  %v4855_v54 = vsel %vm15670_vm14, %v15667_v46, 0.0  ;;  %vm15680_vm11 = vmmov %vm15662_vm7 }
 0x472   : >> { %5931 = vmatmul.mubr.bf16.gmra.mrb[112].mxu0 %v5325_v38  ;;  %v12967_v40 = vpop.permute.xlu0 %5067  ;;  %vm15689_vm13 = vmmov %vm15670_vm14 }
 0x473   : >> { %v5265_v38 = vsel %vm15666_vm12, %v4720_v49, %v5062_v3  ;;  %v4534_v3 = vsel %vm15676_vm3, %v15634_v14, 0.0  ;;  %vm15690_vm12 = vmmov %vm15673_vm4 }
 0x474   : >> { %v5158_v33 = vpop.permute.xlu1 %5157  ;;  %5770 = vmatmul.mubr.bf16.gmra.mrb[80].mxu1 %v5197_v24  ;;  %v4560_v58 = vpack.c.bf16 %v4534_v3, %v4533_v12  ;;  %v4535_v3 = vsel %vm15689_vm13, %v15648_v61, 0.0  ;;  %vm15695_vm14 = vmmov %vm15681_vm2 }
 0x475   : >> { %v5393_v29 = vsel %vm15662_vm7, %v4880_v4, %v5158_v33  ;;  %v4856_v4 = vsel %vm15673_vm4, %v15671_v27, 0.0  ;;  %5777 = vmatprep.mubr.bf16.mxu1 %v5265_v38  ;;  %v4695_v33 = vsel %vm2308_vm0, %v15677_v20, 0.0  ;;  %v15682_v38 = vld [vmem:[#allocation92_spill] sm:$0xff]  ;;  %v15685_v20 = vld [vmem:[#allocation122_spill] sm:$0xff]  ;;  %vm15688_vm7 = vmmov %vm15681_vm2 }
 0x476   : >> { %5938 = vmatprep.mubr.bf16.mxu0 %v5393_v29  ;;  %v5020_v25 = vpop.permute.xlu0 %5019  ;;  %v4696_v29 = vsel %vm15679_vm1, %v15678_v30, 0.0  ;;  %v4881_v49 = vpack.c.bf16 %v4856_v4, %v4855_v54  ;;  %v5201_v14 = vsel %vm15681_vm2, %v4560_v58, %v12669_v59  ;;  %v4857_v54 = vsel %vm15687_vm8, %v15685_v20, 0.0  ;;  %v15693_v20 = vld [vmem:[#allocation21_spill] sm:$0xff]  ;;  %vm15696_vm4 = vmmov %vm15681_vm2 }
 0x477   : >> { %v4721_v53 = vpack.c.bf16 %v4696_v29, %v4695_v33  ;;  %v4536_v59 = vsel %vm15690_vm12, %v15651_v6, 0.0  ;;  %v15692_v29 = vld [vmem:[#allocation91_spill] sm:$0xff]  ;;  %vm15717_vm13 = vmmov %vm15681_vm2 }
 0x478   : >> { %v5110_v9 = vpop.permute.xlu1 %5109  ;;  %v4561_v58 = vpack.c.bf16 %v4536_v59, %v4535_v3  ;;  %v4537_v3 = vsel %vm15701_vm9, %v15667_v46, 0.0  ;;  %vm15718_vm12 = vmmov %vm15681_vm2 }
 0x479   : >> { %v5329_v41 = vsel %vm15674_vm15, %v4784_v22, %v5110_v9  ;;  %v15683_v9 = vld [vmem:[#allocation95_spill] sm:$0xff]  ;;  %v5269_v63 = vsel %vm15684_vm10, %v4721_v53, %v5064_v48  ;;  %v15691_v48 = vld [vmem:[#allocation130_spill] sm:$0xff]  ;;  %vm15699_vm15 = vmmov %vm15681_vm2 }
 0x47a   : >> { %5939 = vmatmul.mubr.bf16.gmra.mrb[116].mxu0 %v5329_v41  ;;  %v4785_v41 = vpack.c.bf16 %v15683_v9, %v15682_v38  ;;  %v4697_v33 = vsel %vm2310_vm5, %v15691_v48, 0.0  ;;  %v5205_v6 = vsel %vm15696_vm4, %v4561_v58, %v12732_v8  ;;  %v15698_v38 = vld [vmem:[#allocation119_spill] sm:$0xff]  ;;  %v15703_v8 = vld [vmem:[#allocation137_spill] sm:$0xff]  ;;  %vm15727_vm9 = vmmov %vm15681_vm2 }
 0x47b   : >> { %v5070_v22 = vpop.permute.xlu0 %5069 }
 0x47c   : >> { %v5160_v24 = vpop.permute.xlu1 %5159  ;;  %5778 = vmatmul.mubr.bf16.gmra.mrb[84].mxu1 %v5201_v14  ;;  %v15697_v14 = vld [vmem:[#allocation94_spill] sm:$0xff] }
 0x47d   : >> { %v5397_v13 = vsel %vm15680_vm11, %v4881_v49, %v5160_v24  ;;  %5785 = vmatprep.mubr.bf16.mxu1 %v5269_v63  ;;  %v15694_v49 = vmov %v15693_v20  ;;  %v4698_v24 = vsel %vm2311_vm6, %v15692_v29, 0.0  ;;  %v4786_v9 = vpack.c.bf16 %v15698_v38, %v15697_v14  ;;  %vm15700_vm6 = vmmov %vm15681_vm2  ;;  %v15710_v14 = vld [vmem:[#allocation24_spill] sm:$0xff] }
 0x47e   : >> { %5946 = vmatprep.mubr.bf16.mxu0 %v5397_v13  ;;  %v4722_v53 = vpack.c.bf16 %v4698_v24, %v4697_v33  ;;  %vm15702_vm3 = vcmp.ge.s32.totalorder %v15694_v49, 1  ;;  %v15704_v33 = vld [vmem:[#allocation23_spill] sm:$0xff]  ;;  %vm15706_vm11 = vmmov %vm15681_vm2  ;;  %vm15712_vm8 = vcmp.lt.s32.totalorder %v15710_v14, 7 }
 0x47f   : >> { %v5022_v12 = vpop.permute.xlu0 %5021  ;;  %v4538_v59 = vsel %vm15702_vm3, %v15671_v27, 0.0  ;;  %vm15705_vm1 = vcmp.lt.s32.totalorder %v15704_v33, 7  ;;  %vm15708_vm10 = vcmp.ge.s32.totalorder %v15704_v33, 1  ;;  %vm15728_vm3 = vmmov %vm15681_vm2 }
 0x480   : >> { %v5112_v47 = vpop.permute.xlu1 %5111  ;;  %v4700_v24 = vsel %vm15705_vm1, %v15703_v8, 0.0  ;;  %vm15730_vm1 = vcmp.ge.s32.totalorder %v15435_v1, 1 }
 0x481   : >> { %v5333_v4 = vsel %vm15688_vm7, %v4785_v41, %v5112_v47  ;;  %v4882_v47 = vpack.c.bf16 %v14941_v19, %v4857_v54  ;;  %v5273_v41 = vsel %vm15699_vm15, %v4722_v53, %v5066_v35  ;;  %v4562_v35 = vpack.c.bf16 %v4538_v59, %v4537_v3  ;;  %v15707_v53 = vld [vmem:[#allocation127_spill] sm:$0xff] }
 0x482   : >> { %5947 = vmatmul.mubr.bf16.gmra.mrb[120].mxu0 %v5333_v4  ;;  %v4540_v27 = vsel %vm15708_vm10, %v15707_v53, 0.0  ;;  %v15723_v53 = vld [vmem:[#allocation134_spill] sm:$0xff]  ;;  %vm15724_vm15 = vcmp.lt.s32.totalorder %v15435_v1, 7  ;;  %vm15736_vm10 = vcmp.lt.s32.totalorder %v15453_v10, 7  ;;  %v15741_v10 = vpack.c.bf16 %v12643_v52, %v12638_v56 }
 0x483   : >> { %v5072_v61 = vpop.permute.xlu0 %5071  ;;  %v5209_v58 = vsel %vm15706_vm11, %v4562_v35, %v12771_v55  ;;  %v4563_v55 = vpack.c.bf16 %v4540_v27, %v14941_v19  ;;  %v15719_v35 = vld [vmem:[#allocation126_spill] sm:$0xff]  ;;  %v4703_v27 = vsel %vm15724_vm15, %v15723_v53, 0.0  ;;  %vm15732_vm11 = vcmp.ge.s32.totalorder %v15438_v16, 1 }
 0x484   : >> { %v5162_v63 = vpop.permute.xlu1 %5161  ;;  %5786 = vmatmul.mubr.bf16.gmra.mrb[88].mxu1 %v5205_v6  ;;  %v15709_v6 = vld [vmem:[#allocation79_spill] sm:$0xff]  ;;  %vm15746_vm15 = vcmp.ge.s32.totalorder %v15704_v33, 1 }
 0x485   : >> { %v5401_v13 = vsel %vm15695_vm14, %v4882_v47, %v5162_v63  ;;  %5793 = vmatprep.mubr.bf16.mxu1 %v5273_v41  ;;  %v4723_v63 = vpack.c.bf16 %v4700_v24, %v14941_v19  ;;  %v15711_v41 = vmov %v15710_v14  ;;  %v4701_v38 = vsel %vm15712_vm8, %v15709_v6, 0.0  ;;  %v15725_v14 = vld [vmem:[#allocation140_spill] sm:$0xff]  ;;  %v15733_v6 = vld [vmem:[#allocation78_spill] sm:$0xff]  ;;  %vm15737_vm8 = vmmov %vm15728_vm3 }
 0x486   : >> { %5954 = vmatprep.mubr.bf16.mxu0 %v5401_v13  ;;  %vm15720_vm14 = vcmp.ge.s32.totalorder %v15711_v41, 1 }
 0x487   : >> { %v5024_v54 = vpop.permute.xlu0 %5023  ;;  %v5277_v13 = vsel %vm15681_vm2, %v4723_v63, %v12967_v40  ;;  %v5213_v40 = vsel %vm15717_vm13, %v4563_v55, %v5020_v25  ;;  %v4541_v63 = vsel %vm15720_vm14, %v15719_v35, 0.0  ;;  %vm15734_vm2 = vcmp.lt.s32.totalorder %v15443_v50, 7  ;;  %vm15743_vm14 = vmmov %vm15728_vm3 }
 0x488   : >> { %v5114_v4 = vpop.permute.xlu1 %5113  ;;  %vm15740_vm13 = vcmp.lt.s32.totalorder %v15491_v62, 7 }
 0x489   : >> { %v5337_v20 = vsel %vm15700_vm6, %v4786_v9, %v5114_v4  ;;  %v15713_v9 = vld [vmem:[#allocation129_spill] sm:$0xff]  ;;  %v15714_v4 = vld [vmem:[#allocation25_spill] sm:$0xff]  ;;  %vm15726_vm6 = vcmp.lt.s32.totalorder %v15438_v16, 7 }
 0x48a   : >> { %5955 = vmatmul.mubr.bf16.gmra.mrb[124].mxu0 %v5337_v20  ;;  %v15715_v49 = vmov %v15714_v4  ;;  %vm15716_vm7 = vcmp.lt.s32.totalorder %v15714_v4, 7  ;;  %v4704_v25 = vsel %vm15726_vm6, %v15725_v14, 0.0  ;;  %vm15748_vm6 = vcmp.ge.s32.totalorder %v15491_v62, 1 }
 0x48b   : >> { %v5074_v47 = vpop.permute.xlu0 %5073  ;;  %v4702_v20 = vsel %vm15716_vm7, %v15713_v9, 0.0  ;;  %vm15722_vm4 = vcmp.ge.s32.totalorder %v15715_v49, 1  ;;  %v4725_v4 = vpack.c.bf16 %v4704_v25, %v4703_v27  ;;  %v15731_v9 = vld [vmem:[#allocation135_spill] sm:$0xff]  ;;  %vm15738_vm7 = vmmov %vm15728_vm3 }
 0x48c   : >> { %5794 = vmatmul.mubr.bf16.gmra.mrb[92].mxu1 %v5209_v58  ;;  %v4724_v59 = vpack.c.bf16 %v4702_v20, %v4701_v38  ;;  %v15721_v58 = vld [vmem:[#allocation131_spill] sm:$0xff]  ;;  %v4544_v53 = vsel %vm15732_vm11, %v15731_v9, 0.0  ;;  %v5116_v56 = vpop.permute.xlu1 %5115 }
 0x48d   : >> { %5801 = vmatprep.mubr.bf16.mxu1 %v5277_v13  ;;  %v4542_v13 = vsel %vm15722_vm4, %v15721_v58, 0.0  ;;  %v5285_v55 = vsel %vm15728_vm3, %v4725_v4, %v5072_v61 }
 0x48e   : >> { %v5281_v8 = vsel %vm15718_vm12, %v4724_v59, %v5070_v22  ;;  %v4564_v22 = vpack.c.bf16 %v4542_v13, %v4541_v63  ;;  %v4705_v63 = vsel %vm15734_vm2, %v15733_v6, 0.0  ;;  %v15735_v13 = vld [vmem:[#allocation76_spill] sm:$0xff]  ;;  %vm15742_vm12 = vmmov %vm15728_vm3  ;;  %vm15752_vm3 = vcmp.ge.s32.totalorder %v15715_v49, 1 }
 0x490   : >> { %v5026_v46 = vpop.permute.xlu0 %5025  ;;  %v5217_v20 = vsel %vm15727_vm9, %v4564_v22, %v5022_v12  ;;  %v4706_v12 = vsel %vm15736_vm10, %v15735_v13, 0.0  ;;  %vm15751_vm9 = vcmp.ge.s32.totalorder %v15711_v41, 1 }
 0x491   : >> { %v4726_v25 = vpack.c.bf16 %v4706_v12, %v4705_v63  ;;  %v4860_v12 = vsel %vm15746_vm15, %v15721_v58, 0.0  ;;  %v4862_v58 = vsel %vm15752_vm3, %v15731_v9, 0.0  ;;  %v5118_v9 = vpop.permute.xlu1 %5117 }
 0x493   : >> { %v5289_v4 = vsel %vm15738_vm7, %v4726_v25, %v5074_v47  ;;  %v15744_v47 = vld [vmem:[#allocation22_spill] sm:$0xff] }
 0x494   : >> { %5802 = vmatmul.mubr.bf16.gmra.mrb[96].mxu1 %v5213_v40  ;;  %v15729_v40 = vld [vmem:[#allocation128_spill] sm:$0xff]  ;;  %vm15745_vm4 = vcmp.ge.s32.totalorder %v15744_v47, 1 }
 0x495   : >> { %5809 = vmatprep.mubr.bf16.mxu1 %v5281_v8  ;;  %v4543_v8 = vsel %vm15730_vm1, %v15729_v40, 0.0  ;;  %v4859_v63 = vsel %vm15745_vm4, %v15719_v35, 0.0  ;;  %v4861_v35 = vsel %vm15751_vm9, %v15729_v40, 0.0  ;;  %vm15753_vm1 = vmmov %vm15738_vm7  ;;  %vm15769_vm4 = vcmp.ge.s32.totalorder %v15443_v50, 1 }
 0x496   : >> { %v5076_v3 = vpop.permute.xlu0 %5075  ;;  %v4565_v61 = vpack.c.bf16 %v4544_v53, %v4543_v8  ;;  %v5225_v53 = vsel %vm15742_vm12, %v15741_v10, %v5026_v46  ;;  %v4883_v52 = vpack.c.bf16 %v4860_v12, %v4859_v63  ;;  %v15749_v10 = vld [vmem:[#allocation116_spill] sm:$0xff]  ;;  %v15750_v46 = vld [vmem:[#allocation121_spill] sm:$0xff]  ;;  %vm15754_vm11 = vmmov %vm15753_vm1  ;;  %v4884_v63 = vpack.c.bf16 %v4862_v58, %v4861_v35 }
 0x497   : >> { %vm15755_vm2 = vmmov %vm15753_vm1  ;;  %v15776_v35 = vld [vmem:[#allocation153_spill] sm:$0xff] }
 0x498   : >> { %v5221_v22 = vsel %vm15737_vm8, %v4565_v61, %v5024_v54  ;;  %v15747_v61 = vld [vmem:[#allocation142_spill] sm:$0xff]  ;;  %vm15757_vm10 = vmmov %vm15753_vm1  ;;  %v15777_v58 = vpack.c.bf16 %v12715_v17, %v15776_v35  ;;  %v15783_v17 = vld [vmem:[#allocation136_spill] sm:$0xff] }
 0x499   : >> { %vm15758_vm8 = vmmov %vm15753_vm1  ;;  %v15815_v35 = vld [vmem:[#allocation118_spill] sm:$0xff] }
 0x49a   : >> { %v5028_v24 = vpop.permute.xlu0 %5027  ;;  %vm15760_vm7 = vmmov %vm15753_vm1 }
 0x49b   : >> { %vm15765_vm12 = vmmov %vm15753_vm1 }
 0x49c   : >> { %5810 = vmatmul.mubr.bf16.gmra.mrb[100].mxu1 %v5217_v20  ;;  %vm15772_vm15 = vmmov %vm15753_vm1 }
 0x49d   : >> { %5817 = vmatprep.mubr.bf16.mxu1 %v5285_v55  ;;  %v15739_v55 = vld [vmem:[#allocation146_spill] sm:$0xff]  ;;  %vm15778_vm9 = vmmov %vm15753_vm1 }
 0x49e   : >> { %v5078_v38 = vpop.permute.xlu0 %5077  ;;  %v4708_v16 = vsel %vm15740_vm13, %v15739_v55, 0.0  ;;  %vm15762_vm13 = vmmov %vm15753_vm1 }
 0x49f   : >> { %v4727_v6 = vpack.c.bf16 %v4708_v16, %v14941_v19  ;;  %v4548_v16 = vsel %vm15748_vm6, %v15747_v61, 0.0  ;;  %vm15775_vm6 = vmmov %vm15753_vm1 }
 0x4a0   : >> { %vm15779_vm3 = vmmov %vm15753_vm1 }
 0x4a1   : >> { %v5293_v8 = vsel %vm15743_vm14, %v4727_v6, %v5076_v3  ;;  %v4787_v6 = vpack.c.bf16 %v15750_v46, %v15749_v10  ;;  %v4567_v3 = vpack.c.bf16 %v4548_v16, %v14941_v19  ;;  %v15759_v16 = vpack.c.bf16 %v12177_v0, %v12167_v11  ;;  %vm15767_vm14 = vmmov %vm15753_vm1  ;;  %v15768_v0 = vld [vmem:[#allocation74_spill] sm:$0xff]  ;;  %v5120_v11 = vpop.permute.xlu1 %5119 }
 0x4a2   : >> { %v5030_v59 = vpop.permute.xlu0 %5029  ;;  %v15766_v10 = vpack.c.bf16 %v12747_v32, %v12739_v18  ;;  %v15773_v18 = vld [vmem:[#allocation152_spill] sm:$0xff] }
 0x4a3   : >> { %v5229_v55 = vsel %vm15755_vm2, %v4567_v3, %v5028_v24  ;;  %v5345_v24 = vsel %vm15760_vm7, %v15759_v16, %v5118_v9  ;;  %v15774_v32 = vpack.c.bf16 %v12705_v7, %v15773_v18  ;;  %vm15793_vm7 = vmmov %vm15755_vm2  ;;  %v15812_v18 = vld [vmem:[#allocation108_spill] sm:$0xff] }
 0x4a4   : >> { %5818 = vmatmul.mubr.bf16.gmra.mrb[104].mxu1 %v5221_v22 }
 0x4a5   : >> { %5825 = vmatprep.mubr.bf16.mxu1 %v5289_v4  ;;  %v5341_v4 = vsel %vm15754_vm11, %v4787_v6, %v5116_v56  ;;  %vm15782_vm11 = vcmp.lt.s32.totalorder %v15211_v43, 7 }
 0x4a6   : >> { %v5080_v27 = vpop.permute.xlu0 %5079  ;;  %v4940_v7 = vsel %vm15782_vm11, %v15594_v2, 0.0 }
 0x4aa   : >> { %v5032_v20 = vpop.permute.xlu0 %5031 }
 0x4ac   : >> { %5826 = vmatmul.mubr.bf16.gmra.mrb[108].mxu1 %v5225_v53  ;;  %v15756_v53 = vpack.c.bf16 %v12667_v28, %v12662_v45  ;;  %v15761_v45 = vpack.c.bf16 %v12676_v44, %v12681_v15  ;;  %v4865_v15 = vsel %vm15769_vm4, %v15768_v0, 0.0  ;;  %v15770_v44 = vld [vmem:[#allocation132_spill] sm:$0xff]  ;;  %v15799_v0 = vld [vmem:[#allocation139_spill] sm:$0xff] }
 0x4ad   : >> { %5833 = vmatprep.mubr.bf16.mxu1 %v5293_v8 }
 0x4ae   : >> { %v5082_v1 = vpop.permute.xlu0 %5081  ;;  %v5297_v8 = vsel %vm15757_vm10, %v15756_v53, %v5078_v38  ;;  %v5233_v28 = vsel %vm15762_vm13, %v15761_v45, %v5030_v59  ;;  %v15763_v38 = vld [vmem:[#allocation151_spill] sm:$0xff]  ;;  %v15780_v53 = vld [vmem:[#allocation6_spill] sm:$0xff]  ;;  %vm15788_vm10 = vmmov %vm15755_vm2  ;;  %vm15794_vm13 = vcmp.lt.s32.totalorder %v15574_v36, 7 }
 0x4af   : >> { %v15764_v56 = vpack.c.bf16 %v12693_v21, %v15763_v38  ;;  %v15771_v59 = vld [vmem:[#allocation123_spill] sm:$0xff]  ;;  %v15790_v45 = vld [vmem:[#allocation156_spill] sm:$0xff] }
 0x4b0   : >> { %v4789_v6 = vpack.c.bf16 %v15771_v59, %v15770_v44  ;;  %v15803_v59 = vld [vmem:[#allocation159_spill] sm:$0xff] }
 0x4b2   : >> { %v5034_v54 = vpop.permute.xlu0 %5033  ;;  %v5349_v3 = vsel %vm15772_vm15, %v4789_v6, %v5120_v11  ;;  %vm15802_vm15 = vmmov %vm15755_vm2  ;;  %v15804_v6 = vld [vmem:[#allocation158_spill] sm:$0xff] }
 0x4b4   : >> { %5834 = vmatmul.mubr.bf16.gmra.mrb[112].mxu1 %v5229_v55  ;;  %v5122_v55 = vpop.permute.xlu1 %5121 }
 0x4b5   : >> { %5841 = vmatprep.mubr.bf16.mxu1 %v5297_v8 }
 0x4b6   : >> { %v5164_v25 = vpop.permute.xlu0 %5163 }
 0x4b7   : >> { %v5405_v22 = vsel %vm15753_vm1, %v4883_v52, %v5164_v25  ;;  %v5301_v52 = vsel %vm15765_vm12, %v15764_v56, %v5080_v27  ;;  %v4886_v27 = vpack.c.bf16 %v14941_v19, %v4865_v15  ;;  %v5237_v25 = vsel %vm15775_vm6, %v15774_v32, %v5032_v20  ;;  %v15797_v56 = vld [vmem:[#allocation11_spill] sm:$0xff]  ;;  %v15800_v15 = vld [vmem:[#allocation138_spill] sm:$0xff]  ;;  %vm15806_vm6 = vmmov %vm15755_vm2 }
 0x4b8   : >> { %5962 = vmatprep.mubr.bf16.mxu0 %v5405_v22  ;;  %v5305_v22 = vsel %vm15778_vm9, %v15777_v58, %v5082_v1  ;;  %vm15781_vm1 = vcmp.lt.s32.totalorder %v15780_v53, 7  ;;  %vm15795_vm12 = vcmp.lt.s32.totalorder %v15576_v23, 7  ;;  %vm15798_vm4 = vcmp.lt.s32.totalorder %v15797_v56, 7  ;;  %vm15807_vm9 = vmmov %vm15755_vm2  ;;  %v15813_v32 = vld [vmem:[#allocation14_spill] sm:$0xff]  ;;  %v15816_v58 = vld [vmem:[#allocation15_spill] sm:$0xff] }
 0x4b9   : >> { %5963 = vmatmul.mubr.bf16.gmra.mrb[128].mxu0 %v5341_v4  ;;  %v4939_v8 = vsel %vm15781_vm1, %v15592_v34, 0.0  ;;  %v4942_v2 = vsel %vm15795_vm12, %v15610_v39, 0.0  ;;  %v15801_v11 = vpack.c.bf16 %v15799_v0, %v15800_v15  ;;  %v15805_v39 = vpack.c.bf16 %v15803_v59, %v15804_v6  ;;  %v15818_v53 = vld [vmem:[#allocation143_spill] sm:$0xff]  ;;  %v15839_v15 = vld [vmem:[#allocation145_spill] sm:$0xff] }
 0x4ba   : >> { %v5166_v40 = vpop.permute.xlu0 %5165  ;;  %v4971_v16 = vpack.c.bf16 %v4940_v7, %v4939_v8  ;;  %vm15814_vm11 = vcmp.lt.s32.totalorder %v15813_v32, 7  ;;  %v15819_v8 = vld [vmem:[#allocation141_spill] sm:$0xff]  ;;  %v15838_v0 = vld [vmem:[#allocation147_spill] sm:$0xff] }
 0x4bb   : >> { %v5409_v12 = vsel %vm15758_vm8, %v4884_v63, %v5166_v40  ;;  %v15784_v63 = vpack.c.bf16 %v12311_v60, %v15783_v17  ;;  %v15785_v40 = vld [vmem:[#allocation155_spill] sm:$0xff]  ;;  %vm15792_vm8 = vmmov %vm15755_vm2  ;;  %v4941_v60 = vsel %vm15794_vm13, %v15608_v31, 0.0  ;;  %v15820_v7 = vpack.c.bf16 %v15818_v53, %v15819_v8  ;;  %v15860_v8 = vld [vmem:[#allocation27_spill] sm:$0xff] }
 0x4bc   : >> { %5970 = vmatprep.mubr.bf16.mxu0 %v5409_v12  ;;  %5842 = vmatmul.mubr.bf16.gmra.mrb[116].mxu1 %v5233_v28  ;;  %v15786_v12 = vld [vmem:[#allocation154_spill] sm:$0xff]  ;;  %v15845_v6 = vld [vmem:[#allocation79_spill] sm:$0xff] }
 0x4bd   : >> { %5849 = vmatprep.mubr.bf16.mxu1 %v5301_v52  ;;  %v5353_v1 = vsel %vm15755_vm2, %v15784_v63, %v5122_v55  ;;  %v15787_v9 = vpack.c.bf16 %v15785_v40, %v15786_v12  ;;  %v4944_v52 = vsel %vm15798_vm4, %v15625_v26, 0.0  ;;  %v15810_v26 = vld [vmem:[#allocation12_spill] sm:$0xff]  ;;  %v15822_v63 = vld [vmem:[#allocation161_spill] sm:$0xff] }
 0x4be   : >> { %v5168_v61 = vpop.permute.xlu0 %5167  ;;  %vm15811_vm1 = vcmp.lt.s32.totalorder %v15810_v26, 7  ;;  %v15849_v26 = vld [vmem:[#allocation148_spill] sm:$0xff] }
 0x4bf   : >> { %v5413_v46 = vsel %vm15767_vm14, %v15766_v10, %v5168_v61  ;;  %v5241_v61 = vsel %vm15788_vm10, %v15787_v9, %v5034_v54  ;;  %v5124_v54 = vpop.permute.xlu1 %5123  ;;  %vm15796_vm14 = vcmp.lt.s32.totalorder %v15600_v37, 7  ;;  %v15828_v9 = vld [vmem:[#allocation150_spill] sm:$0xff] }
 0x4c0   : >> { %v4943_v38 = vsel %vm15796_vm14, %v15623_v51, 0.0  ;;  %v5357_v31 = vsel %vm15802_vm15, %v15801_v11, %v5124_v54  ;;  %v15809_v51 = vld [vmem:[#allocation105_spill] sm:$0xff]  ;;  %vm15837_vm15 = vcmp.lt.s32.totalorder %v15672_v5, 7  ;;  %v15840_v11 = vpack.c.bf16 %v15838_v0, %v15839_v15 }
 0x4c1   : >> { %5971 = vmatmul.mubr.bf16.gmra.mrb[132].mxu0 %v5345_v24  ;;  %v15789_v24 = vld [vmem:[#allocation157_spill] sm:$0xff]  ;;  %v4973_v44 = vpack.c.bf16 %v4944_v52, %v4943_v38  ;;  %v4951_v38 = vsel %vm2308_vm0, %v15691_v48, 0.0  ;;  %v4952_v56 = vsel %vm15837_vm15, %v15692_v29, 0.0  ;;  %v15844_v48 = vld [vmem:[#allocation75_spill] sm:$0xff]  ;;  %vm15865_vm15 = vcmp.lt.s32.totalorder %v15443_v50, 7 }
 0x4c2   : >> { %5978 = vmatprep.mubr.bf16.mxu0 %v5413_v46  ;;  %v5170_v21 = vpop.permute.xlu0 %5169  ;;  %v15791_v28 = vpack.c.bf16 %v15789_v24, %v15790_v45  ;;  %v4972_v46 = vpack.c.bf16 %v4942_v2, %v4941_v60  ;;  %v15832_v45 = vld [vmem:[#allocation124_spill] sm:$0xff]  ;;  %v15835_v60 = vld [vmem:[#allocation17_spill] sm:$0xff]  ;;  %v4953_v29 = vsel %vm2310_vm5, %v15844_v48, 0.0 }
 0x4c3   : >> { %v5417_v4 = vsel %vm15779_vm3, %v4886_v27, %v5170_v21  ;;  %vm15808_vm3 = vmmov %vm15755_vm2  ;;  %v4945_v27 = vsel %vm15811_vm1, %v15809_v51, 0.0  ;;  %vm15817_vm2 = vcmp.lt.s32.totalorder %v15816_v58, 7  ;;  %vm15836_vm4 = vcmp.lt.s32.totalorder %v15835_v60, 7  ;;  %v15878_v60 = vld [vmem:[#allocation81_spill] sm:$0xff]  ;;  %v15942_v50 = vld [vmem:[#allocation67_spill] sm:$0xff] }
 0x4c4   : >> { %5850 = vmatmul.mubr.bf16.gmra.mrb[120].mxu1 %v5237_v25  ;;  %v4947_v25 = vsel %vm15814_vm11, %v15812_v18, 0.0  ;;  %v4974_v55 = vpack.c.bf16 %v14941_v19, %v4945_v27  ;;  %vm15821_vm10 = vmmov %vm15808_vm3  ;;  %v4950_v2 = vsel %vm15836_vm4, %v15678_v30, 0.0  ;;  %vm15846_vm1 = vcmp.lt.s32.totalorder %v15744_v47, 7  ;;  %v15850_v27 = vld [vmem:[#allocation107_spill] sm:$0xff] }
 0x4c5   : >> { %5857 = vmatprep.mubr.bf16.mxu1 %v5305_v22  ;;  %v4948_v22 = vsel %vm15817_vm2, %v15815_v35, 0.0  ;;  %vm15827_vm13 = vmmov %vm15808_vm3  ;;  %vm15848_vm11 = vcmp.lt.s32.totalorder %v15704_v33, 7  ;;  %v4978_v18 = vpack.c.bf16 %v14941_v19, %v4953_v29  ;;  %v15854_v35 = vld [vmem:[#allocation134_spill] sm:$0xff] }
 0x4c6   : >> { %v5172_v20 = vpop.permute.xlu0 %5171  ;;  %v4975_v17 = vpack.c.bf16 %v4948_v22, %v4947_v25  ;;  %vm15843_vm0 = vmmov %vm15808_vm3 }
 0x4c7   : >> { %v5421_v34 = vsel %vm15792_vm8, %v15791_v28, %v5172_v20  ;;  %vm15825_vm8 = vmmov %vm15808_vm3  ;;  %v15833_v28 = vld [vmem:[#allocation16_spill] sm:$0xff] }
 0x4c8   : >> { %vm15834_vm14 = vcmp.lt.s32.totalorder %v15833_v28, 7  ;;  %vm15851_vm2 = vmmov %vm15843_vm0  ;;  %v15876_v28 = vld [vmem:[#allocation162_spill] sm:$0xff] }
 0x4c9   : >> { %5979 = vmatmul.mubr.bf16.gmra.mrb[136].mxu0 %v5349_v3  ;;  %v5126_v3 = vpop.permute.xlu1 %5125  ;;  %vm15853_vm5 = vmmov %vm15843_vm0 }
 0x4ca   : >> { %5986 = vmatprep.mubr.bf16.mxu0 %v5417_v4  ;;  %v5174_v10 = vpop.permute.xlu0 %5173  ;;  %v5361_v20 = vsel %vm15821_vm10, %v15820_v7, %v5126_v3  ;;  %v4794_v3 = vpack.c.bf16 %v15850_v27, %v15849_v26  ;;  %vm15852_vm10 = vmmov %vm15843_vm0 }
 0x4cb   : >> { %v5425_v21 = vsel %vm15806_vm6, %v15805_v39, %v5174_v10  ;;  %vm15841_vm6 = vmmov %vm15808_vm3  ;;  %v4955_v39 = vsel %vm15846_vm1, %v15845_v6, 0.0 }
 0x4cc   : >> { %5858 = vmatmul.mubr.bf16.gmra.mrb[124].mxu1 %v5241_v61  ;;  %v15829_v61 = vld [vmem:[#allocation36_spill] sm:$0xff]  ;;  %vm15863_vm4 = vmmov %vm15843_vm0 }
 0x4cd   : >> { %7987 = vmatprep.mubr.msk.bf16.mxu1 %vm15793_vm7, %v4971_v16  ;;  %vm15826_vm7 = vmmov %vm15808_vm3  ;;  %v15830_v16 = vmov %v15829_v61  ;;  %vm15831_vm12 = vcmp.ge.s32.totalorder %v15829_v61, 1  ;;  %v5128_v54 = vpop.permute.xlu1 %5127  ;;  %v15872_v61 = vld [vmem:[#allocation106_spill] sm:$0xff] }
 0x4ce   : >> { %v5176_v4 = vpop.permute.xlu0 %5175  ;;  %v4873_v24 = vsel %vm15831_vm12, %v15828_v9, 0.0  ;;  %vm15861_vm12 = vcmp.lt.s32.totalorder %v15860_v8, 7  ;;  %vm15879_vm1 = vcmp.lt.s32.totalorder %v15830_v16, 7 }
 0x4cf   : >> { %v4890_v10 = vpack.c.bf16 %v14941_v19, %v4873_v24  ;;  %v4960_v7 = vsel %vm15861_vm12, %v15735_v13, 0.0  ;;  %v15871_v13 = vld [vmem:[#allocation98_spill] sm:$0xff]  ;;  %vm15887_vm12 = vmmov %vm15843_vm0 }
 0x4d0   : >> { %v15873_v24 = vpack.c.bf16 %v15871_v13, %v15872_v61 }
 0x4d1   : >> { %5987 = vmatmul.mubr.bf16.gmra.mrb[140].mxu0 %v5353_v1  ;;  %v15823_v1 = vld [vmem:[#allocation160_spill] sm:$0xff]  ;;  %v5130_v59 = vpop.permute.xlu1 %5129 }
 0x4d2   : >> { %5994 = vmatprep.mubr.bf16.mxu0 %v5421_v34  ;;  %v15824_v40 = vpack.c.bf16 %v15822_v63, %v15823_v1  ;;  %v4949_v34 = vsel %vm15834_vm14, %v15832_v45, 0.0  ;;  %v5178_v52 = vpop.permute.xlu0 %5177  ;;  %v5369_v32 = vsel %vm15851_vm2, %v4794_v3, %v5130_v59  ;;  %vm15862_vm14 = vmmov %vm15843_vm0  ;;  %v15864_v63 = vld [vmem:[#allocation144_spill] sm:$0xff]  ;;  %v15875_v45 = vld [vmem:[#allocation163_spill] sm:$0xff] }
 0x4d3   : >> { %v4961_v1 = vsel %vm15865_vm15, %v15864_v63, 0.0  ;;  %vm15881_vm2 = vmmov %vm15843_vm0 }
 0x4d4   : >> { %7988 = vmatmul.mubr.msk.bf16.vlgmr.msra.gmra.mrb[128].mxu1 %vm15807_vm9, %v4972_v46  ;;  %v5429_v12 = vsel %vm15825_vm8, %v15824_v40, %v5176_v4  ;;  %v4976_v46 = vpack.c.bf16 %v4950_v2, %v4949_v34  ;;  %vm15842_vm9 = vmmov %vm15808_vm3  ;;  %vm15855_vm8 = vcmp.lt.s32.totalorder %v15711_v41, 7  ;;  %v15857_v4 = vld [vmem:[#allocation78_spill] sm:$0xff]  ;;  %v15877_v34 = vpack.c.bf16 %v15875_v45, %v15876_v28 }
 0x4d5   : >> { %7991 = vmatprep.mubr.msk.bf16.mxu1 %vm15808_vm3, %v4973_v44  ;;  %v4977_v44 = vpack.c.bf16 %v4952_v56, %v4951_v38  ;;  %v5433_v30 = vsel %vm15842_vm9, %v4890_v10, %v5178_v52  ;;  %v4957_v58 = vsel %vm15855_vm8, %v15854_v35, 0.0  ;;  %v15867_v40 = vld [vmem:[#allocation110_spill] sm:$0xff]  ;;  %vm15870_vm9 = vmmov %vm15843_vm0  ;;  %v4969_v2 = vsel %vm15879_vm1, %v15878_v60, 0.0 }
 0x4d6   : >> { %vm15884_vm8 = vmmov %vm15843_vm0 }
 0x4d7   : >> { %vm15890_vm15 = vmmov %vm15843_vm0 }
 0x4d8   : >> { %vm15894_vm1 = vmmov %vm15843_vm0 }
 0x4d9   : >> { %5995 = vmatmul.mubr.bf16.gmra.mrb[144].mxu0 %v5357_v31  ;;  %v5365_v31 = vsel %vm15841_vm6, %v15840_v11, %v5128_v54  ;;  %vm15866_vm6 = vmmov %vm15843_vm0  ;;  %v4986_v54 = vpack.c.bf16 %v14941_v19, %v4969_v2  ;;  %v13280_v11 = vld [vmem:[%s11274_s23 + $0x1] ss:$0 sm:$0xff] }
 0x4da   : >> { %6002 = vmatprep.mubr.bf16.mxu0 %v5425_v21  ;;  %v15847_v21 = vld [vmem:[#allocation129_spill] sm:$0xff] }
 0x4db   : >> { %v4956_v51 = vsel %vm15848_vm11, %v15847_v21, 0.0  ;;  %vm15880_vm11 = vmmov %vm15843_vm0 }
 0x4dc   : >> { %7992 = vmatmul.mubr.msk.bf16.gmra.mrb[132].mxu1 %vm15826_vm7, %v4974_v55  ;;  %v4979_v25 = vpack.c.bf16 %v4956_v51, %v4955_v39  ;;  %vm15856_vm7 = vcmp.lt.s32.totalorder %v15715_v49, 7  ;;  %v15858_v55 = vld [vmem:[#allocation26_spill] sm:$0xff] }
 0x4dd   : >> { %7995 = vmatprep.mubr.msk.bf16.mxu1 %vm15827_vm13, %v4975_v17  ;;  %v4958_v22 = vsel %vm15856_vm7, %v15725_v14, 0.0  ;;  %vm15859_vm13 = vcmp.lt.s32.totalorder %v15858_v55, 7  ;;  %v4982_v14 = vpack.c.bf16 %v14941_v19, %v4961_v1  ;;  %vm15885_vm7 = vmmov %vm15843_vm0 }
 0x4de   : >> { %v4959_v53 = vsel %vm15859_vm13, %v15857_v4, 0.0  ;;  %vm15886_vm13 = vmmov %vm15843_vm0 }
 0x4df   : >> { %v4981_v17 = vpack.c.bf16 %v4960_v7, %v4959_v53 }
 0x4e1   : >> { %6003 = vmatmul.mubr.bf16.gmra.mrb[148].mxu0 %v5361_v20  ;;  %v4980_v20 = vpack.c.bf16 %v4958_v22, %v4957_v58 }
 0x4e2   : >> { %6010 = vmatprep.mubr.bf16.mxu0 %v5429_v12  ;;  %v15868_v12 = vld [vmem:[#allocation109_spill] sm:$0xff] }
 0x4e3   : >> { %v15869_v9 = vpack.c.bf16 %v15867_v40, %v15868_v12 }
 0x4e4   : >> { %7996 = vmatmul.mubr.msk.bf16.gmra.mrb[136].mxu1 %vm15808_vm3, %v4976_v46  ;;  %vm15874_vm3 = vmmov %vm15843_vm0 }
 0x4e5   : >> { %7999 = vmatprep.mubr.msk.bf16.mxu1 %vm15843_vm0, %v4977_v44 }
 0x4e9   : >> { %6011 = vmatmul.mubr.bf16.gmra.mrb[152].mxu0 %v5365_v31 }
 0x4ea   : >> { %6018 = vmatprep.mubr.bf16.mxu0 %v5433_v30 }
 0x4ec   : >> { %8000 = vmatmul.mubr.msk.bf16.gmra.mrb[140].mxu1 %vm15852_vm10, %v4978_v18  ;;  %vm15882_vm10 = vmmov %vm15843_vm0 }
 0x4ed   : >> { %8003 = vmatprep.mubr.msk.bf16.mxu1 %vm15853_vm5, %v4979_v25  ;;  %vm15883_vm5 = vmmov %vm15843_vm0 }
 0x4f1   : >> { %6019 = vmatmul.mubr.bf16.gmra.mrb[156].mxu0 %v5369_v32 }
 0x4f4   : >> { %8004 = vmatmul.mubr.msk.bf16.gmra.mrb[144].mxu1 %vm15862_vm14, %v4980_v20  ;;  %vm15888_vm14 = vmmov %vm15843_vm0 }
 0x4f5   : >> { %8007 = vmatprep.mubr.msk.bf16.mxu1 %vm15863_vm4, %v4981_v17  ;;  %vm15889_vm4 = vmmov %vm15843_vm0 }
 0x4fc   : >> { %8008 = vmatmul.mubr.msk.bf16.gmra.mrb[148].mxu1 %vm15866_vm6, %v4982_v14  ;;  %vm15891_vm6 = vmmov %vm15843_vm0 }
 0x4fd   : >> { %8011 = vmatprep.mubr.msk.bf16.mxu1 %vm15870_vm9, %v15869_v9  ;;  %vm15892_vm9 = vmmov %vm15843_vm0 }
 0x504   : >> { %8012 = vmatmul.mubr.msk.bf16.gmra.mrb[152].mxu1 %vm15874_vm3, %v15873_v24  ;;  %vm15893_vm3 = vmmov %vm15843_vm0 }
 0x505   : >> { %8015 = vmatprep.mubr.msk.bf16.mxu1 %vm15843_vm0, %v15877_v34 }
 0x50c   : >> { %8016 = vmatmul.mubr.msk.bf16.gmra.mrb[156].mxu1 %vm15880_vm11, %v4986_v54  ;;  %vm15895_vm11 = vmmov %vm15843_vm0 }
 0x521   : >> { %v7767_v38 = vpop.f32.mrb[96].mxu0 }
 0x522   : >> { %v7768_v56 = vpop.f32.mrb[97].mxu0 }
 0x523   : >> { %v7769_v52 = vadd.f32 %v7768_v56, %v7767_v38  ;;  %v7770_v10 = vpop.f32.mrb[98].mxu0 }
 0x524   : >> { %v7771_v46 = vpop.f32.mrb[99].mxu0 }
 0x525   : >> { %v7772_v0 = vadd.f32 %v7771_v46, %v7770_v10 }
 0x526   : >> { %v7655_v15 = vpop.f32.mrb[64].mxu1 }
 0x527   : >> { %v7656_v31 = vpop.f32.mrb[65].mxu1 }
 0x528   : >> { %v7657_v30 = vadd.f32 %v7656_v31, %v7655_v15  ;;  %v7658_v48 = vpop.f32.mrb[66].mxu1 }
 0x529   : >> { %v7659_v59 = vpop.f32.mrb[67].mxu1 }
 0x52a   : >> { %v5740_v19 = vadd.f32 %v7657_v30, %v13280_v11  ;;  %v7660_v21 = vadd.f32 %v7659_v59, %v7658_v48 }
 0x52c   : >> { %v5743_v27 = vadd.f32 %v7660_v21, %v13280_v11  ;;  %v13284_v3 = vadd.f32 %v7769_v52, %v5740_v19 }
 0x52d   : >> { %v7773_v44 = vpop.f32.mrb[100].mxu0 }
 0x52e   : >> { %v7774_v29 = vpop.f32.mrb[101].mxu0  ;;  %v13286_v32 = vadd.f32 %v7772_v0, %v5743_v27 }
 0x52f   : >> { %v7775_v6 = vadd.f32 %v7774_v29, %v7773_v44  ;;  %v7776_v39 = vpop.f32.mrb[102].mxu0  ;;  %v7661_v18 = vpop.f32.mrb[68].mxu1 }
 0x530   : >> { %v7777_v51 = vpop.f32.mrb[103].mxu0  ;;  %v7662_v25 = vpop.f32.mrb[69].mxu1 }
 0x531   : >> { %v7778_v26 = vadd.f32 %v7777_v51, %v7776_v39  ;;  %v7663_v58 = vadd.f32 %v7662_v25, %v7661_v18  ;;  %v7664_v22 = vpop.f32.mrb[70].mxu1 }
 0x532   : >> { %v7665_v55 = vpop.f32.mrb[71].mxu1 }
 0x533   : >> { %v5748_v7 = vadd.f32 %v7663_v58, %v13280_v11  ;;  %v7666_v20 = vadd.f32 %v7665_v55, %v7664_v22 }
 0x535   : >> { %v7779_v35 = vpop.f32.mrb[104].mxu0  ;;  %v5751_v1 = vadd.f32 %v7666_v20, %v13280_v11  ;;  %v13290_v14 = vadd.f32 %v7775_v6, %v5748_v7 }
 0x536   : >> { %v7780_v4 = vpop.f32.mrb[105].mxu0 }
 0x537   : >> { %v7781_v53 = vadd.f32 %v7780_v4, %v7779_v35  ;;  %v7782_v8 = vpop.f32.mrb[106].mxu0  ;;  %v7667_v40 = vpop.f32.mrb[72].mxu1  ;;  %v13292_v12 = vadd.f32 %v7778_v26, %v5751_v1 }
 0x538   : >> { %v7783_v17 = vpop.f32.mrb[107].mxu0  ;;  %v7668_v9 = vpop.f32.mrb[73].mxu1 }
 0x539   : >> { %v7784_v63 = vadd.f32 %v7783_v17, %v7782_v8  ;;  %v7669_v61 = vadd.f32 %v7668_v9, %v7667_v40  ;;  %v7670_v24 = vpop.f32.mrb[74].mxu1 }
 0x53a   : >> { %v7671_v28 = vpop.f32.mrb[75].mxu1 }
 0x53b   : >> { %v5756_v2 = vadd.f32 %v7669_v61, %v13280_v11  ;;  %v7672_v54 = vadd.f32 %v7671_v28, %v7670_v24 }
 0x53d   : >> { %v7785_v13 = vpop.f32.mrb[108].mxu0  ;;  %v5759_v52 = vadd.f32 %v7672_v54, %v13280_v11  ;;  %v13296_v10 = vadd.f32 %v7781_v53, %v5756_v2 }
 0x53e   : >> { %v7786_v45 = vpop.f32.mrb[109].mxu0 }
 0x53f   : >> { %v7787_v34 = vadd.f32 %v7786_v45, %v7785_v13  ;;  %v7788_v60 = vpop.f32.mrb[110].mxu0  ;;  %v7673_v46 = vpop.f32.mrb[76].mxu1  ;;  %v13298_v0 = vadd.f32 %v7784_v63, %v5759_v52 }
 0x540   : >> { %v7789_v38 = vpop.f32.mrb[111].mxu0  ;;  %v7674_v15 = vpop.f32.mrb[77].mxu1 }
 0x541   : >> { %v7790_v56 = vadd.f32 %v7789_v38, %v7788_v60  ;;  %v7675_v44 = vadd.f32 %v7674_v15, %v7673_v46  ;;  %v7676_v30 = vpop.f32.mrb[78].mxu1 }
 0x542   : >> { %v7677_v29 = vpop.f32.mrb[79].mxu1 }
 0x543   : >> { %v5764_v39 = vadd.f32 %v7675_v44, %v13280_v11  ;;  %v7678_v19 = vadd.f32 %v7677_v29, %v7676_v30 }
 0x545   : >> { %v7791_v31 = vpop.f32.mrb[112].mxu0  ;;  %v5767_v26 = vadd.f32 %v7678_v19, %v13280_v11  ;;  %v13302_v27 = vadd.f32 %v7787_v34, %v5764_v39 }
 0x546   : >> { %v7792_v48 = vpop.f32.mrb[113].mxu0 }
 0x547   : >> { %v7793_v59 = vadd.f32 %v7792_v48, %v7791_v31  ;;  %v7794_v6 = vpop.f32.mrb[114].mxu0  ;;  %v7679_v18 = vpop.f32.mrb[80].mxu1  ;;  %v13304_v25 = vadd.f32 %v7790_v56, %v5767_v26 }
 0x548   : >> { %v7795_v21 = vpop.f32.mrb[115].mxu0  ;;  %v7680_v35 = vpop.f32.mrb[81].mxu1 }
 0x549   : >> { %v7796_v51 = vadd.f32 %v7795_v21, %v7794_v6  ;;  %v7681_v22 = vadd.f32 %v7680_v35, %v7679_v18  ;;  %v7682_v4 = vpop.f32.mrb[82].mxu1 }
 0x54a   : >> { %v7683_v53 = vpop.f32.mrb[83].mxu1 }
 0x54b   : >> { %v7684_v20 = vadd.f32 %v7683_v53, %v7682_v4  ;;  %v5772_v4 = vadd.f32 %v7681_v22, %v13280_v11 }
 0x54d   : >> { %v7797_v58 = vpop.f32.mrb[116].mxu0 }
 0x54e   : >> { %v7798_v55 = vpop.f32.mrb[117].mxu0 }
 0x54f   : >> { %v7799_v8 = vadd.f32 %v7798_v55, %v7797_v58  ;;  %v7800_v7 = vpop.f32.mrb[118].mxu0  ;;  %v7685_v1 = vpop.f32.mrb[84].mxu1  ;;  %v5775_v55 = vadd.f32 %v7684_v20, %v13280_v11 }
 0x550   : >> { %v7801_v17 = vpop.f32.mrb[119].mxu0  ;;  %v7686_v40 = vpop.f32.mrb[85].mxu1 }
 0x551   : >> { %v7802_v63 = vadd.f32 %v7801_v17, %v7800_v7  ;;  %v7687_v13 = vadd.f32 %v7686_v40, %v7685_v1  ;;  %v7688_v61 = vpop.f32.mrb[86].mxu1 }
 0x552   : >> { %v7689_v45 = vpop.f32.mrb[87].mxu1 }
 0x553   : >> { %v7690_v60 = vadd.f32 %v7689_v45, %v7688_v61  ;;  %v5780_v53 = vadd.f32 %v7687_v13, %v13280_v11  ;;  %v13314_v45 = vadd.f32 %v7793_v59, %v5772_v4 }
 0x555   : >> { %v7803_v9 = vpop.f32.mrb[120].mxu0  ;;  %v5783_v7 = vadd.f32 %v7690_v60, %v13280_v11  ;;  %v13316_v20 = vadd.f32 %v7799_v8, %v5780_v53  ;;  %v13320_v60 = vadd.f32 %v7796_v51, %v5775_v55 }
 0x556   : >> { %v7804_v24 = vpop.f32.mrb[121].mxu0 }
 0x557   : >> { %v7805_v28 = vadd.f32 %v7804_v24, %v7803_v9  ;;  %v7806_v34 = vpop.f32.mrb[122].mxu0  ;;  %v7691_v38 = vpop.f32.mrb[88].mxu1  ;;  %v13318_v13 = vadd.f32 %v7802_v63, %v5783_v7 }
 0x558   : >> { %v7807_v2 = vpop.f32.mrb[123].mxu0  ;;  %v7692_v56 = vpop.f32.mrb[89].mxu1 }
 0x559   : >> { %v7808_v54 = vadd.f32 %v7807_v2, %v7806_v34  ;;  %v7693_v46 = vadd.f32 %v7692_v56, %v7691_v38  ;;  %v7694_v15 = vpop.f32.mrb[90].mxu1 }
 0x55a   : >> { %v7695_v44 = vpop.f32.mrb[91].mxu1 }
 0x55b   : >> { %v7696_v29 = vadd.f32 %v7695_v44, %v7694_v15  ;;  %v5788_v1 = vadd.f32 %v7693_v46, %v13280_v11 }
 0x55d   : >> { %v7809_v52 = vpop.f32.mrb[124].mxu0  ;;  %v5791_v61 = vadd.f32 %v7696_v29, %v13280_v11 }
 0x55e   : >> { %v7810_v31 = vpop.f32.mrb[125].mxu0 }
 0x55f   : >> { %v7811_v30 = vadd.f32 %v7810_v31, %v7809_v52  ;;  %v7812_v48 = vpop.f32.mrb[126].mxu0  ;;  %v7697_v19 = vpop.f32.mrb[92].mxu1  ;;  %v13324_v52 = vadd.f32 %v7805_v28, %v5788_v1  ;;  %v13328_v15 = vadd.f32 %v7808_v54, %v5791_v61 }
 0x560   : >> { %v7813_v6 = vpop.f32.mrb[127].mxu0  ;;  %v7698_v21 = vpop.f32.mrb[93].mxu1 }
 0x561   : >> { %v7814_v39 = vadd.f32 %v7813_v6, %v7812_v48  ;;  %v7699_v26 = vadd.f32 %v7698_v21, %v7697_v19  ;;  %v7700_v18 = vpop.f32.mrb[94].mxu1 }
 0x562   : >> { %v7701_v35 = vpop.f32.mrb[95].mxu1 }
 0x563   : >> { %v7702_v58 = vadd.f32 %v7701_v35, %v7700_v18  ;;  %v5796_v17 = vadd.f32 %v7699_v26, %v13280_v11 }
 0x565   : >> { %v5799_v40 = vadd.f32 %v7702_v58, %v13280_v11  ;;  %v13322_v38 = vadd.f32 %v7811_v30, %v5796_v17 }
 0x567   : >> { %v7703_v9 = vpop.f32.mrb[96].mxu1  ;;  %v13326_v46 = vadd.f32 %v7814_v39, %v5799_v40 }
 0x568   : >> { %v7704_v24 = vpop.f32.mrb[97].mxu1 }
 0x569   : >> { %v7705_v34 = vadd.f32 %v7704_v24, %v7703_v9  ;;  %v7706_v22 = vpop.f32.mrb[98].mxu1 }
 0x56a   : >> { %v7707_v2 = vpop.f32.mrb[99].mxu1 }
 0x56b   : >> { %v7708_v56 = vadd.f32 %v7707_v2, %v7706_v22  ;;  %v5804_v7 = vadd.f32 %v7705_v34, %v13280_v11 }
 0x56d   : >> { %v5807_v22 = vadd.f32 %v7708_v56, %v13280_v11 }
 0x56f   : >> { %v7709_v59 = vpop.f32.mrb[100].mxu1 }
 0x570   : >> { %v7710_v31 = vpop.f32.mrb[101].mxu1 }
 0x571   : >> { %v7711_v44 = vadd.f32 %v7710_v31, %v7709_v59  ;;  %v7712_v48 = vpop.f32.mrb[102].mxu1 }
 0x572   : >> { %v7713_v29 = vpop.f32.mrb[103].mxu1 }
 0x573   : >> { %v7714_v8 = vadd.f32 %v7713_v29, %v7712_v48 }
 0x577   : >> { %v7715_v6 = vpop.f32.mrb[104].mxu1 }
 0x578   : >> { %v7716_v63 = vpop.f32.mrb[105].mxu1 }
 0x579   : >> { %v7717_v19 = vadd.f32 %v7716_v63, %v7715_v6  ;;  %v7718_v51 = vpop.f32.mrb[106].mxu1 }
 0x57a   : >> { %v7719_v21 = vpop.f32.mrb[107].mxu1 }
 0x57b   : >> { %v7720_v30 = vadd.f32 %v7719_v21, %v7718_v51  ;;  %v5812_v51 = vadd.f32 %v7711_v44, %v13280_v11 }
 0x57f   : >> { %v7721_v26 = vpop.f32.mrb[108].mxu1 }
 0x580   : >> { %v7722_v18 = vpop.f32.mrb[109].mxu1 }
 0x581   : >> { %v7723_v28 = vadd.f32 %v7722_v18, %v7721_v26  ;;  %v7724_v35 = vpop.f32.mrb[110].mxu1 }
 0x582   : >> { %v7725_v39 = vpop.f32.mrb[111].mxu1 }
 0x583   : >> { %v7726_v58 = vadd.f32 %v7725_v39, %v7724_v35 }
 0x587   : >> { %v7727_v54 = vpop.f32.mrb[112].mxu1 }
 0x588   : >> { %v7728_v55 = vpop.f32.mrb[113].mxu1 }
 0x589   : >> { %v13331_v17 = vadd.f32 %v7728_v55, %v7727_v54  ;;  %v7730_v40 = vpop.f32.mrb[114].mxu1  ;;  %v5815_v54 = vadd.f32 %v7714_v8, %v13280_v11 }
 0x58a   : >> { %v7731_v61 = vpop.f32.mrb[115].mxu1 }
 0x58b   : >> { %v13334_v2 = vadd.f32 %v7731_v61, %v7730_v40  ;;  %v5820_v61 = vadd.f32 %v7717_v19, %v13280_v11 }
 0x58c   : >> { %v7815_v4 = vpop.f32.mrb[128].mxu0 }
 0x58d   : >> { %v7816_v53 = vpop.f32.mrb[129].mxu0 }
 0x58e   : >> { %v7817_v1 = vadd.f32 %v7816_v53, %v7815_v4  ;;  %v7818_v9 = vpop.f32.mrb[130].mxu0 }
 0x58f   : >> { %v7819_v24 = vpop.f32.mrb[131].mxu0  ;;  %v7733_v29 = vpop.f32.mrb[116].mxu1 }
 0x590   : >> { %v7820_v59 = vadd.f32 %v7819_v24, %v7818_v9  ;;  %v13336_v31 = vadd.f32 %v7817_v1, %v5804_v7  ;;  %v7734_v63 = vpop.f32.mrb[117].mxu1 }
 0x591   : >> { %v13341_v21 = vadd.f32 %v7734_v63, %v7733_v29  ;;  %v7736_v18 = vpop.f32.mrb[118].mxu1  ;;  %v5823_v63 = vadd.f32 %v7720_v30, %v13280_v11 }
 0x592   : >> { %v13338_v48 = vadd.f32 %v7820_v59, %v5807_v22  ;;  %v7737_v39 = vpop.f32.mrb[119].mxu1 }
 0x593   : >> { %v13344_v4 = vadd.f32 %v7737_v39, %v7736_v18 }
 0x594   : >> { %v7821_v6 = vpop.f32.mrb[132].mxu0 }
 0x595   : >> { %v7822_v34 = vpop.f32.mrb[133].mxu0 }
 0x596   : >> { %v7823_v26 = vadd.f32 %v7822_v34, %v7821_v6  ;;  %v7824_v35 = vpop.f32.mrb[134].mxu0 }
 0x597   : >> { %v7825_v56 = vpop.f32.mrb[135].mxu0  ;;  %v7739_v1 = vpop.f32.mrb[120].mxu1 }
 0x598   : >> { %v7826_v55 = vadd.f32 %v7825_v56, %v7824_v35  ;;  %v13346_v53 = vadd.f32 %v7823_v26, %v5812_v51  ;;  %v7740_v9 = vpop.f32.mrb[121].mxu1 }
 0x599   : >> { %v13351_v24 = vadd.f32 %v7740_v9, %v7739_v1  ;;  %v7742_v59 = vpop.f32.mrb[122].mxu1 }
 0x59a   : >> { %v13348_v7 = vadd.f32 %v7826_v55, %v5815_v54  ;;  %v7743_v6 = vpop.f32.mrb[123].mxu1  ;;  %v5828_v54 = vadd.f32 %v7723_v28, %v13280_v11 }
 0x59b   : >> { %v13354_v34 = vadd.f32 %v7743_v6, %v7742_v59  ;;  %v5831_v59 = vadd.f32 %v7726_v58, %v13280_v11 }
 0x59c   : >> { %v7827_v40 = vpop.f32.mrb[136].mxu0 }
 0x59d   : >> { %v7828_v44 = vpop.f32.mrb[137].mxu0 }
 0x59e   : >> { %v7829_v22 = vadd.f32 %v7828_v44, %v7827_v40  ;;  %v7830_v29 = vpop.f32.mrb[138].mxu0 }
 0x59f   : >> { %v7831_v8 = vpop.f32.mrb[139].mxu0  ;;  %v7745_v35 = vpop.f32.mrb[124].mxu1 }
 0x5a0   : >> { %v7832_v51 = vadd.f32 %v7831_v8, %v7830_v29  ;;  %v13356_v26 = vadd.f32 %v7829_v22, %v5820_v61  ;;  %v7746_v56 = vpop.f32.mrb[125].mxu1 }
 0x5a1   : >> { %v13361_v55 = vadd.f32 %v7746_v56, %v7745_v35  ;;  %v7748_v40 = vpop.f32.mrb[126].mxu1 }
 0x5a2   : >> { %v13358_v18 = vadd.f32 %v7832_v51, %v5823_v63  ;;  %v7749_v44 = vpop.f32.mrb[127].mxu1 }
 0x5a3   : >> { %v13364_v29 = vadd.f32 %v7749_v44, %v7748_v40  ;;  %v5836_v40 = vadd.f32 %v13331_v17, %v13280_v11 }
 0x5a4   : >> { %v7833_v39 = vpop.f32.mrb[140].mxu0 }
 0x5a5   : >> { %v7834_v19 = vpop.f32.mrb[141].mxu0 }
 0x5a6   : >> { %v7835_v1 = vadd.f32 %v7834_v19, %v7833_v39  ;;  %v7836_v9 = vpop.f32.mrb[142].mxu0 }
 0x5a7   : >> { %v7837_v30 = vpop.f32.mrb[143].mxu0  ;;  %v7989_v63 = vpop.f32.mrb[128].mxu1 }
 0x5a8   : >> { %v7838_v61 = vadd.f32 %v7837_v30, %v7836_v9  ;;  %v13366_v22 = vadd.f32 %v7835_v1, %v5828_v54  ;;  %v13371_v28 = vadd.f32 %v7989_v63, %v13290_v14  ;;  %v6061_v35 = vpop.f32.mrb[129].mxu1  ;;  %v5839_v14 = vadd.f32 %v13334_v2, %v13280_v11 }
 0x5a9   : >> { %v13374_v56 = vadd.f32 %v6061_v35, %v13284_v3  ;;  %v7990_v58 = vpop.f32.mrb[130].mxu1 }
 0x5aa   : >> { %v13368_v6 = vadd.f32 %v7838_v61, %v5831_v59  ;;  %v13379_v54 = vadd.f32 %v7990_v58, %v13292_v12  ;;  %v6064_v9 = vpop.f32.mrb[131].mxu1  ;;  %v6274_v59 = vmul.f32 %v13371_v28, %v13371_v28 }
 0x5ab   : >> { %v6272_v44 = vmul.f32 %v13374_v56, %v13374_v56  ;;  %v13386_v3 = vadd.f32 %v6064_v9, %v13286_v32  ;;  %v6188_v12 = vsel %vm15881_vm2, %v13374_v56, 0.0  ;;  %vm15896_vm2 = vmmov %vm15843_vm0 }
 0x5ac   : >> { %v7839_v8 = vpop.f32.mrb[144].mxu0  ;;  %v6275_v32 = vmul.f32 %v13379_v54, %v13379_v54  ;;  %v6307_v5 = vsel %vm15886_vm13, %v6274_v59, 0.0  ;;  %vm15901_vm13 = vmmov %vm15843_vm0 }
 0x5ad   : >> { %v7840_v51 = vpop.f32.mrb[145].mxu0  ;;  %v6189_v17 = vsel %vm15882_vm10, %v13386_v3, 0.0  ;;  %v6273_v2 = vmul.f32 %v13386_v3, %v13386_v3  ;;  %v6304_v35 = vsel %vm15884_vm8, %v6272_v44, 0.0  ;;  %vm15897_vm10 = vmmov %vm15843_vm0 }
 0x5ae   : >> { %v7841_v39 = vadd.f32 %v7840_v51, %v7839_v8  ;;  %v7842_v19 = vpop.f32.mrb[146].mxu0  ;;  %v6190_v63 = vadd.f32 %v6189_v17, %v6188_v12  ;;  %v6191_v51 = vsel %vm15883_vm5, %v13371_v28, 0.0  ;;  %v6193_v12 = vsel %vm15887_vm12, %v13379_v54, 0.0  ;;  %vm15898_vm5 = vmmov %vm15843_vm0 }
 0x5af   : >> { %v7843_v1 = vpop.f32.mrb[147].mxu0  ;;  %v7993_v58 = vpop.f32.mrb[132].mxu1  ;;  %vm15899_vm8 = vmmov %vm15843_vm0 }
 0x5b0   : >> { %v7844_v30 = vadd.f32 %v7843_v1, %v7842_v19  ;;  %v13390_v61 = vadd.f32 %v7841_v39, %v5836_v40  ;;  %v6305_v39 = vsel %vm15885_vm7, %v6273_v2, 0.0  ;;  %v6192_v40 = vadd.f32 %v6191_v51, %v6190_v63  ;;  %vm15900_vm7 = vmmov %vm15843_vm0 }
 0x5b1   : >> { %v6306_v1 = vadd.f32 %v6305_v39, %v6304_v35  ;;  %v13407_v9 = vadd.f32 %v7993_v58, %v13302_v27  ;;  %v5844_v63 = vadd.f32 %v13341_v21, %v13280_v11  ;;  %v6309_v51 = vsel %vm15888_vm14, %v6275_v32, 0.0  ;;  %vm15902_vm12 = vmmov %vm15843_vm0 }
 0x5b2   : >> { %v13398_v8 = vadd.f32 %v7844_v30, %v5839_v14  ;;  %v6077_v30 = vpop.f32.mrb[133].mxu1  ;;  %v6194_v35 = vadd.f32 %v6193_v12, %v6192_v40  ;;  %vm15903_vm14 = vmmov %vm15843_vm0 }
 0x5b3   : >> { %v13413_v16 = vadd.f32 %v6077_v30, %v13296_v10  ;;  %v7994_v2 = vpop.f32.mrb[134].mxu1  ;;  %v6308_v27 = vadd.f32 %v6307_v5, %v6306_v1  ;;  %v5847_v30 = vadd.f32 %v13344_v4, %v13280_v11  ;;  %v6278_v32 = vmul.f32 %v13407_v9, %v13407_v9 }
 0x5b4   : >> { %v7845_v19 = vpop.f32.mrb[148].mxu0  ;;  %v6080_v58 = vpop.f32.mrb[135].mxu1  ;;  %v13423_v10 = vadd.f32 %v7994_v2, %v13304_v25 }
 0x5b5   : >> { %v7846_v14 = vpop.f32.mrb[149].mxu0  ;;  %v6195_v59 = vsel %vm15889_vm4, %v13413_v16, 0.0  ;;  %v6310_v23 = vadd.f32 %v6309_v51, %v6308_v27  ;;  %v13428_v5 = vadd.f32 %v6080_v58, %v13298_v0  ;;  %v6199_v27 = vsel %vm15892_vm9, %v13407_v9, 0.0  ;;  %vm15904_vm4 = vmmov %vm15843_vm0 }
 0x5b6   : >> { %v7847_v17 = vadd.f32 %v7846_v14, %v7845_v19  ;;  %v7848_v44 = vpop.f32.mrb[150].mxu0  ;;  %v6276_v19 = vmul.f32 %v13413_v16, %v13413_v16  ;;  %v6196_v21 = vadd.f32 %v6195_v59, %v6194_v35  ;;  %v6279_v35 = vmul.f32 %v13423_v10, %v13423_v10  ;;  %vm15907_vm9 = vmmov %vm15843_vm0 }
 0x5b7   : >> { %v7849_v39 = vpop.f32.mrb[151].mxu0  ;;  %v6197_v25 = vsel %vm15891_vm6, %v13428_v5, 0.0  ;;  %v7997_v0 = vpop.f32.mrb[136].mxu1  ;;  %vm15906_vm6 = vmmov %vm15843_vm0 }
 0x5b8   : >> { %v7850_v14 = vadd.f32 %v7849_v39, %v7848_v44  ;;  %v6311_v40 = vsel %vm15890_vm15, %v6276_v19, 0.0  ;;  %v13433_v1 = vadd.f32 %v7847_v17, %v5844_v63  ;;  %v6277_v44 = vmul.f32 %v13428_v5, %v13428_v5  ;;  %v6093_v39 = vpop.f32.mrb[137].mxu1  ;;  %vm15905_vm15 = vmmov %vm15843_vm0 }
 0x5b9   : >> { %v6312_v12 = vadd.f32 %v6311_v40, %v6310_v23  ;;  %v6198_v2 = vadd.f32 %v6197_v25, %v6196_v21  ;;  %v13447_v23 = vadd.f32 %v7997_v0, %v13316_v20  ;;  %v7998_v21 = vpop.f32.mrb[138].mxu1  ;;  %v5852_v40 = vadd.f32 %v13351_v24, %v13280_v11 }
 0x5ba   : >> { %v13439_v4 = vadd.f32 %v7850_v14, %v5847_v30  ;;  %v6313_v17 = vsel %vm15893_vm3, %v6277_v44, 0.0  ;;  %v13450_v14 = vadd.f32 %v6093_v39, %v13314_v45  ;;  %v6315_v25 = vsel %vm15843_vm0, %v6278_v32, 0.0  ;;  %vm15908_vm3 = vmmov %vm15843_vm0 }
 0x5bb   : >> { %v6200_v58 = vadd.f32 %v6199_v27, %v6198_v2  ;;  %v6314_v59 = vadd.f32 %v6313_v17, %v6312_v12  ;;  %v6201_v44 = vsel %vm15894_vm1, %v13423_v10, 0.0  ;;  %v13458_v20 = vadd.f32 %v7998_v21, %v13318_v13  ;;  %v6096_v2 = vpop.f32.mrb[139].mxu1  ;;  %vm15909_vm1 = vmmov %vm15843_vm0 }
 0x5bc   : >> { %v7851_v51 = vpop.f32.mrb[152].mxu0  ;;  %v5855_v12 = vadd.f32 %v13354_v34, %v13280_v11  ;;  %v13464_v45 = vadd.f32 %v13361_v55, %v13280_v11  ;;  %v6317_v24 = vsel %vm15895_vm11, %v6279_v35, 0.0  ;;  %v6282_v32 = vmul.f32 %v13447_v23, %v13447_v23  ;;  %vm15910_vm11 = vmmov %vm15843_vm0 }
 0x5bd   : >> { %v7852_v63 = vpop.f32.mrb[153].mxu0  ;;  %v6316_v27 = vadd.f32 %v6315_v25, %v6314_v59  ;;  %v6280_v13 = vmul.f32 %v13450_v14, %v13450_v14  ;;  %v6212_v34 = vsel %vm15896_vm2, %v13447_v23, 0.0  ;;  %v13474_v21 = vadd.f32 %v6096_v2, %v13320_v60  ;;  %vm15911_vm2 = vmmov %vm15843_vm0 }
 0x5be   : >> { %v7853_v19 = vadd.f32 %v7852_v63, %v7851_v51  ;;  %v7854_v30 = vpop.f32.mrb[154].mxu0  ;;  %v6202_v51 = vadd.f32 %v6201_v44, %v6200_v58  ;;  %v6209_v55 = vsel %vm15897_vm10, %v13450_v14, 0.0  ;;  %v6283_v35 = vmul.f32 %v13458_v20, %v13458_v20  ;;  %vm15913_vm10 = vmmov %vm15843_vm0 }
 0x5bf   : >> { %v7855_v0 = vpop.f32.mrb[155].mxu0  ;;  %v6318_v39 = vadd.f32 %v6317_v24, %v6316_v27  ;;  %v6210_v44 = vsel %vm15898_vm5, %v13474_v21, 0.0  ;;  %v8001_v2 = vpop.f32.mrb[140].mxu1  ;;  %v6328_v27 = vsel %vm15899_vm8, %v6282_v32, 0.0  ;;  %v6325_v24 = vsel %vm15900_vm7, %v6280_v13, 0.0  ;;  %vm15914_vm5 = vmmov %vm15843_vm0 }
 0x5c0   : >> { %v7856_v17 = vadd.f32 %v7855_v0, %v7854_v30  ;;  %v6203_v63 = vrot.slane %v6202_v51, 4  ;;  %v13480_v58 = vadd.f32 %v7853_v19, %v5852_v40  ;;  %v6281_v0 = vmul.f32 %v13474_v21, %v13474_v21  ;;  %vm15915_vm8 = vmmov %vm15843_vm0 }
 0x5c1   : >> { %v6319_v30 = vrot.slane %v6318_v39, 4  ;;  %v6211_v33 = vadd.f32 %v6210_v44, %v6209_v55  ;;  %v13491_v19 = vadd.f32 %v8001_v2, %v13322_v38  ;;  %v6214_v42 = vsel %vm15902_vm12, %v13458_v20, 0.0  ;;  %vm15916_vm7 = vmmov %vm15843_vm0 }
 0x5c2   : >> { %v13482_v59 = vadd.f32 %v7856_v17, %v5855_v12  ;;  %v6204_v25 = vadd.f32 %v6203_v63, %v6202_v51  ;;  %v6109_v12 = vpop.f32.mrb[141].mxu1  ;;  %v6326_v63 = vsel %vm15901_vm13, %v6281_v0, 0.0  ;;  %v6330_v32 = vsel %vm15903_vm14, %v6283_v35, 0.0  ;;  %vm15917_vm13 = vmmov %vm15843_vm0 }
 0x5c3   : >> { %v6320_v17 = vadd.f32 %v6319_v30, %v6318_v39  ;;  %v8002_v41 = vpop.f32.mrb[142].mxu1  ;;  %v6213_v43 = vadd.f32 %v6212_v34, %v6211_v33  ;;  %v6327_v13 = vadd.f32 %v6326_v63, %v6325_v24  ;;  %v13498_v47 = vadd.f32 %v6109_v12, %v13324_v52  ;;  %vm15918_vm12 = vmmov %vm15843_vm0 }
 0x5c4   : >> { %v7857_v60 = vpop.f32.mrb[156].mxu0  ;;  %v6205_v51 = vrot.slane %v6204_v25, 2  ;;  %v6112_v44 = vpop.f32.mrb[143].mxu1  ;;  %v13501_v39 = vadd.f32 %v8002_v41, %v13326_v46  ;;  %v6286_v0 = vmul.f32 %v13491_v19, %v13491_v19  ;;  %v5863_v52 = vadd.f32 %v13364_v29, %v13280_v11  ;;  %vm15919_vm14 = vmmov %vm15843_vm0 }
 0x5c5   : >> { %v7858_v40 = vpop.f32.mrb[157].mxu0  ;;  %v6321_v2 = vrot.slane %v6320_v17, 2  ;;  %v6329_v30 = vadd.f32 %v6328_v27, %v6327_v13  ;;  %v6216_v33 = vsel %vm15904_vm4, %v13498_v47, 0.0  ;;  %v6284_v34 = vmul.f32 %v13498_v47, %v13498_v47  ;;  %vm15921_vm4 = vmmov %vm15843_vm0 }
 0x5c6   : >> { %v7859_v36 = vadd.f32 %v7858_v40, %v7857_v60  ;;  %v7860_v37 = vpop.f32.mrb[158].mxu0  ;;  %v6206_v38 = vadd.f32 %v6205_v51, %v6204_v25  ;;  %v6215_v60 = vadd.f32 %v6214_v42, %v6213_v43  ;;  %v6220_v41 = vsel %vm15905_vm15, %v13491_v19, 0.0  ;;  %vm15922_vm15 = vmmov %vm15843_vm0 }
 0x5c7   : >> { %v7861_v55 = vpop.f32.mrb[159].mxu0  ;;  %v6322_v35 = vadd.f32 %v6321_v2, %v6320_v17  ;;  %v6331_v25 = vadd.f32 %v6330_v32, %v6329_v30  ;;  %v6332_v43 = vsel %vm15906_vm6, %v6284_v34, 0.0  ;;  %v8005_v42 = vpop.f32.mrb[144].mxu1  ;;  %v6336_v12 = vsel %vm15907_vm9, %v6286_v0, 0.0  ;;  %vm15923_vm6 = vmmov %vm15843_vm0 }
 0x5c8   : >> { %v7862_v40 = vadd.f32 %v7861_v55, %v7860_v37  ;;  %v6207_v49 = vrot.slane %v6206_v38, 1  ;;  %v6217_v46 = vadd.f32 %v6216_v33, %v6215_v60  ;;  %v13515_v37 = vadd.f32 %v6112_v44, %v13328_v15  ;;  %v6125_v11 = vpop.f32.mrb[145].mxu1  ;;  %vm15924_vm9 = vmmov %vm15843_vm0 }
 0x5c9   : >> { %v6323_v24 = vrot.slane %v6322_v35, 1  ;;  %v6333_v51 = vadd.f32 %v6332_v43, %v6331_v25  ;;  %v13519_v17 = vadd.f32 %v8005_v42, %v13346_v53  ;;  %v13522_v29 = vadd.f32 %v7859_v36, %v13464_v45  ;;  %v8006_v13 = vpop.f32.mrb[146].mxu1 }
 0x5ca   : >> { %v6208_v27 = vadd.f32 %v6207_v49, %v6206_v38  ;;  %v6287_v49 = vmul.f32 %v13501_v39, %v13501_v39  ;;  %v6218_v15 = vsel %vm15908_vm3, %v13515_v37, 0.0  ;;  %v6285_v44 = vmul.f32 %v13515_v37, %v13515_v37  ;;  %v6128_v45 = vpop.f32.mrb[147].mxu1  ;;  %vm15925_vm3 = vmmov %vm15843_vm0 }
 0x5cb   : >> { %v6324_v63 = vadd.f32 %v6323_v24, %v6322_v35  ;;  %v6219_v55 = vadd.f32 %v6218_v15, %v6217_v46  ;;  %v6290_v53 = vmul.f32 %v13519_v17, %v13519_v17  ;;  %v13535_v36 = vadd.f32 %v6125_v11, %v13336_v31 }
 0x5cc   : >> { %v13524_v32 = vmul.f32 0.015625, %v6208_v27  ;;  %v6222_v24 = vsel %vm15843_vm0, %v13501_v39, 0.0  ;;  %v6338_v43 = vsel %vm15909_vm1, %v6287_v49, 0.0  ;;  %v6334_v42 = vsel %vm15910_vm11, %v6285_v44, 0.0  ;;  %vm15926_vm1 = vmmov %vm15843_vm0 }
 0x5cd   : >> { %v6392_v38 = vmul.f32 0.015625, %v6324_v63  ;;  %v6221_v27 = vadd.f32 %v6220_v41, %v6219_v55  ;;  %v6288_v11 = vmul.f32 %v13535_v36, %v13535_v36  ;;  %v6233_v41 = vsel %vm15911_vm2, %v13519_v17, 0.0 }
 0x5ce   : >> { %v6396_v2 = vmul.f32 %v13524_v32, %v13524_v32  ;;  %v6408_v30 = vsub.f32 %v13374_v56, %v13524_v32  ;;  %v13567_v55 = vadd.f32 %v6128_v45, %v13338_v48  ;;  %v13572_v25 = vadd.f32 %v7862_v40, %v5863_v52 }
 0x5cf   : >> { %v6223_v15 = vadd.f32 %v6222_v24, %v6221_v27  ;;  %v8009_v46 = vpop.f32.mrb[148].mxu1  ;;  %v6346_v24 = vsel %vm15915_vm8, %v6288_v11, 0.0  ;;  %v15931_v56 = vsub.f32 %v13428_v5, %v13524_v32 }
 0x5d0   : >> { %v6400_v34 = vsub.f32 %v6392_v38, %v6396_v2  ;;  %v6335_v38 = vadd.f32 %v6334_v42, %v6333_v51  ;;  %v13562_v2 = vadd.f32 %v8006_v13, %v13348_v7  ;;  %v13570_v49 = vadd.f32 %v8009_v46, %v13366_v22  ;;  %v6141_v44 = vpop.f32.mrb[149].mxu1 }
 0x5d1   : >> { %v6349_v51 = vsel %vm15913_vm10, %v6290_v53, 0.0  ;;  %v8010_v7 = vpop.f32.mrb[150].mxu1  ;;  %v6230_v13 = vsel %vm15914_vm5, %v13535_v36, 0.0  ;;  %v6231_v48 = vsel %vm15916_vm7, %v13567_v55, 0.0  ;;  %v6289_v22 = vmul.f32 %v13567_v55, %v13567_v55 }
 0x5d2   : >> { %v6404_v63 = vmax.f32 %v6400_v34, 0.0  ;;  %15912 = vst [vmem:[#allocation88_spill] sm:$0xff] %v13570_v49  ;;  %v6224_v34 = vrot.slane %v6223_v15, 4  ;;  %v6337_v27 = vadd.f32 %v6336_v12, %v6335_v38  ;;  %v6144_v45 = vpop.f32.mrb[151].mxu1  ;;  %v6232_v46 = vadd.f32 %v6231_v48, %v6230_v13 }
 0x5d3   : >> { %v6235_v12 = vsel %vm15917_vm13, %v13562_v2, 0.0  ;;  %v6291_v53 = vmul.f32 %v13562_v2, %v13562_v2  ;;  %v6347_v42 = vsel %vm15918_vm12, %v6289_v22, 0.0  ;;  %v13588_v11 = vadd.f32 %v6141_v44, %v13356_v26 }
 0x5d4   : >> { %v6440_v33 = vadd.f32 1e-05, %v6404_v63  ;;  %v6225_v40 = vadd.f32 %v6224_v34, %v6223_v15  ;;  %v6339_v52 = vadd.f32 %v6338_v43, %v6337_v27  ;;  %v6234_v31 = vadd.f32 %v6233_v41, %v6232_v46 }
 0x5d5   : >> { %v6348_v35 = vadd.f32 %v6347_v42, %v6346_v24  ;;  %v6237_v43 = vsel %vm15919_vm14, %v13588_v11, 0.0  ;;  %v6292_v15 = vmul.f32 %v13588_v11, %v13588_v11  ;;  %v13597_v34 = vadd.f32 %v8010_v7, %v13368_v6  ;;  %vm15951_vm14 = vmmov %vm15843_vm0 }
 0x5d6   : >> { %8468 = vrsqrt.f32 %v6440_v33  ;;  %v6226_v63 = vrot.slane %v6225_v40, 2  ;;  %v6340_v38 = vrot.slane %v6339_v52, 4  ;;  %v6294_v33 = vmul.f32 %v13570_v49, %v13570_v49 }
 0x5d7   : >> { %15920 = vst [vmem:[#allocation103_spill] sm:$0xff] %v13597_v34  ;;  %v6350_v26 = vadd.f32 %v6349_v51, %v6348_v35  ;;  %v6236_v44 = vadd.f32 %v6235_v12, %v6234_v31  ;;  %v8013_v48 = vpop.f32.mrb[152].mxu1  ;;  %v6351_v41 = vsel %vm15921_vm4, %v6291_v53, 0.0  ;;  %v6241_v24 = vsel %vm15922_vm15, %v13570_v49, 0.0  ;;  %vm15952_vm4 = vmmov %vm15843_vm0 }
 0x5d8   : >> { %v6227_v27 = vadd.f32 %v6226_v63, %v6225_v40  ;;  %v6341_v13 = vadd.f32 %v6340_v38, %v6339_v52  ;;  %v6353_v22 = vsel %vm15923_vm6, %v6292_v15, 0.0  ;;  %v13604_v46 = vadd.f32 %v6144_v45, %v13358_v18  ;;  %v6157_v42 = vpop.f32.mrb[153].mxu1  ;;  %vm15953_vm15 = vmmov %vm15843_vm0 }
 0x5d9   : >> { %v6238_v6 = vadd.f32 %v6237_v43, %v6236_v44  ;;  %v6352_v7 = vadd.f32 %v6351_v41, %v6350_v26  ;;  %v13606_v40 = vpop.f32.mrb[154].mxu1  ;;  %v13609_v35 = vsel %vm15924_vm9, %v6294_v33, 0.0  ;;  %v13616_v52 = vadd.f32 %v8013_v48, %v13433_v1  ;;  %vm15954_vm6 = vmmov %vm15843_vm0 }
 0x5da   : >> { %v6228_v60 = vrot.slane %v6227_v27, 1  ;;  %v6342_v0 = vrot.slane %v6341_v13, 2  ;;  %v6239_v31 = vsel %vm15925_vm3, %v13604_v46, 0.0  ;;  %v6293_v51 = vmul.f32 %v13604_v46, %v13604_v46  ;;  %v13618_v18 = vpop.f32.mrb[155].mxu1  ;;  %vm15955_vm9 = vmmov %vm15843_vm0 }
 0x5db   : >> { %v6354_v53 = vadd.f32 %v6353_v22, %v6352_v7  ;;  %v6240_v63 = vadd.f32 %v6239_v31, %v6238_v6  ;;  %v13622_v38 = vsel %vm15843_vm0, %v13597_v34, 0.0  ;;  %v13626_v33 = vmul.f32 %v13597_v34, %v13597_v34  ;;  %vm15956_vm3 = vmmov %vm15843_vm0 }
 0x5dc   : >> { %v6229_v45 = vadd.f32 %v6228_v60, %v6227_v27  ;;  %v6343_v12 = vadd.f32 %v6342_v0, %v6341_v13  ;;  %v6355_v43 = vsel %vm15926_vm1, %v6293_v51, 0.0  ;;  %v13630_v15 = vadd.f32 %v6157_v42, %v13390_v61  ;;  %vm15957_vm1 = vmmov %vm15843_vm0 }
 0x5dd   : >> { %v13634_v0 = vadd.f32 %v6241_v24, %v6240_v63  ;;  %v13636_v60 = vadd.f32 %v6355_v43, %v6354_v53  ;;  %v15927_v13 = vsub.f32 %v13386_v3, %v13524_v32  ;;  %v15928_v61 = vsub.f32 %v13371_v28, %v13524_v32 }
 0x5de   : >> { %v6344_v26 = vrot.slane %v6343_v12, 1  ;;  %v13632_v44 = vmul.f32 0.015625, %v6229_v45  ;;  %v15929_v22 = vsub.f32 %v13379_v54, %v13524_v32  ;;  %v15930_v24 = vsub.f32 %v13413_v16, %v13524_v32  ;;  %v15934_v54 = vld [vmem:[#allocation39_spill] sm:$0xff] }
 0x5df   : >> { %v15932_v3 = vsub.f32 %v13407_v9, %v13524_v32  ;;  %v15933_v28 = vsub.f32 %v13423_v10, %v13524_v32  ;;  %v13662_v51 = vpop.f32.mrb[156].mxu1  ;;  %v15935_v45 = vmov %v15934_v54 }
 0x5e0   : >> { %v8469_v1 = vpop.eup %8468  ;;  %v6173_v5 = vpop.f32.mrb[157].mxu1 }
 0x5e1   : >> { %v6448_v27 = vmul.f32 %v8469_v1, %v6408_v30  ;;  %v6449_v48 = vmul.f32 %v8469_v1, %v15927_v13  ;;  %v6450_v41 = vmul.f32 %v8469_v1, %v15928_v61  ;;  %v6451_v42 = vmul.f32 %v8469_v1, %v15929_v22  ;;  %v13672_v32 = vpop.f32.mrb[158].mxu1 }
 0x5e2   : >> { %v6452_v6 = vmul.f32 %v8469_v1, %v15930_v24  ;;  %v6453_v30 = vmul.f32 %v8469_v1, %v15931_v56  ;;  %v6454_v7 = vmul.f32 %v8469_v1, %v15932_v3  ;;  %v6455_v31 = vmul.f32 %v8469_v1, %v15933_v28  ;;  %v15936_v1 = vld [vmem:[#allocation73_spill] sm:$0xff] }
 0x5e3   : >> { %v6480_v53 = vmul.f32 %v15934_v54, %v6448_v27  ;;  %v6481_v63 = vmul.f32 %v15935_v45, %v6449_v48  ;;  %v6482_v16 = vmul.f32 %v15935_v45, %v6450_v41  ;;  %v6483_v43 = vmul.f32 %v15935_v45, %v6451_v42  ;;  %v15937_v27 = vld [vmem:[#allocation72_spill] sm:$0xff]  ;;  %v15938_v48 = vld [vmem:[#allocation71_spill] sm:$0xff]  ;;  %v15939_v41 = vld [vmem:[#allocation70_spill] sm:$0xff]  ;;  %v13678_v42 = vpop.f32.mrb[159].mxu1 }
 0x5e4   : >> { %v6484_v13 = vmul.f32 %v15935_v45, %v6452_v6  ;;  %v6485_v9 = vmul.f32 %v15935_v45, %v6453_v30  ;;  %v6486_v61 = vmul.f32 %v15935_v45, %v6454_v7  ;;  %v6487_v10 = vmul.f32 %v15935_v45, %v6455_v31  ;;  %v15940_v28 = vld [vmem:[#allocation69_spill] sm:$0xff]  ;;  %v15941_v54 = vld [vmem:[#allocation68_spill] sm:$0xff] }
 0x5e5   : >> { %v6512_v22 = vadd.f32 %v15936_v1, %v6480_v53  ;;  %v6513_v24 = vadd.f32 %v15937_v27, %v6481_v63  ;;  %v6514_v56 = vadd.f32 %v15938_v48, %v6482_v16  ;;  %v6515_v3 = vadd.f32 %v15939_v41, %v6483_v43 }
 0x5e6   : >> { %v6516_v6 = vadd.f32 %v15940_v28, %v6484_v13  ;;  %v6517_v30 = vadd.f32 %v15941_v54, %v6485_v9  ;;  %v6518_v7 = vadd.f32 %v15942_v50, %v6486_v61  ;;  %v6519_v31 = vadd.f32 %v15943_v57, %v6487_v10 }
 0x5e7   : >> { %vm6544_vm11 = vcmp.gt.f32.partialorder %v6512_v22, 0.0  ;;  %vm6545_vm2 = vcmp.gt.f32.partialorder %v6513_v24, 0.0  ;;  %vm6546_vm10 = vcmp.gt.f32.partialorder %v6514_v56, 0.0  ;;  %vm6547_vm5 = vcmp.gt.f32.partialorder %v6515_v3, 0.0 }
 0x5e8   : >> { %vm6548_vm8 = vcmp.gt.f32.partialorder %v6516_v6, 0.0  ;;  %vm6549_vm7 = vcmp.gt.f32.partialorder %v6517_v30, 0.0  ;;  %vm6550_vm13 = vcmp.gt.f32.partialorder %v6518_v7, 0.0  ;;  %vm6551_vm12 = vcmp.gt.f32.partialorder %v6519_v31, 0.0 }
 0x5e9   : >> { %v6576_v53 = vmul.f32 0.2, %v6512_v22  ;;  %v6577_v63 = vmul.f32 0.2, %v6513_v24  ;;  %v6578_v16 = vmul.f32 0.2, %v6514_v56  ;;  %v6345_v43 = vadd.f32 %v6344_v26, %v6343_v12 }
 0x5ea   : >> { %v6579_v1 = vmul.f32 0.2, %v6515_v3  ;;  %v6580_v13 = vmul.f32 0.2, %v6516_v6  ;;  %v6581_v27 = vmul.f32 0.2, %v6517_v30  ;;  %v6397_v50 = vmul.f32 %v13632_v44, %v13632_v44 }
 0x5eb   : >> { %v6582_v9 = vmul.f32 0.2, %v6518_v7  ;;  %v6583_v57 = vmul.f32 0.2, %v6519_v31  ;;  %v13687_v61 = vsel %vm6544_vm11, %v6512_v22, %v6576_v53   ;;  %v13690_v48 = vsel %vm6545_vm2, %v6513_v24, %v6577_v63   ;;  %vm15958_vm11 = vmmov %vm15843_vm0 }
 0x5ec   : >> { %15944 = vst [vmem:[#allocation164_spill] sm:$0xff] %v13687_v61  ;;  %15945 = vst [vmem:[#allocation165_spill] sm:$0xff] %v13690_v48  ;;  %v13693_v28 = vsel %vm6546_vm10, %v6514_v56, %v6578_v16   ;;  %v13696_v54 = vsel %vm6547_vm5, %v6515_v3, %v6579_v1   ;;  %v13699_v12 = vsel %vm6548_vm8, %v6516_v6, %v6580_v13   ;;  %v6393_v24 = vmul.f32 0.015625, %v6345_v43 }
 0x5ed   : >> { %v15946_v26 = vmov %v13696_v54  ;;  %v15947_v45 = vmov %v13699_v12  ;;  %v13702_v27 = vsel %vm6549_vm7, %v6517_v30, %v6581_v27   ;;  %v13705_v34 = vsel %vm6550_vm13, %v6518_v7, %v6582_v9   ;;  %vm15959_vm2 = vmmov %vm15843_vm0 }
 0x5ee   : >> { %v15948_v62 = vmov %v13702_v27  ;;  %v15949_v49 = vmov %v13705_v34  ;;  %v13708_v22 = vsel %vm6551_vm12, %v6519_v31, %v6583_v57   ;;  %v6416_v56 = vsub.f32 %v13450_v14, %v13632_v44  ;;  %vm15960_vm10 = vmmov %vm15843_vm0 }
 0x5ef   : >> { %v15950_v53 = vmov %v13708_v22  ;;  %v6417_v3 = vsub.f32 %v13474_v21, %v13632_v44  ;;  %v6418_v6 = vsub.f32 %v13447_v23, %v13632_v44  ;;  %v6419_v30 = vsub.f32 %v13458_v20, %v13632_v44  ;;  %vm15961_vm5 = vmmov %vm15843_vm0 }
 0x5f0   : >> { %v6420_v7 = vsub.f32 %v13498_v47, %v13632_v44  ;;  %v6401_v34 = vsub.f32 %v6393_v24, %v6397_v50  ;;  %v6421_v31 = vsub.f32 %v13515_v37, %v13632_v44  ;;  %v6422_v63 = vsub.f32 %v13491_v19, %v13632_v44  ;;  %vm15962_vm8 = vmmov %vm15843_vm0 }
 0x5f1   : >> { %v6423_v16 = vsub.f32 %v13501_v39, %v13632_v44  ;;  %v6359_v43 = vsel %vm15951_vm14, %v13626_v33, 0.0  ;;  %v6244_v1 = vadd.f32 %v13622_v38, %v13634_v0  ;;  %v6358_v13 = vadd.f32 %v13609_v35, %v13636_v60  ;;  %vm15963_vm7 = vmmov %vm15843_vm0  ;;  %v15969_v39 = vld [vmem:[#allocation64_spill] sm:$0xff] }
 0x5f2   : >> { %v6298_v27 = vmul.f32 %v13616_v52, %v13616_v52  ;;  %v6405_v50 = vmax.f32 %v6401_v34, 0.0  ;;  %v6296_v9 = vmul.f32 %v13630_v15, %v13630_v15  ;;  %v13738_v57 = vadd.f32 %v13606_v40, %v13439_v4  ;;  %vm15964_vm13 = vmmov %vm15843_vm0 }
 0x5f3   : >> { %v13742_v33 = vadd.f32 %v13618_v18, %v13398_v8  ;;  %v6245_v61 = vrot.slane %v6244_v1, 4  ;;  %v6360_v38 = vadd.f32 %v6359_v43, %v6358_v13  ;;  %v13746_v35 = vadd.f32 %v13662_v51, %v13522_v29  ;;  %vm15965_vm12 = vmmov %vm15843_vm0 }
 0x5f4   : >> { %v13749_v0 = vadd.f32 %v6173_v5, %v13480_v58  ;;  %v6441_v60 = vadd.f32 1e-05, %v6405_v50  ;;  %v6254_v48 = vsel %vm15952_vm4, %v13616_v52, 0.0  ;;  %v6251_v4 = vsel %vm15953_vm15, %v13630_v15, 0.0 }
 0x5f5   : >> { %v6246_v40 = vadd.f32 %v6245_v61, %v6244_v1  ;;  %v6361_v54 = vrot.slane %v6360_v38, 4  ;;  %v6252_v8 = vsel %vm15954_vm6, %v13742_v33, 0.0  ;;  %v6297_v18 = vmul.f32 %v13742_v33, %v13742_v33 }
 0x5f6   : >> { %8470 = vrsqrt.f32 %v6441_v60  ;;  %v6370_v29 = vsel %vm15955_vm9, %v6298_v27, 0.0  ;;  %v6299_v58 = vmul.f32 %v13738_v57, %v13738_v57  ;;  %v6253_v51 = vadd.f32 %v6252_v8, %v6251_v4 }
 0x5f7   : >> { %v6247_v5 = vrot.slane %v6246_v40, 2  ;;  %v6362_v12 = vadd.f32 %v6361_v54, %v6360_v38  ;;  %v6367_v22 = vsel %vm15956_vm3, %v6296_v9, 0.0  ;;  %v6368_v24 = vsel %vm15843_vm0, %v6297_v18, 0.0 }
 0x5f8   : >> { %v6256_v34 = vsel %vm15957_vm1, %v13738_v57, 0.0  ;;  %v6255_v43 = vadd.f32 %v6254_v48, %v6253_v51  ;;  %v6369_v1 = vadd.f32 %v6368_v24, %v6367_v22  ;;  %v6300_v13 = vmul.f32 %v13749_v0, %v13749_v0 }
 0x5f9   : >> { %v6248_v50 = vadd.f32 %v6247_v5, %v6246_v40  ;;  %v6363_v27 = vrot.slane %v6362_v12, 2  ;;  %v6258_v61 = vsel %vm15958_vm11, %v13749_v0, 0.0  ;;  %v13772_v38 = vadd.f32 %v13672_v32, %v13572_v25  ;;  %vm15988_vm11 = vmmov %vm15959_vm2 }
 0x5fa   : >> { %v6372_v9 = vsel %vm15959_vm2, %v6299_v58, 0.0  ;;  %v6371_v60 = vadd.f32 %v6370_v29, %v6369_v1  ;;  %v6257_v4 = vadd.f32 %v6256_v34, %v6255_v43  ;;  %v13777_v48 = vadd.f32 %v13678_v42, %v13482_v59 }
 0x5fb   : >> { %v6249_v54 = vrot.slane %v6248_v50, 1  ;;  %v6364_v8 = vadd.f32 %v6363_v27, %v6362_v12  ;;  %v6302_v40 = vmul.f32 %v13746_v35, %v13746_v35  ;;  %v6374_v18 = vsel %vm15960_vm10, %v6300_v13, 0.0 }
 0x5fc   : >> { %v6259_v51 = vadd.f32 %v6258_v61, %v6257_v4  ;;  %v6373_v5 = vadd.f32 %v6372_v9, %v6371_v60  ;;  %v6260_v25 = vsel %vm15961_vm5, %v13777_v48, 0.0  ;;  %v6301_v32 = vmul.f32 %v13777_v48, %v13777_v48 }
 0x5fd   : >> { %v6250_v29 = vadd.f32 %v6249_v54, %v6248_v50  ;;  %v6365_v58 = vrot.slane %v6364_v8, 1  ;;  %v6262_v12 = vsel %vm15963_vm7, %v13746_v35, 0.0  ;;  %v13790_v24 = vsel %vm15964_vm13, %v6302_v40, 0.0 }
 0x5fe   : >> { %v6375_v22 = vadd.f32 %v6374_v18, %v6373_v5  ;;  %v6261_v59 = vadd.f32 %v6260_v25, %v6259_v51  ;;  %v6376_v42 = vsel %vm15962_vm8, %v6301_v32, 0.0  ;;  %v13794_v34 = vsel %vm15965_vm12, %v13772_v38, 0.0  ;;  %v15971_v51 = vld [vmem:[#allocation62_spill] sm:$0xff]  ;;  %v15972_v25 = vld [vmem:[#allocation61_spill] sm:$0xff] }
 0x5ff   : >> { %v13798_v43 = vmul.f32 %v13772_v38, %v13772_v38  ;;  %v6366_v13 = vadd.f32 %v6365_v58, %v6364_v8  ;;  %v13800_v50 = vmul.f32 0.015625, %v6250_v29  ;;  %v15973_v29 = vld [vmem:[#allocation60_spill] sm:$0xff] }
 0x600   : >> { %v8471_v1 = vpop.eup %8470  ;;  %v6263_v27 = vadd.f32 %v6262_v12, %v6261_v59  ;;  %v6377_v61 = vadd.f32 %v6376_v42, %v6375_v22  ;;  %v15974_v22 = vld [vmem:[#allocation59_spill] sm:$0xff]  ;;  %v15975_v42 = vld [vmem:[#allocation58_spill] sm:$0xff] }
 0x601   : >> { %v6456_v9 = vmul.f32 %v8471_v1, %v6416_v56  ;;  %v6457_v60 = vmul.f32 %v8471_v1, %v6417_v3  ;;  %v6458_v4 = vmul.f32 %v8471_v1, %v6418_v6  ;;  %v6459_v54 = vmul.f32 %v8471_v1, %v6419_v30  ;;  %v15966_v56 = vld [vmem:[#allocation38_spill] sm:$0xff] }
 0x602   : >> { %v6460_v8 = vmul.f32 %v8471_v1, %v6420_v7  ;;  %v6461_v14 = vmul.f32 %v8471_v1, %v6421_v31  ;;  %v6462_v21 = vmul.f32 %v8471_v1, %v6422_v63  ;;  %v6463_v23 = vmul.f32 %v8471_v1, %v6423_v16  ;;  %v15968_v31 = vld [vmem:[#allocation65_spill] sm:$0xff]  ;;  %v15970_v16 = vld [vmem:[#allocation63_spill] sm:$0xff] }
 0x603   : >> { %v15967_v40 = vmov %v15966_v56  ;;  %v6488_v3 = vmul.f32 %v15966_v56, %v6456_v9 }
 0x604   : >> { %v6489_v20 = vmul.f32 %v15967_v40, %v6457_v60  ;;  %v6490_v6 = vmul.f32 %v15967_v40, %v6458_v4  ;;  %v6491_v47 = vmul.f32 %v15967_v40, %v6459_v54  ;;  %v6492_v30 = vmul.f32 %v15967_v40, %v6460_v8 }
 0x605   : >> { %v6493_v37 = vmul.f32 %v15967_v40, %v6461_v14  ;;  %v6494_v7 = vmul.f32 %v15967_v40, %v6462_v21  ;;  %v6495_v19 = vmul.f32 %v15967_v40, %v6463_v23  ;;  %v6520_v63 = vadd.f32 %v15968_v31, %v6488_v3 }
 0x606   : >> { %v6521_v44 = vadd.f32 %v15969_v39, %v6489_v20  ;;  %v6522_v18 = vadd.f32 %v15970_v16, %v6490_v6  ;;  %v6523_v5 = vadd.f32 %v15971_v51, %v6491_v47  ;;  %v6524_v32 = vadd.f32 %v15972_v25, %v6492_v30 }
 0x607   : >> { %v6525_v58 = vadd.f32 %v15973_v29, %v6493_v37  ;;  %v6526_v59 = vadd.f32 %v15974_v22, %v6494_v7  ;;  %v6527_v12 = vadd.f32 %v15975_v42, %v6495_v19  ;;  %vm6552_vm14 = vcmp.gt.f32.partialorder %v6520_v63, 0.0 }
 0x608   : >> { %vm6553_vm4 = vcmp.gt.f32.partialorder %v6521_v44, 0.0  ;;  %vm6554_vm15 = vcmp.gt.f32.partialorder %v6522_v18, 0.0  ;;  %vm6555_vm6 = vcmp.gt.f32.partialorder %v6523_v5, 0.0  ;;  %vm6556_vm9 = vcmp.gt.f32.partialorder %v6524_v32, 0.0 }
 0x609   : >> { %vm6557_vm3 = vcmp.gt.f32.partialorder %v6525_v58, 0.0  ;;  %vm6558_vm0 = vcmp.gt.f32.partialorder %v6526_v59, 0.0  ;;  %vm6559_vm1 = vcmp.gt.f32.partialorder %v6527_v12, 0.0  ;;  %v6584_v1 = vmul.f32 0.2, %v6520_v63 }
 0x60a   : >> { %v6585_v9 = vmul.f32 0.2, %v6521_v44  ;;  %v6586_v60 = vmul.f32 0.2, %v6522_v18  ;;  %v6398_v4 = vmul.f32 %v13800_v50, %v13800_v50  ;;  %v6587_v54 = vmul.f32 0.2, %v6523_v5 }
 0x60b   : >> { %v6588_v8 = vmul.f32 0.2, %v6524_v32  ;;  %v6589_v14 = vmul.f32 0.2, %v6525_v58  ;;  %v6424_v21 = vsub.f32 %v13535_v36, %v13800_v50  ;;  %v6590_v23 = vmul.f32 0.2, %v6526_v59 }
 0x60c   : >> { %v6591_v56 = vmul.f32 0.2, %v6527_v12  ;;  %v13847_v3 = vsel %vm6552_vm14, %v6520_v63, %v6584_v1   ;;  %v13850_v20 = vsel %vm6553_vm4, %v6521_v44, %v6585_v9   ;;  %v13853_v6 = vsel %vm6554_vm15, %v6522_v18, %v6586_v60  }
 0x60d   : >> { %v15976_v47 = vmov %v13847_v3  ;;  %v15977_v37 = vmov %v13850_v20  ;;  %v15978_v19 = vmov %v13853_v6  ;;  %v13856_v22 = vsel %vm6555_vm6, %v6523_v5, %v6587_v54  }
 0x60e   : >> { %v15979_v31 = vmov %v13856_v22  ;;  %v13859_v30 = vsel %vm6556_vm9, %v6524_v32, %v6588_v8   ;;  %v13865_v54 = vsel %vm6558_vm0, %v6526_v59, %v6590_v23   ;;  %v13868_v7 = vsel %vm6559_vm1, %v6527_v12, %v6591_v56  }
 0x60f   : >> { %v15980_v16 = vmov %v13859_v30  ;;  %v13862_v30 = vsel %vm6557_vm3, %v6525_v58, %v6589_v14   ;;  %15982 = vst [vmem:[#allocation166_spill] sm:$0xff] %v13865_v54  ;;  %v15983_v25 = vmov %v13865_v54  ;;  %15984 = vst [vmem:[#allocation167_spill] sm:$0xff] %v13868_v7  ;;  %v15985_v63 = vmov %v13868_v7  ;;  %v15986_v58 = vld [vmem:[#allocation88_spill] sm:$0xff] }
 0x610   : >> { %v15981_v36 = vmov %v13862_v30  ;;  %v6394_v39 = vmul.f32 0.015625, %v6366_v13  ;;  %v6425_v44 = vsub.f32 %v13567_v55, %v13800_v50  ;;  %v6426_v18 = vsub.f32 %v13519_v17, %v13800_v50  ;;  %v15987_v13 = vld [vmem:[#allocation103_spill] sm:$0xff] }
 0x611   : >> { %v6427_v51 = vsub.f32 %v13562_v2, %v13800_v50  ;;  %v6428_v5 = vsub.f32 %v13588_v11, %v13800_v50  ;;  %v6429_v32 = vsub.f32 %v13604_v46, %v13800_v50  ;;  %v6430_v22 = vsub.f32 %v15986_v58, %v13800_v50 }
 0x612   : >> { %v6402_v29 = vsub.f32 %v6394_v39, %v6398_v4  ;;  %v6431_v59 = vsub.f32 %v15987_v13, %v13800_v50  ;;  %v6265_v55 = vadd.f32 %v13794_v34, %v6263_v27  ;;  %v6379_v17 = vadd.f32 %v13790_v24, %v6377_v61 }
 0x613   : >> { %v6380_v2 = vsel %vm15988_vm11, %v13798_v43, 0.0 }
 0x614   : >> { %v6406_v42 = vmax.f32 %v6402_v29, 0.0  ;;  %v6266_v12 = vrot.slane %v6265_v55, 4  ;;  %v6381_v11 = vadd.f32 %v6380_v2, %v6379_v17  ;;  %v15989_v17 = vld [vmem:[#allocation40_spill] sm:$0xff] }
 0x616   : >> { %v6442_v1 = vadd.f32 1e-05, %v6406_v42  ;;  %v6267_v9 = vadd.f32 %v6266_v12, %v6265_v55  ;;  %v6382_v46 = vrot.slane %v6381_v11, 4  ;;  %v15990_v42 = vmov %v15989_v17 }
 0x618   : >> { %8472 = vrsqrt.f32 %v6442_v1  ;;  %v6268_v60 = vrot.slane %v6267_v9, 2  ;;  %v6383_v4 = vadd.f32 %v6382_v46, %v6381_v11  ;;  %v15994_v1 = vld [vmem:[#allocation54_spill] sm:$0xff]  ;;  %v15995_v46 = vld [vmem:[#allocation53_spill] sm:$0xff] }
 0x61a   : >> { %v6269_v54 = vadd.f32 %v6268_v60, %v6267_v9  ;;  %v6384_v8 = vrot.slane %v6383_v4, 2 }
 0x61c   : >> { %v6270_v14 = vrot.slane %v6269_v54, 1  ;;  %v6385_v50 = vadd.f32 %v6384_v8, %v6383_v4  ;;  %v15996_v4 = vld [vmem:[#allocation52_spill] sm:$0xff]  ;;  %v15997_v8 = vld [vmem:[#allocation51_spill] sm:$0xff] }
 0x61e   : >> { %v6271_v23 = vadd.f32 %v6270_v14, %v6269_v54  ;;  %v6386_v34 = vrot.slane %v6385_v50, 1 }
 0x620   : >> { %v13888_v27 = vmul.f32 0.015625, %v6271_v23  ;;  %v6387_v24 = vadd.f32 %v6386_v34, %v6385_v50  ;;  %v15998_v50 = vld [vmem:[#allocation50_spill] sm:$0xff] }
 0x622   : >> { %v8473_v61 = vpop.eup %8472  ;;  %v6399_v43 = vmul.f32 %v13888_v27, %v13888_v27  ;;  %v6432_v56 = vsub.f32 %v13630_v15, %v13888_v27  ;;  %v6433_v3 = vsub.f32 %v13742_v33, %v13888_v27  ;;  %v6434_v20 = vsub.f32 %v13616_v52, %v13888_v27 }
 0x623   : >> { %v6464_v6 = vmul.f32 %v8473_v61, %v6424_v21  ;;  %v6465_v30 = vmul.f32 %v8473_v61, %v6425_v44  ;;  %v6466_v7 = vmul.f32 %v8473_v61, %v6426_v18  ;;  %v6467_v39 = vmul.f32 %v8473_v61, %v6427_v51  ;;  %v15991_v18 = vld [vmem:[#allocation57_spill] sm:$0xff] }
 0x624   : >> { %v6468_v29 = vmul.f32 %v8473_v61, %v6428_v5  ;;  %v6469_v58 = vmul.f32 %v8473_v61, %v6429_v32  ;;  %v6470_v13 = vmul.f32 %v8473_v61, %v6430_v22  ;;  %v6471_v55 = vmul.f32 %v8473_v61, %v6431_v59  ;;  %v15992_v5 = vld [vmem:[#allocation56_spill] sm:$0xff]  ;;  %v15993_v22 = vld [vmem:[#allocation55_spill] sm:$0xff] }
 0x625   : >> { %v6496_v2 = vmul.f32 %v15989_v17, %v6464_v6  ;;  %v6497_v12 = vmul.f32 %v15990_v42, %v6465_v30  ;;  %v6498_v15 = vmul.f32 %v15990_v42, %v6466_v7  ;;  %v6499_v11 = vmul.f32 %v15990_v42, %v6467_v39 }
 0x626   : >> { %v6500_v33 = vmul.f32 %v15990_v42, %v6468_v29  ;;  %v6501_v52 = vmul.f32 %v15990_v42, %v6469_v58  ;;  %v6502_v21 = vmul.f32 %v15990_v42, %v6470_v13  ;;  %v6503_v44 = vmul.f32 %v15990_v42, %v6471_v55 }
 0x627   : >> { %v6528_v51 = vadd.f32 %v15991_v18, %v6496_v2  ;;  %v6529_v32 = vadd.f32 %v15992_v5, %v6497_v12  ;;  %v6530_v59 = vadd.f32 %v15993_v22, %v6498_v15  ;;  %v6531_v9 = vadd.f32 %v15994_v1, %v6499_v11 }
 0x628   : >> { %v6532_v60 = vadd.f32 %v15995_v46, %v6500_v33  ;;  %v6533_v54 = vadd.f32 %v15996_v4, %v6501_v52  ;;  %v6534_v14 = vadd.f32 %v15997_v8, %v6502_v21  ;;  %v6535_v23 = vadd.f32 %v15998_v50, %v6503_v44 }
 0x629   : >> { %vm6560_vm2 = vcmp.gt.f32.partialorder %v6528_v51, 0.0  ;;  %vm6561_vm10 = vcmp.gt.f32.partialorder %v6529_v32, 0.0  ;;  %vm6562_vm5 = vcmp.gt.f32.partialorder %v6530_v59, 0.0  ;;  %vm6563_vm8 = vcmp.gt.f32.partialorder %v6531_v9, 0.0 }
 0x62a   : >> { %vm6564_vm7 = vcmp.gt.f32.partialorder %v6532_v60, 0.0  ;;  %vm6565_vm13 = vcmp.gt.f32.partialorder %v6533_v54, 0.0  ;;  %vm6566_vm12 = vcmp.gt.f32.partialorder %v6534_v14, 0.0  ;;  %vm6567_vm14 = vcmp.gt.f32.partialorder %v6535_v23, 0.0 }
 0x62b   : >> { %v6592_v34 = vmul.f32 0.2, %v6528_v51  ;;  %v6593_v61 = vmul.f32 0.2, %v6529_v32  ;;  %v6594_v6 = vmul.f32 0.2, %v6530_v59  ;;  %v6435_v30 = vsub.f32 %v13738_v57, %v13888_v27 }
 0x62c   : >> { %v6595_v7 = vmul.f32 0.2, %v6531_v9  ;;  %v6596_v39 = vmul.f32 0.2, %v6532_v60  ;;  %v6597_v29 = vmul.f32 0.2, %v6533_v54  ;;  %v6436_v58 = vsub.f32 %v13749_v0, %v13888_v27 }
 0x62d   : >> { %v6598_v13 = vmul.f32 0.2, %v6534_v14  ;;  %v6599_v55 = vmul.f32 0.2, %v6535_v23  ;;  %v13919_v17 = vsel %vm6560_vm2, %v6528_v51, %v6592_v34   ;;  %v13922_v12 = vsel %vm6561_vm10, %v6529_v32, %v6593_v61  }
 0x62e   : >> { %v15999_v2 = vmov %v13919_v17  ;;  %v16000_v15 = vmov %v13922_v12  ;;  %v13925_v4 = vsel %vm6562_vm5, %v6530_v59, %v6594_v6   ;;  %v13928_v21 = vsel %vm6563_vm8, %v6531_v9, %v6595_v7   ;;  %v16014_v12 = vld [vmem:[#allocation44_spill] sm:$0xff] }
 0x62f   : >> { %v16001_v11 = vmov %v13925_v4  ;;  %v16002_v57 = vmov %v13928_v21  ;;  %v13931_v8 = vsel %vm6564_vm7, %v6532_v60, %v6596_v39   ;;  %v13934_v52 = vsel %vm6565_vm13, %v6533_v54, %v6597_v29   ;;  %v16011_v39 = vld [vmem:[#allocation47_spill] sm:$0xff] }
 0x630   : >> { %v16003_v33 = vmov %v13931_v8  ;;  %v16004_v5 = vmov %v13934_v52  ;;  %v13937_v14 = vsel %vm6566_vm12, %v6534_v14, %v6598_v13   ;;  %v13940_v34 = vsel %vm6567_vm14, %v6535_v23, %v6599_v55   ;;  %v16013_v55 = vld [vmem:[#allocation45_spill] sm:$0xff] }
 0x631   : >> { %v16005_v1 = vmov %v13937_v14  ;;  %v16006_v46 = vmov %v13940_v34  ;;  %v6395_v0 = vmul.f32 0.015625, %v6387_v24  ;;  %v6437_v44 = vsub.f32 %v13777_v48, %v13888_v27  ;;  %v16007_v48 = vld [vmem:[#allocation41_spill] sm:$0xff] }
 0x632   : >> { %v6438_v18 = vsub.f32 %v13746_v35, %v13888_v27  ;;  %v6439_v21 = vsub.f32 %v13772_v38, %v13888_v27  ;;  %v16008_v23 = vmov %v16007_v48  ;;  %vm16063_vm2 = vcmask (%p13991_p12), 523264  }
 0x633   : >> { %v6403_v51 = vsub.f32 %v6395_v0, %v6399_v43  ;;  %v16015_v0 = vld [vmem:[#allocation43_spill] sm:$0xff]  ;;  %vm16064_vm10 = vmmov (%p13991_p12), %vm16063_vm2 }
 0x634   : > { %vm16065_vm5 = vmmov (%p13991_p12), %vm16063_vm2 }
 0x635   : >> { %v6407_v32 = vmax.f32 %v6403_v51, 0.0  ;;  %vm16066_vm8 = vmmov (%p13991_p12), %vm16063_vm2 }
 0x636   : > { %vm16067_vm7 = vmmov (%p13991_p12), %vm16063_vm2 }
 0x637   : >> { %v6443_v22 = vadd.f32 1e-05, %v6407_v32  ;;  %vm16068_vm13 = vmmov (%p13991_p12), %vm16063_vm2 }
 0x638   : > { %vm16069_vm12 = vmmov (%p13991_p12), %vm16063_vm2 }
 0x639   : >> { %8474 = vrsqrt.f32 %v6443_v22  ;;  %vm16070_vm14 = vmmov (%p13991_p12), %vm16063_vm2 }
 0x643   : >> { %v8475_v59 = vpop.eup %8474 }
 0x644   : >> { %v6472_v9 = vmul.f32 %v8475_v59, %v6432_v56  ;;  %v6473_v60 = vmul.f32 %v8475_v59, %v6433_v3  ;;  %v6474_v4 = vmul.f32 %v8475_v59, %v6434_v20  ;;  %v6475_v54 = vmul.f32 %v8475_v59, %v6435_v30  ;;  %v16009_v20 = vld [vmem:[#allocation49_spill] sm:$0xff]  ;;  %v16010_v30 = vld [vmem:[#allocation48_spill] sm:$0xff] }
 0x645   : >> { %v6476_v8 = vmul.f32 %v8475_v59, %v6436_v58  ;;  %v6477_v24 = vmul.f32 %v8475_v59, %v6437_v44  ;;  %v6478_v14 = vmul.f32 %v8475_v59, %v6438_v18  ;;  %v6479_v50 = vmul.f32 %v8475_v59, %v6439_v21  ;;  %v16012_v58 = vld [vmem:[#allocation46_spill] sm:$0xff] }
 0x646   : >> { %v6504_v34 = vmul.f32 %v16007_v48, %v6472_v9  ;;  %v6505_v35 = vmul.f32 %v16008_v23, %v6473_v60  ;;  %v6506_v61 = vmul.f32 %v16008_v23, %v6474_v4  ;;  %v6507_v38 = vmul.f32 %v16008_v23, %v6475_v54  ;;  %v16016_v18 = vld [vmem:[#allocation42_spill] sm:$0xff] }
 0x647   : >> { %v6508_v27 = vmul.f32 %v16008_v23, %v6476_v8  ;;  %v6509_v43 = vmul.f32 %v16008_v23, %v6477_v24  ;;  %v6510_v56 = vmul.f32 %v16008_v23, %v6478_v14  ;;  %v6511_v3 = vmul.f32 %v16008_v23, %v6479_v50 }
 0x648   : >> { %v6536_v6 = vadd.f32 %v16009_v20, %v6504_v34  ;;  %v6537_v7 = vadd.f32 %v16010_v30, %v6505_v35  ;;  %v6538_v29 = vadd.f32 %v16011_v39, %v6506_v61  ;;  %v6539_v13 = vadd.f32 %v16012_v58, %v6507_v38  ;;  %v16059_v38 = vld [vmem:[#allocation164_spill] sm:$0xff] }
 0x649   : >> { %v6540_v17 = vadd.f32 %v16013_v55, %v6508_v27  ;;  %v6541_v52 = vadd.f32 %v16014_v12, %v6509_v43  ;;  %v6542_v44 = vadd.f32 %v16015_v0, %v6510_v56  ;;  %v6543_v21 = vadd.f32 %v16016_v18, %v6511_v3 }
 0x64a   : >> { %vm6568_vm4 = vcmp.gt.f32.partialorder %v6536_v6, 0.0  ;;  %vm6569_vm15 = vcmp.gt.f32.partialorder %v6537_v7, 0.0  ;;  %vm6570_vm6 = vcmp.gt.f32.partialorder %v6538_v29, 0.0  ;;  %vm6571_vm9 = vcmp.gt.f32.partialorder %v6539_v13, 0.0 }
 0x64b   : >> { %vm6572_vm3 = vcmp.gt.f32.partialorder %v6540_v17, 0.0  ;;  %vm6573_vm0 = vcmp.gt.f32.partialorder %v6541_v52, 0.0  ;;  %vm6574_vm1 = vcmp.gt.f32.partialorder %v6542_v44, 0.0  ;;  %vm6575_vm11 = vcmp.gt.f32.partialorder %v6543_v21, 0.0 }
 0x64c   : >> { %v6600_v51 = vmul.f32 0.2, %v6536_v6  ;;  %v6601_v32 = vmul.f32 0.2, %v6537_v7  ;;  %v6602_v22 = vmul.f32 0.2, %v6538_v29  ;;  %v16036_v34 = vmov %v16006_v46 }
 0x64d   : >> { %v6603_v59 = vmul.f32 0.2, %v6539_v13  ;;  %v6604_v9 = vmul.f32 0.2, %v6540_v17  ;;  %v6605_v60 = vmul.f32 0.2, %v6541_v52  ;;  %v16037_v14 = vmov %v16005_v1 }
 0x64e   : >> { %v6606_v4 = vmul.f32 0.2, %v6542_v44  ;;  %v6607_v54 = vmul.f32 0.2, %v6543_v21  ;;  %v13965_v51 = vsel %vm6568_vm4, %v6536_v6, %v6600_v51   ;;  %v13968_v3 = vsel %vm6569_vm15, %v6537_v7, %v6601_v32   ;;  %v8477_v32 = vld [vmem:[%s14316_s6 + $0x8] sm:$0xff] (%p13991_p12)   ;;  %v8478_v14 = vld [vmem:[%s14316_s6 + $0x10] sm:$0xff] (%p13991_p12)   ;;  %vm16071_vm4 = vmmov (%p13991_p12), %vm16063_vm2 }
 0x64f   : >> { %v16017_v50 = vmov %v13965_v51  ;;  %v16018_v43 = vmov %v13968_v3  ;;  %v13971_v7 = vsel %vm6570_vm6, %v6538_v29, %v6602_v22   ;;  %v13974_v8 = vsel %vm6571_vm9, %v6539_v13, %v6603_v59   ;;  %v8476_v29 = vld [vmem:[%s14316_s6] sm:$0xff] (%p13991_p12)   ;;  %vm16072_vm15 = vmmov (%p13991_p12), %vm16063_vm2 }
 0x650   : >> { %v16019_v55 = vmov %v13971_v7  ;;  %v16020_v23 = vmov %v13974_v8  ;;  %v13977_v58 = vsel %vm6572_vm3, %v6540_v17, %v6604_v9   ;;  %v13980_v24 = vsel %vm6573_vm0, %v6541_v52, %v6605_v60   ;;  %v16058_v52 = vld [vmem:[#allocation165_spill] sm:$0xff]  ;;  %8019 = vmatprep.subr.bf16.mxu0 (%p13991_p12), %v8476_v29  ;;  %8063 = vmatprep.subr.bf16.mxu1 (%p13991_p12), %v8476_v29  ;;  %vm16073_vm6 = vmmov (%p13991_p12), %vm16063_vm2 }
 0x651   : >> { %v16021_v40 = vmov %v13977_v58  ;;  %v16022_v42 = vmov %v13980_v24  ;;  %v13983_v24 = vsel %vm6574_vm1, %v6542_v44, %v6606_v4   ;;  %v13986_v60 = vsel %vm6575_vm11, %v6543_v21, %v6607_v54   ;;  %8020 = vmatpush3.bf16.msra.mxu0 (%p13991_p12), %v8476_v29  ;;  %8067 = vmatpush3.bf16.msra.mxu1 (%p13991_p12), %v8476_v29  ;;  %vm16074_vm9 = vmmov (%p13991_p12), %vm16063_vm2 }
 0x652   : >> { %16023 = vst [vmem:[#allocation168_spill] sm:$0xff] %v13983_v24  ;;  %v16024_v10 = vmov %v13983_v24  ;;  %16025 = vst [vmem:[#allocation169_spill] sm:$0xff] %v13986_v60  ;;  %v16026_v41 = vmov %v13986_v60  ;;  %v16030_v44 = vmov %v16022_v42  ;;  %v16031_v58 = vmov %v16021_v40  ;;  %8021 = vmatprep.subr.bf16.mxu0 (%p13991_p12), %v8477_v32  ;;  %8064 = vmatprep.subr.bf16.mxu1 (%p13991_p12), %v8477_v32 }
 0x653   : >> { %v16028_v60 = vmov %v16026_v41  ;;  %v16029_v24 = vmov %v16024_v10  ;;  %v16032_v17 = vmov %v16020_v23  ;;  %v16033_v7 = vmov %v16019_v55  ;;  %1862 = sbr.rel (!%p13991_p12) target bundleno = 397 (0x18d), region = 101  ;;  %v16061_v41 = vld [vmem:[#allocation164_spill] sm:$0xff] (%p13991_p12)  ;;  %v16062_v10 = vld [vmem:[#allocation165_spill] sm:$0xff] (%p13991_p12)  ;;  %vm16075_vm3 = vmmov (%p13991_p12), %vm16063_vm2 }
 0x654   : >> { %v16034_v3 = vmov %v16018_v43  ;;  %v16035_v51 = vmov %v16017_v50  ;;  %v16038_v35 = vmov %v16004_v5  ;;  %v16039_v8 = vmov %v16003_v33  ;;  %vm16076_vm0 = vmmov (%p13991_p12), %vm16063_vm2 }
 0x655   : >> { %v16040_v21 = vmov %v16002_v57  ;;  %v16041_v4 = vmov %v16001_v11  ;;  %v16042_v48 = vmov %v16000_v15  ;;  %v16043_v6 = vmov %v15999_v2  ;;  %8022 = vmatpush3.bf16.msra.mxu0 (%p13991_p12), %v8477_v32  ;;  %8068 = vmatpush3.bf16.msra.mxu1 (%p13991_p12), %v8477_v32  ;;  %vm16081_vm1 = vmmov (%p13991_p12), %vm16076_vm0 }
 0x656   : >> { %v16044_v0 = vmov %v15985_v63  ;;  %v16045_v54 = vmov %v15983_v25  ;;  %v16046_v30 = vmov %v15981_v36  ;;  %v16047_v12 = vmov %v15980_v16  ;;  %8023 = vmatprep.subr.bf16.mxu0 (%p13991_p12), %v8478_v14  ;;  %8065 = vmatprep.subr.bf16.mxu1 (%p13991_p12), %v8478_v14  ;;  %vm16082_vm11 = vmmov (%p13991_p12), %vm16076_vm0 }
 0x657   : >> { %v16048_v22 = vmov %v15979_v31  ;;  %v16049_v61 = vmov %v15978_v19  ;;  %v16050_v13 = vmov %v15977_v37  ;;  %v16051_v56 = vmov %v15976_v47 }
 0x658   : >> { %v16052_v59 = vmov %v15950_v53  ;;  %v16053_v20 = vmov %v15949_v49  ;;  %v16054_v27 = vmov %v15948_v62  ;;  %v16055_v39 = vmov %v15947_v45 }
 0x659   : >> { %v16056_v9 = vmov %v15946_v26  ;;  %v16057_v18 = vmov %v13693_v28  ;;  %v6640_v63 = vpack.c.bf16 (%p13991_p12), %v16062_v10, %v16061_v41  ;;  %v6648_v25 = vpack.c.bf16 (%p13991_p12), %v16000_v15, %v15999_v2  ;;  %v8479_v10 = vld [vmem:[%s14316_s6 + $0x18] sm:$0xff] (%p13991_p12)   ;;  %8024 = vmatpush3.bf16.msra.mxu0 (%p13991_p12), %v8478_v14  ;;  %8069 = vmatpush3.bf16.msra.mxu1 (%p13991_p12), %v8478_v14 }
 0x65a   : > { %8025 = vmatprep.subr.bf16.mxu0 %v8479_v10  ;;  %8066 = vmatprep.subr.bf16.mxu1 %v8479_v10  ;;  %v6641_v41 = vpack.c.bf16 %v15946_v26, %v13693_v28  ;;  %v6650_v2 = vpack.c.bf16 %v16004_v5, %v16003_v33  ;;  %v6643_v28 = vpack.c.bf16 %v15950_v53, %v15949_v49  ;;  %v16077_v15 = vld [vmem:[#allocation166_spill] sm:$0xff] }
 0x65b   : > { %8027 = vmatprep.mubr.msk.bf16.mxu0 %vm16063_vm2, %v6640_v63  ;;  %8043 = vmatprep.mubr.msk.bf16.mxu1 %vm16064_vm10, %v6648_v25  ;;  %v6649_v63 = vpack.c.bf16 %v16002_v57, %v16001_v11  ;;  %v6642_v25 = vpack.c.bf16 %v15948_v62, %v15947_v45  ;;  %v6651_v26 = vpack.c.bf16 %v16006_v46, %v16005_v1  ;;  %v16078_v11 = vld [vmem:[#allocation167_spill] sm:$0xff]  ;;  %v16080_v57 = vld [vmem:[#allocation169_spill] sm:$0xff]  ;;  %vm16083_vm2 = vcmask 261120  }
 0x65c   : > { %v6644_v62 = vpack.c.bf16 %v15977_v37, %v15976_v47  ;;  %v6652_v45 = vpack.c.bf16 %v16018_v43, %v16017_v50  ;;  %v6645_v49 = vpack.c.bf16 %v15979_v31, %v15978_v19  ;;  %v6653_v53 = vpack.c.bf16 %v16020_v23, %v16019_v55  ;;  %v16079_v31 = vld [vmem:[#allocation168_spill] sm:$0xff]  ;;  %vm16084_vm10 = vmmov %vm16083_vm2 }
 0x65d   : > { %8026 = vmatpush3.bf16.msra.mxu0 %v8479_v10  ;;  %8070 = vmatpush3.bf16.msra.mxu1 %v8479_v10  ;;  %v6646_v47 = vpack.c.bf16 %v15981_v36, %v15980_v16  ;;  %v6654_v37 = vpack.c.bf16 %v16022_v42, %v16021_v40  ;;  %v6647_v19 = vpack.c.bf16 %v16078_v11, %v16077_v15  ;;  %v14160_v40 = vld [vmem:[%s14317_s7] ss:$0 sm:$0xff] }
 0x65e   : > { %v6655_v33 = vpack.c.bf16 %v16080_v57, %v16079_v31 }
 0x660   : > { %8028 = vmatmul.mubr.msk.bf16.vlgmr.msra.gmra.mrb[0].mxu0 %vm16065_vm5, %v6641_v41  ;;  %8044 = vmatmul.mubr.msk.bf16.vlgmr.msra.gmra.mrb[0].mxu1 %vm16066_vm8, %v6649_v63  ;;  %vm16085_vm5 = vmmov %vm16083_vm2 }
 0x661   : > { %8031 = vmatprep.mubr.msk.bf16.mxu0 %vm16067_vm7, %v6642_v25  ;;  %8047 = vmatprep.mubr.msk.bf16.mxu1 %vm16068_vm13, %v6650_v2  ;;  %vm16086_vm8 = vmmov %vm16083_vm2 }
 0x662   : > { %vm16087_vm7 = vmmov %vm16083_vm2 }
 0x663   : > { %vm16088_vm13 = vmmov %vm16083_vm2 }
 0x668   : > { %8032 = vmatmul.mubr.msk.bf16.gmra.mrb[4].mxu0 %vm16069_vm12, %v6643_v28  ;;  %8048 = vmatmul.mubr.msk.bf16.gmra.mrb[4].mxu1 %vm16070_vm14, %v6651_v26  ;;  %vm16089_vm12 = vmmov %vm16083_vm2 }
 0x669   : > { %8035 = vmatprep.mubr.msk.bf16.mxu0 %vm16071_vm4, %v6644_v62  ;;  %8051 = vmatprep.mubr.msk.bf16.mxu1 %vm16072_vm15, %v6652_v45  ;;  %vm16090_vm14 = vmmov %vm16083_vm2 }
 0x66a   : > { %vm16091_vm4 = vmmov %vm16083_vm2 }
 0x66b   : > { %vm16092_vm15 = vmmov %vm16083_vm2 }
 0x670   : > { %8036 = vmatmul.mubr.msk.bf16.gmra.mrb[8].mxu0 %vm16073_vm6, %v6645_v49  ;;  %8052 = vmatmul.mubr.msk.bf16.gmra.mrb[8].mxu1 %vm16074_vm9, %v6653_v53  ;;  %vm16093_vm6 = vmmov %vm16083_vm2 }
 0x671   : > { %8039 = vmatprep.mubr.msk.bf16.mxu0 %vm16075_vm3, %v6646_v47  ;;  %8055 = vmatprep.mubr.msk.bf16.mxu1 %vm16076_vm0, %v6654_v37  ;;  %vm16094_vm9 = vmmov %vm16083_vm2 }
 0x672   : > { %vm16095_vm3 = vmmov %vm16083_vm2 }
 0x673   : > { %vm16096_vm0 = vmmov %vm16083_vm2 }
 0x678   : > { %8040 = vmatmul.mubr.msk.bf16.gmra.mrb[12].mxu0 %vm16081_vm1, %v6647_v19  ;;  %8056 = vmatmul.mubr.msk.bf16.gmra.mrb[12].mxu1 %vm16082_vm11, %v6655_v33  ;;  %vm16097_vm1 = vmmov %vm16096_vm0 }
 0x679   : > { %vm16098_vm11 = vmmov %vm16096_vm0 }
 0x733   : > { %v8029_v16 = vpop.f32.mrb[0].mxu0  ;;  %v8045_v36 = vpop.f32.mrb[0].mxu1 }
 0x734   : > { %v6786_v42 = vadd.f32 %v8029_v16, %v14160_v40  ;;  %v6850_v5 = vadd.f32 %v8045_v36, %v14160_v40  ;;  %v6777_v1 = vpop.f32.mrb[1].mxu0  ;;  %v6841_v46 = vpop.f32.mrb[1].mxu1 }
 0x735   : > { %v6778_v23 = vadd.f32 %v14160_v40, %v6777_v1  ;;  %v6842_v48 = vadd.f32 %v14160_v40, %v6841_v46  ;;  %v8030_v34 = vpop.f32.mrb[2].mxu0  ;;  %v8046_v35 = vpop.f32.mrb[2].mxu1 }
 0x736   : > { %6906 = vst.msk [vmem:[%s9759_s25 + $0x10] sm:$0xff] %vm16083_vm2, %v6786_v42  ;;  %v6789_v61 = vadd.f32 %v8030_v34, %v14160_v40  ;;  %v6853_v38 = vadd.f32 %v8046_v35, %v14160_v40  ;;  %v6780_v27 = vpop.f32.mrb[3].mxu0  ;;  %v6844_v56 = vpop.f32.mrb[3].mxu1  ;;  %vm16099_vm2 = vmmov %vm16096_vm0 }
 0x737   : > { %6922 = vst.msk [vmem:[%s9759_s25 + $0x90] sm:$0xff] %vm16084_vm10, %v6850_v5  ;;  %v6781_v3 = vadd.f32 %v14160_v40, %v6780_v27  ;;  %v6845_v20 = vadd.f32 %v14160_v40, %v6844_v56  ;;  %vm16100_vm10 = vmmov %vm16096_vm0 }
 0x738   : > { %6904 = vst.msk [vmem:[%s9759_s25] sm:$0xff] %vm16085_vm5, %v6778_v23  ;;  %vm16101_vm5 = vmmov %vm16096_vm0 }
 0x739   : > { %6920 = vst.msk [vmem:[%s9759_s25 + $0x80] sm:$0xff] %vm16086_vm8, %v6842_v48  ;;  %vm16102_vm8 = vmmov %vm16096_vm0 }
 0x73a   : > { %6907 = vst.msk [vmem:[%s9759_s25 + $0x18] sm:$0xff] %vm16087_vm7, %v6789_v61  ;;  %vm16103_vm7 = vmmov %vm16096_vm0 }
 0x73b   : > { %6923 = vst.msk [vmem:[%s9759_s25 + $0x98] sm:$0xff] %vm16088_vm13, %v6853_v38  ;;  %v8033_v6 = vpop.f32.mrb[4].mxu0  ;;  %v8049_v30 = vpop.f32.mrb[4].mxu1  ;;  %vm16104_vm13 = vmmov %vm16096_vm0 }
 0x73c   : > { %6905 = vst.msk [vmem:[%s9759_s25 + $0x8] sm:$0xff] %vm16089_vm12, %v6781_v3  ;;  %v6802_v7 = vadd.f32 %v8033_v6, %v14160_v40  ;;  %v6866_v39 = vadd.f32 %v8049_v30, %v14160_v40  ;;  %v6793_v58 = vpop.f32.mrb[5].mxu0  ;;  %v6857_v13 = vpop.f32.mrb[5].mxu1  ;;  %vm16105_vm12 = vmmov %vm16096_vm0 }
 0x73d   : > { %6921 = vst.msk [vmem:[%s9759_s25 + $0x88] sm:$0xff] %vm16090_vm14, %v6845_v20  ;;  %v6794_v17 = vadd.f32 %v14160_v40, %v6793_v58  ;;  %v6858_v12 = vadd.f32 %v14160_v40, %v6857_v13  ;;  %v8034_v52 = vpop.f32.mrb[6].mxu0  ;;  %v8050_v0 = vpop.f32.mrb[6].mxu1  ;;  %vm16106_vm14 = vmmov %vm16096_vm0 }
 0x73e   : > { %6910 = vst.msk [vmem:[%s9759_s25 + $0x30] sm:$0xff] %vm16091_vm4, %v6802_v7  ;;  %v6805_v44 = vadd.f32 %v8034_v52, %v14160_v40  ;;  %v6869_v18 = vadd.f32 %v8050_v0, %v14160_v40  ;;  %v6796_v21 = vpop.f32.mrb[7].mxu0  ;;  %v6860_v51 = vpop.f32.mrb[7].mxu1  ;;  %vm16107_vm4 = vmmov %vm16096_vm0 }
 0x73f   : > { %6926 = vst.msk [vmem:[%s9759_s25 + $0xb0] sm:$0xff] %vm16092_vm15, %v6866_v39  ;;  %v6797_v22 = vadd.f32 %v14160_v40, %v6796_v21  ;;  %v6861_v59 = vadd.f32 %v14160_v40, %v6860_v51  ;;  %vm16108_vm15 = vmmov %vm16096_vm0 }
 0x740   : > { %6908 = vst.msk [vmem:[%s9759_s25 + $0x20] sm:$0xff] %vm16093_vm6, %v6794_v17  ;;  %vm16109_vm6 = vmmov %vm16096_vm0 }
 0x741   : > { %6924 = vst.msk [vmem:[%s9759_s25 + $0xa0] sm:$0xff] %vm16094_vm9, %v6858_v12  ;;  %vm16110_vm9 = vmmov %vm16096_vm0 }
 0x742   : > { %6911 = vst.msk [vmem:[%s9759_s25 + $0x38] sm:$0xff] %vm16095_vm3, %v6805_v44  ;;  %vm16111_vm3 = vmmov %vm16096_vm0 }
 0x743   : > { %6927 = vst.msk [vmem:[%s9759_s25 + $0xb8] sm:$0xff] %vm16096_vm0, %v6869_v18  ;;  %v8037_v9 = vpop.f32.mrb[8].mxu0  ;;  %v8053_v60 = vpop.f32.mrb[8].mxu1 }
 0x744   : > { %6909 = vst.msk [vmem:[%s9759_s25 + $0x28] sm:$0xff] %vm16097_vm1, %v6797_v22  ;;  %v6818_v4 = vadd.f32 %v8037_v9, %v14160_v40  ;;  %v6882_v54 = vadd.f32 %v8053_v60, %v14160_v40  ;;  %v6809_v50 = vpop.f32.mrb[9].mxu0  ;;  %v6873_v43 = vpop.f32.mrb[9].mxu1  ;;  %vm16112_vm1 = vmmov %vm16096_vm0 }
 0x745   : > { %6925 = vst.msk [vmem:[%s9759_s25 + $0xa8] sm:$0xff] %vm16098_vm11, %v6861_v59  ;;  %v6810_v55 = vadd.f32 %v14160_v40, %v6809_v50  ;;  %v6874_v8 = vadd.f32 %v14160_v40, %v6873_v43  ;;  %v8038_v24 = vpop.f32.mrb[10].mxu0  ;;  %v8054_v29 = vpop.f32.mrb[10].mxu1  ;;  %vm16113_vm11 = vmmov %vm16096_vm0 }
 0x746   : > { %6914 = vst.msk [vmem:[%s9759_s25 + $0x50] sm:$0xff] %vm16099_vm2, %v6818_v4  ;;  %v6821_v32 = vadd.f32 %v8038_v24, %v14160_v40  ;;  %v6885_v14 = vadd.f32 %v8054_v29, %v14160_v40  ;;  %v6812_v10 = vpop.f32.mrb[11].mxu0  ;;  %v6876_v41 = vpop.f32.mrb[11].mxu1 }
 0x747   : > { %6930 = vst.msk [vmem:[%s9759_s25 + $0xd0] sm:$0xff] %vm16100_vm10, %v6882_v54  ;;  %v6813_v63 = vadd.f32 %v14160_v40, %v6812_v10  ;;  %v6877_v25 = vadd.f32 %v14160_v40, %v6876_v41 }
 0x748   : > { %6912 = vst.msk [vmem:[%s9759_s25 + $0x40] sm:$0xff] %vm16101_vm5, %v6810_v55 }
 0x749   : > { %6928 = vst.msk [vmem:[%s9759_s25 + $0xc0] sm:$0xff] %vm16102_vm8, %v6874_v8 }
 0x74a   : > { %6915 = vst.msk [vmem:[%s9759_s25 + $0x58] sm:$0xff] %vm16103_vm7, %v6821_v32 }
 0x74b   : > { %6931 = vst.msk [vmem:[%s9759_s25 + $0xd8] sm:$0xff] %vm16104_vm13, %v6885_v14  ;;  %v8041_v2 = vpop.f32.mrb[12].mxu0  ;;  %v8057_v28 = vpop.f32.mrb[12].mxu1 }
 0x74c   : > { %6913 = vst.msk [vmem:[%s9759_s25 + $0x48] sm:$0xff] %vm16105_vm12, %v6813_v63  ;;  %v6834_v26 = vadd.f32 %v8041_v2, %v14160_v40  ;;  %v6898_v62 = vadd.f32 %v8057_v28, %v14160_v40  ;;  %v6825_v45 = vpop.f32.mrb[13].mxu0  ;;  %v6889_v49 = vpop.f32.mrb[13].mxu1 }
 0x74d   : > { %6929 = vst.msk [vmem:[%s9759_s25 + $0xc8] sm:$0xff] %vm16106_vm14, %v6877_v25  ;;  %v6826_v53 = vadd.f32 %v14160_v40, %v6825_v45  ;;  %v6890_v47 = vadd.f32 %v14160_v40, %v6889_v49  ;;  %v8042_v37 = vpop.f32.mrb[14].mxu0  ;;  %v8058_v15 = vpop.f32.mrb[14].mxu1 }
 0x74e   : > { %6918 = vst.msk [vmem:[%s9759_s25 + $0x70] sm:$0xff] %vm16107_vm4, %v6834_v26  ;;  %v6837_v11 = vadd.f32 %v8042_v37, %v14160_v40  ;;  %v6901_v19 = vadd.f32 %v8058_v15, %v14160_v40  ;;  %v6828_v31 = vpop.f32.mrb[15].mxu0  ;;  %v6892_v57 = vpop.f32.mrb[15].mxu1 }
 0x74f   : > { %6934 = vst.msk [vmem:[%s9759_s25 + $0xf0] sm:$0xff] %vm16108_vm15, %v6898_v62  ;;  %v6829_v33 = vadd.f32 %v14160_v40, %v6828_v31  ;;  %v6893_v16 = vadd.f32 %v14160_v40, %v6892_v57 }
 0x750   : > { %6916 = vst.msk [vmem:[%s9759_s25 + $0x60] sm:$0xff] %vm16109_vm6, %v6826_v53 }
 0x751   : > { %6932 = vst.msk [vmem:[%s9759_s25 + $0xe0] sm:$0xff] %vm16110_vm9, %v6890_v47 }
 0x752   : > { %6919 = vst.msk [vmem:[%s9759_s25 + $0x78] sm:$0xff] %vm16111_vm3, %v6837_v11 }
 0x753   : > { %6935 = vst.msk [vmem:[%s9759_s25 + $0xf8] sm:$0xff] %vm16096_vm0, %v6901_v19 }
 0x754   : > { %6917 = vst.msk [vmem:[%s9759_s25 + $0x68] sm:$0xff] %vm16112_vm1, %v6829_v33 }
 0x755   : > { %6933 = vst.msk [vmem:[%s9759_s25 + $0xe8] sm:$0xff] %vm16113_vm11, %v6893_v16 }
 0x756   : > { %8493 = shalt.err (!%p8490_p7)
}
 0x757   : > { %s8494_s17 = scalar_lea.hbm %s14249_s13, 4096  ;;  %s8498_s24 = scalar_lea.hbm %s14318_s8, 8192 }
 0x758   : > { %p8495_p8 = scmp.ne.s32.totalorder %s14249_s13, %s8494_s17  ;;  %p8499_p11 = scmp.lt.u32.totalorder %s14249_s13, %s14318_s8 }
 0x759   : > { %p8500_p12 = scmp.lt.u32.totalorder %s8498_s24, %s8494_s17  ;;  %p8502_p0 = scmp.lt.u32.totalorder %s8494_s17, %s14249_s13 }
 0x75a   : > { %p8496_p9 = pnand %p8495_p8, %p8896_p5 }
 0x75b   : > { %p8501_p13 = por %p8500_p12, %p8499_p11 }
 0x75c   : > { %p8497_p10 = pneg %p8496_p9 }
 0x75d   : > { %p8503_p1 = por %p8502_p0, %p8501_p13 }
 0x75f   : > { %p8504_p2 = pnand %p8503_p1, %p8497_p10 }
 0x761   : > { %8507 = shalt.err (!%p8504_p2)
}
 0x762   : > { %s8811_s12 = smov 128   ;;  %s8812_s20 = smov 8  }
 0x763   : > { %8071 = dma.vmem_to_hbm [thread:$0]  (%p8896_p5), %s14251_s10, 4096, %s14249_s13, %s14269_s18, %s8811_s12, %s8811_s12, %s8812_s20  }
 0x764 PF: > { %p8077_p3 = scmp.ge.s32.totalorder %s8674_s30, 2  ;;  %s6965_s19 = sand.u32 1, %s8662_s27  }
 0x765   : > { %s6966_s21 = scalar_lea.sflag [#allocation3], %s6965_s19 }
 0x766   : > { %p8074_p4 = pnand %p8077_p3, %p8900_p6 }
 0x768   : > { %8657 = dma.done.wait (!%p8074_p4), %s6966_s21, 4096  }
 0x769   : > { %8659 = vsyncadd (!%p8074_p4), %s6966_s21, 4294963200  ;;  %p18_p7 = scmp.ge.s32.totalorder %s8883_s11, 4   ;;  %s16114_s27 = smov %s8666_s28 }
 0x76a   : > { %s16115_s28 = smov %s8670_s29  ;;  %s16116_s29 = smov %s8894_s14 }
 0x76b   : > { %s16117_s30 = smov %s8883_s11  ;;  %20 = sbr.rel (!%p18_p7) target bundleno = 3 (0x3), region = 112 }
 0x772   :  { %6971 = vsyncpa [#allocation3], 1 }
 0x773   :  { %6973 = vsyncpa [#allocation3 + $0x1], 1 }

</bundles_post_ra>
